<compile_context>
chip_gen: v6e
topology: v6e:2x2x1
jax: 0.10.0
libtpu: 0.0.40
codegen_flags: <defaults>
</compile_context>

<pallas_src>
import jax
import jax.numpy as jnp
from jax import lax
from jax.experimental import pallas as pl
from jax.experimental.pallas import tpu as pltpu

TQ = 128            # default query (batch) tile  -> sublanes
_EPS = 1e-12        # squared-length guard for degenerate edges / faces
_RAY_EPS = 1e-9     # ray / triangle parallelism guard on det
_FAR = 1e6          # padding vertex coordinate (dist^2 ~ 3e12 stays finite in f32)
_NG = 8             # affine MXU groups: t_ab, t_ac, t_bc, fv, fw, u, v, t_ray
_NC = 16            # per-face constant rows (9 used: a, ab, ac), padded to sublane multiple


def _sdf_kernel(x_ref, coef_ref, const_ref, o_ref, min_d2, hits):
    k = pl.program_id(1)

    @pl.when(k == 0)
    def _():
        min_d2[...] = jnp.full_like(min_d2, jnp.inf)
        hits[...] = jnp.zeros_like(hits)

    P = x_ref[...]        # (tq, 8): x, y, z, 1, 0, 0, 0, 0
    C = coef_ref[...]     # (64, tf): 8 groups x 8 coefficient rows (affine in p)
    A = const_ref[...]    # (16, tf): rows 0..8 = a.xyz, ab.xyz, ac.xyz

    def aff(g):           # MXU: (tq,8)@(8,tf) -> (tq,tf); offsets folded via homogeneous col
        return jnp.dot(P, C[8 * g:8 * g + 8, :],
                       preferred_element_type=jnp.float32,
                       precision=lax.Precision.HIGHEST)

    t_ab = aff(0)   # d1 * 1/|ab|^2
    t_ac = aff(1)   # d2 * 1/|ac|^2
    t_bc = aff(2)   # (d4 - d3) * 1/|bc|^2
    fv = aff(3)     # barycentric coeff of ab of the plane projection of p
    fw = aff(4)     # barycentric coeff of ac
    u = aff(5)      # Moller-Trumbore u   (already * inv_det, 0 for parallel faces)
    v = aff(6)      # Moller-Trumbore v
    t_r = aff(7)    # Moller-Trumbore ray parameter t

    # ---- Ericson closest-point region selection in (s, t) barycentric space ----
    # where-cascade priority (last applied wins): interior < BC < AC < AB < C < B < A
    s_c, t_c = fv, fw                                          # interior
    c_bc = (fv + fw >= 1.0) & (t_bc >= 0.0) & (t_bc <= 1.0)    # edge BC
    s_c = jnp.where(c_bc, 1.0 - t_bc, s_c)
    t_c = jnp.where(c_bc, t_bc, t_c)
    c_ac = (fv <= 0.0) & (t_ac >= 0.0) & (t_ac <= 1.0)         # edge AC
    s_c = jnp.where(c_ac, 0.0, s_c)
    t_c = jnp.where(c_ac, t_ac, t_c)
    c_ab = (fw <= 0.0) & (t_ab >= 0.0) & (t_ab <= 1.0)         # edge AB
    s_c = jnp.where(c_ab, t_ab, s_c)
    t_c = jnp.where(c_ab, 0.0, t_c)
    c_vc = (t_ac >= 1.0) & (t_bc >= 1.0)                       # vertex C
    s_c = jnp.where(c_vc, 0.0, s_c)
    t_c = jnp.where(c_vc, 1.0, t_c)
    c_vb = (t_ab >= 1.0) & (t_bc <= 0.0)                       # vertex B
    s_c = jnp.where(c_vb, 1.0, s_c)
    t_c = jnp.where(c_vb, 0.0, t_c)
    c_va = (t_ab <= 0.0) & (t_ac <= 0.0)                       # vertex A
    s_c = jnp.where(c_va, 0.0, s_c)
    t_c = jnp.where(c_va, 0.0, t_c)

    def row(i):                        # (1, tf) per-face constant row
        return A[i:i + 1, :]

    px, py, pz = P[:, 0:1], P[:, 1:2], P[:, 2:3]               # (tq, 1)
    dx = px - (row(0) + row(3) * s_c + row(6) * t_c)           # p - (a + ab*s + ac*t)
    dy = py - (row(1) + row(4) * s_c + row(7) * t_c)
    dz = pz - (row(2) + row(5) * s_c + row(8) * t_c)
    dist2 = dx * dx + dy * dy + dz * dz                        # (tq, tf)

    # lane-dense accumulation: elementwise only, no per-step cross-lane reduce
    min_d2[...] = jnp.minimum(min_d2[...], dist2)
    hit = (u >= 0.0) & (u <= 1.0) & (v >= 0.0) & (u + v <= 1.0) & (t_r > 0.0)
    hits[...] += hit.astype(jnp.int32)

    @pl.when(k == pl.num_programs(1) - 1)
    def _():
        d = jnp.sqrt(jnp.min(min_d2[...], axis=1, keepdims=True))
        parity = jnp.sum(hits[...], axis=1, keepdims=True) & 1
        # pysdf: sdf > 0 inside; SDFField.forward returns -sdf -> inside is negative.
        o_ref[...] = d * (1.0 - 2.0 * parity.astype(jnp.float32))


def _face_coefficients(verts, faces, Fp):
    """Precompute per-face affine coefficient rows (lane-dense) once in XLA."""
    tri = jnp.asarray(verts, jnp.float32)[jnp.asarray(faces, jnp.int32)]   # (F, 3, 3)
    F = tri.shape[0]
    # pad with far-away degenerate triangles: zero area (det == 0 -> no ray hits,
    # all folded reciprocals guarded to 0) and huge-but-finite distance.
    tri = jnp.concatenate(
        [tri, jnp.full((Fp - F, 3, 3), _FAR, jnp.float32)], axis=0)

    a, b, c = tri[:, 0, :], tri[:, 1, :], tri[:, 2, :]         # (Fp, 3)
    ab, ac, bc = b - a, c - a, c - b
    n = jnp.cross(ab, ac)

    def dotf(x, y):
        return jnp.sum(x * y, axis=1)

    ab2, ac2, bc2, n2 = dotf(ab, ab), dotf(ac, ac), dotf(bc, bc), dotf(n, n)
    abac = dotf(ab, ac)

    def safe_inv(x, eps=_EPS):
        ok = x > eps
        return jnp.where(ok, 1.0 / jnp.where(ok, x, 1.0), 0.0)

    inv_ab2, inv_ac2, inv_bc2, inv_n2 = (safe_inv(ab2), safe_inv(ac2),
                                         safe_inv(bc2), safe_inv(n2))

    # Moller-Trumbore, ray direction = +x
    zero = jnp.zeros_like(ac[:, 0])
    pvec = jnp.stack([zero, -ac[:, 2], ac[:, 1]], axis=1)      # dir x ac
    rvec = jnp.stack([zero, ab[:, 2], -ab[:, 1]], axis=1)      # ((p-a) x ab)_x coeffs
    det = dotf(ab, pvec)
    okd = jnp.abs(det) > _RAY_EPS
    inv_det = jnp.where(okd, 1.0 / jnp.where(okd, det, 1.0), 0.0)

    def affine(coeff, offset):        # (Fp,3),(Fp,) -> (8, Fp): [cx, cy, cz, off, 0,0,0,0]
        g = jnp.concatenate([coeff, offset[:, None]], axis=1)  # (Fp, 4)
        return jnp.pad(g, ((0, 0), (0, 4))).T                  # (8, Fp)

    e1a, e2a = dotf(ab, a), dotf(ac, a)

    groups = [
        # t_ab = d1 / |ab|^2,  d1 = ab.(p - a)
        affine(ab * inv_ab2[:, None], -e1a * inv_ab2),
        # t_ac = d2 / |ac|^2
        affine(ac * inv_ac2[:, None], -e2a * inv_ac2),
        # t_bc = (d4 - d3) / |bc|^2 = bc.(p - b) / |bc|^2
        affine(bc * inv_bc2[:, None], -dotf(bc, b) * inv_bc2),
        # fv = (|ac|^2 d1 - (ab.ac) d2) / |n|^2      (n = ab x ac; va+vb+vc == |n|^2)
        affine((ac2[:, None] * ab - abac[:, None] * ac) * inv_n2[:, None],
               -(ac2 * e1a - abac * e2a) * inv_n2),
        # fw = (|ab|^2 d2 - (ab.ac) d1) / |n|^2
        affine((ab2[:, None] * ac - abac[:, None] * ab) * inv_n2[:, None],
               -(ab2 * e2a - abac * e1a) * inv_n2),
        # u = pvec.(p - a) / det
        affine(pvec * inv_det[:, None], -dotf(pvec, a) * inv_det),
        # v = ((p - a) x ab)_x / det
        affine(rvec * inv_det[:, None],
               -(a[:, 1] * ab[:, 2] - a[:, 2] * ab[:, 1]) * inv_det),
        # t_ray = (p - a).n / det
        affine(n * inv_det[:, None], -dotf(n, a) * inv_det),
    ]
    coef = jnp.concatenate(groups, axis=0)                     # (64, Fp)

    consts = jnp.stack([a[:, 0], a[:, 1], a[:, 2],
                        ab[:, 0], ab[:, 1], ab[:, 2],
                        ac[:, 0], ac[:, 1], ac[:, 2]], axis=0)  # (9, Fp)
    consts = jnp.pad(consts, ((0, _NC - consts.shape[0]), (0, 0)))  # (16, Fp)
    return coef, consts


def _default_face_tile():
    """Per-generation defaults: (face-tile cap, scoped-VMEM override or None)."""
    try:
        vmem = pltpu.get_tpu_info().vmem_capacity_bytes
    except Exception:
        vmem = 64 << 20
    if vmem >= (128 << 20):        # v5e / v6e: 128 MiB physical, raise scoped limit
        return 1024, 64 << 20
    return 512, None               # v7x: 64 MiB physical, keep default scoped limit


def sdf_field_forward(X, verts, faces, *, tq=None, tf=None, vmem_limit_bytes=None):
    """SDFField.forward: X [B,3] float -> [B,1] float32 (= -sdf(X))."""
    X = jnp.asarray(X, jnp.float32)
    B = X.shape[0]

    if tq is None:
        tq = TQ
        # keep >= 2 batch tiles when possible so the "parallel" axis can feed both
        # TensorCores on a v7x megacore; minimum tq = 8 sublanes.
        while tq > 8 and B <= tq:
            tq //= 2
    Bp = pl.cdiv(B, tq) * tq

    # queries padded to (Bp, 8): x, y, z, 1 (homogeneous), then zeros (K=8 MXU dim)
    Xp = jnp.concatenate(
        [jnp.pad(X, ((0, Bp - B), (0, 0))),
         jnp.ones((Bp, 1), jnp.float32),
         jnp.zeros((Bp, 4), jnp.float32)], axis=1)

    F = int(faces.shape[0])
    if tf is None or vmem_limit_bytes is None:
        tf_cap, default_vmem = _default_face_tile()
        if tf is None:
            tf = min(tf_cap, pl.cdiv(F, 128) * 128)
        if vmem_limit_bytes is None:
            vmem_limit_bytes = default_vmem
    Fp = pl.cdiv(F, tf) * tf
    coef, consts = _face_coefficients(verts, faces, Fp)

    grid = (Bp // tq, Fp // tf)
    cost = pl.CostEstimate(
        flops=(16 * _NG + 80) * Bp * Fp,
        transcendentals=Bp,
        bytes_accessed=(coef.size + consts.size) * 4 * grid[0] + Xp.size * 4 + Bp * 4,
    )

    cp_kwargs = dict(dimension_semantics=("parallel", "arbitrary"))
    if vmem_limit_bytes is not None:
        cp_kwargs["vmem_limit_bytes"] = int(vmem_limit_bytes)

    out = pl.pallas_call(
        _sdf_kernel,
        out_shape=jax.ShapeDtypeStruct((Bp, 1), jnp.float32),
        grid_spec=pltpu.PrefetchScalarGridSpec(
            num_scalar_prefetch=0,
            grid=grid,                                        # (batch tiles, face tiles)
            in_specs=[
                pl.BlockSpec((tq, 8), lambda i, k: (i, 0)),
                pl.BlockSpec((8 * _NG, tf), lambda i, k: (0, k)),
                pl.BlockSpec((_NC, tf), lambda i, k: (0, k)),
            ],
            out_specs=pl.BlockSpec((tq, 1), lambda i, k: (i, 0)),
            scratch_shapes=[
                pltpu.VMEM((tq, tf), jnp.float32),            # running min dist^2 (lane-dense)
                pltpu.VMEM((tq, tf), jnp.int32),              # running ray-hit count
            ],
        ),
        compiler_params=pltpu.CompilerParams(**cp_kwargs),
        cost_estimate=cost,
    )(Xp, coef, consts)
    return out[:B]


def _make_cube_mesh(half=0.5):
    """Deterministic synthetic 'Trimesh': axis-aligned cube, 8 verts / 12 tris."""
    verts = jnp.array(
        [[x, y, z] for x in (-half, half) for y in (-half, half) for z in (-half, half)],
        dtype=jnp.float32,
    )
    faces = jnp.array(
        [
            [0, 1, 3], [0, 3, 2],   # x = -half
            [4, 5, 7], [4, 7, 6],   # x = +half
            [0, 1, 5], [0, 5, 4],   # y = -half
            [2, 3, 7], [2, 7, 6],   # y = +half
            [0, 2, 6], [0, 6, 4],   # z = -half
            [1, 3, 7], [1, 7, 5],   # z = +half
        ],
        dtype=jnp.int32,
    )
    return verts, faces


if __name__ == "__main__":
    key = jax.random.PRNGKey(0)
    verts, faces = _make_cube_mesh(0.5)

    # batch of random query points plus two analytically-known probes
    X_rand = jax.random.uniform(key, (200, 3), jnp.float32, minval=-1.0, maxval=1.0)
    X_known = jnp.array([[0.1, 0.05, -0.03],    # inside cube  -> -(0.5 - 0.1) = -0.4
                         [2.0, 0.0, 0.0]],      # outside cube -> +1.5
                        dtype=jnp.float32)
    X = jnp.concatenate([X_rand, X_known], axis=0)

    out = sdf_field_forward(X, verts, faces)
    out = jax.block_until_ready(out)

    assert out.shape == (X.shape[0], 1) and out.dtype == jnp.float32
    assert bool(jnp.all(jnp.isfinite(out)))
    assert abs(float(out[-2, 0]) + 0.4) < 1e-4, float(out[-2, 0])
    assert abs(float(out[-1, 0]) - 1.5) < 1e-4, float(out[-1, 0])
    print("KERNEL_OK")
</pallas_src>

<mosaic_0001>
module attributes {stable_mosaic.version = 11 : i64} {
  func.func @_sdf_kernel(%arg0: i32, %arg1: i32, %arg2: memref<128x8xf32, #tpu.memory_space<vmem>>, %arg3: memref<64x128xf32, #tpu.memory_space<vmem>>, %arg4: memref<16x128xf32, #tpu.memory_space<vmem>>, %arg5: memref<128x1xf32, #tpu.memory_space<vmem>>, %arg6: memref<128x128xf32, #tpu.memory_space<vmem>>, %arg7: memref<128x128xi32, #tpu.memory_space<vmem>>) attributes {dimension_semantics = [#tpu.dimension_semantics<parallel>, #tpu.dimension_semantics<arbitrary>], iteration_bounds = array<i64: 2, 1>, scalar_prefetch = 0 : i64, scratch_operands = 2 : i64, tpu.core_type = #tpu.core_type<tc>, window_params = [{transform_indices = @transform_0, window_bounds = array<i64: 128, 8>}, {transform_indices = @transform_1, window_bounds = array<i64: 64, 128>}, {transform_indices = @transform_2, window_bounds = array<i64: 16, 128>}, {transform_indices = @transform_3, window_bounds = array<i64: 128, 1>}]} {
    %c0_i32 = arith.constant 0 : i32
    %0 = arith.cmpi eq, %arg1, %c0_i32 : i32
    %1 = arith.extui %0 : i1 to i32
    %c0_i32_0 = arith.constant 0 : i32
    %2 = arith.cmpi ne, %1, %c0_i32_0 : i32
    scf.if %2 {
      %cst_52 = arith.constant 0x7F800000 : f32
      %153 = vector.broadcast %cst_52 : f32 to vector<128x128xf32>
      %c0_53 = arith.constant 0 : index
      %c0_54 = arith.constant 0 : index
      %154 = vector.load %arg6[%c0_53, %c0_54] : memref<128x128xf32, #tpu.memory_space<vmem>>, vector<128x128xf32>
      tpu.vector_store %arg6[%c0_53, %c0_54], %153 {strides = array<i32>} : memref<128x128xf32, #tpu.memory_space<vmem>>, vector<128x128xf32>,
      %c0_i32_55 = arith.constant 0 : i32
      %155 = vector.broadcast %c0_i32_55 : i32 to vector<128x128xi32>
      %c0_56 = arith.constant 0 : index
      %c0_57 = arith.constant 0 : index
      %156 = vector.load %arg7[%c0_56, %c0_57] : memref<128x128xi32, #tpu.memory_space<vmem>>, vector<128x128xi32>
      tpu.vector_store %arg7[%c0_56, %c0_57], %155 {strides = array<i32>} : memref<128x128xi32, #tpu.memory_space<vmem>>, vector<128x128xi32>,
    } else {
    }
    %c0 = arith.constant 0 : index
    %c0_1 = arith.constant 0 : index
    %3 = vector.load %arg2[%c0, %c0_1] : memref<128x8xf32, #tpu.memory_space<vmem>>, vector<128x8xf32>
    %c0_2 = arith.constant 0 : index
    %c0_3 = arith.constant 0 : index
    %4 = vector.load %arg3[%c0_2, %c0_3] : memref<64x128xf32, #tpu.memory_space<vmem>>, vector<64x128xf32>
    %c0_4 = arith.constant 0 : index
    %c0_5 = arith.constant 0 : index
    %5 = vector.load %arg4[%c0_4, %c0_5] : memref<16x128xf32, #tpu.memory_space<vmem>>, vector<16x128xf32>
    %6 = vector.extract_strided_slice %4 {offsets = [0, 0], sizes = [8, 128], strides = [1, 1]} : vector<64x128xf32> to vector<8x128xf32>
    %cst = arith.constant dense<0.000000e+00> : vector<128x128xf32>
    %7 = tpu.matmul %3, %6, %cst {dimension_numbers = #tpu.dot_dimension_numbers<[1], [0], [0], [1], [0, 0, 1, 1], [], []>, precision = #tpu.contract_precision<fp32>} : vector<128x8xf32>, vector<8x128xf32>, vector<128x128xf32> -> vector<128x128xf32>
    %8 = vector.extract_strided_slice %4 {offsets = [8, 0], sizes = [8, 128], strides = [1, 1]} : vector<64x128xf32> to vector<8x128xf32>
    %cst_6 = arith.constant dense<0.000000e+00> : vector<128x128xf32>
    %9 = tpu.matmul %3, %8, %cst_6 {dimension_numbers = #tpu.dot_dimension_numbers<[1], [0], [0], [1], [0, 0, 1, 1], [], []>, precision = #tpu.contract_precision<fp32>} : vector<128x8xf32>, vector<8x128xf32>, vector<128x128xf32> -> vector<128x128xf32>
    %10 = vector.extract_strided_slice %4 {offsets = [16, 0], sizes = [8, 128], strides = [1, 1]} : vector<64x128xf32> to vector<8x128xf32>
    %cst_7 = arith.constant dense<0.000000e+00> : vector<128x128xf32>
    %11 = tpu.matmul %3, %10, %cst_7 {dimension_numbers = #tpu.dot_dimension_numbers<[1], [0], [0], [1], [0, 0, 1, 1], [], []>, precision = #tpu.contract_precision<fp32>} : vector<128x8xf32>, vector<8x128xf32>, vector<128x128xf32> -> vector<128x128xf32>
    %12 = vector.extract_strided_slice %4 {offsets = [24, 0], sizes = [8, 128], strides = [1, 1]} : vector<64x128xf32> to vector<8x128xf32>
    %cst_8 = arith.constant dense<0.000000e+00> : vector<128x128xf32>
    %13 = tpu.matmul %3, %12, %cst_8 {dimension_numbers = #tpu.dot_dimension_numbers<[1], [0], [0], [1], [0, 0, 1, 1], [], []>, precision = #tpu.contract_precision<fp32>} : vector<128x8xf32>, vector<8x128xf32>, vector<128x128xf32> -> vector<128x128xf32>
    %14 = vector.extract_strided_slice %4 {offsets = [32, 0], sizes = [8, 128], strides = [1, 1]} : vector<64x128xf32> to vector<8x128xf32>
    %cst_9 = arith.constant dense<0.000000e+00> : vector<128x128xf32>
    %15 = tpu.matmul %3, %14, %cst_9 {dimension_numbers = #tpu.dot_dimension_numbers<[1], [0], [0], [1], [0, 0, 1, 1], [], []>, precision = #tpu.contract_precision<fp32>} : vector<128x8xf32>, vector<8x128xf32>, vector<128x128xf32> -> vector<128x128xf32>
    %16 = vector.extract_strided_slice %4 {offsets = [40, 0], sizes = [8, 128], strides = [1, 1]} : vector<64x128xf32> to vector<8x128xf32>
    %cst_10 = arith.constant dense<0.000000e+00> : vector<128x128xf32>
    %17 = tpu.matmul %3, %16, %cst_10 {dimension_numbers = #tpu.dot_dimension_numbers<[1], [0], [0], [1], [0, 0, 1, 1], [], []>, precision = #tpu.contract_precision<fp32>} : vector<128x8xf32>, vector<8x128xf32>, vector<128x128xf32> -> vector<128x128xf32>
    %18 = vector.extract_strided_slice %4 {offsets = [48, 0], sizes = [8, 128], strides = [1, 1]} : vector<64x128xf32> to vector<8x128xf32>
    %cst_11 = arith.constant dense<0.000000e+00> : vector<128x128xf32>
    %19 = tpu.matmul %3, %18, %cst_11 {dimension_numbers = #tpu.dot_dimension_numbers<[1], [0], [0], [1], [0, 0, 1, 1], [], []>, precision = #tpu.contract_precision<fp32>} : vector<128x8xf32>, vector<8x128xf32>, vector<128x128xf32> -> vector<128x128xf32>
    %20 = vector.extract_strided_slice %4 {offsets = [56, 0], sizes = [8, 128], strides = [1, 1]} : vector<64x128xf32> to vector<8x128xf32>
    %cst_12 = arith.constant dense<0.000000e+00> : vector<128x128xf32>
    %21 = tpu.matmul %3, %20, %cst_12 {dimension_numbers = #tpu.dot_dimension_numbers<[1], [0], [0], [1], [0, 0, 1, 1], [], []>, precision = #tpu.contract_precision<fp32>} : vector<128x8xf32>, vector<8x128xf32>, vector<128x128xf32> -> vector<128x128xf32>
    %22 = arith.addf %13, %15 : vector<128x128xf32>
    %cst_13 = arith.constant 1.000000e+00 : f32
    %23 = vector.broadcast %cst_13 : f32 to vector<128x128xf32>
    %24 = arith.cmpf oge, %22, %23 : vector<128x128xf32>
    %cst_14 = arith.constant 0.000000e+00 : f32
    %25 = vector.broadcast %cst_14 : f32 to vector<128x128xf32>
    %26 = arith.cmpf oge, %11, %25 : vector<128x128xf32>
    %27 = arith.andi %24, %26 : vector<128x128xi1>
    %cst_15 = arith.constant 1.000000e+00 : f32
    %28 = vector.broadcast %cst_15 : f32 to vector<128x128xf32>
    %29 = arith.cmpf ole, %11, %28 : vector<128x128xf32>
    %30 = arith.andi %27, %29 : vector<128x128xi1>
    %cst_16 = arith.constant 1.000000e+00 : f32
    %31 = vector.broadcast %cst_16 : f32 to vector<128x128xf32>
    %32 = arith.subf %31, %11 : vector<128x128xf32>
    %33 = arith.select %30, %32, %13 : vector<128x128xi1>, vector<128x128xf32>
    %34 = arith.select %30, %11, %15 : vector<128x128xi1>, vector<128x128xf32>
    %cst_17 = arith.constant 0.000000e+00 : f32
    %35 = vector.broadcast %cst_17 : f32 to vector<128x128xf32>
    %36 = arith.cmpf ole, %13, %35 : vector<128x128xf32>
    %cst_18 = arith.constant 0.000000e+00 : f32
    %37 = vector.broadcast %cst_18 : f32 to vector<128x128xf32>
    %38 = arith.cmpf oge, %9, %37 : vector<128x128xf32>
    %39 = arith.andi %36, %38 : vector<128x128xi1>
    %cst_19 = arith.constant 1.000000e+00 : f32
    %40 = vector.broadcast %cst_19 : f32 to vector<128x128xf32>
    %41 = arith.cmpf ole, %9, %40 : vector<128x128xf32>
    %42 = arith.andi %39, %41 : vector<128x128xi1>
    %cst_20 = arith.constant 0.000000e+00 : f32
    %43 = vector.broadcast %cst_20 : f32 to vector<128x128xf32>
    %44 = arith.select %42, %43, %33 : vector<128x128xi1>, vector<128x128xf32>
    %45 = arith.select %42, %9, %34 : vector<128x128xi1>, vector<128x128xf32>
    %cst_21 = arith.constant 0.000000e+00 : f32
    %46 = vector.broadcast %cst_21 : f32 to vector<128x128xf32>
    %47 = arith.cmpf ole, %15, %46 : vector<128x128xf32>
    %cst_22 = arith.constant 0.000000e+00 : f32
    %48 = vector.broadcast %cst_22 : f32 to vector<128x128xf32>
    %49 = arith.cmpf oge, %7, %48 : vector<128x128xf32>
    %50 = arith.andi %47, %49 : vector<128x128xi1>
    %cst_23 = arith.constant 1.000000e+00 : f32
    %51 = vector.broadcast %cst_23 : f32 to vector<128x128xf32>
    %52 = arith.cmpf ole, %7, %51 : vector<128x128xf32>
    %53 = arith.andi %50, %52 : vector<128x128xi1>
    %54 = arith.select %53, %7, %44 : vector<128x128xi1>, vector<128x128xf32>
    %cst_24 = arith.constant 0.000000e+00 : f32
    %55 = vector.broadcast %cst_24 : f32 to vector<128x128xf32>
    %56 = arith.select %53, %55, %45 : vector<128x128xi1>, vector<128x128xf32>
    %cst_25 = arith.constant 1.000000e+00 : f32
    %57 = vector.broadcast %cst_25 : f32 to vector<128x128xf32>
    %58 = arith.cmpf oge, %9, %57 : vector<128x128xf32>
    %cst_26 = arith.constant 1.000000e+00 : f32
    %59 = vector.broadcast %cst_26 : f32 to vector<128x128xf32>
    %60 = arith.cmpf oge, %11, %59 : vector<128x128xf32>
    %61 = arith.andi %58, %60 : vector<128x128xi1>
    %cst_27 = arith.constant 0.000000e+00 : f32
    %62 = vector.broadcast %cst_27 : f32 to vector<128x128xf32>
    %63 = arith.select %61, %62, %54 : vector<128x128xi1>, vector<128x128xf32>
    %cst_28 = arith.constant 1.000000e+00 : f32
    %64 = vector.broadcast %cst_28 : f32 to vector<128x128xf32>
    %65 = arith.select %61, %64, %56 : vector<128x128xi1>, vector<128x128xf32>
    %cst_29 = arith.constant 1.000000e+00 : f32
    %66 = vector.broadcast %cst_29 : f32 to vector<128x128xf32>
    %67 = arith.cmpf oge, %7, %66 : vector<128x128xf32>
    %cst_30 = arith.constant 0.000000e+00 : f32
    %68 = vector.broadcast %cst_30 : f32 to vector<128x128xf32>
    %69 = arith.cmpf ole, %11, %68 : vector<128x128xf32>
    %70 = arith.andi %67, %69 : vector<128x128xi1>
    %cst_31 = arith.constant 1.000000e+00 : f32
    %71 = vector.broadcast %cst_31 : f32 to vector<128x128xf32>
    %72 = arith.select %70, %71, %63 : vector<128x128xi1>, vector<128x128xf32>
    %cst_32 = arith.constant 0.000000e+00 : f32
    %73 = vector.broadcast %cst_32 : f32 to vector<128x128xf32>
    %74 = arith.select %70, %73, %65 : vector<128x128xi1>, vector<128x128xf32>
    %cst_33 = arith.constant 0.000000e+00 : f32
    %75 = vector.broadcast %cst_33 : f32 to vector<128x128xf32>
    %76 = arith.cmpf ole, %7, %75 : vector<128x128xf32>
    %cst_34 = arith.constant 0.000000e+00 : f32
    %77 = vector.broadcast %cst_34 : f32 to vector<128x128xf32>
    %78 = arith.cmpf ole, %9, %77 : vector<128x128xf32>
    %79 = arith.andi %76, %78 : vector<128x128xi1>
    %cst_35 = arith.constant 0.000000e+00 : f32
    %80 = vector.broadcast %cst_35 : f32 to vector<128x128xf32>
    %81 = arith.select %79, %80, %72 : vector<128x128xi1>, vector<128x128xf32>
    %cst_36 = arith.constant 0.000000e+00 : f32
    %82 = vector.broadcast %cst_36 : f32 to vector<128x128xf32>
    %83 = arith.select %79, %82, %74 : vector<128x128xi1>, vector<128x128xf32>
    %84 = vector.extract_strided_slice %3 {offsets = [0, 0], sizes = [128, 1], strides = [1, 1]} : vector<128x8xf32> to vector<128x1xf32>
    %85 = vector.extract_strided_slice %3 {offsets = [0, 1], sizes = [128, 1], strides = [1, 1]} : vector<128x8xf32> to vector<128x1xf32>
    %86 = vector.extract_strided_slice %3 {offsets = [0, 2], sizes = [128, 1], strides = [1, 1]} : vector<128x8xf32> to vector<128x1xf32>
    %87 = vector.extract_strided_slice %5 {offsets = [0, 0], sizes = [1, 128], strides = [1, 1]} : vector<16x128xf32> to vector<1x128xf32>
    %88 = vector.extract_strided_slice %5 {offsets = [3, 0], sizes = [1, 128], strides = [1, 1]} : vector<16x128xf32> to vector<1x128xf32>
    %89 = vector.broadcast %88 : vector<1x128xf32> to vector<128x128xf32>
    %90 = arith.mulf %89, %81 : vector<128x128xf32>
    %91 = vector.broadcast %87 : vector<1x128xf32> to vector<128x128xf32>
    %92 = arith.addf %91, %90 : vector<128x128xf32>
    %93 = vector.extract_strided_slice %5 {offsets = [6, 0], sizes = [1, 128], strides = [1, 1]} : vector<16x128xf32> to vector<1x128xf32>
    %94 = vector.broadcast %93 : vector<1x128xf32> to vector<128x128xf32>
    %95 = arith.mulf %94, %83 : vector<128x128xf32>
    %96 = arith.addf %92, %95 : vector<128x128xf32>
    %97 = vector.broadcast %84 : vector<128x1xf32> to vector<128x128xf32>
    %98 = arith.subf %97, %96 : vector<128x128xf32>
    %99 = vector.extract_strided_slice %5 {offsets = [1, 0], sizes = [1, 128], strides = [1, 1]} : vector<16x128xf32> to vector<1x128xf32>
    %100 = vector.extract_strided_slice %5 {offsets = [4, 0], sizes = [1, 128], strides = [1, 1]} : vector<16x128xf32> to vector<1x128xf32>
    %101 = vector.broadcast %100 : vector<1x128xf32> to vector<128x128xf32>
    %102 = arith.mulf %101, %81 : vector<128x128xf32>
    %103 = vector.broadcast %99 : vector<1x128xf32> to vector<128x128xf32>
    %104 = arith.addf %103, %102 : vector<128x128xf32>
    %105 = vector.extract_strided_slice %5 {offsets = [7, 0], sizes = [1, 128], strides = [1, 1]} : vector<16x128xf32> to vector<1x128xf32>
    %106 = vector.broadcast %105 : vector<1x128xf32> to vector<128x128xf32>
    %107 = arith.mulf %106, %83 : vector<128x128xf32>
    %108 = arith.addf %104, %107 : vector<128x128xf32>
    %109 = vector.broadcast %85 : vector<128x1xf32> to vector<128x128xf32>
    %110 = arith.subf %109, %108 : vector<128x128xf32>
    %111 = vector.extract_strided_slice %5 {offsets = [2, 0], sizes = [1, 128], strides = [1, 1]} : vector<16x128xf32> to vector<1x128xf32>
    %112 = vector.extract_strided_slice %5 {offsets = [5, 0], sizes = [1, 128], strides = [1, 1]} : vector<16x128xf32> to vector<1x128xf32>
    %113 = vector.broadcast %112 : vector<1x128xf32> to vector<128x128xf32>
    %114 = arith.mulf %113, %81 : vector<128x128xf32>
    %115 = vector.broadcast %111 : vector<1x128xf32> to vector<128x128xf32>
    %116 = arith.addf %115, %114 : vector<128x128xf32>
    %117 = vector.extract_strided_slice %5 {offsets = [8, 0], sizes = [1, 128], strides = [1, 1]} : vector<16x128xf32> to vector<1x128xf32>
    %118 = vector.broadcast %117 : vector<1x128xf32> to vector<128x128xf32>
    %119 = arith.mulf %118, %83 : vector<128x128xf32>
    %120 = arith.addf %116, %119 : vector<128x128xf32>
    %121 = vector.broadcast %86 : vector<128x1xf32> to vector<128x128xf32>
    %122 = arith.subf %121, %120 : vector<128x128xf32>
    %123 = arith.mulf %98, %98 : vector<128x128xf32>
    %124 = arith.mulf %110, %110 : vector<128x128xf32>
    %125 = arith.addf %123, %124 : vector<128x128xf32>
    %126 = arith.mulf %122, %122 : vector<128x128xf32>
    %127 = arith.addf %125, %126 : vector<128x128xf32>
    %c0_37 = arith.constant 0 : index
    %c0_38 = arith.constant 0 : index
    %128 = vector.load %arg6[%c0_37, %c0_38] : memref<128x128xf32, #tpu.memory_space<vmem>>, vector<128x128xf32>
    %129 = arith.minimumf %128, %127 : vector<128x128xf32>
    %c0_39 = arith.constant 0 : index
    %c0_40 = arith.constant 0 : index
    %130 = vector.load %arg6[%c0_39, %c0_40] : memref<128x128xf32, #tpu.memory_space<vmem>>, vector<128x128xf32>
    tpu.vector_store %arg6[%c0_39, %c0_40], %129 {strides = array<i32>} : memref<128x128xf32, #tpu.memory_space<vmem>>, vector<128x128xf32>,
    %cst_41 = arith.constant 0.000000e+00 : f32
    %131 = vector.broadcast %cst_41 : f32 to vector<128x128xf32>
    %132 = arith.cmpf oge, %17, %131 : vector<128x128xf32>
    %cst_42 = arith.constant 1.000000e+00 : f32
    %133 = vector.broadcast %cst_42 : f32 to vector<128x128xf32>
    %134 = arith.cmpf ole, %17, %133 : vector<128x128xf32>
    %135 = arith.andi %132, %134 : vector<128x128xi1>
    %cst_43 = arith.constant 0.000000e+00 : f32
    %136 = vector.broadcast %cst_43 : f32 to vector<128x128xf32>
    %137 = arith.cmpf oge, %19, %136 : vector<128x128xf32>
    %138 = arith.andi %135, %137 : vector<128x128xi1>
    %139 = arith.addf %17, %19 : vector<128x128xf32>
    %cst_44 = arith.constant 1.000000e+00 : f32
    %140 = vector.broadcast %cst_44 : f32 to vector<128x128xf32>
    %141 = arith.cmpf ole, %139, %140 : vector<128x128xf32>
    %142 = arith.andi %138, %141 : vector<128x128xi1>
    %cst_45 = arith.constant 0.000000e+00 : f32
    %143 = vector.broadcast %cst_45 : f32 to vector<128x128xf32>
    %144 = arith.cmpf ogt, %21, %143 : vector<128x128xf32>
    %145 = arith.andi %142, %144 : vector<128x128xi1>
    %c0_46 = arith.constant 0 : index
    %c0_47 = arith.constant 0 : index
    %146 = vector.load %arg7[%c0_46, %c0_47] : memref<128x128xi32, #tpu.memory_space<vmem>>, vector<128x128xi32>
    %147 = arith.extui %145 : vector<128x128xi1> to vector<128x128xi32>
    %148 = arith.addi %146, %147 : vector<128x128xi32>
    %c0_48 = arith.constant 0 : index
    %c0_49 = arith.constant 0 : index
    %149 = vector.load %arg7[%c0_48, %c0_49] : memref<128x128xi32, #tpu.memory_space<vmem>>, vector<128x128xi32>
    tpu.vector_store %arg7[%c0_48, %c0_49], %148 {strides = array<i32>} : memref<128x128xi32, #tpu.memory_space<vmem>>, vector<128x128xi32>,
    %c0_i32_50 = arith.constant 0 : i32
    %150 = arith.cmpi eq, %arg1, %c0_i32_50 : i32
    %151 = arith.extui %150 : i1 to i32
    %c0_i32_51 = arith.constant 0 : i32
    %152 = arith.cmpi ne, %151, %c0_i32_51 : i32
    scf.if %152 {
      %c0_52 = arith.constant 0 : index
      %c0_53 = arith.constant 0 : index
      %153 = vector.load %arg6[%c0_52, %c0_53] : memref<128x128xf32, #tpu.memory_space<vmem>>, vector<128x128xf32>
      %cst_54 = arith.constant dense<0x7F800000> : vector<128xf32>
      %154 = vector.multi_reduction <minimumf>, %153, %cst_54 [1] : vector<128x128xf32> to vector<128xf32>
      %155 = vector.shape_cast %154 : vector<128xf32> to vector<128x1xf32>
      %156 = math.sqrt %155 : vector<128x1xf32>
      %c0_55 = arith.constant 0 : index
      %c0_56 = arith.constant 0 : index
      %157 = vector.load %arg7[%c0_55, %c0_56] : memref<128x128xi32, #tpu.memory_space<vmem>>, vector<128x128xi32>
      %cst_57 = arith.constant dense<0> : vector<128xi32>
      %158 = vector.multi_reduction <add>, %157, %cst_57 [1] : vector<128x128xi32> to vector<128xi32>
      %159 = vector.shape_cast %158 : vector<128xi32> to vector<128x1xi32>
      %c1_i32 = arith.constant 1 : i32
      %160 = vector.broadcast %c1_i32 : i32 to vector<128x1xi32>
      %161 = arith.andi %159, %160 : vector<128x1xi32>
      %162 = arith.sitofp %161 : vector<128x1xi32> to vector<128x1xf32>
      %cst_58 = arith.constant 2.000000e+00 : f32
      %163 = vector.broadcast %cst_58 : f32 to vector<128x1xf32>
      %164 = arith.mulf %163, %162 : vector<128x1xf32>
      %cst_59 = arith.constant 1.000000e+00 : f32
      %165 = vector.broadcast %cst_59 : f32 to vector<128x1xf32>
      %166 = arith.subf %165, %164 : vector<128x1xf32>
      %167 = arith.mulf %156, %166 : vector<128x1xf32>
      %c0_60 = arith.constant 0 : index
      %c0_61 = arith.constant 0 : index
      %168 = vector.load %arg5[%c0_60, %c0_61] : memref<128x1xf32, #tpu.memory_space<vmem>>, vector<128x1xf32>
      tpu.vector_store %arg5[%c0_60, %c0_61], %167 {strides = array<i32>} : memref<128x1xf32, #tpu.memory_space<vmem>>, vector<128x1xf32>,
    } else {
    }
    return
  }
  func.func @transform_0(%arg0: i32, %arg1: i32) -> (i32, i32) {
    %c0_i32 = arith.constant 0 : i32
    %c0_i32_0 = arith.constant 0 : i32
    return %arg0, %c0_i32 : i32, i32
  }
  func.func @transform_1(%arg0: i32, %arg1: i32) -> (i32, i32) {
    %c0_i32 = arith.constant 0 : i32
    %c0_i32_0 = arith.constant 0 : i32
    return %c0_i32, %arg1 : i32, i32
  }
  func.func @transform_2(%arg0: i32, %arg1: i32) -> (i32, i32) {
    %c0_i32 = arith.constant 0 : i32
    %c0_i32_0 = arith.constant 0 : i32
    return %c0_i32, %arg1 : i32, i32
  }
  func.func @transform_3(%arg0: i32, %arg1: i32) -> (i32, i32) {
    %c0_i32 = arith.constant 0 : i32
    %c0_i32_0 = arith.constant 0 : i32
    return %arg0, %c0_i32 : i32, i32
  }
}

</mosaic_0001>

<bundles_post_ra>
// kernel: tpu_custom_call.1
= control target key start
LH: loop header
LB: loop body
LE: loop exit
PB: predicated region body
PF: predicated region fallthrough
CT: control target
= control target key end

     0   :  { %s13255_s12 = smov 0   ;;  %s13257_s13 = smov 0   ;;  %s18727_s0 = inlined_call_operand.vmem [shape: f32[256,8], index: 0, kind: input, shape index: {}]   ;;  %s18728_s1 = inlined_call_operand.vmem [shape: f32[64,128], index: 1, kind: input, shape index: {}]   ;;  %s18729_s2 = inlined_call_operand.vmem [shape: f32[16,128], index: 2, kind: input, shape index: {}]   ;;  %s18730_s3 = inlined_call_operand.vmem [shape: f32[256,1], index: 3, kind: output, shape index: {}]  }
   0x1   :  { %s13259_s14 = smov 0  }
   0x2 LB: > { %s25_s15 = sadd.s32 1, %s13226_s13  ;;  %p11056_p0 = scmp.ge.s32.totalorder %s13230_s14, 1  ;;  %s13230_s14 = sphi %s13259_s14, %s13_s14   ;;  %s13226_s13 = sphi %s13257_s13, %s20790_s13   ;;  %s13222_s12 = sphi %s13255_s12, %s20789_s12  }
   0x3   : > { %p27_p1 = scmp.ge.s32.totalorder %s25_s15, 2  ;;  %p168_p2 = scmp.lt.s32.totalorder %s13230_s14, 3 }
   0x5   : > { %s20792_s15 = smov (%p27_p1, %s25_s15), 0  ;;  %p169_p3 = pnand %p11056_p0, %p168_p2 }
   0x7   : > { %172 = sbr.rel (%p169_p3) target bundleno = 1240 (0x4d8), region = 32 }
   0xc   : > { %v272_v0 = vld [vmem:[%s18728_s1] sm:$0xff]  ;;  %s11057_s18 = sshll.u32 %s13222_s12, 4  ;;  %vm282_vm0 = vcmask 64512  }
   0xd   : > { %v13276_v1 = vand.u32 4294901760, %v272_v0  ;;  %p201_p4 = scmp.lt.s32.totalorder %s11057_s18, 31 }
   0xf   : > { %11879 = vmatprep.subr.mxu0 %v13276_v1  ;;  %v13280_v2 = vsub.f32 %v272_v0, %v13276_v1  ;;  %s20794_s18 = smov (!%p201_p4, %s11057_s18), 31 }
  0x10   : > { %11880 = vmatpush3.msra.mxu0 %v13276_v1  ;;  %s11058_s19 = sshll.u32 %s20794_s18, 3 }
  0x11   : > { %v13286_v3 = vand.u32 4294901760, %v13280_v2  ;;  %11931 = vmatprep.subr.mxu0 %v13280_v2  ;;  %s13295_s22 = scalar_lea.vmem %s18727_s0, %s11058_s19  ;;  %s18603_s21 = scalar_lea.vmem %s18730_s3, %s11058_s19 }
  0x12   : > { %v256_v5 = vld [vmem:[%s13295_s22] sm:$0xff]  ;;  %v257_v6 = vld [vmem:[%s13295_s22 + $0x8] sm:$0xff]  ;;  %v258_v7 = vld [vmem:[%s13295_s22 + $0x10] sm:$0xff] }
  0x13   : > { %v591_v4 = vsub.f32 %v13280_v2, %v13286_v3  ;;  %v284_v8 = vsel %vm282_vm0, %v256_v5, 0  ;;  %v287_v9 = vsel %vm282_vm0, %v257_v6, 0  ;;  %v290_v10 = vsel %vm282_vm0, %v258_v7, 0  ;;  %v259_v11 = vld [vmem:[%s13295_s22 + $0x18] sm:$0xff]  ;;  %v260_v12 = vld [vmem:[%s13295_s22 + $0x20] sm:$0xff]  ;;  %v261_v13 = vld [vmem:[%s13295_s22 + $0x28] sm:$0xff] }
  0x14   : > { %v13308_v15 = vand.u32 4294901760, %v284_v8  ;;  %v13310_v16 = vand.u32 4294901760, %v287_v9  ;;  %v13312_v17 = vand.u32 4294901760, %v290_v10  ;;  %v262_v18 = vld [vmem:[%s13295_s22 + $0x30] sm:$0xff]  ;;  %v263_v19 = vld [vmem:[%s13295_s22 + $0x38] sm:$0xff]  ;;  %v293_v20 = vsel %vm282_vm0, %v259_v11, 0 }
  0x15   : > { %v592_v14 = vand.u32 4294901760, %v591_v4  ;;  %v296_v21 = vsel %vm282_vm0, %v260_v12, 0  ;;  %v299_v22 = vsel %vm282_vm0, %v261_v13, 0  ;;  %v302_v23 = vsel %vm282_vm0, %v262_v18, 0  ;;  %v264_v48 = vld [vmem:[%s13295_s22 + $0x40] sm:$0xff]  ;;  %v265_v49 = vld [vmem:[%s13295_s22 + $0x48] sm:$0xff] }
  0x16   : > { %19267 = vst [vmem:[#allocation4_spill] sm:$0xff] %v13308_v15  ;;  %19268 = vst [vmem:[#allocation5_spill] sm:$0xff] %v13310_v16  ;;  %v13321_v24 = vsub.f32 %v284_v8, %v13308_v15  ;;  %11907 = vmatprep.mubr.f32.mxu1 %v13308_v15  ;;  %v13325_v25 = vsub.f32 %v287_v9, %v13310_v16  ;;  %v13328_v26 = vsub.f32 %v290_v10, %v13312_v17  ;;  %v266_v50 = vld [vmem:[%s13295_s22 + $0x50] sm:$0xff]  ;;  %v267_v59 = vld [vmem:[%s13295_s22 + $0x58] sm:$0xff] }
  0x17   : > { %19269 = vst [vmem:[#allocation6_spill] sm:$0xff] %v13312_v17  ;;  %11905 = vmatprep.subr.mxu1 %v592_v14  ;;  %v13330_v27 = vand.u32 4294901760, %v293_v20  ;;  %v13332_v28 = vand.u32 4294901760, %v296_v21  ;;  %v13334_v29 = vand.u32 4294901760, %v299_v22  ;;  %v13336_v30 = vand.u32 4294901760, %v302_v23  ;;  %v268_v63 = vld [vmem:[%s13295_s22 + $0x60] sm:$0xff] }
  0x18   : > { %19270 = vst [vmem:[#allocation7_spill] sm:$0xff] %v13321_v24  ;;  %19271 = vst [vmem:[#allocation8_spill] sm:$0xff] %v13325_v25  ;;  %11906 = vmatpush3.msra.mxu1 %v592_v14  ;;  %v305_v31 = vsel %vm282_vm0, %v263_v19, 0  ;;  %v13340_v32 = vand.u32 4294901760, %v13321_v24  ;;  %v13343_v33 = vand.u32 4294901760, %v13325_v25  ;;  %v13348_v34 = vand.u32 4294901760, %v13328_v26 }
  0x19   : > { %19272 = vst [vmem:[#allocation9_spill] sm:$0xff] %v13328_v26  ;;  %19273 = vst [vmem:[#allocation10_spill] sm:$0xff] %v13330_v27  ;;  %11908 = vmatmul.mubr.f32.vlgmr.msra.gmra.mxu1 %v13310_v16  ;;  %11957 = vmatprep.subr.mxu1 %v13276_v1  ;;  %v13351_v35 = vsub.f32 %v293_v20, %v13330_v27  ;;  %v13356_v36 = vsub.f32 %v296_v21, %v13332_v28  ;;  %v13364_v39 = vand.u32 4294901760, %v305_v31  ;;  %v269_v0 = vld [vmem:[%s13295_s22 + $0x68] sm:$0xff]  ;;  %v270_v12 = vld [vmem:[%s13295_s22 + $0x70] sm:$0xff] }
  0x1a   : > { %19274 = vst [vmem:[#allocation11_spill] sm:$0xff] %v13332_v28  ;;  %19275 = vst [vmem:[#allocation12_spill] sm:$0xff] %v13334_v29  ;;  %11958 = vmatpush3.msra.mxu1 %v13276_v1  ;;  %11910 = vmatprep.mubr.f32.mxu1 %v13312_v17  ;;  %v13359_v37 = vsub.f32 %v299_v22, %v13334_v29  ;;  %v13362_v38 = vsub.f32 %v302_v23, %v13336_v30  ;;  %v308_v60 = vsel %vm282_vm0, %v264_v48, 0  ;;  %v271_v13 = vld [vmem:[%s13295_s22 + $0x78] sm:$0xff]  ;;  %v273_v48 = vld [vmem:[%s18728_s1 + $0x8] sm:$0xff] }
  0x1b   : > { %19276 = vst [vmem:[#allocation13_spill] sm:$0xff] %v13336_v30  ;;  %19277 = vst [vmem:[#allocation14_spill] sm:$0xff] %v13340_v32  ;;  %v400_v40 = vsub.f32 %v13321_v24, %v13340_v32  ;;  %v410_v41 = vsub.f32 %v13325_v25, %v13343_v33  ;;  %v420_v42 = vsub.f32 %v13328_v26, %v13348_v34  ;;  %v13373_v43 = vand.u32 4294901760, %v13351_v35 }
  0x1c   : > { %19278 = vst [vmem:[#allocation15_spill] sm:$0xff] %v13343_v33  ;;  %19279 = vst [vmem:[#allocation16_spill] sm:$0xff] %v13348_v34  ;;  %12009 = vmatprep.subr.mxu1 %v13276_v1  ;;  %v13377_v44 = vand.u32 4294901760, %v13356_v36  ;;  %v13380_v45 = vand.u32 4294901760, %v13359_v37  ;;  %v13383_v46 = vand.u32 4294901760, %v13362_v38  ;;  %v13386_v47 = vsub.f32 %v305_v31, %v13364_v39 }
  0x1d   : > { %19280 = vst [vmem:[#allocation17_spill] sm:$0xff] %v13351_v35  ;;  %19281 = vst [vmem:[#allocation18_spill] sm:$0xff] %v13356_v36  ;;  %v13391_v51 = vand.u32 4294901760, %v400_v40  ;;  %v13393_v52 = vand.u32 4294901760, %v410_v41  ;;  %v13395_v53 = vand.u32 4294901760, %v420_v42  ;;  %v430_v54 = vsub.f32 %v13351_v35, %v13373_v43  ;;  %11911 = vmatmul.mubr.f32.gmra.mxu1 %v13330_v27 }
  0x1e   : > { %19282 = vst [vmem:[#allocation19_spill] sm:$0xff] %v13359_v37  ;;  %19283 = vst [vmem:[#allocation20_spill] sm:$0xff] %v13362_v38  ;;  %v440_v55 = vsub.f32 %v13356_v36, %v13377_v44  ;;  %11913 = vmatprep.mubr.f32.mxu1 %v13332_v28  ;;  %v450_v56 = vsub.f32 %v13359_v37, %v13380_v45  ;;  %v460_v57 = vsub.f32 %v13362_v38, %v13383_v46 }
  0x1f   : > { %19284 = vst [vmem:[#allocation21_spill] sm:$0xff] %v13364_v39  ;;  %19285 = vst [vmem:[#allocation22_spill] sm:$0xff] %v13373_v43  ;;  %v13408_v58 = vand.u32 4294901760, %v13386_v47  ;;  %11881 = vmatprep.mubr.f32.mxu0 %v13391_v51  ;;  %v311_v61 = vsel %vm282_vm0, %v265_v49, 0  ;;  %v314_v62 = vsel %vm282_vm0, %v266_v50, 0  ;;  %v13418_v4 = vand.u32 4294901760, %v430_v54 }
  0x20   : > { %19286 = vst [vmem:[#allocation23_spill] sm:$0xff] %v13377_v44  ;;  %19287 = vst [vmem:[#allocation24_spill] sm:$0xff] %v13380_v45  ;;  %11882 = vmatmul.mubr.f32.vlgmr.msra.gmra.mxu0 %v13393_v52  ;;  %v13420_v5 = vand.u32 4294901760, %v440_v55  ;;  %v13422_v6 = vand.u32 4294901760, %v450_v56  ;;  %v13424_v7 = vand.u32 4294901760, %v460_v57  ;;  %v13428_v8 = vand.u32 4294901760, %v308_v60 }
  0x21   : > { %19288 = vst [vmem:[#allocation25_spill] sm:$0xff] %v13383_v46  ;;  %19289 = vst [vmem:[#allocation26_spill] sm:$0xff] %v13386_v47  ;;  %11932 = vmatpush3.msra.mxu0 %v13280_v2  ;;  %11884 = vmatprep.mubr.f32.mxu0 %v13395_v53  ;;  %v13430_v9 = vand.u32 4294901760, %v311_v61  ;;  %v13432_v10 = vand.u32 4294901760, %v314_v62  ;;  %v317_v11 = vsel %vm282_vm0, %v267_v59, 0  ;;  %v470_v14 = vsub.f32 %v13386_v47, %v13408_v58 }
  0x22   : > { %19290 = vst [vmem:[#allocation27_spill] sm:$0xff] %v13391_v51  ;;  %19291 = vst [vmem:[#allocation28_spill] sm:$0xff] %v13393_v52  ;;  %11914 = vmatmul.mubr.f32.gmra.mxu1 %v13334_v29  ;;  %v13440_v18 = vand.u32 4294901760, %v317_v11  ;;  %v320_v2 = vsel %vm282_vm0, %v268_v63, 0  ;;  %v323_v19 = vsel %vm282_vm0, %v269_v0, 0  ;;  %11983 = vmatprep.subr.mxu0 %v13286_v3  ;;  %v13447_v20 = vsub.f32 %v308_v60, %v13428_v8 }
  0x23   : > { %19292 = vst [vmem:[#allocation29_spill] sm:$0xff] %v13395_v53  ;;  %19293 = vst [vmem:[#allocation30_spill] sm:$0xff] %v13408_v58  ;;  %11916 = vmatprep.mubr.f32.mxu1 %v13336_v30  ;;  %v13450_v21 = vsub.f32 %v311_v61, %v13430_v9  ;;  %v13453_v22 = vsub.f32 %v314_v62, %v13432_v10  ;;  %v13455_v23 = vand.u32 4294901760, %v320_v2  ;;  %v13461_v40 = vand.u32 4294901760, %v323_v19 }
  0x24   : > { %19294 = vst [vmem:[#allocation31_spill] sm:$0xff] %v13418_v4  ;;  %19295 = vst [vmem:[#allocation32_spill] sm:$0xff] %v13420_v5  ;;  %11885 = vmatmul.mubr.f32.gmra.mxu0 %v13418_v4  ;;  %v13459_v31 = vsub.f32 %v317_v11, %v13440_v18  ;;  %v326_v41 = vsel %vm282_vm0, %v270_v12, 0  ;;  %v329_v42 = vsel %vm282_vm0, %v271_v13, 0  ;;  %v13470_v49 = vand.u32 4294901760, %v13447_v20 }
  0x25   : > { %19296 = vst [vmem:[#allocation33_spill] sm:$0xff] %v13422_v6  ;;  %19297 = vst [vmem:[#allocation34_spill] sm:$0xff] %v13424_v7  ;;  %11887 = vmatprep.mubr.f32.mxu0 %v13420_v5  ;;  %v13473_v50 = vand.u32 4294901760, %v13450_v21  ;;  %v13476_v54 = vand.u32 4294901760, %v13453_v22  ;;  %v13479_v55 = vsub.f32 %v320_v2, %v13455_v23  ;;  %v13482_v56 = vand.u32 4294901760, %v326_v41 }
  0x26   : > { %19298 = vst [vmem:[#allocation35_spill] sm:$0xff] %v13428_v8  ;;  %19299 = vst [vmem:[#allocation36_spill] sm:$0xff] %v13430_v9  ;;  %11917 = vmatmul.mubr.f32.gmra.mxu1 %v13364_v39  ;;  %v13484_v57 = vand.u32 4294901760, %v470_v14  ;;  %v480_v59 = vsub.f32 %v13447_v20, %v13470_v49  ;;  %v13489_v60 = vand.u32 4294901760, %v273_v48  ;;  %v13495_v62 = vand.u32 4294901760, %v13459_v31 }
  0x27   : > { %19300 = vst [vmem:[#allocation37_spill] sm:$0xff] %v13432_v10  ;;  %19301 = vst [vmem:[#allocation38_spill] sm:$0xff] %v13440_v18  ;;  %11919 = vmatprep.mubr.f32.mxu1 %v13428_v8  ;;  %v490_v61 = vsub.f32 %v13450_v21, %v13473_v50  ;;  %v13498_v63 = vsub.f32 %v323_v19, %v13461_v40  ;;  %v13500_v0 = vand.u32 4294901760, %v329_v42  ;;  %v13508_v13 = vand.u32 4294901760, %v13479_v55 }
  0x28   : > { %19302 = vst [vmem:[#allocation39_spill] sm:$0xff] %v13447_v20  ;;  %19303 = vst [vmem:[#allocation40_spill] sm:$0xff] %v13450_v21  ;;  %11888 = vmatmul.mubr.f32.gmra.mxu0 %v13422_v6  ;;  %v13503_v11 = vand.u32 4294901760, %v480_v59  ;;  %v500_v12 = vsub.f32 %v13453_v22, %v13476_v54  ;;  %v13511_v14 = vsub.f32 %v326_v41, %v13482_v56 }
  0x29   : > { %19304 = vst [vmem:[#allocation41_spill] sm:$0xff] %v13453_v22  ;;  %19305 = vst [vmem:[#allocation42_spill] sm:$0xff] %v13455_v23  ;;  %11890 = vmatprep.mubr.f32.mxu0 %v13424_v7  ;;  %v13516_v2 = vsub.f32 %v273_v48, %v13489_v60  ;;  %v13519_v19 = vand.u32 4294901760, %v490_v61  ;;  %v510_v59 = vsub.f32 %v13459_v31, %v13495_v62  ;;  %v13524_v7 = vand.u32 4294901760, %v13498_v63 }
  0x2a   : > { %19306 = vst [vmem:[#allocation43_spill] sm:$0xff] %v13459_v31  ;;  %19307 = vst [vmem:[#allocation44_spill] sm:$0xff] %v13461_v40  ;;  %11920 = vmatmul.mubr.f32.gmra.mxu1 %v13430_v9  ;;  %v13527_v41 = vsub.f32 %v329_v42, %v13500_v0  ;;  %v13530_v6 = vand.u32 4294901760, %v500_v12  ;;  %v520_v48 = vsub.f32 %v13479_v55, %v13508_v13 }
  0x2b   : > { %19308 = vst [vmem:[#allocation45_spill] sm:$0xff] %v13470_v49  ;;  %19309 = vst [vmem:[#allocation46_spill] sm:$0xff] %v13473_v50  ;;  %11922 = vmatprep.mubr.f32.mxu1 %v13432_v10  ;;  %v13540_v61 = vand.u32 4294901760, %v510_v59  ;;  %v530_v42 = vsub.f32 %v13498_v63, %v13524_v7 }
  0x2c   : > { %19310 = vst [vmem:[#allocation47_spill] sm:$0xff] %v13476_v54  ;;  %19311 = vst [vmem:[#allocation48_spill] sm:$0xff] %v13479_v55  ;;  %11891 = vmatmul.mubr.f32.gmra.mxu0 %v13484_v57  ;;  %v13545_v12 = vand.u32 4294901760, %v13527_v41  ;;  %v13551_v5 = vand.u32 4294901760, %v520_v48 }
  0x2d   : > { %19312 = vst [vmem:[#allocation49_spill] sm:$0xff] %v13482_v56  ;;  %19313 = vst [vmem:[#allocation50_spill] sm:$0xff] %v13484_v57  ;;  %11893 = vmatprep.mubr.f32.mxu0 %v13503_v11  ;;  %v13535_v57 = vand.u32 4294901760, %v13511_v14  ;;  %v13558_v59 = vand.u32 4294901760, %v530_v42 }
  0x2e   : > { %19314 = vst [vmem:[#allocation51_spill] sm:$0xff] %v13495_v62  ;;  %19315 = vst [vmem:[#allocation52_spill] sm:$0xff] %v13498_v63  ;;  %11923 = vmatmul.mubr.f32.gmra.mxu1 %v13440_v18 }
  0x2f   : > { %19316 = vst [vmem:[#allocation53_spill] sm:$0xff] %v13500_v0  ;;  %19317 = vst [vmem:[#allocation54_spill] sm:$0xff] %v13503_v11  ;;  %11925 = vmatprep.mubr.f32.mxu1 %v13455_v23  ;;  %v13548_v11 = vand.u32 4294901760, %v13516_v2  ;;  %v540_v4 = vsub.f32 %v13511_v14, %v13535_v57 }
  0x30   : > { %19318 = vst [vmem:[#allocation55_spill] sm:$0xff] %v13508_v13  ;;  %19319 = vst [vmem:[#allocation56_spill] sm:$0xff] %v13511_v14  ;;  %11894 = vmatmul.mubr.f32.gmra.mxu0 %v13519_v19 }
  0x31   : > { %19320 = vst [vmem:[#allocation57_spill] sm:$0xff] %v13519_v19  ;;  %19321 = vst [vmem:[#allocation58_spill] sm:$0xff] %v13524_v7  ;;  %11896 = vmatprep.mubr.f32.mxu0 %v13530_v6  ;;  %v550_v19 = vsub.f32 %v13527_v41, %v13545_v12  ;;  %v1682_v53 = vsub.f32 %v13516_v2, %v13548_v11  ;;  %v13565_v48 = vand.u32 4294901760, %v540_v4  ;;  %v274_v4 = vld [vmem:[%s18728_s1 + $0x10] sm:$0xff] }
  0x32   : > { %19322 = vst [vmem:[#allocation59_spill] sm:$0xff] %v13527_v41  ;;  %19323 = vst [vmem:[#allocation60_spill] sm:$0xff] %v13530_v6  ;;  %11926 = vmatmul.mubr.f32.gmra.mxu1 %v13461_v40 }
  0x33   : > { %19324 = vst [vmem:[#allocation61_spill] sm:$0xff] %v13535_v57  ;;  %19325 = vst [vmem:[#allocation62_spill] sm:$0xff] %v13540_v61  ;;  %11928 = vmatprep.mubr.f32.mxu1 %v13482_v56  ;;  %v13570_v6 = vand.u32 4294901760, %v550_v19  ;;  %v1683_v42 = vand.u32 4294901760, %v1682_v53  ;;  %v19333_v53 = vld [vmem:[#allocation32_spill] sm:$0xff]  ;;  %v13665_v19 = vand.u32 4294901760, %v274_v4 }
  0x34   : > { %19326 = vst [vmem:[#allocation63_spill] sm:$0xff] %v13545_v12  ;;  %19327 = vst [vmem:[#allocation64_spill] sm:$0xff] %v13551_v5  ;;  %11897 = vmatmul.mubr.f32.gmra.mxu0 %v13540_v61 }
  0x35   : > { %19328 = vst [vmem:[#allocation65_spill] sm:$0xff] %v13558_v59  ;;  %11899 = vmatprep.mubr.f32.mxu0 %v13551_v5  ;;  %19329 = vst [vmem:[#allocation66_spill] sm:$0xff] %v13565_v48 }
  0x36   : > { %11929 = vmatmul.mubr.f32.gmra.mxu1 %v13500_v0  ;;  %19330 = vst [vmem:[#allocation67_spill] sm:$0xff] %v13570_v6 }
  0x37   : > { %11959 = vmatprep.mubr.f32.mxu1 %v13340_v32 }
  0x38   : > { %11900 = vmatmul.mubr.f32.gmra.mxu0 %v13558_v59 }
  0x39   : > { %11902 = vmatprep.mubr.f32.mxu0 %v13565_v48 }
  0x3a   : > { %11960 = vmatmul.mubr.f32.vlgmr.msra.gmra.mxu1 %v13343_v33 }
  0x3b   : > { %12010 = vmatpush3.msra.mxu1 %v13276_v1  ;;  %11962 = vmatprep.mubr.f32.mxu1 %v13348_v34  ;;  %v19331_v1 = vld [vmem:[#allocation29_spill] sm:$0xff] }
  0x3c   : > { %11903 = vmatmul.mubr.f32.gmra.mxu0 %v13570_v6  ;;  %12061 = vmatprep.subr.mxu1 %v1683_v42 }
  0x3d   : > { %11933 = vmatprep.mubr.f32.mxu0 %v13321_v24 }
  0x3e   : > { %11963 = vmatmul.mubr.f32.gmra.mxu1 %v13373_v43 }
  0x3f   : > { %11965 = vmatprep.mubr.f32.mxu1 %v13377_v44 }
  0x40   : > { %11934 = vmatmul.mubr.f32.vlgmr.msra.gmra.mxu0 %v13325_v25 }
  0x41   : > { %11984 = vmatpush3.msra.mxu0 %v13286_v3  ;;  %11936 = vmatprep.mubr.f32.mxu0 %v13328_v26  ;;  %v19332_v3 = vld [vmem:[#allocation31_spill] sm:$0xff] }
  0x42   : > { %11966 = vmatmul.mubr.f32.gmra.mxu1 %v13380_v45  ;;  %12035 = vmatprep.subr.mxu0 %v13489_v60 }
  0x43   : > { %11968 = vmatprep.mubr.f32.mxu1 %v13383_v46 }
  0x44   : > { %11937 = vmatmul.mubr.f32.gmra.mxu0 %v13351_v35 }
  0x45   : > { %11939 = vmatprep.mubr.f32.mxu0 %v13356_v36 }
  0x46   : > { %11969 = vmatmul.mubr.f32.gmra.mxu1 %v13408_v58 }
  0x47   : > { %11971 = vmatprep.mubr.f32.mxu1 %v13470_v49 }
  0x48   : > { %11940 = vmatmul.mubr.f32.gmra.mxu0 %v13359_v37 }
  0x49   : > { %11942 = vmatprep.mubr.f32.mxu0 %v13362_v38 }
  0x4a   : > { %11972 = vmatmul.mubr.f32.gmra.mxu1 %v13473_v50 }
  0x4b   : > { %11974 = vmatprep.mubr.f32.mxu1 %v13476_v54 }
  0x4c   : > { %11943 = vmatmul.mubr.f32.gmra.mxu0 %v13386_v47 }
  0x4d   : > { %11945 = vmatprep.mubr.f32.mxu0 %v13447_v20 }
  0x4e   : > { %11975 = vmatmul.mubr.f32.gmra.mxu1 %v13495_v62 }
  0x4f   : > { %11977 = vmatprep.mubr.f32.mxu1 %v13508_v13 }
  0x50   : > { %11946 = vmatmul.mubr.f32.gmra.mxu0 %v13450_v21 }
  0x51   : > { %11948 = vmatprep.mubr.f32.mxu0 %v13453_v22 }
  0x52   : > { %11978 = vmatmul.mubr.f32.gmra.mxu1 %v13524_v7 }
  0x53   : > { %11980 = vmatprep.mubr.f32.mxu1 %v13535_v57 }
  0x54   : > { %11949 = vmatmul.mubr.f32.gmra.mxu0 %v13459_v31 }
  0x55   : > { %11951 = vmatprep.mubr.f32.mxu0 %v13479_v55 }
  0x56   : > { %11981 = vmatmul.mubr.f32.gmra.mxu1 %v13545_v12 }
  0x57   : > { %12011 = vmatprep.mubr.f32.mxu1 %v13308_v15 }
  0x58   : > { %11952 = vmatmul.mubr.f32.gmra.mxu0 %v13498_v63 }
  0x59   : > { %11954 = vmatprep.mubr.f32.mxu0 %v13511_v14 }
  0x5a   : > { %12012 = vmatmul.mubr.f32.vlgmr.msra.gmra.mxu1 %v13310_v16 }
  0x5b   : > { %12062 = vmatpush3.msra.mxu1 %v1683_v42  ;;  %12014 = vmatprep.mubr.f32.mxu1 %v13312_v17  ;;  %v19335_v42 = vld [vmem:[#allocation34_spill] sm:$0xff] }
  0x5c   : > { %11955 = vmatmul.mubr.f32.gmra.mxu0 %v13527_v41  ;;  %12113 = vmatprep.subr.mxu1 %v13489_v60 }
  0x5d   : > { %11985 = vmatprep.mubr.f32.mxu0 %v13308_v15 }
  0x5e   : > { %12015 = vmatmul.mubr.f32.gmra.mxu1 %v13330_v27 }
  0x5f   : > { %12017 = vmatprep.mubr.f32.mxu1 %v13332_v28 }
  0x60   : > { %11986 = vmatmul.mubr.f32.vlgmr.msra.gmra.mxu0 %v13310_v16 }
  0x61   : > { %12036 = vmatpush3.msra.mxu0 %v13489_v60  ;;  %11988 = vmatprep.mubr.f32.mxu0 %v13312_v17 }
  0x62   : > { %12018 = vmatmul.mubr.f32.gmra.mxu1 %v13334_v29  ;;  %12087 = vmatprep.subr.mxu0 %v13516_v2 }
  0x63   : > { %12020 = vmatprep.mubr.f32.mxu1 %v13336_v30 }
  0x64   : > { %11989 = vmatmul.mubr.f32.gmra.mxu0 %v13330_v27 }
  0x65   : > { %11991 = vmatprep.mubr.f32.mxu0 %v13332_v28 }
  0x66   : > { %12021 = vmatmul.mubr.f32.gmra.mxu1 %v13364_v39 }
  0x67   : > { %12023 = vmatprep.mubr.f32.mxu1 %v13428_v8 }
  0x68   : > { %11992 = vmatmul.mubr.f32.gmra.mxu0 %v13334_v29 }
  0x69   : > { %11994 = vmatprep.mubr.f32.mxu0 %v13336_v30 }
  0x6a   : > { %12024 = vmatmul.mubr.f32.gmra.mxu1 %v13430_v9 }
  0x6b   : > { %12026 = vmatprep.mubr.f32.mxu1 %v13432_v10 }
  0x6c   : > { %11995 = vmatmul.mubr.f32.gmra.mxu0 %v13364_v39 }
  0x6d   : > { %11997 = vmatprep.mubr.f32.mxu0 %v13428_v8 }
  0x6e   : > { %12027 = vmatmul.mubr.f32.gmra.mxu1 %v13440_v18 }
  0x6f   : > { %12029 = vmatprep.mubr.f32.mxu1 %v13455_v23 }
  0x70   : > { %11998 = vmatmul.mubr.f32.gmra.mxu0 %v13430_v9 }
  0x71   : > { %12000 = vmatprep.mubr.f32.mxu0 %v13432_v10 }
  0x72   : > { %12030 = vmatmul.mubr.f32.gmra.mxu1 %v13461_v40 }
  0x73   : > { %12032 = vmatprep.mubr.f32.mxu1 %v13482_v56 }
  0x74   : > { %12001 = vmatmul.mubr.f32.gmra.mxu0 %v13440_v18 }
  0x75   : > { %12003 = vmatprep.mubr.f32.mxu0 %v13455_v23 }
  0x76   : > { %12033 = vmatmul.mubr.f32.gmra.mxu1 %v13500_v0 }
  0x77   : > { %12063 = vmatprep.mubr.f32.mxu1 %v13308_v15 }
  0x78   : > { %12004 = vmatmul.mubr.f32.gmra.mxu0 %v13461_v40 }
  0x79   : > { %12006 = vmatprep.mubr.f32.mxu0 %v13482_v56 }
  0x7a   : > { %12064 = vmatmul.mubr.f32.vlgmr.msra.gmra.mxu1 %v13310_v16 }
  0x7b   : > { %12114 = vmatpush3.msra.mxu1 %v13489_v60  ;;  %12066 = vmatprep.mubr.f32.mxu1 %v13312_v17 }
  0x7c   : > { %12007 = vmatmul.mubr.f32.gmra.mxu0 %v13500_v0  ;;  %12165 = vmatprep.subr.mxu1 %v13489_v60 }
  0x7d   : > { %12037 = vmatprep.mubr.f32.mxu0 %v13391_v51 }
  0x7e   : > { %12067 = vmatmul.mubr.f32.gmra.mxu1 %v13330_v27 }
  0x7f   : > { %12069 = vmatprep.mubr.f32.mxu1 %v13332_v28 }
  0x80   : > { %12038 = vmatmul.mubr.f32.vlgmr.msra.gmra.mxu0 %v13393_v52 }
  0x81   : > { %12088 = vmatpush3.msra.mxu0 %v13516_v2  ;;  %12040 = vmatprep.mubr.f32.mxu0 %v19331_v1  ;;  %v19334_v2 = vld [vmem:[#allocation33_spill] sm:$0xff]  ;;  %v19337_v1 = vld [vmem:[#allocation54_spill] sm:$0xff] }
  0x82   : > { %12070 = vmatmul.mubr.f32.gmra.mxu1 %v13334_v29  ;;  %12139 = vmatprep.subr.mxu0 %v13548_v11 }
  0x83   : > { %12072 = vmatprep.mubr.f32.mxu1 %v13336_v30 }
  0x84   : > { %12041 = vmatmul.mubr.f32.gmra.mxu0 %v19332_v3  ;;  %v19336_v3 = vld [vmem:[#allocation50_spill] sm:$0xff] }
  0x85   : > { %12043 = vmatprep.mubr.f32.mxu0 %v19333_v53  ;;  %v13672_v53 = vsub.f32 %v274_v4, %v13665_v19 }
  0x86   : > { %12073 = vmatmul.mubr.f32.gmra.mxu1 %v13364_v39 }
  0x87   : > { %12075 = vmatprep.mubr.f32.mxu1 %v13428_v8  ;;  %v13679_v52 = vand.u32 4294901760, %v13672_v53 }
  0x88   : > { %12044 = vmatmul.mubr.f32.gmra.mxu0 %v19334_v2  ;;  %v19338_v2 = vld [vmem:[#allocation57_spill] sm:$0xff] }
  0x89   : > { %12046 = vmatprep.mubr.f32.mxu0 %v19335_v42  ;;  %v19339_v42 = vld [vmem:[#allocation60_spill] sm:$0xff]  ;;  %v2773_v4 = vsub.f32 %v13672_v53, %v13679_v52 }
  0x8a   : > { %12076 = vmatmul.mubr.f32.gmra.mxu1 %v13430_v9 }
  0x8b   : > { %12078 = vmatprep.mubr.f32.mxu1 %v13432_v10 }
  0x8c   : > { %12047 = vmatmul.mubr.f32.gmra.mxu0 %v19336_v3 }
  0x8d   : > { %12049 = vmatprep.mubr.f32.mxu0 %v19337_v1 }
  0x8e   : > { %12079 = vmatmul.mubr.f32.gmra.mxu1 %v13440_v18 }
  0x8f   : > { %12081 = vmatprep.mubr.f32.mxu1 %v13455_v23 }
  0x90   : > { %12050 = vmatmul.mubr.f32.gmra.mxu0 %v19338_v2  ;;  %v2774_v2 = vand.u32 4294901760, %v2773_v4 }
  0x91   : > { %12052 = vmatprep.mubr.f32.mxu0 %v19339_v42 }
  0x92   : > { %12082 = vmatmul.mubr.f32.gmra.mxu1 %v13461_v40 }
  0x93   : > { %12084 = vmatprep.mubr.f32.mxu1 %v13482_v56 }
  0x94   : > { %12053 = vmatmul.mubr.f32.gmra.mxu0 %v13540_v61 }
  0x95   : > { %12055 = vmatprep.mubr.f32.mxu0 %v13551_v5 }
  0x96   : > { %12085 = vmatmul.mubr.f32.gmra.mxu1 %v13500_v0 }
  0x97   : > { %12115 = vmatprep.mubr.f32.mxu1 %v13340_v32 }
  0x98   : > { %12056 = vmatmul.mubr.f32.gmra.mxu0 %v13558_v59 }
  0x99   : > { %12058 = vmatprep.mubr.f32.mxu0 %v13565_v48 }
  0x9a   : > { %12116 = vmatmul.mubr.f32.vlgmr.msra.gmra.mxu1 %v13343_v33 }
  0x9b   : > { %12166 = vmatpush3.msra.mxu1 %v13489_v60  ;;  %12118 = vmatprep.mubr.f32.mxu1 %v13348_v34 }
  0x9c   : > { %12059 = vmatmul.mubr.f32.gmra.mxu0 %v13570_v6  ;;  %12217 = vmatprep.subr.mxu1 %v2774_v2 }
  0x9d   : > { %12089 = vmatprep.mubr.f32.mxu0 %v13321_v24 }
  0x9e   : > { %12119 = vmatmul.mubr.f32.gmra.mxu1 %v13373_v43 }
  0x9f   : > { %12121 = vmatprep.mubr.f32.mxu1 %v13377_v44 }
  0xa0   : > { %12090 = vmatmul.mubr.f32.vlgmr.msra.gmra.mxu0 %v13325_v25 }
  0xa1   : > { %12140 = vmatpush3.msra.mxu0 %v13548_v11  ;;  %12092 = vmatprep.mubr.f32.mxu0 %v13328_v26 }
  0xa2   : > { %12122 = vmatmul.mubr.f32.gmra.mxu1 %v13380_v45  ;;  %12191 = vmatprep.subr.mxu0 %v13665_v19 }
  0xa3   : > { %12124 = vmatprep.mubr.f32.mxu1 %v13383_v46 }
  0xa4   : > { %12093 = vmatmul.mubr.f32.gmra.mxu0 %v13351_v35 }
  0xa5   : > { %12095 = vmatprep.mubr.f32.mxu0 %v13356_v36 }
  0xa6   : > { %12125 = vmatmul.mubr.f32.gmra.mxu1 %v13408_v58 }
  0xa7   : > { %12127 = vmatprep.mubr.f32.mxu1 %v13470_v49 }
  0xa8   : > { %12096 = vmatmul.mubr.f32.gmra.mxu0 %v13359_v37 }
  0xa9   : > { %12098 = vmatprep.mubr.f32.mxu0 %v13362_v38 }
  0xaa   : > { %12128 = vmatmul.mubr.f32.gmra.mxu1 %v13473_v50 }
  0xab   : > { %12130 = vmatprep.mubr.f32.mxu1 %v13476_v54 }
  0xac   : > { %12099 = vmatmul.mubr.f32.gmra.mxu0 %v13386_v47 }
  0xad   : > { %12101 = vmatprep.mubr.f32.mxu0 %v13447_v20 }
  0xae   : > { %12131 = vmatmul.mubr.f32.gmra.mxu1 %v13495_v62 }
  0xaf   : > { %12133 = vmatprep.mubr.f32.mxu1 %v13508_v13 }
  0xb0   : > { %12102 = vmatmul.mubr.f32.gmra.mxu0 %v13450_v21 }
  0xb1   : > { %12104 = vmatprep.mubr.f32.mxu0 %v13453_v22 }
  0xb2   : > { %12134 = vmatmul.mubr.f32.gmra.mxu1 %v13524_v7 }
  0xb3   : > { %12136 = vmatprep.mubr.f32.mxu1 %v13535_v57 }
  0xb4   : > { %12105 = vmatmul.mubr.f32.gmra.mxu0 %v13459_v31 }
  0xb5   : > { %12107 = vmatprep.mubr.f32.mxu0 %v13479_v55 }
  0xb6   : > { %12137 = vmatmul.mubr.f32.gmra.mxu1 %v13545_v12 }
  0xb7   : > { %12167 = vmatprep.mubr.f32.mxu1 %v13308_v15 }
  0xb8   : > { %12108 = vmatmul.mubr.f32.gmra.mxu0 %v13498_v63 }
  0xb9   : > { %12110 = vmatprep.mubr.f32.mxu0 %v13511_v14  ;;  %v19340_v14 = vld [vmem:[#allocation28_spill] sm:$0xff] }
  0xba   : > { %12168 = vmatmul.mubr.f32.vlgmr.msra.gmra.mxu1 %v13310_v16 }
  0xbb   : > { %12218 = vmatpush3.msra.mxu1 %v2774_v2  ;;  %12170 = vmatprep.mubr.f32.mxu1 %v13312_v17 }
  0xbc   : > { %12111 = vmatmul.mubr.f32.gmra.mxu0 %v13527_v41  ;;  %12269 = vmatprep.subr.mxu1 %v13665_v19 }
  0xbd   : > { %12141 = vmatprep.mubr.f32.mxu0 %v13308_v15 }
  0xbe   : > { %12171 = vmatmul.mubr.f32.gmra.mxu1 %v13330_v27 }
  0xbf   : > { %12173 = vmatprep.mubr.f32.mxu1 %v13332_v28 }
  0xc0   : > { %12142 = vmatmul.mubr.f32.vlgmr.msra.gmra.mxu0 %v13310_v16 }
  0xc1   : > { %12192 = vmatpush3.msra.mxu0 %v13665_v19  ;;  %12144 = vmatprep.mubr.f32.mxu0 %v13312_v17 }
  0xc2   : > { %12174 = vmatmul.mubr.f32.gmra.mxu1 %v13334_v29  ;;  %12243 = vmatprep.subr.mxu0 %v13672_v53 }
  0xc3   : > { %12176 = vmatprep.mubr.f32.mxu1 %v13336_v30 }
  0xc4   : > { %12145 = vmatmul.mubr.f32.gmra.mxu0 %v13330_v27 }
  0xc5   : > { %12147 = vmatprep.mubr.f32.mxu0 %v13332_v28 }
  0xc6   : > { %12177 = vmatmul.mubr.f32.gmra.mxu1 %v13364_v39 }
  0xc7   : > { %12179 = vmatprep.mubr.f32.mxu1 %v13428_v8 }
  0xc8   : > { %12148 = vmatmul.mubr.f32.gmra.mxu0 %v13334_v29 }
  0xc9   : > { %12150 = vmatprep.mubr.f32.mxu0 %v13336_v30 }
  0xca   : > { %12180 = vmatmul.mubr.f32.gmra.mxu1 %v13430_v9 }
  0xcb   : > { %12182 = vmatprep.mubr.f32.mxu1 %v13432_v10 }
  0xcc   : > { %12151 = vmatmul.mubr.f32.gmra.mxu0 %v13364_v39 }
  0xcd   : > { %12153 = vmatprep.mubr.f32.mxu0 %v13428_v8 }
  0xce   : > { %12183 = vmatmul.mubr.f32.gmra.mxu1 %v13440_v18 }
  0xcf   : > { %12185 = vmatprep.mubr.f32.mxu1 %v13455_v23 }
  0xd0   : > { %12154 = vmatmul.mubr.f32.gmra.mxu0 %v13430_v9 }
  0xd1   : > { %12156 = vmatprep.mubr.f32.mxu0 %v13432_v10 }
  0xd2   : > { %12186 = vmatmul.mubr.f32.gmra.mxu1 %v13461_v40 }
  0xd3   : > { %12188 = vmatprep.mubr.f32.mxu1 %v13482_v56 }
  0xd4   : > { %12157 = vmatmul.mubr.f32.gmra.mxu0 %v13440_v18 }
  0xd5   : > { %12159 = vmatprep.mubr.f32.mxu0 %v13455_v23 }
  0xd6   : > { %12189 = vmatmul.mubr.f32.gmra.mxu1 %v13500_v0 }
  0xd7   : > { %12219 = vmatprep.mubr.f32.mxu1 %v13308_v15 }
  0xd8   : > { %12160 = vmatmul.mubr.f32.gmra.mxu0 %v13461_v40 }
  0xd9   : > { %12162 = vmatprep.mubr.f32.mxu0 %v13482_v56  ;;  %v11909_v60 = vpop.f32.mrf.mxu1 }
  0xda   : > { %12220 = vmatmul.mubr.f32.vlgmr.msra.gmra.mxu1 %v13310_v16 }
  0xdb   : > { %v629_v11 = vpop.f32.mrf.mxu1  ;;  %12270 = vmatpush3.msra.mxu1 %v13665_v19  ;;  %12222 = vmatprep.mubr.f32.mxu1 %v13312_v17  ;;  %v19341_v17 = vld [vmem:[#allocation29_spill] sm:$0xff] }
  0xdc   : > { %12163 = vmatmul.mubr.f32.gmra.mxu0 %v13500_v0  ;;  %12321 = vmatprep.subr.mxu1 %v13665_v19 }
  0xdd   : > { %12193 = vmatprep.mubr.f32.mxu0 %v13391_v51  ;;  %v11912_v2 = vpop.f32.mrf.mxu1 }
  0xde   : > { %12223 = vmatmul.mubr.f32.gmra.mxu1 %v13330_v27  ;;  %v19342_v27 = vld [vmem:[#allocation31_spill] sm:$0xff] }
  0xdf   : > { %v641_v4 = vpop.f32.mrf.mxu1  ;;  %12225 = vmatprep.mubr.f32.mxu1 %v13332_v28 }
  0xe0   : > { %v11883_v41 = vpop.f32.mrf.mxu0  ;;  %12194 = vmatmul.mubr.f32.vlgmr.msra.gmra.mxu0 %v19340_v14 }
  0xe1   : > { %v13771_v16 = vadd.f32 %v11909_v60, %v11883_v41  ;;  %12244 = vmatpush3.msra.mxu0 %v13672_v53  ;;  %12196 = vmatprep.mubr.f32.mxu0 %v19341_v17  ;;  %v19343_v60 = vld [vmem:[#allocation32_spill] sm:$0xff]  ;;  %v275_v53 = vld [vmem:[%s18728_s1 + $0x18] sm:$0xff] }
  0xe2   : > { %v403_v63 = vpop.f32.mrf.mxu0  ;;  %v11915_v15 = vpop.f32.mrf.mxu1  ;;  %12226 = vmatmul.mubr.f32.gmra.mxu1 %v13334_v29  ;;  %12295 = vmatprep.subr.mxu0 %v13679_v52 }
  0xe3   : > { %v13777_v51 = vadd.f32 %v629_v11, %v403_v63  ;;  %12228 = vmatprep.mubr.f32.mxu1 %v13336_v30  ;;  %v19344_v30 = vld [vmem:[#allocation33_spill] sm:$0xff] }
  0xe4   : > { %v11886_v28 = vpop.f32.mrf.mxu0  ;;  %12197 = vmatmul.mubr.f32.gmra.mxu0 %v19342_v27  ;;  %v653_v14 = vpop.f32.mrf.mxu1 }
  0xe5   : > { %v13781_v41 = vadd.f32 %v11912_v2, %v11886_v28  ;;  %12199 = vmatprep.mubr.f32.mxu0 %v19343_v60  ;;  %v13792_v28 = vand.u32 4294901760, %v275_v53  ;;  %v19345_v60 = vld [vmem:[#allocation34_spill] sm:$0xff] }
  0xe6   : > { %v423_v17 = vpop.f32.mrf.mxu0  ;;  %v11918_v29 = vpop.f32.mrf.mxu1  ;;  %12229 = vmatmul.mubr.f32.gmra.mxu1 %v13364_v39 }
  0xe7   : > { %v13788_v63 = vadd.f32 %v641_v4, %v423_v17  ;;  %12231 = vmatprep.mubr.f32.mxu1 %v13428_v8 }
  0xe8   : > { %v11889_v11 = vpop.f32.mrf.mxu0  ;;  %12200 = vmatmul.mubr.f32.gmra.mxu0 %v19344_v30  ;;  %v665_v27 = vpop.f32.mrf.mxu1  ;;  %v13803_v30 = vsub.f32 %v275_v53, %v13792_v28 }
  0xe9   : > { %v13794_v2 = vadd.f32 %v11915_v15, %v11889_v11  ;;  %12202 = vmatprep.mubr.f32.mxu0 %v19345_v60 }
  0xea   : > { %v443_v12 = vpop.f32.mrf.mxu0  ;;  %v11921_v55 = vpop.f32.mrf.mxu1  ;;  %12232 = vmatmul.mubr.f32.gmra.mxu1 %v13430_v9 }
  0xeb   : > { %v13798_v31 = vadd.f32 %v653_v14, %v443_v12  ;;  %12234 = vmatprep.mubr.f32.mxu1 %v13432_v10  ;;  %v19346_v12 = vld [vmem:[#allocation57_spill] sm:$0xff]  ;;  %v13814_v10 = vand.u32 4294901760, %v13803_v30 }
  0xec   : > { %v11892_v17 = vpop.f32.mrf.mxu0  ;;  %12203 = vmatmul.mubr.f32.gmra.mxu0 %v19336_v3  ;;  %v677_v4 = vpop.f32.mrf.mxu1 }
  0xed   : > { %v13805_v8 = vadd.f32 %v11918_v29, %v11892_v17  ;;  %12205 = vmatprep.mubr.f32.mxu0 %v19337_v1 }
  0xee   : > { %v463_v15 = vpop.f32.mrf.mxu0  ;;  %v11924_v11 = vpop.f32.mrf.mxu1  ;;  %12235 = vmatmul.mubr.f32.gmra.mxu1 %v13440_v18 }
  0xef   : > { %v13809_v60 = vadd.f32 %v665_v27, %v463_v15  ;;  %12237 = vmatprep.mubr.f32.mxu1 %v13455_v23 }
  0xf0   : > { %v11895_v14 = vpop.f32.mrf.mxu0  ;;  %12206 = vmatmul.mubr.f32.gmra.mxu0 %v19346_v12  ;;  %v689_v3 = vpop.f32.mrf.mxu1  ;;  %v3864_v12 = vsub.f32 %v13803_v30, %v13814_v10 }
  0xf1   : > { %v13816_v53 = vadd.f32 %v11921_v55, %v11895_v14  ;;  %12208 = vmatprep.mubr.f32.mxu0 %v19339_v42 }
  0xf2   : > { %v483_v29 = vpop.f32.mrf.mxu0  ;;  %v11927_v17 = vpop.f32.mrf.mxu1  ;;  %12238 = vmatmul.mubr.f32.gmra.mxu1 %v13461_v40 }
  0xf3   : > { %v13820_v1 = vadd.f32 %v677_v4, %v483_v29  ;;  %12240 = vmatprep.mubr.f32.mxu1 %v13482_v56 }
  0xf4   : > { %v11898_v27 = vpop.f32.mrf.mxu0  ;;  %12209 = vmatmul.mubr.f32.gmra.mxu0 %v13540_v61  ;;  %v701_v15 = vpop.f32.mrf.mxu1  ;;  %v13834_v61 = vand.u32 4294901760, %v3864_v12 }
  0xf5   : > { %v13826_v23 = vadd.f32 %v11924_v11, %v11898_v27  ;;  %12211 = vmatprep.mubr.f32.mxu0 %v13551_v5 }
  0xf6   : > { %v503_v55 = vpop.f32.mrf.mxu0  ;;  %v11930_v14 = vpop.f32.mrf.mxu1  ;;  %12241 = vmatmul.mubr.f32.gmra.mxu1 %v13500_v0 }
  0xf7   : > { %v13830_v42 = vadd.f32 %v689_v3, %v503_v55  ;;  %12271 = vmatprep.mubr.f32.mxu1 %v13340_v32 }
  0xf8   : > { %v11901_v4 = vpop.f32.mrf.mxu0  ;;  %12212 = vmatmul.mubr.f32.gmra.mxu0 %v13558_v59  ;;  %v713_v29 = vpop.f32.mrf.mxu1 }
  0xf9   : > { %v13836_v56 = vadd.f32 %v11927_v17, %v11901_v4  ;;  %12214 = vmatprep.mubr.f32.mxu0 %v13565_v48 }
  0xfa   : > { %v523_v11 = vpop.f32.mrf.mxu0  ;;  %v11961_v27 = vpop.f32.mrf.mxu1  ;;  %12272 = vmatmul.mubr.f32.vlgmr.msra.gmra.mxu1 %v13343_v33 }
  0xfb   : > { %v13840_v5 = vadd.f32 %v701_v15, %v523_v11  ;;  %12322 = vmatpush3.msra.mxu1 %v13665_v19  ;;  %12274 = vmatprep.mubr.f32.mxu1 %v13348_v34 }
  0xfc   : > { %v11904_v3 = vpop.f32.mrf.mxu0  ;;  %12215 = vmatmul.mubr.f32.gmra.mxu0 %v13570_v6  ;;  %v972_v55 = vpop.f32.mrf.mxu1  ;;  %12373 = vmatprep.subr.mxu1 %v13834_v61 }
  0xfd   : > { %v13846_v12 = vadd.f32 %v11930_v14, %v11904_v3  ;;  %12245 = vmatprep.mubr.f32.mxu0 %v13321_v24 }
  0xfe   : > { %v543_v17 = vpop.f32.mrf.mxu0  ;;  %v11964_v4 = vpop.f32.mrf.mxu1  ;;  %12275 = vmatmul.mubr.f32.gmra.mxu1 %v13373_v43 }
  0xff   : > { %v13850_v15 = vadd.f32 %v713_v29, %v543_v17  ;;  %12277 = vmatprep.mubr.f32.mxu1 %v13377_v44 }
 0x100   : > { %v11935_v19 = vpop.f32.mrf.mxu0  ;;  %12246 = vmatmul.mubr.f32.vlgmr.msra.gmra.mxu0 %v13325_v25  ;;  %v988_v11 = vpop.f32.mrf.mxu1 }
 0x101   : > { %v801_v6 = vadd.f32 %v11935_v19, %v13771_v16  ;;  %12296 = vmatpush3.msra.mxu0 %v13679_v52  ;;  %12248 = vmatprep.mubr.f32.mxu0 %v13328_v26 }
 0x102   : > { %v793_v14 = vpop.f32.mrf.mxu0  ;;  %v11967_v3 = vpop.f32.mrf.mxu1  ;;  %12278 = vmatmul.mubr.f32.gmra.mxu1 %v13380_v45  ;;  %12347 = vmatprep.subr.mxu0 %v13792_v28 }
 0x103   : > { %v13859_v29 = vadd.f32 %v11961_v27, %v801_v6  ;;  %v794_v17 = vadd.f32 %v793_v14, %v13777_v51  ;;  %12280 = vmatprep.mubr.f32.mxu1 %v13383_v46 }
 0x104   : > { %v11938_v25 = vpop.f32.mrf.mxu0  ;;  %12249 = vmatmul.mubr.f32.gmra.mxu0 %v13351_v35  ;;  %v1004_v16 = vpop.f32.mrf.mxu1 }
 0x105   : > { %v13864_v19 = vadd.f32 %v972_v55, %v794_v17  ;;  %v815_v52 = vadd.f32 %v11938_v25, %v13781_v41  ;;  %12251 = vmatprep.mubr.f32.mxu0 %v13356_v36 }
 0x106   : > { %v807_v26 = vpop.f32.mrf.mxu0  ;;  %v11970_v45 = vpop.f32.mrf.mxu1  ;;  %12281 = vmatmul.mubr.f32.gmra.mxu1 %v13408_v58 }
 0x107   : > { %v13869_v6 = vadd.f32 %v11964_v4, %v815_v52  ;;  %v808_v51 = vadd.f32 %v807_v26, %v13788_v63  ;;  %12283 = vmatprep.mubr.f32.mxu1 %v13470_v49 }
 0x108   : > { %v11941_v27 = vpop.f32.mrf.mxu0  ;;  %12252 = vmatmul.mubr.f32.gmra.mxu0 %v13359_v37  ;;  %v1020_v14 = vpop.f32.mrf.mxu1 }
 0x109   : > { %v13874_v55 = vadd.f32 %v988_v11, %v808_v51  ;;  %v829_v25 = vadd.f32 %v11941_v27, %v13794_v2  ;;  %12254 = vmatprep.mubr.f32.mxu0 %v13362_v38 }
 0x10a   : > { %v821_v41 = vpop.f32.mrf.mxu0  ;;  %v11973_v17 = vpop.f32.mrf.mxu1  ;;  %12284 = vmatmul.mubr.f32.gmra.mxu1 %v13473_v50 }
 0x10b   : > { %v13879_v4 = vadd.f32 %v11967_v3, %v829_v25  ;;  %v822_v26 = vadd.f32 %v821_v41, %v13798_v31  ;;  %12286 = vmatprep.mubr.f32.mxu1 %v13476_v54 }
 0x10c   : > { %v11944_v63 = vpop.f32.mrf.mxu0  ;;  %12255 = vmatmul.mubr.f32.gmra.mxu0 %v13386_v47  ;;  %v1036_v52 = vpop.f32.mrf.mxu1 }
 0x10d   : > { %v13884_v11 = vadd.f32 %v1004_v16, %v822_v26  ;;  %v843_v2 = vadd.f32 %v11944_v63, %v13805_v8  ;;  %12257 = vmatprep.mubr.f32.mxu0 %v13447_v20 }
 0x10e   : > { %v835_v51 = vpop.f32.mrf.mxu0  ;;  %v11976_v27 = vpop.f32.mrf.mxu1  ;;  %12287 = vmatmul.mubr.f32.gmra.mxu1 %v13495_v62 }
 0x10f   : > { %v13889_v3 = vadd.f32 %v11970_v45, %v843_v2  ;;  %v836_v31 = vadd.f32 %v835_v51, %v13809_v60  ;;  %12289 = vmatprep.mubr.f32.mxu1 %v13508_v13  ;;  %v19347_v51 = vld [vmem:[#allocation43_spill] sm:$0xff] }
 0x110   : > { %v11947_v25 = vpop.f32.mrf.mxu0  ;;  %12258 = vmatmul.mubr.f32.gmra.mxu0 %v13450_v21  ;;  %v1052_v41 = vpop.f32.mrf.mxu1  ;;  %v19349_v13 = vld [vmem:[#allocation63_spill] sm:$0xff] }
 0x111   : > { %v13894_v16 = vadd.f32 %v1020_v14, %v836_v31  ;;  %v857_v8 = vadd.f32 %v11947_v25, %v13816_v53  ;;  %12260 = vmatprep.mubr.f32.mxu0 %v13453_v22  ;;  %v19348_v31 = vld [vmem:[#allocation48_spill] sm:$0xff] }
 0x112   : > { %v849_v26 = vpop.f32.mrf.mxu0  ;;  %v11979_v63 = vpop.f32.mrf.mxu1  ;;  %12290 = vmatmul.mubr.f32.gmra.mxu1 %v13524_v7  ;;  %v19353_v7 = vld [vmem:[#allocation5_spill] sm:$0xff] }
 0x113   : > { %v13899_v45 = vadd.f32 %v11973_v17, %v857_v8  ;;  %v850_v60 = vadd.f32 %v849_v26, %v13820_v1  ;;  %12292 = vmatprep.mubr.f32.mxu1 %v13535_v57  ;;  %v19350_v8 = vld [vmem:[#allocation4_spill] sm:$0xff] }
 0x114   : > { %v11950_v2 = vpop.f32.mrf.mxu0  ;;  %12261 = vmatmul.mubr.f32.gmra.mxu0 %v19347_v51  ;;  %v1068_v21 = vpop.f32.mrf.mxu1  ;;  %v19351_v57 = vld [vmem:[#allocation52_spill] sm:$0xff] }
 0x115   : > { %v13904_v14 = vadd.f32 %v1036_v52, %v850_v60  ;;  %v871_v53 = vadd.f32 %v11950_v2, %v13826_v23  ;;  %12263 = vmatprep.mubr.f32.mxu0 %v19348_v31  ;;  %v19352_v60 = vld [vmem:[#allocation56_spill] sm:$0xff] }
 0x116   : > { %v863_v25 = vpop.f32.mrf.mxu0  ;;  %v11982_v22 = vpop.f32.mrf.mxu1  ;;  %12293 = vmatmul.mubr.f32.gmra.mxu1 %v19349_v13 }
 0x117   : > { %v13909_v17 = vadd.f32 %v11976_v27, %v871_v53  ;;  %v864_v1 = vadd.f32 %v863_v25, %v13830_v42  ;;  %12323 = vmatprep.mubr.f32.mxu1 %v19350_v8  ;;  %v19354_v53 = vld [vmem:[#allocation6_spill] sm:$0xff] }
 0x118   : > { %v11953_v26 = vpop.f32.mrf.mxu0  ;;  %12264 = vmatmul.mubr.f32.gmra.mxu0 %v19351_v57  ;;  %v1084_v51 = vpop.f32.mrf.mxu1  ;;  %v19355_v57 = vld [vmem:[#allocation59_spill] sm:$0xff] }
 0x119   : > { %v13914_v52 = vadd.f32 %v1052_v41, %v864_v1  ;;  %v885_v23 = vadd.f32 %v11953_v26, %v13836_v56  ;;  %12266 = vmatprep.mubr.f32.mxu0 %v19352_v60 }
 0x11a   : > { %v877_v2 = vpop.f32.mrf.mxu0  ;;  %v12013_v31 = vpop.f32.mrf.mxu1  ;;  %12324 = vmatmul.mubr.f32.vlgmr.msra.gmra.mxu1 %v19353_v7 }
 0x11b   : > { %v13919_v27 = vadd.f32 %v11979_v63, %v885_v23  ;;  %v878_v42 = vadd.f32 %v877_v2, %v13840_v5  ;;  %12374 = vmatpush3.msra.mxu1 %v13834_v61  ;;  %12326 = vmatprep.mubr.f32.mxu1 %v19354_v53  ;;  %v19356_v23 = vld [vmem:[#allocation10_spill] sm:$0xff]  ;;  %v19357_v2 = vld [vmem:[#allocation11_spill] sm:$0xff] }
 0x11c   : > { %v11956_v25 = vpop.f32.mrf.mxu0  ;;  %12267 = vmatmul.mubr.f32.gmra.mxu0 %v19355_v57  ;;  %v1328_v41 = vpop.f32.mrf.mxu1  ;;  %12425 = vmatprep.subr.mxu1 %v13792_v28 }
 0x11d   : > { %v13926_v56 = vadd.f32 %v1068_v21, %v878_v42  ;;  %v899_v1 = vadd.f32 %v11956_v25, %v13846_v12  ;;  %12297 = vmatprep.mubr.f32.mxu0 %v19350_v8 }
 0x11e   : > { %v891_v63 = vpop.f32.mrf.mxu0  ;;  %v12016_v26 = vpop.f32.mrf.mxu1  ;;  %12327 = vmatmul.mubr.f32.gmra.mxu1 %v19356_v23 }
 0x11f   : > { %v13931_v5 = vadd.f32 %v11982_v22, %v899_v1  ;;  %v892_v61 = vadd.f32 %v891_v63, %v13850_v15  ;;  %12329 = vmatprep.mubr.f32.mxu1 %v19357_v2  ;;  %v19358_v22 = vld [vmem:[#allocation12_spill] sm:$0xff]  ;;  %v19360_v63 = vld [vmem:[#allocation13_spill] sm:$0xff] }
 0x120   : > { %v11987_v57 = vpop.f32.mrf.mxu0  ;;  %12298 = vmatmul.mubr.f32.vlgmr.msra.gmra.mxu0 %v19353_v7  ;;  %v1340_v60 = vpop.f32.mrf.mxu1 }
 0x121   : > { %v13936_v21 = vadd.f32 %v1084_v51, %v892_v61  ;;  %v1173_v12 = vadd.f32 %v11987_v57, %v13859_v29  ;;  %12348 = vmatpush3.msra.mxu0 %v13792_v28  ;;  %12300 = vmatprep.mubr.f32.mxu0 %v19354_v53 }
 0x122   : > { %v1166_v42 = vpop.f32.mrf.mxu0  ;;  %v12019_v25 = vpop.f32.mrf.mxu1  ;;  %12330 = vmatmul.mubr.f32.gmra.mxu1 %v19358_v22  ;;  %12399 = vmatprep.subr.mxu0 %v13803_v30 }
 0x123   : > { %v13943_v15 = vadd.f32 %v12013_v31, %v1173_v12  ;;  %v1167_v1 = vadd.f32 %v1166_v42, %v13864_v19  ;;  %12332 = vmatprep.mubr.f32.mxu1 %v19360_v63  ;;  %v19363_v12 = vld [vmem:[#allocation35_spill] sm:$0xff] }
 0x124   : > { %v11990_v51 = vpop.f32.mrf.mxu0  ;;  %12301 = vmatmul.mubr.f32.gmra.mxu0 %v19356_v23  ;;  %v1352_v57 = vpop.f32.mrf.mxu1 }
 0x125   : > { %19359 = vst [vmem:[#allocation68_spill] sm:$0xff] %v13943_v15  ;;  %v13948_v29 = vadd.f32 %v1328_v41, %v1167_v1  ;;  %v1185_v61 = vadd.f32 %v11990_v51, %v13869_v6  ;;  %12303 = vmatprep.mubr.f32.mxu0 %v19357_v2 }
 0x126   : > { %v1178_v13 = vpop.f32.mrf.mxu0  ;;  %v12022_v62 = vpop.f32.mrf.mxu1  ;;  %12333 = vmatmul.mubr.f32.gmra.mxu1 %v13364_v39 }
 0x127   : > { %19361 = vst [vmem:[#allocation69_spill] sm:$0xff] %v13948_v29  ;;  %v13953_v31 = vadd.f32 %v12016_v26, %v1185_v61  ;;  %v1179_v19 = vadd.f32 %v1178_v13, %v13874_v55  ;;  %12335 = vmatprep.mubr.f32.mxu1 %v19363_v12  ;;  %v19366_v55 = vld [vmem:[#allocation37_spill] sm:$0xff]  ;;  %vm9587_vm4 = vcmp.le.f32.partialorder %v13948_v29, 0.0 }
 0x128   : > { %v11993_v42 = vpop.f32.mrf.mxu0  ;;  %12304 = vmatmul.mubr.f32.gmra.mxu0 %v19358_v22  ;;  %v1364_v15 = vpop.f32.mrf.mxu1 }
 0x129   : > { %19362 = vst [vmem:[#allocation70_spill] sm:$0xff] %v13953_v31  ;;  %v13958_v41 = vadd.f32 %v1340_v60, %v1179_v19  ;;  %v1197_v6 = vadd.f32 %v11993_v42, %v13879_v4  ;;  %12306 = vmatprep.mubr.f32.mxu0 %v19360_v63 }
 0x12a   : > { %v1190_v1 = vpop.f32.mrf.mxu0  ;;  %v12025_v51 = vpop.f32.mrf.mxu1  ;;  %12336 = vmatmul.mubr.f32.gmra.mxu1 %v13430_v9 }
 0x12b   : > { %19364 = vst [vmem:[#allocation71_spill] sm:$0xff] %v13958_v41  ;;  %v13963_v26 = vadd.f32 %v12019_v25, %v1197_v6  ;;  %v1191_v13 = vadd.f32 %v1190_v1, %v13884_v11  ;;  %12338 = vmatprep.mubr.f32.mxu1 %v19366_v55  ;;  %v19369_v6 = vld [vmem:[#allocation42_spill] sm:$0xff]  ;;  %vm9589_vm10 = vcmp.le.f32.partialorder %v13958_v41, 0.0 }
 0x12c   : > { %v11996_v61 = vpop.f32.mrf.mxu0  ;;  %12307 = vmatmul.mubr.f32.gmra.mxu0 %v13364_v39  ;;  %v1376_v31 = vpop.f32.mrf.mxu1 }
 0x12d   : > { %19365 = vst [vmem:[#allocation72_spill] sm:$0xff] %v13963_v26  ;;  %v13968_v60 = vadd.f32 %v1352_v57, %v1191_v13  ;;  %v1209_v4 = vadd.f32 %v11996_v61, %v13889_v3  ;;  %12309 = vmatprep.mubr.f32.mxu0 %v19363_v12 }
 0x12e   : > { %v1202_v19 = vpop.f32.mrf.mxu0  ;;  %v12028_v42 = vpop.f32.mrf.mxu1  ;;  %12339 = vmatmul.mubr.f32.gmra.mxu1 %v13440_v18 }
 0x12f   : > { %19367 = vst [vmem:[#allocation73_spill] sm:$0xff] %v13968_v60  ;;  %v13973_v25 = vadd.f32 %v12022_v62, %v1209_v4  ;;  %v1203_v11 = vadd.f32 %v1202_v19, %v13894_v16  ;;  %12341 = vmatprep.mubr.f32.mxu1 %v19369_v6  ;;  %v19372_v4 = vld [vmem:[#allocation49_spill] sm:$0xff] }
 0x130   : > { %v11999_v1 = vpop.f32.mrf.mxu0  ;;  %12310 = vmatmul.mubr.f32.gmra.mxu0 %v13430_v9  ;;  %v1388_v26 = vpop.f32.mrf.mxu1 }
 0x131   : > { %19368 = vst [vmem:[#allocation74_spill] sm:$0xff] %v13973_v25  ;;  %v13978_v57 = vadd.f32 %v1364_v15, %v1203_v11  ;;  %v1221_v3 = vadd.f32 %v11999_v1, %v13899_v45  ;;  %12312 = vmatprep.mubr.f32.mxu0 %v19366_v55 }
 0x132   : > { %v1214_v13 = vpop.f32.mrf.mxu0  ;;  %v12031_v61 = vpop.f32.mrf.mxu1  ;;  %12342 = vmatmul.mubr.f32.gmra.mxu1 %v13461_v40 }
 0x133   : > { %19370 = vst [vmem:[#allocation75_spill] sm:$0xff] %v13978_v57  ;;  %v13983_v62 = vadd.f32 %v12025_v51, %v1221_v3  ;;  %v1215_v16 = vadd.f32 %v1214_v13, %v13904_v14  ;;  %12344 = vmatprep.mubr.f32.mxu1 %v19372_v4 }
 0x134   : > { %v12002_v19 = vpop.f32.mrf.mxu0  ;;  %12313 = vmatmul.mubr.f32.gmra.mxu0 %v13440_v18  ;;  %v1400_v25 = vpop.f32.mrf.mxu1 }
 0x135   : > { %19371 = vst [vmem:[#allocation76_spill] sm:$0xff] %v13983_v62  ;;  %v13988_v15 = vadd.f32 %v1376_v31, %v1215_v16  ;;  %v1233_v45 = vadd.f32 %v12002_v19, %v13909_v17  ;;  %12315 = vmatprep.mubr.f32.mxu0 %v19369_v6 }
 0x136   : > { %v1226_v11 = vpop.f32.mrf.mxu0  ;;  %v12034_v1 = vpop.f32.mrf.mxu1  ;;  %12345 = vmatmul.mubr.f32.gmra.mxu1 %v13500_v0 }
 0x137   : > { %19373 = vst [vmem:[#allocation77_spill] sm:$0xff] %v13988_v15  ;;  %v13993_v51 = vadd.f32 %v12028_v42, %v1233_v45  ;;  %v1227_v14 = vadd.f32 %v1226_v11, %v13914_v52  ;;  %12375 = vmatprep.mubr.f32.mxu1 %v19350_v8 }
 0x138   : > { %v12005_v3 = vpop.f32.mrf.mxu0  ;;  %12316 = vmatmul.mubr.f32.gmra.mxu0 %v13461_v40  ;;  %v1412_v13 = vpop.f32.mrf.mxu1 }
 0x139   : > { %19374 = vst [vmem:[#allocation78_spill] sm:$0xff] %v13993_v51  ;;  %v13998_v31 = vadd.f32 %v1388_v26, %v1227_v14  ;;  %v1245_v17 = vadd.f32 %v12005_v3, %v13919_v27  ;;  %12318 = vmatprep.mubr.f32.mxu0 %v19372_v4  ;;  %v19378_v14 = vld [vmem:[#allocation27_spill] sm:$0xff] }
 0x13a   : > { %v1238_v16 = vpop.f32.mrf.mxu0  ;;  %v12065_v19 = vpop.f32.mrf.mxu1  ;;  %12376 = vmatmul.mubr.f32.vlgmr.msra.gmra.mxu1 %v19353_v7 }
 0x13b   : > { %19375 = vst [vmem:[#allocation79_spill] sm:$0xff] %v13998_v31  ;;  %v14003_v42 = vadd.f32 %v12031_v61, %v1245_v17  ;;  %v1239_v52 = vadd.f32 %v1238_v16, %v13926_v56  ;;  %12426 = vmatpush3.msra.mxu1 %v13792_v28  ;;  %12378 = vmatprep.mubr.f32.mxu1 %v19354_v53 }
 0x13c   : > { %v12008_v45 = vpop.f32.mrf.mxu0  ;;  %12319 = vmatmul.mubr.f32.gmra.mxu0 %v13500_v0  ;;  %v1720_v26 = vpop.f32.mrf.mxu1  ;;  %12477 = vmatprep.subr.mxu1 %v13792_v28 }
 0x13d   : > { %19376 = vst [vmem:[#allocation80_spill] sm:$0xff] %v14003_v42  ;;  %v14010_v27 = vadd.f32 %v1400_v25, %v1239_v52  ;;  %v1257_v11 = vadd.f32 %v12008_v45, %v13931_v5  ;;  %12349 = vmatprep.mubr.f32.mxu0 %v19378_v14  ;;  %v19380_v42 = vld [vmem:[#allocation28_spill] sm:$0xff]  ;;  %v19382_v5 = vld [vmem:[#allocation29_spill] sm:$0xff] }
 0x13e   : > { %v1250_v61 = vpop.f32.mrf.mxu0  ;;  %v12068_v3 = vpop.f32.mrf.mxu1  ;;  %12379 = vmatmul.mubr.f32.gmra.mxu1 %v19356_v23 }
 0x13f   : > { %19377 = vst [vmem:[#allocation81_spill] sm:$0xff] %v14010_v27  ;;  %v14015_v56 = vadd.f32 %v12034_v1, %v1257_v11  ;;  %v1251_v17 = vadd.f32 %v1250_v61, %v13936_v21  ;;  %12381 = vmatprep.mubr.f32.mxu1 %v19357_v2  ;;  %v19383_v11 = vld [vmem:[#allocation31_spill] sm:$0xff]  ;;  %v19384_v61 = vld [vmem:[#allocation32_spill] sm:$0xff] }
 0x140   : > { %v12039_v16 = vpop.f32.mrf.mxu0  ;;  %12350 = vmatmul.mubr.f32.vlgmr.msra.gmra.mxu0 %v19380_v42  ;;  %v1732_v31 = vpop.f32.mrf.mxu1 }
 0x141   : > { %19379 = vst [vmem:[#allocation82_spill] sm:$0xff] %v14015_v56  ;;  %v14020_v25 = vadd.f32 %v1412_v13, %v1251_v17  ;;  %v14022_v52 = vadd.f32 %v12065_v19, %v12039_v16  ;;  %12400 = vmatpush3.msra.mxu0 %v13803_v30  ;;  %12352 = vmatprep.mubr.f32.mxu0 %v19382_v5  ;;  %v276_v30 = vld [vmem:[%s18728_s1 + $0x20] sm:$0xff] }
 0x142   : > { %v1494_v45 = vpop.f32.mrf.mxu0  ;;  %v12071_v27 = vpop.f32.mrf.mxu1  ;;  %12382 = vmatmul.mubr.f32.gmra.mxu1 %v19358_v22  ;;  %12451 = vmatprep.subr.mxu0 %v13814_v10 }
 0x143   : > { %19381 = vst [vmem:[#allocation83_spill] sm:$0xff] %v14020_v25  ;;  %v14028_v21 = vadd.f32 %v1720_v26, %v1494_v45  ;;  %12384 = vmatprep.mubr.f32.mxu1 %v19360_v63  ;;  %v19385_v25 = vld [vmem:[#allocation33_spill] sm:$0xff] }
 0x144   : > { %v12042_v1 = vpop.f32.mrf.mxu0  ;;  %12353 = vmatmul.mubr.f32.gmra.mxu0 %v19383_v11  ;;  %v1744_v13 = vpop.f32.mrf.mxu1 }
 0x145   : > { %v14032_v19 = vadd.f32 %v12068_v3, %v12042_v1  ;;  %12355 = vmatprep.mubr.f32.mxu0 %v19384_v61  ;;  %v14043_v3 = vand.u32 4294901760, %v276_v30  ;;  %v19386_v61 = vld [vmem:[#allocation34_spill] sm:$0xff] }
 0x146   : > { %v1514_v17 = vpop.f32.mrf.mxu0  ;;  %v12074_v16 = vpop.f32.mrf.mxu1  ;;  %12385 = vmatmul.mubr.f32.gmra.mxu1 %v13364_v39 }
 0x147   : > { %v14039_v26 = vadd.f32 %v1732_v31, %v1514_v17  ;;  %12387 = vmatprep.mubr.f32.mxu1 %v19363_v12  ;;  %v19387_v17 = vld [vmem:[#allocation50_spill] sm:$0xff] }
 0x148   : > { %v12045_v45 = vpop.f32.mrf.mxu0  ;;  %12356 = vmatmul.mubr.f32.gmra.mxu0 %v19385_v25  ;;  %v1756_v11 = vpop.f32.mrf.mxu1  ;;  %v14054_v25 = vsub.f32 %v276_v30, %v14043_v3 }
 0x149   : > { %v14045_v1 = vadd.f32 %v12071_v27, %v12045_v45  ;;  %12358 = vmatprep.mubr.f32.mxu0 %v19386_v61  ;;  %v19388_v27 = vld [vmem:[#allocation54_spill] sm:$0xff] }
 0x14a   : > { %v1534_v56 = vpop.f32.mrf.mxu0  ;;  %v12077_v5 = vpop.f32.mrf.mxu1  ;;  %12388 = vmatmul.mubr.f32.gmra.mxu1 %v13430_v9  ;;  %v14065_v62 = vand.u32 4294901760, %v14054_v25 }
 0x14b   : > { %v14049_v42 = vadd.f32 %v1744_v13, %v1534_v56  ;;  %12390 = vmatprep.mubr.f32.mxu1 %v19366_v55  ;;  %v19389_v13 = vld [vmem:[#allocation57_spill] sm:$0xff] }
 0x14c   : > { %v12048_v31 = vpop.f32.mrf.mxu0  ;;  %12359 = vmatmul.mubr.f32.gmra.mxu0 %v19387_v17  ;;  %v1768_v14 = vpop.f32.mrf.mxu1  ;;  %v4955_v60 = vsub.f32 %v14054_v25, %v14065_v62 }
 0x14d   : > { %v14056_v51 = vadd.f32 %v12074_v16, %v12048_v31  ;;  %12361 = vmatprep.mubr.f32.mxu0 %v19388_v27  ;;  %v19390_v16 = vld [vmem:[#allocation60_spill] sm:$0xff] }
 0x14e   : > { %v1554_v45 = vpop.f32.mrf.mxu0  ;;  %v12080_v61 = vpop.f32.mrf.mxu1  ;;  %12391 = vmatmul.mubr.f32.gmra.mxu1 %v13440_v18 }
 0x14f   : > { %v14060_v15 = vadd.f32 %v1756_v11, %v1554_v45  ;;  %12393 = vmatprep.mubr.f32.mxu1 %v19369_v6  ;;  %v19391_v45 = vld [vmem:[#allocation62_spill] sm:$0xff] }
 0x150   : > { %v12051_v56 = vpop.f32.mrf.mxu0  ;;  %12362 = vmatmul.mubr.f32.gmra.mxu0 %v19389_v13  ;;  %v1780_v17 = vpop.f32.mrf.mxu1 }
 0x151   : > { %v14067_v30 = vadd.f32 %v12077_v5, %v12051_v56  ;;  %12364 = vmatprep.mubr.f32.mxu0 %v19390_v16  ;;  %v19392_v5 = vld [vmem:[#allocation64_spill] sm:$0xff] }
 0x152   : > { %v1574_v31 = vpop.f32.mrf.mxu0  ;;  %v12083_v27 = vpop.f32.mrf.mxu1  ;;  %12394 = vmatmul.mubr.f32.gmra.mxu1 %v13461_v40 }
 0x153   : > { %v14071_v57 = vadd.f32 %v1768_v14, %v1574_v31  ;;  %12396 = vmatprep.mubr.f32.mxu1 %v19372_v4 }
 0x154   : > { %v12054_v11 = vpop.f32.mrf.mxu0  ;;  %12365 = vmatmul.mubr.f32.gmra.mxu0 %v19391_v45  ;;  %v1792_v13 = vpop.f32.mrf.mxu1  ;;  %v14085_v45 = vand.u32 4294901760, %v4955_v60 }
 0x155   : > { %v14077_v6 = vadd.f32 %v12080_v61, %v12054_v11  ;;  %12367 = vmatprep.mubr.f32.mxu0 %v19392_v5 }
 0x156   : > { %v1594_v56 = vpop.f32.mrf.mxu0  ;;  %v12086_v16 = vpop.f32.mrf.mxu1  ;;  %12397 = vmatmul.mubr.f32.gmra.mxu1 %v13500_v0 }
 0x157   : > { %v14081_v40 = vadd.f32 %v1780_v17, %v1594_v56  ;;  %12427 = vmatprep.mubr.f32.mxu1 %v13340_v32  ;;  %v19393_v56 = vld [vmem:[#allocation67_spill] sm:$0xff] }
 0x158   : > { %v12057_v14 = vpop.f32.mrf.mxu0  ;;  %12368 = vmatmul.mubr.f32.gmra.mxu0 %v13558_v59  ;;  %v1804_v31 = vpop.f32.mrf.mxu1 }
 0x159   : > { %v14087_v4 = vadd.f32 %v12083_v27, %v12057_v14  ;;  %12370 = vmatprep.mubr.f32.mxu0 %v13565_v48 }
 0x15a   : > { %v1614_v61 = vpop.f32.mrf.mxu0  ;;  %v12117_v11 = vpop.f32.mrf.mxu1  ;;  %12428 = vmatmul.mubr.f32.vlgmr.msra.gmra.mxu1 %v13343_v33  ;;  %v19396_v33 = vld [vmem:[#allocation24_spill] sm:$0xff] }
 0x15b   : > { %v14091_v5 = vadd.f32 %v1792_v13, %v1614_v61  ;;  %12478 = vmatpush3.msra.mxu1 %v13792_v28  ;;  %12430 = vmatprep.mubr.f32.mxu1 %v13348_v34  ;;  %v19394_v61 = vld [vmem:[#allocation8_spill] sm:$0xff] }
 0x15c   : > { %v12060_v17 = vpop.f32.mrf.mxu0  ;;  %12371 = vmatmul.mubr.f32.gmra.mxu0 %v19393_v56  ;;  %v2063_v59 = vpop.f32.mrf.mxu1  ;;  %12529 = vmatprep.subr.mxu1 %v14085_v45 }
 0x15d   : > { %v14097_v60 = vadd.f32 %v12086_v16, %v12060_v17  ;;  %12401 = vmatprep.mubr.f32.mxu0 %v13321_v24  ;;  %v19395_v16 = vld [vmem:[#allocation9_spill] sm:$0xff] }
 0x15e   : > { %v1634_v27 = vpop.f32.mrf.mxu0  ;;  %v12120_v14 = vpop.f32.mrf.mxu1  ;;  %12431 = vmatmul.mubr.f32.gmra.mxu1 %v13373_v43 }
 0x15f   : > { %v14101_v13 = vadd.f32 %v1804_v31, %v1634_v27  ;;  %12433 = vmatprep.mubr.f32.mxu1 %v13377_v44 }
 0x160   : > { %v12091_v28 = vpop.f32.mrf.mxu0  ;;  %12402 = vmatmul.mubr.f32.vlgmr.msra.gmra.mxu0 %v19394_v61  ;;  %v2079_v34 = vpop.f32.mrf.mxu1 }
 0x161   : > { %v1892_v56 = vadd.f32 %v12091_v28, %v14022_v52  ;;  %12452 = vmatpush3.msra.mxu0 %v13814_v10  ;;  %12404 = vmatprep.mubr.f32.mxu0 %v19395_v16 }
 0x162   : > { %v1884_v17 = vpop.f32.mrf.mxu0  ;;  %v12123_v24 = vpop.f32.mrf.mxu1  ;;  %12434 = vmatmul.mubr.f32.gmra.mxu1 %v19396_v33  ;;  %12503 = vmatprep.subr.mxu0 %v14043_v3 }
 0x163   : > { %v14110_v31 = vadd.f32 %v12117_v11, %v1892_v56  ;;  %v1885_v27 = vadd.f32 %v1884_v17, %v14028_v21  ;;  %12436 = vmatprep.mubr.f32.mxu1 %v13383_v46 }
 0x164   : > { %v12094_v61 = vpop.f32.mrf.mxu0  ;;  %12405 = vmatmul.mubr.f32.gmra.mxu0 %v13351_v35  ;;  %v2095_v52 = vpop.f32.mrf.mxu1 }
 0x165   : > { %v14115_v28 = vadd.f32 %v2063_v59, %v1885_v27  ;;  %v1906_v10 = vadd.f32 %v12094_v61, %v14032_v19  ;;  %12407 = vmatprep.mubr.f32.mxu0 %v13356_v36 }
 0x166   : > { %v1898_v16 = vpop.f32.mrf.mxu0  ;;  %v12126_v33 = vpop.f32.mrf.mxu1  ;;  %12437 = vmatmul.mubr.f32.gmra.mxu1 %v13408_v58  ;;  %v19452_v58 = vld [vmem:[#allocation76_spill] sm:$0xff] }
 0x167   : > { %v14120_v11 = vadd.f32 %v12120_v14, %v1906_v10  ;;  %v1899_v21 = vadd.f32 %v1898_v16, %v14039_v26  ;;  %12439 = vmatprep.mubr.f32.mxu1 %v13470_v49  ;;  %v19441_v49 = vld [vmem:[#allocation74_spill] sm:$0xff] }
 0x168   : > { %v12097_v56 = vpop.f32.mrf.mxu0  ;;  %12408 = vmatmul.mubr.f32.gmra.mxu0 %v13359_v37  ;;  %v2111_v17 = vpop.f32.mrf.mxu1 }
 0x169   : > { %v14125_v59 = vadd.f32 %v2079_v34, %v1899_v21  ;;  %v1920_v19 = vadd.f32 %v12097_v56, %v14045_v1  ;;  %12410 = vmatprep.mubr.f32.mxu0 %v13362_v38  ;;  %v19397_v38 = vld [vmem:[#allocation51_spill] sm:$0xff] }
 0x16a   : > { %v1912_v61 = vpop.f32.mrf.mxu0  ;;  %v12129_v27 = vpop.f32.mrf.mxu1  ;;  %12440 = vmatmul.mubr.f32.gmra.mxu1 %v13473_v50 }
 0x16b   : > { %v14130_v14 = vadd.f32 %v12123_v24, %v1920_v19  ;;  %v1913_v26 = vadd.f32 %v1912_v61, %v14049_v42  ;;  %12442 = vmatprep.mubr.f32.mxu1 %v13476_v54  ;;  %v19398_v19 = vld [vmem:[#allocation55_spill] sm:$0xff]  ;;  %v19399_v54 = vld [vmem:[#allocation40_spill] sm:$0xff] }
 0x16c   : > { %v12100_v16 = vpop.f32.mrf.mxu0  ;;  %12411 = vmatmul.mubr.f32.gmra.mxu0 %v13386_v47  ;;  %v2127_v10 = vpop.f32.mrf.mxu1 }
 0x16d   : > { %v14135_v34 = vadd.f32 %v2095_v52, %v1913_v26  ;;  %v1934_v1 = vadd.f32 %v12100_v16, %v14056_v51  ;;  %12413 = vmatprep.mubr.f32.mxu0 %v13447_v20  ;;  %v19400_v16 = vld [vmem:[#allocation41_spill] sm:$0xff] }
 0x16e   : > { %v1926_v21 = vpop.f32.mrf.mxu0  ;;  %v12132_v56 = vpop.f32.mrf.mxu1  ;;  %12443 = vmatmul.mubr.f32.gmra.mxu1 %v19397_v38  ;;  %v19401_v38 = vld [vmem:[#allocation58_spill] sm:$0xff] }
 0x16f   : > { %v14140_v24 = vadd.f32 %v12126_v33, %v1934_v1  ;;  %v1927_v42 = vadd.f32 %v1926_v21, %v14060_v15  ;;  %12445 = vmatprep.mubr.f32.mxu1 %v19398_v19  ;;  %v19402_v1 = vld [vmem:[#allocation61_spill] sm:$0xff]  ;;  %v18848_v21 = vmov 0  }
 0x170   : > { %v12103_v61 = vpop.f32.mrf.mxu0  ;;  %12414 = vmatmul.mubr.f32.gmra.mxu0 %v19399_v54  ;;  %v2143_v52 = vpop.f32.mrf.mxu1  ;;  %13155 = vset.pattern.permute.xlu1 %v18848_v21  ;;  %v19407_v54 = vld [vmem:[#allocation56_spill] sm:$0xff] }
 0x171   : > { %v14145_v26 = vadd.f32 %v2111_v17, %v1927_v42  ;;  %v1948_v51 = vadd.f32 %v12103_v61, %v14067_v30  ;;  %12416 = vmatprep.mubr.f32.mxu0 %v19400_v16  ;;  %v19403_v42 = vld [vmem:[#allocation43_spill] sm:$0xff]  ;;  %v14157_v61 = vld [vmem:[%s13295_s22 + $0x10] sm:$0xff]  ;;  %13154 = vset.pattern.permute.xlu0 %v18848_v21  ;;  %v14167_v16 = vld [vmem:[%s13295_s22] sm:$0xff] }
 0x172   : > { %v1940_v20 = vpop.f32.mrf.mxu0  ;;  %v12135_v47 = vpop.f32.mrf.mxu1  ;;  %12446 = vmatmul.mubr.f32.gmra.mxu1 %v19401_v38  ;;  %9752 = vperm.xlu1 %13155, %v14157_v61   ;;  %v14176_v21 = vld [vmem:[%s13295_s22 + $0x18] sm:$0xff] }
 0x173   : > { %v14150_v33 = vadd.f32 %v12129_v27, %v1948_v51  ;;  %v1941_v15 = vadd.f32 %v1940_v20, %v14071_v57  ;;  %12448 = vmatprep.mubr.f32.mxu1 %v19402_v1  ;;  %v19404_v20 = vld [vmem:[#allocation48_spill] sm:$0xff]  ;;  %v19405_v1 = vld [vmem:[#allocation63_spill] sm:$0xff]  ;;  %9744 = vperm.xlu0 %13154, %v14167_v16  }
 0x174   : > { %v12106_v17 = vpop.f32.mrf.mxu0  ;;  %12417 = vmatmul.mubr.f32.gmra.mxu0 %v19403_v42  ;;  %v2159_v30 = vpop.f32.mrf.mxu1 }
 0x175   : > { %v14160_v38 = vadd.f32 %v2127_v10, %v1941_v15  ;;  %v1962_v27 = vadd.f32 %v12106_v17, %v14077_v6  ;;  %12419 = vmatprep.mubr.f32.mxu0 %v19404_v20  ;;  %v19406_v15 = vld [vmem:[#allocation52_spill] sm:$0xff] }
 0x176   : > { %v1954_v57 = vpop.f32.mrf.mxu0  ;;  %v12138_v51 = vpop.f32.mrf.mxu1  ;;  %12449 = vmatmul.mubr.f32.gmra.mxu1 %v19405_v1  ;;  %9756 = vperm.xlu1 %13155, %v14176_v21  }
 0x177   : > { %v14170_v42 = vadd.f32 %v12132_v56, %v1962_v27  ;;  %v1955_v10 = vadd.f32 %v1954_v57, %v14081_v40  ;;  %12479 = vmatprep.mubr.f32.mxu1 %v19350_v8  ;;  %v14185_v40 = vld [vmem:[%s13295_s22 + $0x8] sm:$0xff] }
 0x178   : > { %v12109_v6 = vpop.f32.mrf.mxu0  ;;  %12420 = vmatmul.mubr.f32.gmra.mxu0 %v19406_v15  ;;  %v2175_v17 = vpop.f32.mrf.mxu1  ;;  %9748 = vperm.xlu0 %13154, %v14185_v40  }
 0x179   : > { %v14179_v1 = vadd.f32 %v2143_v52, %v1955_v10  ;;  %v1976_v20 = vadd.f32 %v12109_v6, %v14087_v4  ;;  %12422 = vmatprep.mubr.f32.mxu0 %v19407_v54  ;;  %v19408_v52 = vld [vmem:[#allocation59_spill] sm:$0xff] }
 0x17a   : > { %v1968_v56 = vpop.f32.mrf.mxu0  ;;  %v12169_v27 = vpop.f32.mrf.mxu1  ;;  %12480 = vmatmul.mubr.f32.vlgmr.msra.gmra.mxu1 %v19353_v7 }
 0x17b   : > { %v14188_v57 = vadd.f32 %v12135_v47, %v1976_v20  ;;  %v1969_v15 = vadd.f32 %v1968_v56, %v14091_v5  ;;  %12530 = vmatpush3.msra.mxu1 %v14085_v45  ;;  %12482 = vmatprep.mubr.f32.mxu1 %v19354_v53  ;;  %v14200_v47 = vld [vmem:[%s13295_s22 + $0x28] sm:$0xff]  ;;  %v14205_v20 = vld [vmem:[%s13295_s22 + $0x20] sm:$0xff] }
 0x17c   : > { %v12112_v4 = vpop.f32.mrf.mxu0  ;;  %12423 = vmatmul.mubr.f32.gmra.mxu0 %v19408_v52  ;;  %v2419_v10 = vpop.f32.mrf.mxu1  ;;  %12581 = vmatprep.subr.mxu1 %v14043_v3 }
 0x17d   : > { %v14195_v6 = vadd.f32 %v2159_v30, %v1969_v15  ;;  %v1990_v54 = vadd.f32 %v12112_v4, %v14097_v60  ;;  %12453 = vmatprep.mubr.f32.mxu0 %v19350_v8  ;;  %9764 = vperm.xlu1 %13155, %v14200_v47  }
 0x17e   : > { %v1982_v5 = vpop.f32.mrf.mxu0  ;;  %v12172_v45 = vpop.f32.mrf.mxu1  ;;  %12483 = vmatmul.mubr.f32.gmra.mxu1 %v19356_v23  ;;  %9760 = vperm.xlu0 %13154, %v14205_v20  }
 0x17f   : > { %v14208_v56 = vadd.f32 %v12138_v51, %v1990_v54  ;;  %v1983_v30 = vadd.f32 %v1982_v5, %v14101_v13  ;;  %12485 = vmatprep.mubr.f32.mxu1 %v19357_v2 }
 0x180   : > { %v12143_v60 = vpop.f32.mrf.mxu0  ;;  %12454 = vmatmul.mubr.f32.vlgmr.msra.gmra.mxu0 %v19353_v7  ;;  %v2431_v15 = vpop.f32.mrf.mxu1 }
 0x181   : > { %v14213_v4 = vadd.f32 %v2175_v17, %v1983_v30  ;;  %v2264_v52 = vadd.f32 %v12143_v60, %v14110_v31  ;;  %12504 = vmatpush3.msra.mxu0 %v14043_v3  ;;  %12456 = vmatprep.mubr.f32.mxu0 %v19354_v53  ;;  %v14225_v17 = vld [vmem:[%s13295_s22 + $0x38] sm:$0xff]  ;;  %v14230_v60 = vld [vmem:[%s13295_s22 + $0x30] sm:$0xff] }
 0x182   : > { %v2257_v54 = vpop.f32.mrf.mxu0  ;;  %v12175_v51 = vpop.f32.mrf.mxu1  ;;  %12486 = vmatmul.mubr.f32.gmra.mxu1 %v19358_v22  ;;  %12555 = vmatprep.subr.mxu0 %v14054_v25 }
 0x183   : > { %v14220_v13 = vadd.f32 %v12169_v27, %v2264_v52  ;;  %v2258_v5 = vadd.f32 %v2257_v54, %v14115_v28  ;;  %12488 = vmatprep.mubr.f32.mxu1 %v19360_v63  ;;  %9772 = vperm.xlu1 %13155, %v14225_v17   ;;  %v19411_v54 = vld [vmem:[#allocation68_spill] sm:$0xff] }
 0x184   : > { %v12146_v31 = vpop.f32.mrf.mxu0  ;;  %12457 = vmatmul.mubr.f32.gmra.mxu0 %v19356_v23  ;;  %v2443_v30 = vpop.f32.mrf.mxu1  ;;  %9768 = vperm.xlu0 %13154, %v14230_v60   ;;  %vm9588_vm1 = vcmp.le.f32.partialorder %v19411_v54, 0.0  ;;  %v14254_v54 = vld [vmem:[%s13295_s22 + $0x40] sm:$0xff] }
 0x185   : > { %19409 = vst [vmem:[#allocation84_spill] sm:$0xff] %v14220_v13  ;;  %v14233_v19 = vadd.f32 %v2419_v10, %v2258_v5  ;;  %v2276_v27 = vadd.f32 %v12146_v31, %v14120_v11  ;;  %12459 = vmatprep.mubr.f32.mxu0 %v19357_v2  ;;  %vm9604_vm2 = vcmp.le.f32.partialorder %v14220_v13, 0.0  ;;  %v14245_v10 = vld [vmem:[%s13295_s22 + $0x48] sm:$0xff]  ;;  %v19413_v11 = vmov 0  ;;  %v19420_v13 = vld [vmem:[#allocation70_spill] sm:$0xff] }
 0x186   : > { %v2269_v28 = vpop.f32.mrf.mxu0  ;;  %v12178_v52 = vpop.f32.mrf.mxu1  ;;  %12489 = vmatmul.mubr.f32.gmra.mxu1 %v13364_v39  ;;  %vm14248_vm3 = vmand %vm9588_vm1, %vm9604_vm2  ;;  %vm9590_vm7 = vcmp.le.f32.partialorder %v19420_v13, 0.0  ;;  %v14284_v13 = vld [vmem:[%s13295_s22 + $0x50] sm:$0xff] }
 0x187   : > { %19410 = vst [vmem:[#allocation85_spill] sm:$0xff] %v14233_v19  ;;  %v14240_v50 = vadd.f32 %v12172_v45, %v2276_v27  ;;  %v2270_v37 = vadd.f32 %v2269_v28, %v14125_v59  ;;  %12491 = vmatprep.mubr.f32.mxu1 %v19363_v12  ;;  %9780 = vperm.xlu1 %13155, %v14245_v10   ;;  %v19414_v11 = vsel %vm14248_vm3, 4294967295, %v19413_v11  ;;  %vm9603_vm5 = vcmp.le.f32.partialorder %v14233_v19, 0.0  ;;  %v19440_v19 = vld [vmem:[#allocation44_spill] sm:$0xff] }
 0x188   : > { %19415 = vst [vmem:[#allocation87_spill] sm:$0xff] %v19414_v11  ;;  %v12149_v5 = vpop.f32.mrf.mxu0  ;;  %12460 = vmatmul.mubr.f32.gmra.mxu0 %v19358_v22  ;;  %v2455_v31 = vpop.f32.mrf.mxu1  ;;  %9776 = vperm.xlu0 %13154, %v14254_v54   ;;  %vm14263_vm6 = vmand %vm9587_vm4, %vm9603_vm5  ;;  %v19417_v27 = vmov 0  ;;  %vm9594_vm4 = vcmp.le.f32.partialorder %v19441_v49, 0.0 }
 0x189   : > { %19412 = vst [vmem:[#allocation86_spill] sm:$0xff] %v14240_v50  ;;  %v14259_v59 = vadd.f32 %v2431_v15, %v2270_v37  ;;  %v2288_v45 = vadd.f32 %v12149_v5, %v14130_v14  ;;  %12462 = vmatprep.mubr.f32.mxu0 %v19360_v63  ;;  %v19418_v27 = vsel %vm14263_vm6, 4294967295, %v19417_v27  ;;  %vm9606_vm8 = vcmp.le.f32.partialorder %v14240_v50, 0.0  ;;  %v14275_v14 = vld [vmem:[%s13295_s22 + $0x58] sm:$0xff]  ;;  %v19429_v50 = vld [vmem:[#allocation72_spill] sm:$0xff] }
 0x18a   : > { %19419 = vst [vmem:[#allocation89_spill] sm:$0xff] %v19418_v27  ;;  %v2281_v28 = vpop.f32.mrf.mxu0  ;;  %v12181_v11 = vpop.f32.mrf.mxu1  ;;  %12492 = vmatmul.mubr.f32.gmra.mxu1 %v13430_v9  ;;  %vm14278_vm9 = vmand %vm9590_vm7, %vm9606_vm8  ;;  %v19422_v15 = vmov 0  ;;  %vm9592_vm13 = vcmp.le.f32.partialorder %v19429_v50, 0.0 }
 0x18b   : > { %19416 = vst [vmem:[#allocation88_spill] sm:$0xff] %v14259_v59  ;;  %v14270_v29 = vadd.f32 %v12175_v51, %v2288_v45  ;;  %v2282_v37 = vadd.f32 %v2281_v28, %v14135_v34  ;;  %12494 = vmatprep.mubr.f32.mxu1 %v19366_v55  ;;  %9788 = vperm.xlu1 %13155, %v14275_v14   ;;  %v19423_v15 = vsel %vm14278_vm9, 4294967295, %v19422_v15  ;;  %vm9605_vm11 = vcmp.le.f32.partialorder %v14259_v59, 0.0  ;;  %v14314_v59 = vld [vmem:[%s13295_s22 + $0x60] sm:$0xff] }
 0x18c   : > { %19424 = vst [vmem:[#allocation91_spill] sm:$0xff] %v19423_v15  ;;  %v12152_v5 = vpop.f32.mrf.mxu0  ;;  %12463 = vmatmul.mubr.f32.gmra.mxu0 %v13364_v39  ;;  %v2467_v27 = vpop.f32.mrf.mxu1  ;;  %9784 = vperm.xlu0 %13154, %v14284_v13   ;;  %vm14293_vm12 = vmand %vm9589_vm10, %vm9605_vm11  ;;  %v19426_v45 = vmov 0 }
 0x18d   : > { %19421 = vst [vmem:[#allocation90_spill] sm:$0xff] %v14270_v29  ;;  %v14289_v34 = vadd.f32 %v2443_v30, %v2282_v37  ;;  %v2300_v51 = vadd.f32 %v12152_v5, %v14140_v24  ;;  %12465 = vmatprep.mubr.f32.mxu0 %v19363_v12  ;;  %v19427_v45 = vsel %vm14293_vm12, 4294967295, %v19426_v45  ;;  %vm9608_vm14 = vcmp.le.f32.partialorder %v14270_v29, 0.0  ;;  %v19431_v24 = vld [vmem:[#allocation42_spill] sm:$0xff]  ;;  %v14305_v37 = vld [vmem:[%s13295_s22 + $0x68] sm:$0xff] }
 0x18e   : > { %19428 = vst [vmem:[#allocation93_spill] sm:$0xff] %v19427_v45  ;;  %v2293_v28 = vpop.f32.mrf.mxu0  ;;  %v12184_v15 = vpop.f32.mrf.mxu1  ;;  %12495 = vmatmul.mubr.f32.gmra.mxu1 %v13440_v18  ;;  %vm14308_vm15 = vmand %vm9592_vm13, %vm9608_vm14  ;;  %v19432_v5 = vmov 0  ;;  %vm9596_vm13 = vcmp.le.f32.partialorder %v19452_v58, 0.0  ;;  %v19457_v58 = vld [vmem:[#allocation77_spill] sm:$0xff] }
 0x18f   : > { %19425 = vst [vmem:[#allocation92_spill] sm:$0xff] %v14289_v34  ;;  %v14300_v41 = vadd.f32 %v12178_v52, %v2300_v51  ;;  %v2294_v30 = vadd.f32 %v2293_v28, %v14145_v26  ;;  %12497 = vmatprep.mubr.f32.mxu1 %v19431_v24  ;;  %9796 = vperm.xlu1 %13155, %v14305_v37   ;;  %v19433_v5 = vsel %vm14308_vm15, 4294967295, %v19432_v5  ;;  %v19435_v26 = vld [vmem:[#allocation73_spill] sm:$0xff]  ;;  %vm9607_vm1 = vcmp.le.f32.partialorder %v14289_v34, 0.0  ;;  %v14344_v34 = vld [vmem:[%s13295_s22 + $0x70] sm:$0xff] }
 0x190   : > { %19434 = vst [vmem:[#allocation95_spill] sm:$0xff] %v19433_v5  ;;  %v12155_v45 = vpop.f32.mrf.mxu0  ;;  %12466 = vmatmul.mubr.f32.gmra.mxu0 %v13430_v9  ;;  %v2479_v50 = vpop.f32.mrf.mxu1  ;;  %9792 = vperm.xlu0 %13154, %v14314_v59   ;;  %vm9591_vm0 = vcmp.le.f32.partialorder %v19435_v26, 0.0  ;;  %v19437_v28 = vmov 0 }
 0x191   : > { %19430 = vst [vmem:[#allocation94_spill] sm:$0xff] %v14300_v41  ;;  %v14319_v52 = vadd.f32 %v2455_v31, %v2294_v30  ;;  %v2312_v51 = vadd.f32 %v12155_v45, %v14150_v33  ;;  %12468 = vmatprep.mubr.f32.mxu0 %v19366_v55  ;;  %vm14323_vm2 = vmand %vm9591_vm0, %vm9607_vm1  ;;  %vm9610_vm5 = vcmp.le.f32.partialorder %v14300_v41, 0.0  ;;  %v19443_v33 = vld [vmem:[#allocation49_spill] sm:$0xff]  ;;  %v14335_v45 = vld [vmem:[%s13295_s22 + $0x78] sm:$0xff]  ;;  %v19444_v30 = vmov 0 }
 0x192   : > { %v19438_v28 = vsel %vm14323_vm2, 4294967295, %v19437_v28  ;;  %v2305_v5 = vpop.f32.mrf.mxu0  ;;  %v12187_v29 = vpop.f32.mrf.mxu1  ;;  %12498 = vmatmul.mubr.f32.gmra.mxu1 %v19440_v19  ;;  %vm14338_vm7 = vmand %vm9594_vm4, %vm9610_vm5  ;;  %vm9595_vm1 = vcmp.le.f32.partialorder %v19457_v58, 0.0  ;;  %v19462_v58 = vld [vmem:[#allocation78_spill] sm:$0xff] }
 0x193   : > { %19436 = vst [vmem:[#allocation96_spill] sm:$0xff] %v14319_v52  ;;  %19439 = vst [vmem:[#allocation97_spill] sm:$0xff] %v19438_v28  ;;  %v14330_v26 = vadd.f32 %v12181_v11, %v2312_v51  ;;  %v2306_v31 = vadd.f32 %v2305_v5, %v14160_v38  ;;  %12500 = vmatprep.mubr.f32.mxu1 %v19443_v33  ;;  %9804 = vperm.xlu1 %13155, %v14335_v45   ;;  %v19445_v30 = vsel %vm14338_vm7, 4294967295, %v19444_v30  ;;  %v19447_v11 = vld [vmem:[#allocation75_spill] sm:$0xff]  ;;  %v19449_v51 = vmov 0 }
 0x194   : > { %19446 = vst [vmem:[#allocation99_spill] sm:$0xff] %v19445_v30  ;;  %v12158_v28 = vpop.f32.mrf.mxu0  ;;  %12469 = vmatmul.mubr.f32.gmra.mxu0 %v13440_v18  ;;  %v2491_v49 = vpop.f32.mrf.mxu1  ;;  %9800 = vperm.xlu0 %13154, %v14344_v34   ;;  %vm9593_vm8 = vcmp.le.f32.partialorder %v19447_v11, 0.0  ;;  %vm9609_vm10 = vcmp.le.f32.partialorder %v14319_v52, 0.0  ;;  %v19502_v52 = vld [vmem:[#allocation62_spill] sm:$0xff] }
 0x195   : > { %19442 = vst [vmem:[#allocation98_spill] sm:$0xff] %v14330_v26  ;;  %v14349_v38 = vadd.f32 %v2467_v27, %v2306_v31  ;;  %v2324_v5 = vadd.f32 %v12158_v28, %v14170_v42  ;;  %12471 = vmatprep.mubr.f32.mxu0 %v19431_v24  ;;  %vm14353_vm11 = vmand %vm9593_vm8, %vm9609_vm10  ;;  %vm9612_vm14 = vcmp.le.f32.partialorder %v14330_v26, 0.0  ;;  %v13233_v42 = vmov 1  }
 0x196   : > { %v19450_v51 = vsel %vm14353_vm11, 4294967295, %v19449_v51  ;;  %v2317_v30 = vpop.f32.mrf.mxu0  ;;  %v12190_v41 = vpop.f32.mrf.mxu1  ;;  %12501 = vmatmul.mubr.f32.gmra.mxu1 %v13500_v0  ;;  %vm14364_vm0 = vmand %vm9596_vm13, %vm9612_vm14  ;;  %v19454_v28 = vmov 0  ;;  %vm9598_vm8 = vcmp.le.f32.partialorder %v19462_v58, 0.0 }
 0x197   : > { %19448 = vst [vmem:[#allocation100_spill] sm:$0xff] %v14349_v38  ;;  %19451 = vst [vmem:[#allocation101_spill] sm:$0xff] %v19450_v51  ;;  %v14360_v11 = vadd.f32 %v12184_v15, %v2324_v5  ;;  %v2318_v27 = vadd.f32 %v2317_v30, %v14179_v1  ;;  %12531 = vmatprep.mubr.f32.mxu1 %v19350_v8  ;;  %13157 = vset.pattern.permute.xlu1 %v13233_v42  ;;  %v19455_v28 = vsel %vm14364_vm0, 4294967295, %v19454_v28  ;;  %v19459_v30 = vmov 0 }
 0x198   : > { %19456 = vst [vmem:[#allocation103_spill] sm:$0xff] %v19455_v28  ;;  %v12161_v31 = vpop.f32.mrf.mxu0  ;;  %12472 = vmatmul.mubr.f32.gmra.mxu0 %v19440_v19  ;;  %v2503_v51 = vpop.f32.mrf.mxu1  ;;  %9904 = vperm.xlu1 %13157, %v14185_v40   ;;  %vm9611_vm4 = vcmp.le.f32.partialorder %v14349_v38, 0.0  ;;  %v19499_v38 = vld [vmem:[#allocation57_spill] sm:$0xff] }
 0x199   : > { %19453 = vst [vmem:[#allocation102_spill] sm:$0xff] %v14360_v11  ;;  %v14372_v15 = vadd.f32 %v2479_v50, %v2318_v27  ;;  %v2336_v1 = vadd.f32 %v12161_v31, %v14188_v57  ;;  %12474 = vmatprep.mubr.f32.mxu0 %v19443_v33  ;;  %13156 = vset.pattern.permute.xlu0 %v13233_v42  ;;  %vm14376_vm5 = vmand %vm9595_vm1, %vm9611_vm4  ;;  %vm9614_vm10 = vcmp.le.f32.partialorder %v14360_v11, 0.0  ;;  %v19464_v27 = vmov 0 }
 0x19a   : > { %v19460_v30 = vsel %vm14376_vm5, 4294967295, %v19459_v30  ;;  %v2329_v5 = vpop.f32.mrf.mxu0  ;;  %v12221_v28 = vpop.f32.mrf.mxu1  ;;  %12532 = vmatmul.mubr.f32.vlgmr.msra.gmra.mxu1 %v19353_v7  ;;  %9900 = vperm.xlu0 %13156, %v14167_v16   ;;  %vm14389_vm13 = vmand %vm9598_vm8, %vm9614_vm10 }
 0x19b   : > { %19458 = vst [vmem:[#allocation104_spill] sm:$0xff] %v14372_v15  ;;  %19461 = vst [vmem:[#allocation105_spill] sm:$0xff] %v19460_v30  ;;  %v14384_v50 = vadd.f32 %v12187_v29, %v2336_v1  ;;  %v2330_v57 = vadd.f32 %v2329_v5, %v14195_v6  ;;  %12582 = vmatpush3.msra.mxu1 %v14043_v3  ;;  %12534 = vmatprep.mubr.f32.mxu1 %v19354_v53  ;;  %v19465_v27 = vsel %vm14389_vm13, 4294967295, %v19464_v27  ;;  %v19467_v30 = vld [vmem:[#allocation79_spill] sm:$0xff]  ;;  %v19470_v5 = vmov 0 }
 0x19c   : > { %19466 = vst [vmem:[#allocation107_spill] sm:$0xff] %v19465_v27  ;;  %v12164_v42 = vpop.f32.mrf.mxu0  ;;  %12475 = vmatmul.mubr.f32.gmra.mxu0 %v13500_v0  ;;  %v2811_v31 = vpop.f32.mrf.mxu1  ;;  %12633 = vmatprep.subr.mxu1 %v14043_v3  ;;  %vm9597_vm14 = vcmp.le.f32.partialorder %v19467_v30, 0.0  ;;  %vm9613_vm1 = vcmp.le.f32.partialorder %v14372_v15, 0.0  ;;  %v19469_v1 = vld [vmem:[#allocation27_spill] sm:$0xff]  ;;  %v19473_v30 = vld [vmem:[#allocation80_spill] sm:$0xff]  ;;  %v19479_v15 = vld [vmem:[#allocation81_spill] sm:$0xff] }
 0x19d   : > { %19463 = vst [vmem:[#allocation106_spill] sm:$0xff] %v14384_v50  ;;  %v14397_v29 = vadd.f32 %v2491_v49, %v2330_v57  ;;  %v2348_v6 = vadd.f32 %v12164_v42, %v14208_v56  ;;  %12505 = vmatprep.mubr.f32.mxu0 %v19469_v1  ;;  %9908 = vperm.xlu1 %13157, %v14157_v61   ;;  %vm14402_vm4 = vmand %vm9597_vm14, %vm9613_vm1  ;;  %vm9600_vm8 = vcmp.le.f32.partialorder %v19473_v30, 0.0  ;;  %vm9616_vm10 = vcmp.le.f32.partialorder %v14384_v50, 0.0 }
 0x19e   : > { %v19471_v5 = vsel %vm14402_vm4, 4294967295, %v19470_v5  ;;  %v2341_v27 = vpop.f32.mrf.mxu0  ;;  %v12224_v58 = vpop.f32.mrf.mxu1  ;;  %12535 = vmatmul.mubr.f32.gmra.mxu1 %v19356_v23  ;;  %9912 = vperm.xlu0 %13156, %v14176_v21   ;;  %vm14414_vm14 = vmand %vm9600_vm8, %vm9616_vm10  ;;  %v19475_v57 = vmov 0  ;;  %vm9599_vm1 = vcmp.le.f32.partialorder %v19479_v15, 0.0  ;;  %v19485_v15 = vld [vmem:[#allocation82_spill] sm:$0xff] }
 0x19f   : > { %19468 = vst [vmem:[#allocation108_spill] sm:$0xff] %v14397_v29  ;;  %19472 = vst [vmem:[#allocation109_spill] sm:$0xff] %v19471_v5  ;;  %v14410_v49 = vadd.f32 %v12190_v41, %v2348_v6  ;;  %v2342_v56 = vadd.f32 %v2341_v27, %v14213_v4  ;;  %12537 = vmatprep.mubr.f32.mxu1 %v19357_v2  ;;  %v19476_v57 = vsel %vm14414_vm14, 4294967295, %v19475_v57  ;;  %v19478_v5 = vld [vmem:[#allocation28_spill] sm:$0xff]  ;;  %vm9615_vm4 = vcmp.le.f32.partialorder %v14397_v29, 0.0  ;;  %v19481_v4 = vld [vmem:[#allocation29_spill] sm:$0xff] }
 0x1a0   : > { %19477 = vst [vmem:[#allocation111_spill] sm:$0xff] %v19476_v57  ;;  %v12195_v42 = vpop.f32.mrf.mxu0  ;;  %12506 = vmatmul.mubr.f32.vlgmr.msra.gmra.mxu0 %v19478_v5  ;;  %v2823_v1 = vpop.f32.mrf.mxu1  ;;  %vm14427_vm8 = vmand %vm9599_vm1, %vm9615_vm4  ;;  %v19482_v27 = vmov 0  ;;  %vm9602_vm10 = vcmp.le.f32.partialorder %v19485_v15, 0.0  ;;  %v277_v15 = vld [vmem:[%s18728_s1 + $0x28] sm:$0xff] }
 0x1a1   : > { %19474 = vst [vmem:[#allocation110_spill] sm:$0xff] %v14410_v49  ;;  %v14421_v30 = vadd.f32 %v2503_v51, %v2342_v56  ;;  %v14423_v41 = vadd.f32 %v12221_v28, %v12195_v42  ;;  %12556 = vmatpush3.msra.mxu0 %v14054_v25  ;;  %12508 = vmatprep.mubr.f32.mxu0 %v19481_v4  ;;  %v19483_v27 = vsel %vm14427_vm8, 4294967295, %v19482_v27  ;;  %vm9618_vm14 = vcmp.le.f32.partialorder %v14410_v49, 0.0  ;;  %v19489_v56 = vld [vmem:[#allocation31_spill] sm:$0xff] }
 0x1a2   : > { %19484 = vst [vmem:[#allocation113_spill] sm:$0xff] %v19483_v27  ;;  %v2585_v6 = vpop.f32.mrf.mxu0  ;;  %v12227_v57 = vpop.f32.mrf.mxu1  ;;  %12538 = vmatmul.mubr.f32.gmra.mxu1 %v19358_v22  ;;  %12607 = vmatprep.subr.mxu0 %v14065_v62  ;;  %vm14439_vm4 = vmand %vm9602_vm10, %vm9618_vm14  ;;  %v19486_v25 = vmov 0  ;;  %v19490_v27 = vld [vmem:[#allocation83_spill] sm:$0xff] }
 0x1a3   : > { %19480 = vst [vmem:[#allocation112_spill] sm:$0xff] %v14421_v30  ;;  %v14435_v51 = vadd.f32 %v2811_v31, %v2585_v6  ;;  %12540 = vmatprep.mubr.f32.mxu1 %v19360_v63  ;;  %9916 = vperm.xlu1 %13157, %v14205_v20   ;;  %v19487_v25 = vsel %vm14439_vm4, 4294967295, %v19486_v25  ;;  %vm9601_vm1 = vcmp.le.f32.partialorder %v19490_v27, 0.0  ;;  %vm9617_vm8 = vcmp.le.f32.partialorder %v14421_v30, 0.0  ;;  %v19491_v6 = vld [vmem:[#allocation32_spill] sm:$0xff] }
 0x1a4   : > { %19488 = vst [vmem:[#allocation114_spill] sm:$0xff] %v19487_v25  ;;  %v12198_v28 = vpop.f32.mrf.mxu0  ;;  %12509 = vmatmul.mubr.f32.gmra.mxu0 %v19489_v56  ;;  %v2835_v42 = vpop.f32.mrf.mxu1  ;;  %9920 = vperm.xlu0 %13156, %v14200_v47   ;;  %vm14453_vm14 = vmand %vm9601_vm1, %vm9617_vm8  ;;  %v19492_v25 = vmov 0 }
 0x1a5   : > { %v14447_v31 = vadd.f32 %v12224_v58, %v12198_v28  ;;  %12511 = vmatprep.mubr.f32.mxu0 %v19491_v6  ;;  %v19493_v25 = vsel %vm14453_vm14, 4294967295, %v19492_v25  ;;  %v19495_v28 = vld [vmem:[#allocation33_spill] sm:$0xff]  ;;  %v14463_v6 = vand.u32 4294901760, %v277_v15 }
 0x1a6   : > { %19494 = vst [vmem:[#allocation115_spill] sm:$0xff] %v19493_v25  ;;  %v2605_v56 = vpop.f32.mrf.mxu0  ;;  %v12230_v49 = vpop.f32.mrf.mxu1  ;;  %12541 = vmatmul.mubr.f32.gmra.mxu1 %v13364_v39  ;;  %v19496_v25 = vld [vmem:[#allocation34_spill] sm:$0xff] }
 0x1a7   : > { %v14458_v4 = vadd.f32 %v2823_v1, %v2605_v56  ;;  %12543 = vmatprep.mubr.f32.mxu1 %v19363_v12  ;;  %9924 = vperm.xlu1 %13157, %v14230_v60   ;;  %v14476_v11 = vsub.f32 %v277_v15, %v14463_v6 }
 0x1a8   : > { %v12201_v58 = vpop.f32.mrf.mxu0  ;;  %12512 = vmatmul.mubr.f32.gmra.mxu0 %v19495_v28  ;;  %v2847_v27 = vpop.f32.mrf.mxu1  ;;  %9928 = vperm.xlu0 %13156, %v14225_v17   ;;  %v19497_v28 = vld [vmem:[#allocation50_spill] sm:$0xff] }
 0x1a9   : > { %v14466_v30 = vadd.f32 %v12227_v57, %v12201_v58  ;;  %12514 = vmatprep.mubr.f32.mxu0 %v19496_v25  ;;  %v19498_v58 = vld [vmem:[#allocation54_spill] sm:$0xff]  ;;  %v14489_v26 = vand.u32 4294901760, %v14476_v11 }
 0x1aa   : > { %v2625_v29 = vpop.f32.mrf.mxu0  ;;  %v12233_v5 = vpop.f32.mrf.mxu1  ;;  %12544 = vmatmul.mubr.f32.gmra.mxu1 %v13430_v9 }
 0x1ab   : > { %v14470_v1 = vadd.f32 %v2835_v42, %v2625_v29  ;;  %12546 = vmatprep.mubr.f32.mxu1 %v19366_v55  ;;  %9932 = vperm.xlu1 %13157, %v14254_v54   ;;  %19500 = vst [vmem:[#allocation116_spill] sm:$0xff] %v14489_v26 }
 0x1ac   : > { %v12204_v56 = vpop.f32.mrf.mxu0  ;;  %12515 = vmatmul.mubr.f32.gmra.mxu0 %v19497_v28  ;;  %v2859_v50 = vpop.f32.mrf.mxu1  ;;  %9936 = vperm.xlu0 %13156, %v14245_v10  }
 0x1ad   : > { %v14479_v57 = vadd.f32 %v12230_v49, %v12204_v56  ;;  %12517 = vmatprep.mubr.f32.mxu0 %v19498_v58  ;;  %v19501_v56 = vld [vmem:[#allocation60_spill] sm:$0xff] }
 0x1ae   : > { %v2645_v25 = vpop.f32.mrf.mxu0  ;;  %v12236_v29 = vpop.f32.mrf.mxu1  ;;  %12547 = vmatmul.mubr.f32.gmra.mxu1 %v13440_v18 }
 0x1af   : > { %v14483_v42 = vadd.f32 %v2847_v27, %v2645_v25  ;;  %12549 = vmatprep.mubr.f32.mxu1 %v19431_v24  ;;  %9940 = vperm.xlu1 %13157, %v14284_v13  }
 0x1b0   : > { %v12207_v28 = vpop.f32.mrf.mxu0  ;;  %12518 = vmatmul.mubr.f32.gmra.mxu0 %v19499_v38  ;;  %v2871_v15 = vpop.f32.mrf.mxu1  ;;  %9944 = vperm.xlu0 %13156, %v14275_v14  }
 0x1b1   : > { %v14492_v49 = vadd.f32 %v12233_v5, %v12207_v28  ;;  %12520 = vmatprep.mubr.f32.mxu0 %v19501_v56  ;;  %v6046_v5 = vsub.f32 %v14476_v11, %v14489_v26  ;;  %v19503_v56 = vld [vmem:[#allocation64_spill] sm:$0xff] }
 0x1b2   : > { %v2665_v58 = vpop.f32.mrf.mxu0  ;;  %v12239_v27 = vpop.f32.mrf.mxu1  ;;  %12550 = vmatmul.mubr.f32.gmra.mxu1 %v19440_v19 }
 0x1b3   : > { %v14496_v25 = vadd.f32 %v2859_v50, %v2665_v58  ;;  %12552 = vmatprep.mubr.f32.mxu1 %v19443_v33  ;;  %9948 = vperm.xlu1 %13157, %v14314_v59   ;;  %v19504_v33 = vld [vmem:[#allocation65_spill] sm:$0xff]  ;;  %v14513_v18 = vand.u32 4294901760, %v6046_v5 }
 0x1b4   : > { %v12210_v38 = vpop.f32.mrf.mxu0  ;;  %12521 = vmatmul.mubr.f32.gmra.mxu0 %v19502_v52  ;;  %v2883_v24 = vpop.f32.mrf.mxu1  ;;  %9952 = vperm.xlu0 %13156, %v14305_v37  }
 0x1b5   : > { %v14504_v28 = vadd.f32 %v12236_v29, %v12210_v38  ;;  %12523 = vmatprep.mubr.f32.mxu0 %v19503_v56 }
 0x1b6   : > { %v2685_v19 = vpop.f32.mrf.mxu0  ;;  %v12242_v50 = vpop.f32.mrf.mxu1  ;;  %12553 = vmatmul.mubr.f32.gmra.mxu1 %v13500_v0  ;;  %v19507_v0 = vld [vmem:[#allocation67_spill] sm:$0xff] }
 0x1b7   : > { %v14508_v58 = vadd.f32 %v2871_v15, %v2685_v19  ;;  %12583 = vmatprep.mubr.f32.mxu1 %v13340_v32  ;;  %9956 = vperm.xlu1 %13157, %v14344_v34   ;;  %v19505_v19 = vld [vmem:[#allocation15_spill] sm:$0xff]  ;;  %v19506_v32 = vld [vmem:[#allocation16_spill] sm:$0xff] }
 0x1b8   : > { %v12213_v52 = vpop.f32.mrf.mxu0  ;;  %12524 = vmatmul.mubr.f32.gmra.mxu0 %v19504_v33  ;;  %v2895_v26 = vpop.f32.mrf.mxu1  ;;  %9960 = vperm.xlu0 %13156, %v14335_v45  }
 0x1b9   : > { %v14516_v38 = vadd.f32 %v12239_v27, %v12213_v52  ;;  %12526 = vmatprep.mubr.f32.mxu0 %v13565_v48  ;;  %v19508_v27 = vld [vmem:[#allocation7_spill] sm:$0xff]  ;;  %v13234_v48 = vmov 2  }
 0x1ba   : > { %v2705_v29 = vpop.f32.mrf.mxu0  ;;  %v12273_v56 = vpop.f32.mrf.mxu1  ;;  %12584 = vmatmul.mubr.f32.vlgmr.msra.gmra.mxu1 %v19505_v19 }
 0x1bb   : > { %v14520_v15 = vadd.f32 %v2883_v24, %v2705_v29  ;;  %12634 = vmatpush3.msra.mxu1 %v14043_v3  ;;  %12586 = vmatprep.mubr.f32.mxu1 %v19506_v32  ;;  %v19509_v29 = vld [vmem:[#allocation8_spill] sm:$0xff] }
 0x1bc   : > { %v12216_v33 = vpop.f32.mrf.mxu0  ;;  %12527 = vmatmul.mubr.f32.gmra.mxu0 %v19507_v0  ;;  %v3154_v5 = vpop.f32.mrf.mxu1  ;;  %12685 = vmatprep.subr.mxu1 %v14513_v18 }
 0x1bd   : > { %v14526_v52 = vadd.f32 %v12242_v50, %v12216_v33  ;;  %12557 = vmatprep.mubr.f32.mxu0 %v19508_v27  ;;  %13158 = vset.pattern.permute.xlu1 %v13234_v48  ;;  %v19510_v27 = vld [vmem:[#allocation9_spill] sm:$0xff] }
 0x1be   : > { %v2725_v55 = vpop.f32.mrf.mxu0  ;;  %v12276_v19 = vpop.f32.mrf.mxu1  ;;  %12587 = vmatmul.mubr.f32.gmra.mxu1 %v13373_v43  ;;  %10056 = vperm.xlu1 %13158, %v14167_v16   ;;  %v19511_v16 = vld [vmem:[#allocation24_spill] sm:$0xff] }
 0x1bf   : > { %v14531_v3 = vadd.f32 %v2895_v26, %v2725_v55  ;;  %12589 = vmatprep.mubr.f32.mxu1 %v13377_v44  ;;  %13159 = vset.pattern.permute.xlu0 %v13234_v48 }
 0x1c0   : > { %v12247_v24 = vpop.f32.mrf.mxu0  ;;  %12558 = vmatmul.mubr.f32.vlgmr.msra.gmra.mxu0 %v19509_v29  ;;  %v3170_v33 = vpop.f32.mrf.mxu1  ;;  %10060 = vperm.xlu0 %13159, %v14185_v40  }
 0x1c1   : > { %v2983_v50 = vadd.f32 %v12247_v24, %v14423_v41  ;;  %12608 = vmatpush3.msra.mxu0 %v14065_v62  ;;  %12560 = vmatprep.mubr.f32.mxu0 %v19510_v27 }
 0x1c2   : > { %v2975_v43 = vpop.f32.mrf.mxu0  ;;  %v12279_v0 = vpop.f32.mrf.mxu1  ;;  %12590 = vmatmul.mubr.f32.gmra.mxu1 %v19511_v16  ;;  %12659 = vmatprep.subr.mxu0 %v14463_v6 }
 0x1c3   : > { %v14541_v55 = vadd.f32 %v12273_v56, %v2983_v50  ;;  %v2976_v48 = vadd.f32 %v2975_v43, %v14435_v51  ;;  %12592 = vmatprep.mubr.f32.mxu1 %v13383_v46  ;;  %10064 = vperm.xlu1 %13158, %v14157_v61   ;;  %v19512_v50 = vld [vmem:[#allocation30_spill] sm:$0xff]  ;;  %v19513_v51 = vld [vmem:[#allocation45_spill] sm:$0xff] }
 0x1c4   : > { %v12250_v40 = vpop.f32.mrf.mxu0  ;;  %12561 = vmatmul.mubr.f32.gmra.mxu0 %v13351_v35  ;;  %v3186_v62 = vpop.f32.mrf.mxu1  ;;  %10072 = vperm.xlu0 %13159, %v14205_v20   ;;  %v19514_v20 = vld [vmem:[#allocation19_spill] sm:$0xff] }
 0x1c5   : > { %v14548_v26 = vadd.f32 %v3154_v5, %v2976_v48  ;;  %v2997_v41 = vadd.f32 %v12250_v40, %v14447_v31  ;;  %12563 = vmatprep.mubr.f32.mxu0 %v13356_v36  ;;  %v19515_v40 = vld [vmem:[#allocation20_spill] sm:$0xff] }
 0x1c6   : > { %v2989_v56 = vpop.f32.mrf.mxu0  ;;  %v12282_v24 = vpop.f32.mrf.mxu1  ;;  %12593 = vmatmul.mubr.f32.gmra.mxu1 %v19512_v50  ;;  %v19516_v50 = vld [vmem:[#allocation46_spill] sm:$0xff] }
 0x1c7   : > { %v14553_v43 = vadd.f32 %v12276_v19, %v2997_v41  ;;  %v2990_v61 = vadd.f32 %v2989_v56, %v14458_v4  ;;  %12595 = vmatprep.mubr.f32.mxu1 %v19513_v51  ;;  %10068 = vperm.xlu1 %13158, %v14176_v21   ;;  %v19517_v56 = vld [vmem:[#allocation47_spill] sm:$0xff] }
 0x1c8   : > { %v12253_v35 = vpop.f32.mrf.mxu0  ;;  %12564 = vmatmul.mubr.f32.gmra.mxu0 %v19514_v20  ;;  %v3202_v5 = vpop.f32.mrf.mxu1  ;;  %10080 = vperm.xlu0 %13159, %v14230_v60   ;;  %v19518_v60 = vld [vmem:[#allocation26_spill] sm:$0xff] }
 0x1c9   : > { %v14560_v31 = vadd.f32 %v3170_v33, %v2990_v61  ;;  %v3011_v48 = vadd.f32 %v12253_v35, %v14466_v30  ;;  %12566 = vmatprep.mubr.f32.mxu0 %v19515_v40  ;;  %v19519_v61 = vld [vmem:[#allocation39_spill] sm:$0xff] }
 0x1ca   : > { %v3003_v19 = vpop.f32.mrf.mxu0  ;;  %v12285_v41 = vpop.f32.mrf.mxu1  ;;  %12596 = vmatmul.mubr.f32.gmra.mxu1 %v19516_v50  ;;  %v19520_v50 = vld [vmem:[#allocation51_spill] sm:$0xff] }
 0x1cb   : > { %v14565_v4 = vadd.f32 %v12279_v0, %v3011_v48  ;;  %v3004_v21 = vadd.f32 %v3003_v19, %v14470_v1  ;;  %12598 = vmatprep.mubr.f32.mxu1 %v19517_v56  ;;  %10076 = vperm.xlu1 %13158, %v14200_v47   ;;  %v19521_v19 = vld [vmem:[#allocation55_spill] sm:$0xff] }
 0x1cc   : > { %v12256_v20 = vpop.f32.mrf.mxu0  ;;  %12567 = vmatmul.mubr.f32.gmra.mxu0 %v19518_v60  ;;  %v3218_v33 = vpop.f32.mrf.mxu1  ;;  %10088 = vperm.xlu0 %13159, %v14254_v54   ;;  %v19522_v54 = vld [vmem:[#allocation40_spill] sm:$0xff] }
 0x1cd   : > { %v14572_v35 = vadd.f32 %v3186_v62, %v3004_v21  ;;  %v3025_v30 = vadd.f32 %v12256_v20, %v14479_v57  ;;  %12569 = vmatprep.mubr.f32.mxu0 %v19519_v61  ;;  %v19523_v21 = vld [vmem:[#allocation41_spill] sm:$0xff] }
 0x1ce   : > { %v3017_v0 = vpop.f32.mrf.mxu0  ;;  %v12288_v48 = vpop.f32.mrf.mxu1  ;;  %12599 = vmatmul.mubr.f32.gmra.mxu1 %v19520_v50  ;;  %v19524_v50 = vld [vmem:[#allocation58_spill] sm:$0xff] }
 0x1cf   : > { %v14577_v1 = vadd.f32 %v12282_v24, %v3025_v30  ;;  %v3018_v47 = vadd.f32 %v3017_v0, %v14483_v42  ;;  %12601 = vmatprep.mubr.f32.mxu1 %v19521_v19  ;;  %10084 = vperm.xlu1 %13158, %v14225_v17   ;;  %v19525_v0 = vld [vmem:[#allocation61_spill] sm:$0xff] }
 0x1d0   : > { %v12259_v60 = vpop.f32.mrf.mxu0  ;;  %12570 = vmatmul.mubr.f32.gmra.mxu0 %v19522_v54  ;;  %v3234_v62 = vpop.f32.mrf.mxu1  ;;  %10096 = vperm.xlu0 %13159, %v14284_v13   ;;  %v19526_v13 = vld [vmem:[#allocation43_spill] sm:$0xff] }
 0x1d1   : > { %v14584_v57 = vadd.f32 %v3202_v5, %v3018_v47  ;;  %v3039_v20 = vadd.f32 %v12259_v60, %v14492_v49  ;;  %12572 = vmatprep.mubr.f32.mxu0 %v19523_v21  ;;  %v19527_v47 = vld [vmem:[#allocation48_spill] sm:$0xff] }
 0x1d2   : > { %v3031_v24 = vpop.f32.mrf.mxu0  ;;  %v12291_v30 = vpop.f32.mrf.mxu1  ;;  %12602 = vmatmul.mubr.f32.gmra.mxu1 %v19524_v50  ;;  %v19528_v50 = vld [vmem:[#allocation63_spill] sm:$0xff] }
 0x1d3   : > { %v14589_v42 = vadd.f32 %v12285_v41, %v3039_v20  ;;  %v3032_v17 = vadd.f32 %v3031_v24, %v14496_v25  ;;  %12604 = vmatprep.mubr.f32.mxu1 %v19525_v0  ;;  %10092 = vperm.xlu1 %13158, %v14245_v10  }
 0x1d4   : > { %v12262_v54 = vpop.f32.mrf.mxu0  ;;  %12573 = vmatmul.mubr.f32.gmra.mxu0 %v19526_v13  ;;  %v3250_v5 = vpop.f32.mrf.mxu1  ;;  %10104 = vperm.xlu0 %13159, %v14314_v59   ;;  %v19529_v59 = vld [vmem:[#allocation52_spill] sm:$0xff] }
 0x1d5   : > { %v14596_v49 = vadd.f32 %v3218_v33, %v3032_v17  ;;  %v3053_v60 = vadd.f32 %v12262_v54, %v14504_v28  ;;  %12575 = vmatprep.mubr.f32.mxu0 %v19527_v47  ;;  %v19530_v17 = vld [vmem:[#allocation56_spill] sm:$0xff] }
 0x1d6   : > { %v3045_v41 = vpop.f32.mrf.mxu0  ;;  %v12294_v20 = vpop.f32.mrf.mxu1  ;;  %12605 = vmatmul.mubr.f32.gmra.mxu1 %v19528_v50 }
 0x1d7   : > { %v14601_v25 = vadd.f32 %v12288_v48, %v3053_v60  ;;  %v3046_v10 = vadd.f32 %v3045_v41, %v14508_v58  ;;  %12635 = vmatprep.mubr.f32.mxu1 %v19350_v8  ;;  %10100 = vperm.xlu1 %13158, %v14275_v14  }
 0x1d8   : > { %v12265_v24 = vpop.f32.mrf.mxu0  ;;  %12576 = vmatmul.mubr.f32.gmra.mxu0 %v19529_v59  ;;  %v3266_v33 = vpop.f32.mrf.mxu1  ;;  %10112 = vperm.xlu0 %13159, %v14344_v34   ;;  %v19531_v34 = vld [vmem:[#allocation59_spill] sm:$0xff] }
 0x1d9   : > { %v14608_v28 = vadd.f32 %v3234_v62, %v3046_v10  ;;  %v3067_v54 = vadd.f32 %v12265_v24, %v14516_v38  ;;  %12578 = vmatprep.mubr.f32.mxu0 %v19530_v17 }
 0x1da   : > { %v3059_v48 = vpop.f32.mrf.mxu0  ;;  %v12325_v60 = vpop.f32.mrf.mxu1  ;;  %12636 = vmatmul.mubr.f32.vlgmr.msra.gmra.mxu1 %v19353_v7 }
 0x1db   : > { %v14613_v58 = vadd.f32 %v12291_v30, %v3067_v54  ;;  %v3060_v14 = vadd.f32 %v3059_v48, %v14520_v15  ;;  %12686 = vmatpush3.msra.mxu1 %v14513_v18  ;;  %12638 = vmatprep.mubr.f32.mxu1 %v19354_v53 }
 0x1dc   : > { %v12268_v41 = vpop.f32.mrf.mxu0  ;;  %12579 = vmatmul.mubr.f32.gmra.mxu0 %v19531_v34  ;;  %v3510_v62 = vpop.f32.mrf.mxu1  ;;  %12737 = vmatprep.subr.mxu1 %v14463_v6 }
 0x1dd   : > { %v14620_v38 = vadd.f32 %v3250_v5, %v3060_v14  ;;  %v3081_v10 = vadd.f32 %v12268_v41, %v14526_v52  ;;  %12609 = vmatprep.mubr.f32.mxu0 %v19350_v8  ;;  %10108 = vperm.xlu1 %13158, %v14305_v37  }
 0x1de   : > { %v3073_v30 = vpop.f32.mrf.mxu0  ;;  %v12328_v15 = vpop.f32.mrf.mxu1  ;;  %12639 = vmatmul.mubr.f32.gmra.mxu1 %v19356_v23 }
 0x1df   : > { %v14626_v18 = vadd.f32 %v12294_v20, %v3081_v10  ;;  %v3074_v24 = vadd.f32 %v3073_v30, %v14531_v3  ;;  %12641 = vmatprep.mubr.f32.mxu1 %v19357_v2 }
 0x1e0   : > { %v12299_v54 = vpop.f32.mrf.mxu0  ;;  %12610 = vmatmul.mubr.f32.vlgmr.msra.gmra.mxu0 %v19353_v7  ;;  %v3522_v5 = vpop.f32.mrf.mxu1 }
 0x1e1   : > { %v14631_v48 = vadd.f32 %v3266_v33, %v3074_v24  ;;  %v3355_v52 = vadd.f32 %v12299_v54, %v14541_v55  ;;  %12660 = vmatpush3.msra.mxu0 %v14463_v6  ;;  %12612 = vmatprep.mubr.f32.mxu0 %v19354_v53 }
 0x1e2   : > { %v3348_v37 = vpop.f32.mrf.mxu0  ;;  %v12331_v14 = vpop.f32.mrf.mxu1  ;;  %12642 = vmatmul.mubr.f32.gmra.mxu1 %v19358_v22  ;;  %12711 = vmatprep.subr.mxu0 %v14476_v11 }
 0x1e3   : > { %v14638_v3 = vadd.f32 %v12325_v60, %v3355_v52  ;;  %v3349_v20 = vadd.f32 %v3348_v37, %v14548_v26  ;;  %12644 = vmatprep.mubr.f32.mxu1 %v19360_v63  ;;  %10116 = vperm.xlu1 %13158, %v14335_v45   ;;  %v19534_v60 = vld [vmem:[#allocation84_spill] sm:$0xff]  ;;  %v19540_v37 = vld [vmem:[#allocation85_spill] sm:$0xff] }
 0x1e4   : > { %v12302_v33 = vpop.f32.mrf.mxu0  ;;  %12613 = vmatmul.mubr.f32.gmra.mxu0 %v19356_v23  ;;  %v3534_v55 = vpop.f32.mrf.mxu1  ;;  %vm9428_vm8 = vcmp.ge.f32.partialorder %v19534_v60, 1.0  ;;  %vm9427_vm13 = vcmp.ge.f32.partialorder %v19540_v37, 1.0 }
 0x1e5   : > { %19532 = vst [vmem:[#allocation117_spill] sm:$0xff] %v14638_v3  ;;  %v14644_v41 = vadd.f32 %v3510_v62, %v3349_v20  ;;  %v3367_v10 = vadd.f32 %v12302_v33, %v14553_v43  ;;  %12615 = vmatprep.mubr.f32.mxu0 %v19357_v2  ;;  %vm9444_vm10 = vcmp.ge.f32.partialorder %v14638_v3, 1.0  ;;  %vm9524_vm1 = vcmp.le.f32.partialorder %v14638_v3, 0.0  ;;  %v19539_v62 = vld [vmem:[#allocation68_spill] sm:$0xff] }
 0x1e6   : > { %v3360_v30 = vpop.f32.mrf.mxu0  ;;  %v12334_v24 = vpop.f32.mrf.mxu1  ;;  %12645 = vmatmul.mubr.f32.gmra.mxu1 %v13364_v39  ;;  %vm14656_vm14 = vmand %vm9428_vm8, %vm9444_vm10  ;;  %v19536_v43 = vmov 0  ;;  %vm9508_vm4 = vcmp.ge.f32.partialorder %v19539_v62, 1.0  ;;  %v19545_v33 = vmov 0  ;;  %v19559_v3 = vld [vmem:[#allocation88_spill] sm:$0xff]  ;;  %v19568_v62 = vld [vmem:[#allocation38_spill] sm:$0xff] }
 0x1e7   : > { %19533 = vst [vmem:[#allocation118_spill] sm:$0xff] %v14644_v41  ;;  %v14652_v45 = vadd.f32 %v12328_v15, %v3367_v10  ;;  %v3361_v26 = vadd.f32 %v3360_v30, %v14560_v31  ;;  %12647 = vmatprep.mubr.f32.mxu1 %v19363_v12  ;;  %v19537_v43 = vsel %vm14656_vm14, 4294967295, %v19536_v43  ;;  %vm9443_vm5 = vcmp.ge.f32.partialorder %v14644_v41, 1.0  ;;  %vm14665_vm11 = vmand %vm9508_vm4, %vm9524_vm1  ;;  %v19548_v10 = vld [vmem:[#allocation69_spill] sm:$0xff] }
 0x1e8   : > { %19538 = vst [vmem:[#allocation120_spill] sm:$0xff] %v19537_v43  ;;  %v12305_v54 = vpop.f32.mrf.mxu0  ;;  %12616 = vmatmul.mubr.f32.gmra.mxu0 %v19358_v22  ;;  %v3546_v52 = vpop.f32.mrf.mxu1  ;;  %vm9523_vm0 = vcmp.le.f32.partialorder %v14644_v41, 0.0  ;;  %v19541_v31 = vmov 0  ;;  %vm14673_vm8 = vmand %vm9427_vm13, %vm9443_vm5  ;;  %vm9507_vm10 = vcmp.ge.f32.partialorder %v19548_v10, 1.0  ;;  %v19549_v41 = vmov 0 }
 0x1e9   : > { %19535 = vst [vmem:[#allocation119_spill] sm:$0xff] %v14652_v45  ;;  %v19542_v31 = vsel %vm14665_vm11, 4294967295, %v19541_v31  ;;  %v14669_v15 = vadd.f32 %v3522_v5, %v3361_v26  ;;  %v3379_v20 = vadd.f32 %v12305_v54, %v14565_v4  ;;  %12618 = vmatprep.mubr.f32.mxu0 %v19360_v63  ;;  %v19546_v33 = vsel %vm14673_vm8, 4294967295, %v19545_v33  ;;  %vm14679_vm4 = vmand %vm9507_vm10, %vm9523_vm0  ;;  %v19552_v5 = vld [vmem:[#allocation86_spill] sm:$0xff]  ;;  %v19554_v54 = vld [vmem:[#allocation37_spill] sm:$0xff] }
 0x1ea   : > { %19543 = vst [vmem:[#allocation121_spill] sm:$0xff] %v19542_v31  ;;  %19547 = vst [vmem:[#allocation123_spill] sm:$0xff] %v19546_v33  ;;  %v3372_v30 = vpop.f32.mrf.mxu0  ;;  %v12337_v43 = vpop.f32.mrf.mxu1  ;;  %12648 = vmatmul.mubr.f32.gmra.mxu1 %v13430_v9  ;;  %v19550_v41 = vsel %vm14679_vm4, 4294967295, %v19549_v41  ;;  %vm9430_vm1 = vcmp.ge.f32.partialorder %v19552_v5, 1.0  ;;  %vm9446_vm7 = vcmp.ge.f32.partialorder %v14652_v45, 1.0  ;;  %vm9526_vm2 = vcmp.le.f32.partialorder %v14652_v45, 0.0 }
 0x1eb   : > { %19544 = vst [vmem:[#allocation122_spill] sm:$0xff] %v14669_v15  ;;  %19551 = vst [vmem:[#allocation124_spill] sm:$0xff] %v19550_v41  ;;  %v14686_v4 = vadd.f32 %v12331_v14, %v3379_v20  ;;  %v3373_v26 = vadd.f32 %v3372_v30, %v14572_v35  ;;  %12650 = vmatprep.mubr.f32.mxu1 %v19554_v54  ;;  %v19555_v31 = vmov 0  ;;  %v19558_v33 = vld [vmem:[#allocation70_spill] sm:$0xff]  ;;  %vm9429_vm13 = vcmp.ge.f32.partialorder %v19559_v3, 1.0 }
 0x1ec   : > { %vm14690_vm5 = vmand %vm9430_vm1, %vm9446_vm7  ;;  %vm9510_vm0 = vcmp.ge.f32.partialorder %v19558_v33, 1.0  ;;  %v12308_v10 = vpop.f32.mrf.mxu0  ;;  %12619 = vmatmul.mubr.f32.gmra.mxu0 %v13364_v39  ;;  %v3558_v41 = vpop.f32.mrf.mxu1  ;;  %vm9445_vm10 = vcmp.ge.f32.partialorder %v14669_v15, 1.0  ;;  %vm9525_vm15 = vcmp.le.f32.partialorder %v14669_v15, 0.0  ;;  %v19560_v35 = vmov 0 }
 0x1ed   : > { %19553 = vst [vmem:[#allocation125_spill] sm:$0xff] %v14686_v4  ;;  %v19556_v31 = vsel %vm14690_vm5, 4294967295, %v19555_v31  ;;  %vm14699_vm9 = vmand %vm9510_vm0, %vm9526_vm2  ;;  %v14703_v14 = vadd.f32 %v3534_v55, %v3373_v26  ;;  %v3391_v20 = vadd.f32 %v12308_v10, %v14577_v1  ;;  %12621 = vmatprep.mubr.f32.mxu0 %v19363_v12  ;;  %v19564_v30 = vmov 0  ;;  %v19572_v55 = vld [vmem:[#allocation90_spill] sm:$0xff] }
 0x1ee   : > { %19557 = vst [vmem:[#allocation126_spill] sm:$0xff] %v19556_v31  ;;  %v19561_v35 = vsel %vm14699_vm9, 4294967295, %v19560_v35  ;;  %vm14707_vm7 = vmand %vm9429_vm13, %vm9445_vm10  ;;  %v19567_v31 = vld [vmem:[#allocation71_spill] sm:$0xff]  ;;  %v3384_v33 = vpop.f32.mrf.mxu0  ;;  %v12340_v45 = vpop.f32.mrf.mxu1  ;;  %12651 = vmatmul.mubr.f32.gmra.mxu1 %v19568_v62  ;;  %v19569_v15 = vmov 0  ;;  %vm9432_vm0 = vcmp.ge.f32.partialorder %v19572_v55, 1.0  ;;  %vm9448_vm9 = vcmp.ge.f32.partialorder %v14686_v4, 1.0 }
 0x1ef   : > { %19562 = vst [vmem:[#allocation127_spill] sm:$0xff] %v19561_v35  ;;  %19563 = vst [vmem:[#allocation128_spill] sm:$0xff] %v14703_v14  ;;  %v19565_v30 = vsel %vm14707_vm7, 4294967295, %v19564_v30  ;;  %vm9509_vm1 = vcmp.ge.f32.partialorder %v19567_v31, 1.0  ;;  %vm9528_vm5 = vcmp.le.f32.partialorder %v14686_v4, 0.0  ;;  %v14720_v1 = vadd.f32 %v12334_v24, %v3391_v20  ;;  %v19574_v26 = vld [vmem:[#allocation42_spill] sm:$0xff] }
 0x1f0   : > { %19566 = vst [vmem:[#allocation129_spill] sm:$0xff] %v19565_v30  ;;  %vm14713_vm2 = vmand %vm9509_vm1, %vm9525_vm15  ;;  %v3385_v10 = vadd.f32 %v3384_v33, %v14584_v57  ;;  %12653 = vmatprep.mubr.f32.mxu1 %v19574_v26  ;;  %v19575_v35 = vmov 0  ;;  %v19578_v30 = vld [vmem:[#allocation72_spill] sm:$0xff]  ;;  %v12311_v31 = vpop.f32.mrf.mxu0  ;;  %12622 = vmatmul.mubr.f32.gmra.mxu0 %v13430_v9  ;;  %v19579_v55 = vmov 0  ;;  %vm9447_vm3 = vcmp.ge.f32.partialorder %v14703_v14, 1.0 }
 0x1f1   : > { %v19570_v15 = vsel %vm14713_vm2, 4294967295, %v19569_v15  ;;  %19573 = vst [vmem:[#allocation131_spill] sm:$0xff] %v14720_v1  ;;  %vm14724_vm13 = vmand %vm9432_vm0, %vm9448_vm9  ;;  %vm9512_vm15 = vcmp.ge.f32.partialorder %v19578_v30, 1.0  ;;  %v19582_v24 = vld [vmem:[#allocation92_spill] sm:$0xff]  ;;  %vm9527_vm11 = vcmp.le.f32.partialorder %v14703_v14, 0.0  ;;  %v3403_v33 = vadd.f32 %v12311_v31, %v14589_v42  ;;  %12624 = vmatprep.mubr.f32.mxu0 %v19554_v54 }
 0x1f2   : > { %19571 = vst [vmem:[#allocation130_spill] sm:$0xff] %v19570_v15  ;;  %v19576_v35 = vsel %vm14724_vm13, 4294967295, %v19575_v35  ;;  %v3570_v15 = vpop.f32.mrf.mxu1  ;;  %vm14730_vm10 = vmand %vm9512_vm15, %vm9528_vm5  ;;  %vm9431_vm1 = vcmp.ge.f32.partialorder %v19582_v24, 1.0  ;;  %v14737_v57 = vadd.f32 %v3546_v52, %v3385_v10  ;;  %v19584_v20 = vmov 0  ;;  %v3396_v30 = vpop.f32.mrf.mxu0  ;;  %v19588_v4 = vld [vmem:[#allocation44_spill] sm:$0xff]  ;;  %v19592_v52 = vld [vmem:[#allocation94_spill] sm:$0xff] }
 0x1f3   : > { %19577 = vst [vmem:[#allocation132_spill] sm:$0xff] %v19576_v35  ;;  %v19580_v55 = vsel %vm14730_vm10, 4294967295, %v19579_v55  ;;  %vm14741_vm9 = vmand %vm9431_vm1, %vm9447_vm3  ;;  %v19587_v35 = vld [vmem:[#allocation73_spill] sm:$0xff]  ;;  %12654 = vmatmul.mubr.f32.gmra.mxu1 %v19588_v4  ;;  %v19589_v24 = vmov 0  ;;  %vm9434_vm15 = vcmp.ge.f32.partialorder %v19592_v52, 1.0  ;;  %vm9450_vm10 = vcmp.ge.f32.partialorder %v14720_v1, 1.0 }
 0x1f4   : > { %19581 = vst [vmem:[#allocation133_spill] sm:$0xff] %v19580_v55  ;;  %19583 = vst [vmem:[#allocation134_spill] sm:$0xff] %v14737_v57  ;;  %v19585_v20 = vsel %vm14741_vm9, 4294967295, %v19584_v20  ;;  %vm9511_vm5 = vcmp.ge.f32.partialorder %v19587_v35, 1.0  ;;  %v12343_v55 = vpop.f32.mrf.mxu1  ;;  %vm9530_vm13 = vcmp.le.f32.partialorder %v14720_v1, 0.0  ;;  %v14754_v42 = vadd.f32 %v12337_v43, %v3403_v33  ;;  %v19594_v10 = vld [vmem:[#allocation49_spill] sm:$0xff]  ;;  %v12314_v14 = vpop.f32.mrf.mxu0  ;;  %12625 = vmatmul.mubr.f32.gmra.mxu0 %v19568_v62 }
 0x1f5   : > { %19586 = vst [vmem:[#allocation135_spill] sm:$0xff] %v19585_v20  ;;  %vm14747_vm0 = vmand %vm9511_vm5, %vm9527_vm11  ;;  %v3397_v31 = vadd.f32 %v3396_v30, %v14596_v49  ;;  %12656 = vmatprep.mubr.f32.mxu1 %v19594_v10  ;;  %v19595_v20 = vmov 0  ;;  %v19598_v35 = vld [vmem:[#allocation74_spill] sm:$0xff]  ;;  %v19599_v52 = vmov 0  ;;  %v19602_v43 = vld [vmem:[#allocation96_spill] sm:$0xff]  ;;  %vm9529_vm9 = vcmp.le.f32.partialorder %v14737_v57, 0.0  ;;  %12627 = vmatprep.mubr.f32.mxu0 %v19574_v26 }
 0x1f6   : > { %v19590_v24 = vsel %vm14747_vm0, 4294967295, %v19589_v24  ;;  %19593 = vst [vmem:[#allocation137_spill] sm:$0xff] %v14754_v42  ;;  %vm14758_vm3 = vmand %vm9434_vm15, %vm9450_vm10  ;;  %vm9514_vm11 = vcmp.ge.f32.partialorder %v19598_v35, 1.0  ;;  %vm9433_vm5 = vcmp.ge.f32.partialorder %v19602_v43, 1.0  ;;  %vm9449_vm0 = vcmp.ge.f32.partialorder %v14737_v57, 1.0  ;;  %v3408_v35 = vpop.f32.mrf.mxu0  ;;  %v19608_v1 = vld [vmem:[#allocation53_spill] sm:$0xff] }
 0x1f7   : > { %19591 = vst [vmem:[#allocation136_spill] sm:$0xff] %v19590_v24  ;;  %v19596_v20 = vsel %vm14758_vm3, 4294967295, %v19595_v20  ;;  %v3582_v24 = vpop.f32.mrf.mxu1  ;;  %vm14764_vm1 = vmand %vm9514_vm11, %vm9530_vm13  ;;  %v14771_v49 = vadd.f32 %v3558_v41, %v3397_v31  ;;  %v3415_v30 = vadd.f32 %v12314_v14, %v14601_v25  ;;  %v19604_v33 = vmov 0  ;;  %12657 = vmatmul.mubr.f32.gmra.mxu1 %v19608_v1  ;;  %v19612_v41 = vld [vmem:[#allocation98_spill] sm:$0xff] }
 0x1f8   : > { %19597 = vst [vmem:[#allocation138_spill] sm:$0xff] %v19596_v20  ;;  %v19600_v52 = vsel %vm14764_vm1, 4294967295, %v19599_v52  ;;  %vm14775_vm10 = vmand %vm9433_vm5, %vm9449_vm0  ;;  %v19607_v20 = vld [vmem:[#allocation75_spill] sm:$0xff]  ;;  %v19609_v43 = vmov 0  ;;  %vm9436_vm11 = vcmp.ge.f32.partialorder %v19612_v41, 1.0  ;;  %vm9452_vm1 = vcmp.ge.f32.partialorder %v14754_v42, 1.0  ;;  %12687 = vmatprep.mubr.f32.mxu1 %v19350_v8  ;;  %12628 = vmatmul.mubr.f32.gmra.mxu0 %v19588_v4 }
 0x1f9   : > { %19601 = vst [vmem:[#allocation139_spill] sm:$0xff] %v19600_v52  ;;  %19603 = vst [vmem:[#allocation140_spill] sm:$0xff] %v14771_v49  ;;  %v19605_v33 = vsel %vm14775_vm10, 4294967295, %v19604_v33  ;;  %vm9513_vm13 = vcmp.ge.f32.partialorder %v19607_v20, 1.0  ;;  %v12346_v52 = vpop.f32.mrf.mxu1  ;;  %vm9532_vm3 = vcmp.le.f32.partialorder %v14754_v42, 0.0  ;;  %v14788_v25 = vadd.f32 %v12340_v45, %v3415_v30  ;;  %v12317_v20 = vpop.f32.mrf.mxu0  ;;  %v19621_v45 = vld [vmem:[#allocation100_spill] sm:$0xff]  ;;  %12630 = vmatprep.mubr.f32.mxu0 %v19594_v10 }
 0x1fa   : > { %19606 = vst [vmem:[#allocation141_spill] sm:$0xff] %v19605_v33  ;;  %vm14781_vm15 = vmand %vm9513_vm13, %vm9529_vm9  ;;  %v3409_v14 = vadd.f32 %v3408_v35, %v14608_v28  ;;  %v19614_v31 = vmov 0  ;;  %v19617_v33 = vld [vmem:[#allocation76_spill] sm:$0xff]  ;;  %v19618_v57 = vmov 0  ;;  %vm9435_vm13 = vcmp.ge.f32.partialorder %v19621_v45, 1.0 }
 0x1fb   : > { %v19610_v43 = vsel %vm14781_vm15, 4294967295, %v19609_v43  ;;  %19613 = vst [vmem:[#allocation143_spill] sm:$0xff] %v14788_v25  ;;  %vm14792_vm0 = vmand %vm9436_vm11, %vm9452_vm1  ;;  %vm9516_vm9 = vcmp.ge.f32.partialorder %v19617_v33, 1.0  ;;  %vm9451_vm15 = vcmp.ge.f32.partialorder %v14771_v49, 1.0  ;;  %vm9531_vm10 = vcmp.le.f32.partialorder %v14771_v49, 0.0  ;;  %v3420_v33 = vpop.f32.mrf.mxu0  ;;  %12688 = vmatmul.mubr.f32.vlgmr.msra.gmra.mxu1 %v19353_v7 }
 0x1fc   : > { %19611 = vst [vmem:[#allocation142_spill] sm:$0xff] %v19610_v43  ;;  %v19615_v31 = vsel %vm14792_vm0, 4294967295, %v19614_v31  ;;  %v3594_v43 = vpop.f32.mrf.mxu1  ;;  %vm14798_vm5 = vmand %vm9516_vm9, %vm9532_vm3  ;;  %v14805_v28 = vadd.f32 %v3570_v15, %v3409_v14  ;;  %v3427_v35 = vadd.f32 %v12317_v20, %v14613_v58  ;;  %v19623_v30 = vmov 0  ;;  %v19630_v15 = vld [vmem:[#allocation102_spill] sm:$0xff]  ;;  %12738 = vmatpush3.msra.mxu1 %v14463_v6  ;;  %12690 = vmatprep.mubr.f32.mxu1 %v19354_v53 }
 0x1fd   : > { %19616 = vst [vmem:[#allocation144_spill] sm:$0xff] %v19615_v31  ;;  %v19619_v57 = vsel %vm14798_vm5, 4294967295, %v19618_v57  ;;  %vm14809_vm1 = vmand %vm9435_vm13, %vm9451_vm15  ;;  %v19626_v31 = vld [vmem:[#allocation77_spill] sm:$0xff]  ;;  %v19627_v42 = vmov 0  ;;  %vm9438_vm9 = vcmp.ge.f32.partialorder %v19630_v15, 1.0  ;;  %vm9454_vm5 = vcmp.ge.f32.partialorder %v14788_v25, 1.0  ;;  %12631 = vmatmul.mubr.f32.gmra.mxu0 %v19608_v1  ;;  %12789 = vmatprep.subr.mxu1 %v14463_v6 }
 0x1fe   : > { %19620 = vst [vmem:[#allocation145_spill] sm:$0xff] %v19619_v57  ;;  %19622 = vst [vmem:[#allocation146_spill] sm:$0xff] %v14805_v28  ;;  %v19624_v30 = vsel %vm14809_vm1, 4294967295, %v19623_v30  ;;  %vm9515_vm3 = vcmp.ge.f32.partialorder %v19626_v31, 1.0  ;;  %v12377_v57 = vpop.f32.mrf.mxu1  ;;  %vm9534_vm0 = vcmp.le.f32.partialorder %v14788_v25, 0.0  ;;  %v14822_v58 = vadd.f32 %v12343_v55, %v3427_v35  ;;  %v19645_v25 = vld [vmem:[#allocation79_spill] sm:$0xff] }
 0x1ff   : > { %19625 = vst [vmem:[#allocation147_spill] sm:$0xff] %v19624_v30  ;;  %vm14815_vm11 = vmand %vm9515_vm3, %vm9531_vm10  ;;  %v3421_v20 = vadd.f32 %v3420_v33, %v14620_v38  ;;  %v19632_v14 = vmov 0  ;;  %v19635_v30 = vld [vmem:[#allocation78_spill] sm:$0xff]  ;;  %v19636_v55 = vmov 0  ;;  %v19639_v38 = vld [vmem:[#allocation104_spill] sm:$0xff]  ;;  %12691 = vmatmul.mubr.f32.gmra.mxu1 %v19356_v23 }
 0x200   : > { %v19628_v42 = vsel %vm14815_vm11, 4294967295, %v19627_v42  ;;  %19631 = vst [vmem:[#allocation149_spill] sm:$0xff] %v14822_v58  ;;  %vm14827_vm15 = vmand %vm9438_vm9, %vm9454_vm5  ;;  %vm9518_vm10 = vcmp.ge.f32.partialorder %v19635_v30, 1.0  ;;  %v3902_v31 = vpop.f32.mrf.mxu1  ;;  %vm9437_vm3 = vcmp.ge.f32.partialorder %v19639_v38, 1.0  ;;  %vm9453_vm11 = vcmp.ge.f32.partialorder %v14805_v28, 1.0  ;;  %12693 = vmatprep.mubr.f32.mxu1 %v19357_v2 }
 0x201   : > { %19629 = vst [vmem:[#allocation148_spill] sm:$0xff] %v19628_v42  ;;  %v19633_v14 = vsel %vm14827_vm15, 4294967295, %v19632_v14  ;;  %v12320_v42 = vpop.f32.mrf.mxu0  ;;  %vm14834_vm13 = vmand %vm9518_vm10, %vm9534_vm0  ;;  %vm9533_vm5 = vcmp.le.f32.partialorder %v14805_v28, 0.0  ;;  %v14841_v33 = vadd.f32 %v3582_v24, %v3421_v20  ;;  %v19642_v30 = vmov 0  ;;  %v19649_v24 = vld [vmem:[#allocation106_spill] sm:$0xff] }
 0x202   : > { %19634 = vst [vmem:[#allocation150_spill] sm:$0xff] %v19633_v14  ;;  %v19637_v55 = vsel %vm14834_vm13, 4294967295, %v19636_v55  ;;  %v3439_v35 = vadd.f32 %v12320_v42, %v14626_v18  ;;  %v19641_v14 = vld [vmem:[#allocation27_spill] sm:$0xff]  ;;  %vm14845_vm9 = vmand %vm9437_vm3, %vm9453_vm11  ;;  %vm9517_vm0 = vcmp.ge.f32.partialorder %v19645_v25, 1.0  ;;  %v19646_v38 = vmov 0 }
 0x203   : > { %19638 = vst [vmem:[#allocation151_spill] sm:$0xff] %v19637_v55  ;;  %19640 = vst [vmem:[#allocation152_spill] sm:$0xff] %v14841_v33  ;;  %12661 = vmatprep.mubr.f32.mxu0 %v19641_v14  ;;  %v19643_v30 = vsel %vm14845_vm9, 4294967295, %v19642_v30  ;;  %v3432_v49 = vpop.f32.mrf.mxu0  ;;  %v12380_v55 = vpop.f32.mrf.mxu1  ;;  %vm9440_vm13 = vcmp.ge.f32.partialorder %v19649_v24, 1.0  ;;  %vm9456_vm15 = vcmp.ge.f32.partialorder %v14822_v58, 1.0  ;;  %vm9536_vm1 = vcmp.le.f32.partialorder %v14822_v58, 0.0  ;;  %12694 = vmatmul.mubr.f32.gmra.mxu1 %v19358_v22 }
 0x204   : > { %19644 = vst [vmem:[#allocation153_spill] sm:$0xff] %v19643_v30  ;;  %vm14851_vm10 = vmand %vm9517_vm0, %vm9533_vm5  ;;  %v14858_v18 = vadd.f32 %v12346_v52, %v3439_v35  ;;  %v3433_v42 = vadd.f32 %v3432_v49, %v14631_v48  ;;  %v19651_v20 = vmov 0  ;;  %v19654_v30 = vld [vmem:[#allocation80_spill] sm:$0xff]  ;;  %v19656_v14 = vmov 0  ;;  %v19661_v35 = vld [vmem:[#allocation29_spill] sm:$0xff]  ;;  %12696 = vmatprep.mubr.f32.mxu1 %v19360_v63 }
 0x205   : > { %v19647_v38 = vsel %vm14851_vm10, 4294967295, %v19646_v38  ;;  %vm14862_vm11 = vmand %vm9440_vm13, %vm9456_vm15  ;;  %vm9520_vm3 = vcmp.ge.f32.partialorder %v19654_v30, 1.0  ;;  %v12351_v25 = vpop.f32.mrf.mxu0  ;;  %v3914_v28 = vpop.f32.mrf.mxu1  ;;  %v19659_v52 = vld [vmem:[#allocation108_spill] sm:$0xff]  ;;  %vm9455_vm10 = vcmp.ge.f32.partialorder %v14841_v33, 1.0  ;;  %vm9535_vm9 = vcmp.le.f32.partialorder %v14841_v33, 0.0  ;;  %v19665_v30 = vld [vmem:[#allocation81_spill] sm:$0xff] }
 0x206   : > { %19648 = vst [vmem:[#allocation154_spill] sm:$0xff] %v19647_v38  ;;  %19650 = vst [vmem:[#allocation155_spill] sm:$0xff] %v14858_v18  ;;  %v19652_v20 = vsel %vm14862_vm11, 4294967295, %v19651_v20  ;;  %v19655_v38 = vld [vmem:[#allocation28_spill] sm:$0xff]  ;;  %vm9439_vm0 = vcmp.ge.f32.partialorder %v19659_v52, 1.0  ;;  %v14875_v48 = vadd.f32 %v3594_v43, %v3433_v42  ;;  %v14877_v49 = vadd.f32 %v12377_v57, %v12351_v25  ;;  %v19670_v57 = vld [vmem:[#allocation110_spill] sm:$0xff] }
 0x207   : > { %19653 = vst [vmem:[#allocation156_spill] sm:$0xff] %v19652_v20  ;;  %12662 = vmatmul.mubr.f32.vlgmr.msra.gmra.mxu0 %v19655_v38  ;;  %vm14868_vm5 = vmand %vm9520_vm3, %vm9536_vm1  ;;  %v19662_v20 = vmov 0  ;;  %vm9519_vm1 = vcmp.ge.f32.partialorder %v19665_v30, 1.0  ;;  %v12383_v58 = vpop.f32.mrf.mxu1  ;;  %v19666_v38 = vld [vmem:[#allocation116_spill] sm:$0xff]  ;;  %v19667_v43 = vmov 0  ;;  %vm9442_vm3 = vcmp.ge.f32.partialorder %v19670_v57, 1.0  ;;  %12697 = vmatmul.mubr.f32.gmra.mxu1 %v13364_v39 }
 0x208   : > { %v19657_v14 = vsel %vm14868_vm5, 4294967295, %v19656_v14  ;;  %19660 = vst [vmem:[#allocation158_spill] sm:$0xff] %v14875_v48  ;;  %12712 = vmatpush3.msra.mxu0 %v14476_v11  ;;  %12664 = vmatprep.mubr.f32.mxu0 %v19661_v35  ;;  %vm14881_vm15 = vmand %vm9439_vm0, %vm9455_vm10  ;;  %vm9458_vm5 = vcmp.ge.f32.partialorder %v14858_v18, 1.0  ;;  %vm9538_vm10 = vcmp.le.f32.partialorder %v14858_v18, 0.0  ;;  %v19671_v25 = vmov 0  ;;  %v19674_v42 = vld [vmem:[#allocation82_spill] sm:$0xff] }
 0x209   : > { %19658 = vst [vmem:[#allocation157_spill] sm:$0xff] %v19657_v14  ;;  %v19663_v20 = vsel %vm14881_vm15, 4294967295, %v19662_v20  ;;  %v3676_v14 = vpop.f32.mrf.mxu0  ;;  %12763 = vmatprep.subr.mxu0 %v19666_v38  ;;  %vm14888_vm13 = vmand %vm9519_vm1, %vm9535_vm9  ;;  %vm9522_vm15 = vcmp.ge.f32.partialorder %v19674_v42, 1.0  ;;  %v19675_v30 = vld [vmem:[#allocation31_spill] sm:$0xff]  ;;  %v19676_v33 = vmov 0  ;;  %v19679_v35 = vld [vmem:[#allocation112_spill] sm:$0xff]  ;;  %12699 = vmatprep.mubr.f32.mxu1 %v19363_v12 }
 0x20a   : > { %19664 = vst [vmem:[#allocation159_spill] sm:$0xff] %v19663_v20  ;;  %v19668_v43 = vsel %vm14888_vm13, 4294967295, %v19667_v43  ;;  %v14895_v11 = vadd.f32 %v3902_v31, %v3676_v14  ;;  %vm14898_vm0 = vmand %vm9442_vm3, %vm9458_vm5  ;;  %vm9441_vm1 = vcmp.ge.f32.partialorder %v19679_v35, 1.0  ;;  %vm9457_vm13 = vcmp.ge.f32.partialorder %v14875_v48, 1.0  ;;  %v19680_v14 = vld [vmem:[#allocation32_spill] sm:$0xff]  ;;  %v19684_v18 = vld [vmem:[#allocation83_spill] sm:$0xff] }
 0x20b   : > { %19669 = vst [vmem:[#allocation116_spill] sm:$0xff] %v19668_v43  ;;  %v19672_v25 = vsel %vm14898_vm0, 4294967295, %v19671_v25  ;;  %v12354_v20 = vpop.f32.mrf.mxu0  ;;  %12665 = vmatmul.mubr.f32.gmra.mxu0 %v19675_v30  ;;  %v3926_v43 = vpop.f32.mrf.mxu1  ;;  %vm14904_vm9 = vmand %vm9522_vm15, %vm9538_vm10  ;;  %vm9537_vm11 = vcmp.le.f32.partialorder %v14875_v48, 0.0  ;;  %v19681_v42 = vmov 0  ;;  %vm9521_vm15 = vcmp.ge.f32.partialorder %v19684_v18, 1.0  ;;  %v19689_v18 = vld [vmem:[#allocation34_spill] sm:$0xff]  ;;  %12700 = vmatmul.mubr.f32.gmra.mxu1 %v13430_v9 }
 0x20c   : > { %19673 = vst [vmem:[#allocation160_spill] sm:$0xff] %v19672_v25  ;;  %v19677_v33 = vsel %vm14904_vm9, 4294967295, %v19676_v33  ;;  %v14911_v31 = vadd.f32 %v12380_v55, %v12354_v20  ;;  %12667 = vmatprep.mubr.f32.mxu0 %v19680_v14  ;;  %v278_v25 = vld [vmem:[%s18728_s1 + $0x30] sm:$0xff]  ;;  %vm14917_vm5 = vmand %vm9441_vm1, %vm9457_vm13  ;;  %v19685_v48 = vmov 0  ;;  %v19688_v14 = vld [vmem:[#allocation33_spill] sm:$0xff]  ;;  %12702 = vmatprep.mubr.f32.mxu1 %v19554_v54  ;;  %vm9220_vm13 = vcmp.ge.f32.partialorder %v19534_v60, 0.0 }
 0x20d   : > { %19678 = vst [vmem:[#allocation161_spill] sm:$0xff] %v19677_v33  ;;  %v19682_v42 = vsel %vm14917_vm5, 4294967295, %v19681_v42  ;;  %v3696_v33 = vpop.f32.mrf.mxu0  ;;  %v12386_v30 = vpop.f32.mrf.mxu1  ;;  %vm14923_vm3 = vmand %vm9521_vm15, %vm9537_vm11  ;;  %v14931_v57 = vand.u32 4294901760, %v278_v25  ;;  %vm9252_vm1 = vcmp.le.f32.partialorder %v19534_v60, 1.0  ;;  %vm9219_vm5 = vcmp.ge.f32.partialorder %v19540_v37, 0.0 }
 0x20e   : > { %19683 = vst [vmem:[#allocation162_spill] sm:$0xff] %v19682_v42  ;;  %v19686_v48 = vsel %vm14923_vm3, 4294967295, %v19685_v48  ;;  %v14927_v55 = vadd.f32 %v3914_v28, %v3696_v33  ;;  %v19690_v33 = vld [vmem:[#allocation50_spill] sm:$0xff]  ;;  %v19729_v60 = vmov 0 }
 0x20f   : > { %19687 = vst [vmem:[#allocation163_spill] sm:$0xff] %v19686_v48  ;;  %v12357_v20 = vpop.f32.mrf.mxu0  ;;  %12668 = vmatmul.mubr.f32.gmra.mxu0 %v19688_v14  ;;  %v3938_v35 = vpop.f32.mrf.mxu1  ;;  %v14942_v14 = vsub.f32 %v278_v25, %v14931_v57  ;;  %12703 = vmatmul.mubr.f32.gmra.mxu1 %v19568_v62 }
 0x210   : > { %v14933_v42 = vadd.f32 %v12383_v58, %v12357_v20  ;;  %12670 = vmatprep.mubr.f32.mxu0 %v19689_v18  ;;  %v19691_v58 = vld [vmem:[#allocation54_spill] sm:$0xff]  ;;  %12705 = vmatprep.mubr.f32.mxu1 %v19574_v26 }
 0x211   : > { %v3716_v52 = vpop.f32.mrf.mxu0  ;;  %v12389_v24 = vpop.f32.mrf.mxu1  ;;  %v14953_v54 = vand.u32 4294901760, %v14942_v14 }
 0x212   : > { %v14937_v15 = vadd.f32 %v3926_v43, %v3716_v52  ;;  %v19692_v43 = vld [vmem:[#allocation57_spill] sm:$0xff] }
 0x213   : > { %v12360_v28 = vpop.f32.mrf.mxu0  ;;  %12671 = vmatmul.mubr.f32.gmra.mxu0 %v19690_v33  ;;  %v3950_v48 = vpop.f32.mrf.mxu1  ;;  %19693 = vst [vmem:[#allocation164_spill] sm:$0xff] %v14953_v54  ;;  %12706 = vmatmul.mubr.f32.gmra.mxu1 %v19588_v4  ;;  %v7137_v26 = vsub.f32 %v14942_v14, %v14953_v54  ;;  %v19700_v54 = vld [vmem:[#allocation15_spill] sm:$0xff] }
 0x214   : > { %v14944_v45 = vadd.f32 %v12386_v30, %v12360_v28  ;;  %12673 = vmatprep.mubr.f32.mxu0 %v19691_v58  ;;  %v19694_v30 = vld [vmem:[#allocation60_spill] sm:$0xff]  ;;  %12708 = vmatprep.mubr.f32.mxu1 %v19594_v10  ;;  %v19698_v10 = vld [vmem:[#allocation65_spill] sm:$0xff] }
 0x215   : > { %v3736_v20 = vpop.f32.mrf.mxu0  ;;  %v12392_v18 = vpop.f32.mrf.mxu1  ;;  %v14973_v9 = vand.u32 4294901760, %v7137_v26 }
 0x216   : > { %v14948_v41 = vadd.f32 %v3938_v35, %v3736_v20  ;;  %v19695_v20 = vld [vmem:[#allocation62_spill] sm:$0xff] }
 0x217   : > { %v12363_v52 = vpop.f32.mrf.mxu0  ;;  %12674 = vmatmul.mubr.f32.gmra.mxu0 %v19692_v43  ;;  %v3962_v33 = vpop.f32.mrf.mxu1  ;;  %12709 = vmatmul.mubr.f32.gmra.mxu1 %v19608_v1 }
 0x218   : > { %v14955_v25 = vadd.f32 %v12389_v24, %v12363_v52  ;;  %12676 = vmatprep.mubr.f32.mxu0 %v19694_v30  ;;  %v19696_v24 = vld [vmem:[#allocation64_spill] sm:$0xff] }
 0x219   : > { %v3756_v28 = vpop.f32.mrf.mxu0  ;;  %v12395_v58 = vpop.f32.mrf.mxu1 }
 0x21a   : > { %v14959_v62 = vadd.f32 %v3950_v48, %v3756_v28  ;;  %v19697_v48 = vld [vmem:[#allocation14_spill] sm:$0xff] }
 0x21b   : > { %v12366_v35 = vpop.f32.mrf.mxu0  ;;  %12677 = vmatmul.mubr.f32.gmra.mxu0 %v19695_v20  ;;  %v3974_v43 = vpop.f32.mrf.mxu1  ;;  %12739 = vmatprep.mubr.f32.mxu1 %v19697_v48  ;;  %v19703_v48 = vld [vmem:[#allocation22_spill] sm:$0xff] }
 0x21c   : > { %v14965_v3 = vadd.f32 %v12392_v18, %v12366_v35  ;;  %12679 = vmatprep.mubr.f32.mxu0 %v19696_v24  ;;  %v19699_v18 = vld [vmem:[#allocation66_spill] sm:$0xff]  ;;  %12740 = vmatmul.mubr.f32.vlgmr.msra.gmra.mxu1 %v19700_v54 }
 0x21d   : > { %v3776_v52 = vpop.f32.mrf.mxu0  ;;  %v12398_v30 = vpop.f32.mrf.mxu1  ;;  %12790 = vmatpush3.msra.mxu1 %v14463_v6  ;;  %12742 = vmatprep.mubr.f32.mxu1 %v19506_v32 }
 0x21e   : > { %v14969_v4 = vadd.f32 %v3962_v33, %v3776_v52  ;;  %v19701_v52 = vld [vmem:[#allocation67_spill] sm:$0xff]  ;;  %12841 = vmatprep.subr.mxu1 %v14973_v9 }
 0x21f   : > { %v12369_v28 = vpop.f32.mrf.mxu0  ;;  %12680 = vmatmul.mubr.f32.gmra.mxu0 %v19698_v10  ;;  %v3986_v20 = vpop.f32.mrf.mxu1 }
 0x220   : > { %v14975_v5 = vadd.f32 %v12395_v58, %v12369_v28  ;;  %12682 = vmatprep.mubr.f32.mxu0 %v19699_v18  ;;  %v19702_v58 = vld [vmem:[#allocation7_spill] sm:$0xff]  ;;  %12743 = vmatmul.mubr.f32.gmra.mxu1 %v19703_v48  ;;  %v19705_v48 = vld [vmem:[#allocation30_spill] sm:$0xff] }
 0x221   : > { %v3796_v35 = vpop.f32.mrf.mxu0  ;;  %v12429_v24 = vpop.f32.mrf.mxu1  ;;  %12745 = vmatprep.mubr.f32.mxu1 %v13377_v44  ;;  %v19704_v44 = vld [vmem:[#allocation17_spill] sm:$0xff] }
 0x222   : > { %v14979_v12 = vadd.f32 %v3974_v43, %v3796_v35 }
 0x223   : > { %v12372_v33 = vpop.f32.mrf.mxu0  ;;  %12683 = vmatmul.mubr.f32.gmra.mxu0 %v19701_v52  ;;  %v4245_v10 = vpop.f32.mrf.mxu1 }
 0x224   : > { %v14985_v26 = vadd.f32 %v12398_v30, %v12372_v33  ;;  %12713 = vmatprep.mubr.f32.mxu0 %v19702_v58  ;;  %12746 = vmatmul.mubr.f32.gmra.mxu1 %v19511_v16 }
 0x225   : > { %v3816_v28 = vpop.f32.mrf.mxu0  ;;  %v12432_v18 = vpop.f32.mrf.mxu1  ;;  %12748 = vmatprep.mubr.f32.mxu1 %v13383_v46 }
 0x226   : > { %v14989_v43 = vadd.f32 %v3986_v20, %v3816_v28 }
 0x227   : > { %v12403_v6 = vpop.f32.mrf.mxu0  ;;  %12714 = vmatmul.mubr.f32.vlgmr.msra.gmra.mxu0 %v19509_v29  ;;  %v4261_v35 = vpop.f32.mrf.mxu1 }
 0x228   : > { %v4074_v52 = vadd.f32 %v12403_v6, %v14877_v49  ;;  %12764 = vmatpush3.msra.mxu0 %v19666_v38  ;;  %12716 = vmatprep.mubr.f32.mxu0 %v19510_v27 }
 0x229   : > { %v4066_v30 = vpop.f32.mrf.mxu0  ;;  %v12435_v33 = vpop.f32.mrf.mxu1  ;;  %12815 = vmatprep.subr.mxu0 %v14931_v57  ;;  %12749 = vmatmul.mubr.f32.gmra.mxu1 %v19705_v48 }
 0x22a   : > { %v14998_v20 = vadd.f32 %v12429_v24, %v4074_v52  ;;  %v4067_v28 = vadd.f32 %v4066_v30, %v14895_v11  ;;  %12751 = vmatprep.mubr.f32.mxu1 %v19513_v51  ;;  %v19706_v30 = vld [vmem:[#allocation19_spill] sm:$0xff] }
 0x22b   : > { %v12406_v29 = vpop.f32.mrf.mxu0  ;;  %12717 = vmatmul.mubr.f32.gmra.mxu0 %v19704_v44  ;;  %v4277_v49 = vpop.f32.mrf.mxu1 }
 0x22c   : > { %v15003_v6 = vadd.f32 %v4245_v10, %v4067_v28  ;;  %v4088_v38 = vadd.f32 %v12406_v29, %v14911_v31  ;;  %12719 = vmatprep.mubr.f32.mxu0 %v13356_v36  ;;  %v19707_v36 = vld [vmem:[#allocation46_spill] sm:$0xff] }
 0x22d   : > { %v4080_v27 = vpop.f32.mrf.mxu0  ;;  %v12438_v16 = vpop.f32.mrf.mxu1  ;;  %12752 = vmatmul.mubr.f32.gmra.mxu1 %v19707_v36 }
 0x22e   : > { %v15008_v24 = vadd.f32 %v12432_v18, %v4088_v38  ;;  %v4081_v11 = vadd.f32 %v4080_v27, %v14927_v55  ;;  %12754 = vmatprep.mubr.f32.mxu1 %v19517_v56  ;;  %v19708_v38 = vld [vmem:[#allocation26_spill] sm:$0xff] }
 0x22f   : > { %v12409_v52 = vpop.f32.mrf.mxu0  ;;  %12720 = vmatmul.mubr.f32.gmra.mxu0 %v19706_v30  ;;  %v4293_v44 = vpop.f32.mrf.mxu1 }
 0x230   : > { %v15013_v10 = vadd.f32 %v4261_v35, %v4081_v11  ;;  %v4102_v29 = vadd.f32 %v12409_v52, %v14933_v42  ;;  %12722 = vmatprep.mubr.f32.mxu0 %v19515_v40  ;;  %v19709_v40 = vld [vmem:[#allocation51_spill] sm:$0xff] }
 0x231   : > { %v4094_v31 = vpop.f32.mrf.mxu0  ;;  %v12441_v28 = vpop.f32.mrf.mxu1  ;;  %12755 = vmatmul.mubr.f32.gmra.mxu1 %v19709_v40 }
 0x232   : > { %v15018_v18 = vadd.f32 %v12435_v33, %v4102_v29  ;;  %v4095_v27 = vadd.f32 %v4094_v31, %v14937_v15  ;;  %12757 = vmatprep.mubr.f32.mxu1 %v19521_v19  ;;  %v19710_v31 = vld [vmem:[#allocation40_spill] sm:$0xff] }
 0x233   : > { %v12412_v55 = vpop.f32.mrf.mxu0  ;;  %12723 = vmatmul.mubr.f32.gmra.mxu0 %v19708_v38  ;;  %v4309_v30 = vpop.f32.mrf.mxu1 }
 0x234   : > { %v15023_v35 = vadd.f32 %v4277_v49, %v4095_v27  ;;  %v4116_v42 = vadd.f32 %v12412_v55, %v14944_v45  ;;  %12725 = vmatprep.mubr.f32.mxu0 %v19519_v61  ;;  %v19711_v61 = vld [vmem:[#allocation58_spill] sm:$0xff] }
 0x235   : > { %v4108_v11 = vpop.f32.mrf.mxu0  ;;  %v12444_v52 = vpop.f32.mrf.mxu1  ;;  %12758 = vmatmul.mubr.f32.gmra.mxu1 %v19711_v61 }
 0x236   : > { %v15028_v33 = vadd.f32 %v12438_v16, %v4116_v42  ;;  %v4109_v15 = vadd.f32 %v4108_v11, %v14948_v41  ;;  %12760 = vmatprep.mubr.f32.mxu1 %v19525_v0 }
 0x237   : > { %v12415_v29 = vpop.f32.mrf.mxu0  ;;  %12726 = vmatmul.mubr.f32.gmra.mxu0 %v19710_v31  ;;  %v4325_v38 = vpop.f32.mrf.mxu1 }
 0x238   : > { %v15033_v49 = vadd.f32 %v4293_v44, %v4109_v15  ;;  %v4130_v45 = vadd.f32 %v12415_v29, %v14955_v25  ;;  %12728 = vmatprep.mubr.f32.mxu0 %v19523_v21 }
 0x239   : > { %v4122_v27 = vpop.f32.mrf.mxu0  ;;  %v12447_v55 = vpop.f32.mrf.mxu1  ;;  %12761 = vmatmul.mubr.f32.gmra.mxu1 %v19528_v50 }
 0x23a   : > { %v15038_v16 = vadd.f32 %v12441_v28, %v4130_v45  ;;  %v4123_v41 = vadd.f32 %v4122_v27, %v14959_v62  ;;  %12791 = vmatprep.mubr.f32.mxu1 %v19350_v8 }
 0x23b   : > { %v12418_v42 = vpop.f32.mrf.mxu0  ;;  %12729 = vmatmul.mubr.f32.gmra.mxu0 %v19526_v13  ;;  %v4341_v11 = vpop.f32.mrf.mxu1 }
 0x23c   : > { %v15043_v44 = vadd.f32 %v4309_v30, %v4123_v41  ;;  %v4144_v25 = vadd.f32 %v12418_v42, %v14965_v3  ;;  %12731 = vmatprep.mubr.f32.mxu0 %v19527_v47 }
 0x23d   : > { %v4136_v15 = vpop.f32.mrf.mxu0  ;;  %v12450_v29 = vpop.f32.mrf.mxu1  ;;  %12792 = vmatmul.mubr.f32.vlgmr.msra.gmra.mxu1 %v19353_v7 }
 0x23e   : > { %v15048_v28 = vadd.f32 %v12444_v52, %v4144_v25  ;;  %v4137_v62 = vadd.f32 %v4136_v15, %v14969_v4  ;;  %12842 = vmatpush3.msra.mxu1 %v14973_v9  ;;  %12794 = vmatprep.mubr.f32.mxu1 %v19354_v53 }
 0x23f   : > { %v12421_v45 = vpop.f32.mrf.mxu0  ;;  %12732 = vmatmul.mubr.f32.gmra.mxu0 %v19529_v59  ;;  %v4357_v27 = vpop.f32.mrf.mxu1  ;;  %12893 = vmatprep.subr.mxu1 %v14931_v57 }
 0x240   : > { %v15053_v30 = vadd.f32 %v4325_v38, %v4137_v62  ;;  %v4158_v3 = vadd.f32 %v12421_v45, %v14975_v5  ;;  %12734 = vmatprep.mubr.f32.mxu0 %v19530_v17 }
 0x241   : > { %v4150_v41 = vpop.f32.mrf.mxu0  ;;  %v12481_v42 = vpop.f32.mrf.mxu1  ;;  %12795 = vmatmul.mubr.f32.gmra.mxu1 %v19356_v23 }
 0x242   : > { %v15058_v52 = vadd.f32 %v12447_v55, %v4158_v3  ;;  %v4151_v4 = vadd.f32 %v4150_v41, %v14979_v12  ;;  %12797 = vmatprep.mubr.f32.mxu1 %v19357_v2 }
 0x243   : > { %v12424_v25 = vpop.f32.mrf.mxu0  ;;  %12735 = vmatmul.mubr.f32.gmra.mxu0 %v19531_v34  ;;  %v4601_v38 = vpop.f32.mrf.mxu1 }
 0x244   : > { %v15065_v5 = vadd.f32 %v4341_v11, %v4151_v4  ;;  %v4172_v15 = vadd.f32 %v12424_v25, %v14985_v26  ;;  %12765 = vmatprep.mubr.f32.mxu0 %v19350_v8 }
 0x245   : > { %v4164_v55 = vpop.f32.mrf.mxu0  ;;  %v12484_v62 = vpop.f32.mrf.mxu1  ;;  %12798 = vmatmul.mubr.f32.gmra.mxu1 %v19358_v22 }
 0x246   : > { %v15070_v12 = vadd.f32 %v12450_v29, %v4172_v15  ;;  %v4165_v9 = vadd.f32 %v4164_v55, %v14989_v43  ;;  %12800 = vmatprep.mubr.f32.mxu1 %v19360_v63  ;;  %v19712_v55 = vmov 0 }
 0x247   : > { %v12455_v45 = vpop.f32.mrf.mxu0  ;;  %12766 = vmatmul.mubr.f32.vlgmr.msra.gmra.mxu0 %v19353_v7  ;;  %v4613_v3 = vpop.f32.mrf.mxu1 }
 0x248   : > { %v15075_v11 = vadd.f32 %v4357_v27, %v4165_v9  ;;  %v4446_v26 = vadd.f32 %v12455_v45, %v14998_v20  ;;  %12816 = vmatpush3.msra.mxu0 %v14931_v57  ;;  %12768 = vmatprep.mubr.f32.mxu0 %v19354_v53  ;;  %v19716_v9 = vld [vmem:[#allocation35_spill] sm:$0xff] }
 0x249   : > { %v4439_v41 = vpop.f32.mrf.mxu0  ;;  %v12487_v4 = vpop.f32.mrf.mxu1  ;;  %12867 = vmatprep.subr.mxu0 %v14942_v14  ;;  %12801 = vmatmul.mubr.f32.gmra.mxu1 %v13364_v39 }
 0x24a   : > { %v15082_v43 = vadd.f32 %v12481_v42, %v4446_v26  ;;  %v4440_v29 = vadd.f32 %v4439_v41, %v15003_v6  ;;  %12803 = vmatprep.mubr.f32.mxu1 %v19716_v9  ;;  %v19717_v41 = vmov 0 }
 0x24b   : > { %v12458_v27 = vpop.f32.mrf.mxu0  ;;  %12769 = vmatmul.mubr.f32.gmra.mxu0 %v19356_v23  ;;  %v4625_v20 = vpop.f32.mrf.mxu1 }
 0x24c   : > { %vm9204_vm11 = vcmp.le.f32.partialorder %v15082_v43, 0.0  ;;  %v15089_v25 = vadd.f32 %v4601_v38, %v4440_v29  ;;  %v4458_v15 = vadd.f32 %v12458_v27, %v15008_v24  ;;  %12771 = vmatprep.mubr.f32.mxu0 %v19357_v2  ;;  %v19720_v29 = vld [vmem:[#allocation86_spill] sm:$0xff] }
 0x24d   : > { %vm9236_vm10 = vmand %vm9204_vm11, %vm9220_vm13  ;;  %v4451_v6 = vpop.f32.mrf.mxu0  ;;  %v12490_v42 = vpop.f32.mrf.mxu1  ;;  %vm9251_vm13 = vcmp.le.f32.partialorder %v19540_v37, 1.0  ;;  %vm9222_vm9 = vcmp.ge.f32.partialorder %v19720_v29, 0.0  ;;  %v19723_v37 = vmov 0 }
 0x24e   : > { %vm15095_vm15 = vmand %vm9236_vm10, %vm9252_vm1  ;;  %vm9203_vm3 = vcmp.le.f32.partialorder %v15089_v25, 0.0  ;;  %v15101_v38 = vadd.f32 %v12484_v62, %v4458_v15  ;;  %v4452_v24 = vadd.f32 %v4451_v6, %v15013_v10  ;;  %v19722_v6 = vld [vmem:[#allocation36_spill] sm:$0xff] }
 0x24f   : > { %v19713_v55 = vsel %vm15095_vm15, 4294967295, %v19712_v55  ;;  %vm9235_vm11 = vmand %vm9203_vm3, %vm9219_vm5  ;;  %v12461_v45 = vpop.f32.mrf.mxu0  ;;  %12772 = vmatmul.mubr.f32.gmra.mxu0 %v19358_v22  ;;  %v4637_v26 = vpop.f32.mrf.mxu1  ;;  %vm9254_vm3 = vcmp.le.f32.partialorder %v19720_v29, 1.0  ;;  %12804 = vmatmul.mubr.f32.gmra.mxu1 %v19722_v6 }
 0x250   : > { %19714 = vst [vmem:[#allocation165_spill] sm:$0xff] %v19713_v55  ;;  %19715 = vst [vmem:[#allocation166_spill] sm:$0xff] %v15101_v38  ;;  %vm9206_vm1 = vcmp.le.f32.partialorder %v15101_v38, 0.0  ;;  %v15113_v62 = vadd.f32 %v4613_v3, %v4452_v24  ;;  %v4470_v10 = vadd.f32 %v12461_v45, %v15018_v18  ;;  %12774 = vmatprep.mubr.f32.mxu0 %v19360_v63  ;;  %v19728_v24 = vld [vmem:[#allocation37_spill] sm:$0xff]  ;;  %v15328_v55 = vpop.permute.xlu1 %9752 }
 0x251   : > { %vm15107_vm10 = vmand %vm9235_vm11, %vm9251_vm13  ;;  %v4463_v27 = vpop.f32.mrf.mxu0  ;;  %v12493_v15 = vpop.f32.mrf.mxu1  ;;  %12806 = vmatprep.mubr.f32.mxu1 %v19728_v24  ;;  %19809 = vst [vmem:[#allocation195_spill] sm:$0xff] %v15328_v55 }
 0x252   : > { %v19718_v41 = vsel %vm15107_vm10, 4294967295, %v19717_v41  ;;  %19721 = vst [vmem:[#allocation168_spill] sm:$0xff] %v15113_v62  ;;  %vm9238_vm5 = vmand %vm9206_vm1, %vm9222_vm9  ;;  %vm9205_vm13 = vcmp.le.f32.partialorder %v15113_v62, 0.0  ;;  %v15125_v3 = vadd.f32 %v12487_v4, %v4470_v10  ;;  %v4464_v18 = vadd.f32 %v4463_v27, %v15023_v35 }
 0x253   : > { %19719 = vst [vmem:[#allocation167_spill] sm:$0xff] %v19718_v41  ;;  %vm15119_vm11 = vmand %vm9238_vm5, %vm9254_vm3  ;;  %v19726_v41 = vld [vmem:[#allocation88_spill] sm:$0xff]  ;;  %v12464_v45 = vpop.f32.mrf.mxu0  ;;  %12775 = vmatmul.mubr.f32.gmra.mxu0 %v13364_v39  ;;  %v4649_v29 = vpop.f32.mrf.mxu1  ;;  %v19735_v62 = vmov 0 }
 0x254   : > { %v19724_v37 = vsel %vm15119_vm11, 4294967295, %v19723_v37  ;;  %vm9221_vm0 = vcmp.ge.f32.partialorder %v19726_v41, 0.0  ;;  %19727 = vst [vmem:[#allocation170_spill] sm:$0xff] %v15125_v3  ;;  %vm9253_vm1 = vcmp.le.f32.partialorder %v19726_v41, 1.0  ;;  %vm9208_vm3 = vcmp.le.f32.partialorder %v15125_v3, 0.0  ;;  %12777 = vmatprep.mubr.f32.mxu0 %v19716_v9  ;;  %v19734_v41 = vld [vmem:[#allocation38_spill] sm:$0xff] }
 0x255   : > { %19725 = vst [vmem:[#allocation169_spill] sm:$0xff] %v19724_v37  ;;  %vm9237_vm9 = vmand %vm9205_vm13, %vm9221_vm0  ;;  %v19732_v37 = vld [vmem:[#allocation90_spill] sm:$0xff]  ;;  %v15137_v4 = vadd.f32 %v4625_v20, %v4464_v18  ;;  %v4482_v35 = vadd.f32 %v12464_v45, %v15028_v33  ;;  %v4475_v10 = vpop.f32.mrf.mxu0  ;;  %v12496_v27 = vpop.f32.mrf.mxu1  ;;  %12807 = vmatmul.mubr.f32.gmra.mxu1 %v19734_v41  ;;  %v19741_v3 = vmov 0 }
 0x256   : > { %vm15131_vm5 = vmand %vm9237_vm9, %vm9253_vm1  ;;  %vm9224_vm14 = vcmp.ge.f32.partialorder %v19732_v37, 0.0  ;;  %vm9256_vm13 = vcmp.le.f32.partialorder %v19732_v37, 1.0  ;;  %v4476_v33 = vadd.f32 %v4475_v10, %v15033_v49  ;;  %v19740_v18 = vld [vmem:[#allocation42_spill] sm:$0xff] }
 0x257   : > { %v19730_v60 = vsel %vm15131_vm5, 4294967295, %v19729_v60  ;;  %19733 = vst [vmem:[#allocation172_spill] sm:$0xff] %v15137_v4  ;;  %vm9240_vm0 = vmand %vm9208_vm3, %vm9224_vm14  ;;  %vm9207_vm1 = vcmp.le.f32.partialorder %v15137_v4, 0.0  ;;  %v15149_v20 = vadd.f32 %v12490_v42, %v4482_v35  ;;  %12809 = vmatprep.mubr.f32.mxu1 %v19740_v18  ;;  %v12467_v45 = vpop.f32.mrf.mxu0  ;;  %12778 = vmatmul.mubr.f32.gmra.mxu0 %v19722_v6  ;;  %v4661_v37 = vpop.f32.mrf.mxu1  ;;  %v19747_v4 = vmov 0 }
 0x258   : > { %19731 = vst [vmem:[#allocation171_spill] sm:$0xff] %v19730_v60  ;;  %vm15143_vm9 = vmand %vm9240_vm0, %vm9256_vm13  ;;  %v19738_v60 = vld [vmem:[#allocation92_spill] sm:$0xff]  ;;  %v15161_v42 = vadd.f32 %v4637_v26, %v4476_v33  ;;  %v4494_v49 = vadd.f32 %v12467_v45, %v15038_v16  ;;  %12780 = vmatprep.mubr.f32.mxu0 %v19728_v24  ;;  %v19752_v33 = vld [vmem:[#allocation49_spill] sm:$0xff] }
 0x259   : > { %v19736_v62 = vsel %vm15143_vm9, 4294967295, %v19735_v62  ;;  %vm9223_vm12 = vcmp.ge.f32.partialorder %v19738_v60, 0.0  ;;  %19739 = vst [vmem:[#allocation174_spill] sm:$0xff] %v15149_v20  ;;  %vm9255_vm3 = vcmp.le.f32.partialorder %v19738_v60, 1.0  ;;  %vm9210_vm13 = vcmp.le.f32.partialorder %v15149_v20, 0.0  ;;  %v4487_v35 = vpop.f32.mrf.mxu0  ;;  %v12499_v10 = vpop.f32.mrf.mxu1  ;;  %v19746_v60 = vld [vmem:[#allocation44_spill] sm:$0xff] }
 0x25a   : > { %19737 = vst [vmem:[#allocation173_spill] sm:$0xff] %v19736_v62  ;;  %vm9239_vm14 = vmand %vm9207_vm1, %vm9223_vm12  ;;  %v19744_v62 = vld [vmem:[#allocation94_spill] sm:$0xff]  ;;  %12810 = vmatmul.mubr.f32.gmra.mxu1 %v19746_v60  ;;  %v15173_v26 = vadd.f32 %v12493_v15, %v4494_v49  ;;  %v4488_v16 = vadd.f32 %v4487_v35, %v15043_v44  ;;  %v19753_v20 = vmov 0 }
 0x25b   : > { %vm15155_vm0 = vmand %vm9239_vm14, %vm9255_vm3  ;;  %vm9226_vm2 = vcmp.ge.f32.partialorder %v19744_v62, 0.0  ;;  %19745 = vst [vmem:[#allocation176_spill] sm:$0xff] %v15161_v42  ;;  %vm9258_vm1 = vcmp.le.f32.partialorder %v19744_v62, 1.0  ;;  %vm9209_vm3 = vcmp.le.f32.partialorder %v15161_v42, 0.0  ;;  %12812 = vmatprep.mubr.f32.mxu1 %v19752_v33  ;;  %v12470_v45 = vpop.f32.mrf.mxu0  ;;  %12781 = vmatmul.mubr.f32.gmra.mxu0 %v19734_v41  ;;  %v4673_v62 = vpop.f32.mrf.mxu1 }
 0x25c   : > { %v19742_v3 = vsel %vm15155_vm0, 4294967295, %v19741_v3  ;;  %vm9242_vm12 = vmand %vm9210_vm13, %vm9226_vm2  ;;  %19751 = vst [vmem:[#allocation178_spill] sm:$0xff] %v15173_v26  ;;  %v15185_v15 = vadd.f32 %v4649_v29, %v4488_v16  ;;  %v4506_v44 = vadd.f32 %v12470_v45, %v15048_v28  ;;  %12783 = vmatprep.mubr.f32.mxu0 %v19740_v18 }
 0x25d   : > { %19743 = vst [vmem:[#allocation175_spill] sm:$0xff] %v19742_v3  ;;  %vm15167_vm14 = vmand %vm9242_vm12, %vm9258_vm1  ;;  %v19750_v3 = vld [vmem:[#allocation96_spill] sm:$0xff]  ;;  %vm9212_vm1 = vcmp.le.f32.partialorder %v15173_v26, 0.0  ;;  %v4499_v49 = vpop.f32.mrf.mxu0  ;;  %v12502_v35 = vpop.f32.mrf.mxu1 }
 0x25e   : > { %v19748_v4 = vsel %vm15167_vm14, 4294967295, %v19747_v4  ;;  %vm9225_vm7 = vcmp.ge.f32.partialorder %v19750_v3, 0.0  ;;  %vm9257_vm13 = vcmp.le.f32.partialorder %v19750_v3, 1.0  ;;  %19757 = vst [vmem:[#allocation180_spill] sm:$0xff] %v15185_v15  ;;  %12813 = vmatmul.mubr.f32.gmra.mxu1 %v19608_v1  ;;  %v19758_v3 = vmov 0 }
 0x25f   : > { %19749 = vst [vmem:[#allocation177_spill] sm:$0xff] %v19748_v4  ;;  %vm9241_vm2 = vmand %vm9209_vm3, %vm9225_vm7  ;;  %v19756_v4 = vld [vmem:[#allocation98_spill] sm:$0xff]  ;;  %v15197_v29 = vadd.f32 %v12496_v27, %v4506_v44  ;;  %v4500_v28 = vadd.f32 %v4499_v49, %v15053_v30  ;;  %12843 = vmatprep.mubr.f32.mxu1 %v19350_v8  ;;  %v12473_v16 = vpop.f32.mrf.mxu0  ;;  %12784 = vmatmul.mubr.f32.gmra.mxu0 %v19746_v60  ;;  %v4685_v45 = vpop.f32.mrf.mxu1 }
 0x260   : > { %vm15179_vm12 = vmand %vm9241_vm2, %vm9257_vm13  ;;  %vm9228_vm14 = vcmp.ge.f32.partialorder %v19756_v4, 0.0  ;;  %vm9260_vm3 = vcmp.le.f32.partialorder %v19756_v4, 1.0  ;;  %vm9211_vm13 = vcmp.le.f32.partialorder %v15185_v15, 0.0  ;;  %v19763_v4 = vmov 0  ;;  %12786 = vmatprep.mubr.f32.mxu0 %v19752_v33 }
 0x261   : > { %v19754_v20 = vsel %vm15179_vm12, 4294967295, %v19753_v20  ;;  %vm9244_vm7 = vmand %vm9212_vm1, %vm9228_vm14  ;;  %19762 = vst [vmem:[#allocation182_spill] sm:$0xff] %v15197_v29  ;;  %v15209_v27 = vadd.f32 %v4661_v37, %v4500_v28  ;;  %v4518_v30 = vadd.f32 %v12473_v16, %v15058_v52  ;;  %v4511_v44 = vpop.f32.mrf.mxu0  ;;  %v12533_v49 = vpop.f32.mrf.mxu1 }
 0x262   : > { %19755 = vst [vmem:[#allocation179_spill] sm:$0xff] %v19754_v20  ;;  %vm15191_vm2 = vmand %vm9244_vm7, %vm9260_vm3  ;;  %v19761_v20 = vld [vmem:[#allocation100_spill] sm:$0xff]  ;;  %vm9214_vm3 = vcmp.le.f32.partialorder %v15197_v29, 0.0  ;;  %12844 = vmatmul.mubr.f32.vlgmr.msra.gmra.mxu1 %v19353_v7  ;;  %v4512_v52 = vadd.f32 %v4511_v44, %v15065_v5  ;;  %v19776_v5 = vld [vmem:[#allocation106_spill] sm:$0xff] }
 0x263   : > { %v19759_v3 = vsel %vm15191_vm2, 4294967295, %v19758_v3  ;;  %vm9227_vm12 = vcmp.ge.f32.partialorder %v19761_v20, 0.0  ;;  %vm9259_vm1 = vcmp.le.f32.partialorder %v19761_v20, 1.0  ;;  %19767 = vst [vmem:[#allocation184_spill] sm:$0xff] %v15209_v27  ;;  %v19768_v20 = vmov 0  ;;  %12894 = vmatpush3.msra.mxu1 %v14931_v57  ;;  %12846 = vmatprep.mubr.f32.mxu1 %v19354_v53  ;;  %v12476_v28 = vpop.f32.mrf.mxu0  ;;  %v4993_v16 = vpop.f32.mrf.mxu1  ;;  %v19778_v44 = vld [vmem:[#allocation27_spill] sm:$0xff] }
 0x264   : > { %19760 = vst [vmem:[#allocation181_spill] sm:$0xff] %v19759_v3  ;;  %vm9243_vm14 = vmand %vm9211_vm13, %vm9227_vm12  ;;  %v19766_v3 = vld [vmem:[#allocation102_spill] sm:$0xff]  ;;  %v15221_v37 = vadd.f32 %v12499_v10, %v4518_v30  ;;  %12787 = vmatmul.mubr.f32.gmra.mxu0 %v19608_v1  ;;  %12945 = vmatprep.subr.mxu1 %v14931_v57  ;;  %v15235_v10 = vadd.f32 %v4673_v62, %v4512_v52 }
 0x265   : > { %vm15203_vm7 = vmand %vm9243_vm14, %vm9259_vm1  ;;  %vm9230_vm2 = vcmp.ge.f32.partialorder %v19766_v3, 0.0  ;;  %vm9262_vm13 = vcmp.le.f32.partialorder %v19766_v3, 1.0  ;;  %vm9213_vm1 = vcmp.le.f32.partialorder %v15209_v27, 0.0  ;;  %v19773_v3 = vmov 0  ;;  %12817 = vmatprep.mubr.f32.mxu0 %v19778_v44 }
 0x266   : > { %v19764_v4 = vsel %vm15203_vm7, 4294967295, %v19763_v4  ;;  %vm9246_vm12 = vmand %vm9214_vm3, %vm9230_vm2  ;;  %19772 = vst [vmem:[#allocation186_spill] sm:$0xff] %v15221_v37  ;;  %v4530_v30 = vadd.f32 %v12476_v28, %v15070_v12  ;;  %12847 = vmatmul.mubr.f32.gmra.mxu1 %v19356_v23  ;;  %v19779_v27 = vmov 0  ;;  %v19784_v28 = vld [vmem:[#allocation28_spill] sm:$0xff] }
 0x267   : > { %19765 = vst [vmem:[#allocation183_spill] sm:$0xff] %v19764_v4  ;;  %vm15215_vm14 = vmand %vm9246_vm12, %vm9262_vm13  ;;  %v19771_v4 = vld [vmem:[#allocation104_spill] sm:$0xff]  ;;  %vm9216_vm13 = vcmp.le.f32.partialorder %v15221_v37, 0.0  ;;  %12849 = vmatprep.mubr.f32.mxu1 %v19357_v2  ;;  %v19785_v37 = vmov 0 }
 0x268   : > { %v19769_v20 = vsel %vm15215_vm14, 4294967295, %v19768_v20  ;;  %vm9229_vm7 = vcmp.ge.f32.partialorder %v19771_v4, 0.0  ;;  %vm9261_vm3 = vcmp.le.f32.partialorder %v19771_v4, 1.0  ;;  %vm9232_vm14 = vcmp.ge.f32.partialorder %v19776_v5, 0.0  ;;  %19777 = vst [vmem:[#allocation188_spill] sm:$0xff] %v15235_v10  ;;  %v4523_v4 = vpop.f32.mrf.mxu0  ;;  %12818 = vmatmul.mubr.f32.vlgmr.msra.gmra.mxu0 %v19784_v28 }
 0x269   : > { %19770 = vst [vmem:[#allocation185_spill] sm:$0xff] %v19769_v20  ;;  %vm9245_vm2 = vmand %vm9213_vm1, %vm9229_vm7  ;;  %vm9264_vm1 = vcmp.le.f32.partialorder %v19776_v5, 1.0  ;;  %v12536_v20 = vpop.f32.mrf.mxu1  ;;  %v15247_v62 = vadd.f32 %v12502_v35, %v4530_v30  ;;  %v4524_v12 = vadd.f32 %v4523_v4, %v15075_v11  ;;  %12868 = vmatpush3.msra.mxu0 %v14942_v14  ;;  %v19790_v4 = vld [vmem:[#allocation29_spill] sm:$0xff] }
 0x26a   : > { %vm15229_vm12 = vmand %vm9245_vm2, %vm9261_vm3  ;;  %vm9215_vm3 = vcmp.le.f32.partialorder %v15235_v10, 0.0  ;;  %v12507_v52 = vpop.f32.mrf.mxu0  ;;  %v19788_v10 = vld [vmem:[#allocation110_spill] sm:$0xff]  ;;  %12820 = vmatprep.mubr.f32.mxu0 %v19790_v4  ;;  %12850 = vmatmul.mubr.f32.gmra.mxu1 %v19358_v22  ;;  %v19801_v4 = vld [vmem:[#allocation33_spill] sm:$0xff] }
 0x26b   : > { %v19774_v3 = vsel %vm15229_vm12, 4294967295, %v19773_v3  ;;  %vm9248_vm7 = vmand %vm9216_vm13, %vm9232_vm14  ;;  %19783 = vst [vmem:[#allocation190_spill] sm:$0xff] %v15247_v62  ;;  %v5005_v5 = vpop.f32.mrf.mxu1  ;;  %v15259_v35 = vadd.f32 %v4685_v45, %v4524_v12  ;;  %v15261_v11 = vadd.f32 %v12533_v49, %v12507_v52  ;;  %v19795_v45 = vld [vmem:[#allocation112_spill] sm:$0xff]  ;;  %12852 = vmatprep.mubr.f32.mxu1 %v19360_v63  ;;  %v19796_v12 = vld [vmem:[#allocation31_spill] sm:$0xff] }
 0x26c   : > { %19775 = vst [vmem:[#allocation187_spill] sm:$0xff] %v19774_v3  ;;  %vm15241_vm2 = vmand %vm9248_vm7, %vm9264_vm1  ;;  %v19782_v3 = vld [vmem:[#allocation108_spill] sm:$0xff]  ;;  %vm9218_vm1 = vcmp.le.f32.partialorder %v15247_v62, 0.0  ;;  %v4767_v30 = vpop.f32.mrf.mxu0  ;;  %v19792_v62 = vmov 0  ;;  %12821 = vmatmul.mubr.f32.gmra.mxu0 %v19796_v12 }
 0x26d   : > { %v19780_v27 = vsel %vm15241_vm2, 4294967295, %v19779_v27  ;;  %vm9231_vm12 = vcmp.ge.f32.partialorder %v19782_v3, 0.0  ;;  %vm9263_vm13 = vcmp.le.f32.partialorder %v19782_v3, 1.0  ;;  %vm9234_vm2 = vcmp.ge.f32.partialorder %v19788_v10, 0.0  ;;  %19789 = vst [vmem:[#allocation192_spill] sm:$0xff] %v15259_v35  ;;  %v12539_v3 = vpop.f32.mrf.mxu1 }
 0x26e   : > { %19781 = vst [vmem:[#allocation189_spill] sm:$0xff] %v19780_v27  ;;  %vm9247_vm14 = vmand %vm9215_vm3, %vm9231_vm12  ;;  %vm9266_vm3 = vcmp.le.f32.partialorder %v19788_v10, 1.0  ;;  %v15274_v14 = vadd.f32 %v4993_v16, %v4767_v30  ;;  %v12510_v49 = vpop.f32.mrf.mxu0  ;;  %v19797_v10 = vmov 0  ;;  %v279_v16 = vld [vmem:[%s18728_s1 + $0x38] sm:$0xff]  ;;  %12853 = vmatmul.mubr.f32.gmra.mxu1 %v13364_v39 }
 0x26f   : > { %vm15253_vm7 = vmand %vm9247_vm14, %vm9263_vm13  ;;  %vm9217_vm13 = vcmp.le.f32.partialorder %v15259_v35, 0.0  ;;  %v5017_v52 = vpop.f32.mrf.mxu1  ;;  %v19800_v35 = vld [vmem:[#allocation32_spill] sm:$0xff]  ;;  %12855 = vmatprep.mubr.f32.mxu1 %v19716_v9 }
 0x270   : > { %v19786_v37 = vsel %vm15253_vm7, 4294967295, %v19785_v37  ;;  %vm9250_vm12 = vmand %vm9218_vm1, %vm9234_vm2  ;;  %vm9233_vm7 = vcmp.ge.f32.partialorder %v19795_v45, 0.0  ;;  %vm9265_vm1 = vcmp.le.f32.partialorder %v19795_v45, 1.0  ;;  %12823 = vmatprep.mubr.f32.mxu0 %v19800_v35  ;;  %v4787_v30 = vpop.f32.mrf.mxu0  ;;  %v19802_v35 = vld [vmem:[#allocation34_spill] sm:$0xff] }
 0x271   : > { %19787 = vst [vmem:[#allocation191_spill] sm:$0xff] %v19786_v37  ;;  %v19791_v37 = vld [vmem:[#allocation164_spill] sm:$0xff]  ;;  %vm15268_vm14 = vmand %vm9250_vm12, %vm9266_vm3  ;;  %v12542_v27 = vpop.f32.mrf.mxu1  ;;  %v15290_v45 = vadd.f32 %v5005_v5, %v4787_v30  ;;  %12824 = vmatmul.mubr.f32.gmra.mxu0 %v19801_v4  ;;  %v19803_v30 = vld [vmem:[#allocation50_spill] sm:$0xff] }
 0x272   : > { %12919 = vmatprep.subr.mxu0 %v19791_v37  ;;  %v19793_v62 = vsel %vm15268_vm14, 4294967295, %v19792_v62  ;;  %vm9249_vm2 = vmand %vm9217_vm13, %vm9233_vm7  ;;  %v12513_v12 = vpop.f32.mrf.mxu0  ;;  %12826 = vmatprep.mubr.f32.mxu0 %v19802_v35 }
 0x273   : > { %19794 = vst [vmem:[#allocation164_spill] sm:$0xff] %v19793_v62  ;;  %vm15279_vm0 = vmand %vm9249_vm2, %vm9265_vm1  ;;  %v15283_v62 = vadd.f32 %v12536_v20, %v12510_v49  ;;  %v15294_v20 = vand.u32 4294901760, %v279_v16  ;;  %v15296_v49 = vadd.f32 %v12539_v3, %v12513_v12  ;;  %12856 = vmatmul.mubr.f32.gmra.mxu1 %v19722_v6  ;;  %v19804_v3 = vld [vmem:[#allocation54_spill] sm:$0xff] }
 0x274   : > { %v19798_v10 = vsel %vm15279_vm0, 4294967295, %v19797_v10  ;;  %v4807_v28 = vpop.f32.mrf.mxu0  ;;  %12858 = vmatprep.mubr.f32.mxu1 %v19728_v24 }
 0x275   : > { %19799 = vst [vmem:[#allocation193_spill] sm:$0xff] %v19798_v10  ;;  %v5029_v10 = vpop.f32.mrf.mxu1  ;;  %v15300_v15 = vadd.f32 %v5017_v52, %v4807_v28  ;;  %12827 = vmatmul.mubr.f32.gmra.mxu0 %v19803_v30  ;;  %v15305_v4 = vsub.f32 %v279_v16, %v15294_v20  ;;  %v19805_v52 = vld [vmem:[#allocation57_spill] sm:$0xff] }
 0x276   : > { %v12516_v5 = vpop.f32.mrf.mxu0  ;;  %12829 = vmatprep.mubr.f32.mxu0 %v19804_v3 }
 0x277   : > { %v12545_v29 = vpop.f32.mrf.mxu1  ;;  %v15307_v26 = vadd.f32 %v12542_v27, %v12516_v5  ;;  %12859 = vmatmul.mubr.f32.gmra.mxu1 %v19734_v41  ;;  %v15316_v24 = vand.u32 4294901760, %v15305_v4  ;;  %v19807_v27 = vld [vmem:[#allocation60_spill] sm:$0xff] }
 0x278   : > { %v4827_v12 = vpop.f32.mrf.mxu0  ;;  %12861 = vmatprep.mubr.f32.mxu1 %v19740_v18 }
 0x279   : > { %v5041_v44 = vpop.f32.mrf.mxu1  ;;  %v15311_v42 = vadd.f32 %v5029_v10, %v4827_v12  ;;  %12830 = vmatmul.mubr.f32.gmra.mxu0 %v19805_v52  ;;  %19806 = vst [vmem:[#allocation194_spill] sm:$0xff] %v15316_v24  ;;  %v19808_v12 = vld [vmem:[#allocation62_spill] sm:$0xff]  ;;  %v8228_v18 = vsub.f32 %v15305_v4, %v15316_v24 }
 0x27a   : > { %v12519_v28 = vpop.f32.mrf.mxu0  ;;  %12832 = vmatprep.mubr.f32.mxu0 %v19807_v27 }
 0x27b   : > { %v12548_v35 = vpop.f32.mrf.mxu1  ;;  %v15318_v16 = vadd.f32 %v12545_v29, %v12519_v28  ;;  %12862 = vmatmul.mubr.f32.gmra.mxu1 %v19746_v60  ;;  %v19810_v28 = vld [vmem:[#allocation64_spill] sm:$0xff]  ;;  %v15338_v38 = vand.u32 4294901760, %v8228_v18 }
 0x27c   : > { %v4847_v5 = vpop.f32.mrf.mxu0  ;;  %12864 = vmatprep.mubr.f32.mxu1 %v19752_v33 }
 0x27d   : > { %v5053_v30 = vpop.f32.mrf.mxu1  ;;  %v15322_v41 = vadd.f32 %v5041_v44, %v4847_v5  ;;  %12833 = vmatmul.mubr.f32.gmra.mxu0 %v19808_v12  ;;  %v19811_v5 = vld [vmem:[#allocation14_spill] sm:$0xff]  ;;  %v19812_v12 = vld [vmem:[#allocation65_spill] sm:$0xff] }
 0x27e   : > { %v12522_v10 = vpop.f32.mrf.mxu0  ;;  %12835 = vmatprep.mubr.f32.mxu0 %v19810_v28  ;;  %v15344_v28 = vpop.permute.xlu1 %9756 }
 0x27f   : > { %v12551_v3 = vpop.f32.mrf.mxu1  ;;  %v15330_v29 = vadd.f32 %v12548_v35, %v12522_v10  ;;  %12865 = vmatmul.mubr.f32.gmra.mxu1 %v19608_v1  ;;  %v19813_v35 = vld [vmem:[#allocation66_spill] sm:$0xff]  ;;  %19814 = vst [vmem:[#allocation196_spill] sm:$0xff] %v15344_v28  ;;  %v19818_v28 = vld [vmem:[#allocation8_spill] sm:$0xff] }
 0x280   : > { %v4867_v27 = vpop.f32.mrf.mxu0  ;;  %12895 = vmatprep.mubr.f32.mxu1 %v19811_v5 }
 0x281   : > { %v5065_v52 = vpop.f32.mrf.mxu1  ;;  %v15334_v44 = vadd.f32 %v5053_v30, %v4867_v27  ;;  %12836 = vmatmul.mubr.f32.gmra.mxu0 %v19812_v12  ;;  %v19815_v12 = vld [vmem:[#allocation67_spill] sm:$0xff] }
 0x282   : > { %v12525_v33 = vpop.f32.mrf.mxu0  ;;  %12838 = vmatprep.mubr.f32.mxu0 %v19813_v35  ;;  %v19816_v35 = vld [vmem:[#allocation22_spill] sm:$0xff]  ;;  %v15362_v5 = vpop.permute.xlu1 %9764 }
 0x283   : > { %v12554_v6 = vpop.f32.mrf.mxu1  ;;  %v15340_v24 = vadd.f32 %v12551_v3, %v12525_v33  ;;  %12896 = vmatmul.mubr.f32.vlgmr.msra.gmra.mxu1 %v19700_v54  ;;  %19820 = vst [vmem:[#allocation198_spill] sm:$0xff] %v15362_v5  ;;  %v19823_v5 = vld [vmem:[#allocation17_spill] sm:$0xff] }
 0x284   : > { %v4887_v10 = vpop.f32.mrf.mxu0  ;;  %12946 = vmatpush3.msra.mxu1 %v14931_v57  ;;  %12898 = vmatprep.mubr.f32.mxu1 %v19506_v32 }
 0x285   : > { %v5077_v60 = vpop.f32.mrf.mxu1  ;;  %v15346_v30 = vadd.f32 %v5065_v52, %v4887_v10  ;;  %12839 = vmatmul.mubr.f32.gmra.mxu0 %v19815_v12  ;;  %12997 = vmatprep.subr.mxu1 %v15338_v38  ;;  %v19817_v10 = vld [vmem:[#allocation23_spill] sm:$0xff]  ;;  %v15360_v12 = vpop.permute.xlu0 %9744 }
 0x286   : > { %v12528_v27 = vpop.f32.mrf.mxu0  ;;  %12869 = vmatprep.mubr.f32.mxu0 %v19702_v58  ;;  %19819 = vst [vmem:[#allocation197_spill] sm:$0xff] %v15360_v12 }
 0x287   : > { %v12585_v55 = vpop.f32.mrf.mxu1  ;;  %v15352_v33 = vadd.f32 %v12554_v6, %v12528_v27  ;;  %12899 = vmatmul.mubr.f32.gmra.mxu1 %v19816_v35  ;;  %v19821_v27 = vld [vmem:[#allocation9_spill] sm:$0xff] }
 0x288   : > { %v4907_v3 = vpop.f32.mrf.mxu0  ;;  %12901 = vmatprep.mubr.f32.mxu1 %v19817_v10 }
 0x289   : > { %v5336_v18 = vpop.f32.mrf.mxu1  ;;  %v15356_v52 = vadd.f32 %v5077_v60, %v4907_v3  ;;  %12870 = vmatmul.mubr.f32.vlgmr.msra.gmra.mxu0 %v19818_v28  ;;  %v19822_v60 = vld [vmem:[#allocation24_spill] sm:$0xff] }
 0x28a   : > { %v12559_v57 = vpop.f32.mrf.mxu0  ;;  %12920 = vmatpush3.msra.mxu0 %v19791_v37  ;;  %12872 = vmatprep.mubr.f32.mxu0 %v19821_v27  ;;  %v19824_v27 = vld [vmem:[#allocation18_spill] sm:$0xff] }
 0x28b   : > { %v12588_v54 = vpop.f32.mrf.mxu1  ;;  %v5165_v6 = vadd.f32 %v12559_v57, %v15261_v11  ;;  %12902 = vmatmul.mubr.f32.gmra.mxu1 %v19822_v60  ;;  %12971 = vmatprep.subr.mxu0 %v15294_v20 }
 0x28c   : > { %v5157_v58 = vpop.f32.mrf.mxu0  ;;  %12904 = vmatprep.mubr.f32.mxu1 %v13383_v46 }
 0x28d   : > { %v5352_v32 = vpop.f32.mrf.mxu1  ;;  %v15369_v3 = vadd.f32 %v12585_v55, %v5165_v6  ;;  %v5158_v28 = vadd.f32 %v5157_v58, %v15274_v14  ;;  %12873 = vmatmul.mubr.f32.gmra.mxu0 %v19823_v5  ;;  %v15379_v55 = vpop.permute.xlu0 %9748  ;;  %v19828_v5 = vld [vmem:[#allocation20_spill] sm:$0xff] }
 0x28e   : > { %v12562_v12 = vpop.f32.mrf.mxu0  ;;  %12875 = vmatprep.mubr.f32.mxu0 %v19824_v27  ;;  %19825 = vst [vmem:[#allocation199_spill] sm:$0xff] %v15379_v55  ;;  %v15381_v6 = vpop.permute.xlu1 %9772 }
 0x28f   : > { %v12591_v35 = vpop.f32.mrf.mxu1  ;;  %v15374_v57 = vadd.f32 %v5336_v18, %v5158_v28  ;;  %v5179_v37 = vadd.f32 %v12562_v12, %v15283_v62  ;;  %12905 = vmatmul.mubr.f32.gmra.mxu1 %v19705_v48  ;;  %19826 = vst [vmem:[#allocation200_spill] sm:$0xff] %v15381_v6  ;;  %v19827_v18 = vld [vmem:[#allocation19_spill] sm:$0xff] }
 0x290   : > { %v5171_v10 = vpop.f32.mrf.mxu0  ;;  %12907 = vmatprep.mubr.f32.mxu1 %v19513_v51 }
 0x291   : > { %v5368_v11 = vpop.f32.mrf.mxu1  ;;  %v15383_v58 = vadd.f32 %v12588_v54, %v5179_v37  ;;  %v5172_v14 = vadd.f32 %v5171_v10, %v15290_v45  ;;  %12876 = vmatmul.mubr.f32.gmra.mxu0 %v19827_v18  ;;  %v19829_v37 = vld [vmem:[#allocation26_spill] sm:$0xff] }
 0x292   : > { %v12565_v28 = vpop.f32.mrf.mxu0  ;;  %12878 = vmatprep.mubr.f32.mxu0 %v19828_v5  ;;  %v19832_v5 = vld [vmem:[#allocation39_spill] sm:$0xff] }
 0x293   : > { %v12594_v60 = vpop.f32.mrf.mxu1  ;;  %v15388_v12 = vadd.f32 %v5352_v32, %v5172_v14  ;;  %v5193_v27 = vadd.f32 %v12565_v28, %v15296_v49  ;;  %12908 = vmatmul.mubr.f32.gmra.mxu1 %v19707_v36  ;;  %v15398_v32 = vpop.permute.xlu0 %9760 }
 0x294   : > { %v5185_v48 = vpop.f32.mrf.mxu0  ;;  %12910 = vmatprep.mubr.f32.mxu1 %v19517_v56  ;;  %19830 = vst [vmem:[#allocation201_spill] sm:$0xff] %v15398_v32  ;;  %v15400_v14 = vpop.permute.xlu1 %9780 }
 0x295   : > { %v5384_v62 = vpop.f32.mrf.mxu1  ;;  %v15393_v54 = vadd.f32 %v12591_v35, %v5193_v27  ;;  %v5186_v45 = vadd.f32 %v5185_v48, %v15300_v15  ;;  %12879 = vmatmul.mubr.f32.gmra.mxu0 %v19829_v37  ;;  %19831 = vst [vmem:[#allocation202_spill] sm:$0xff] %v15400_v14 }
 0x296   : > { %v12568_v10 = vpop.f32.mrf.mxu0  ;;  %12881 = vmatprep.mubr.f32.mxu0 %v19832_v5 }
 0x297   : > { %v12597_v46 = vpop.f32.mrf.mxu1  ;;  %v15402_v49 = vadd.f32 %v5368_v11, %v5186_v45  ;;  %v5207_v28 = vadd.f32 %v12568_v10, %v15307_v26  ;;  %12911 = vmatmul.mubr.f32.gmra.mxu1 %v19709_v40 }
 0x298   : > { %v5199_v35 = vpop.f32.mrf.mxu0  ;;  %12913 = vmatprep.mubr.f32.mxu1 %v19521_v19 }
 0x299   : > { %v5400_v6 = vpop.f32.mrf.mxu1  ;;  %v15407_v48 = vadd.f32 %v12594_v60, %v5207_v28  ;;  %v5200_v15 = vadd.f32 %v5199_v35, %v15311_v42  ;;  %12882 = vmatmul.mubr.f32.gmra.mxu0 %v19710_v31  ;;  %v15417_v60 = vpop.permute.xlu0 %9768 }
 0x29a   : > { %v12571_v37 = vpop.f32.mrf.mxu0  ;;  %12884 = vmatprep.mubr.f32.mxu0 %v19523_v21  ;;  %19833 = vst [vmem:[#allocation203_spill] sm:$0xff] %v15417_v60  ;;  %v15419_v28 = vpop.permute.xlu1 %9788 }
 0x29b   : > { %v12600_v27 = vpop.f32.mrf.mxu1  ;;  %v15412_v11 = vadd.f32 %v5384_v62, %v5200_v15  ;;  %v5221_v26 = vadd.f32 %v12571_v37, %v15318_v16  ;;  %12914 = vmatmul.mubr.f32.gmra.mxu1 %v19711_v61  ;;  %19834 = vst [vmem:[#allocation204_spill] sm:$0xff] %v15419_v28 }
 0x29c   : > { %v5213_v45 = vpop.f32.mrf.mxu0  ;;  %12916 = vmatprep.mubr.f32.mxu1 %v19525_v0  ;;  %v19857_v0 = vld [vmem:[#allocation140_spill] sm:$0xff] }
 0x29d   : > { %v5416_v14 = vpop.f32.mrf.mxu1  ;;  %v15421_v42 = vadd.f32 %v12597_v46, %v5221_v26  ;;  %v5214_v35 = vadd.f32 %v5213_v45, %v15322_v41  ;;  %12885 = vmatmul.mubr.f32.gmra.mxu0 %v19526_v13  ;;  %v19852_v13 = vld [vmem:[#allocation131_spill] sm:$0xff] }
 0x29e   : > { %v12574_v62 = vpop.f32.mrf.mxu0  ;;  %12887 = vmatprep.mubr.f32.mxu0 %v19527_v47  ;;  %v19851_v47 = vld [vmem:[#allocation128_spill] sm:$0xff] }
 0x29f   : > { %v12603_v10 = vpop.f32.mrf.mxu1  ;;  %v15426_v37 = vadd.f32 %v5400_v6, %v5214_v35  ;;  %v5235_v15 = vadd.f32 %v12574_v62, %v15330_v29  ;;  %12917 = vmatmul.mubr.f32.gmra.mxu1 %v19528_v50  ;;  %v15436_v6 = vpop.permute.xlu0 %9776 }
 0x2a0   : > { %v5227_v32 = vpop.f32.mrf.mxu0  ;;  %12947 = vmatprep.mubr.f32.mxu1 %v19350_v8  ;;  %19835 = vst [vmem:[#allocation205_spill] sm:$0xff] %v15436_v6  ;;  %v15438_v35 = vpop.permute.xlu1 %9796  ;;  %v19847_v6 = vld [vmem:[#allocation119_spill] sm:$0xff] }
 0x2a1   : > { %v5432_v16 = vpop.f32.mrf.mxu1  ;;  %v15431_v46 = vadd.f32 %v12600_v27, %v5235_v15  ;;  %v5228_v41 = vadd.f32 %v5227_v32, %v15334_v44  ;;  %12888 = vmatmul.mubr.f32.gmra.mxu0 %v19529_v59  ;;  %19836 = vst [vmem:[#allocation206_spill] sm:$0xff] %v15438_v35  ;;  %v19843_v35 = vld [vmem:[#allocation68_spill] sm:$0xff]  ;;  %v19850_v59 = vld [vmem:[#allocation125_spill] sm:$0xff] }
 0x2a2   : > { %v12577_v26 = vpop.f32.mrf.mxu0  ;;  %12890 = vmatprep.mubr.f32.mxu0 %v19530_v17  ;;  %vm9332_vm7 = vcmp.ge.f32.partialorder %v19843_v35, 0.0  ;;  %vm9364_vm13 = vcmp.le.f32.partialorder %v19843_v35, 1.0  ;;  %v19848_v17 = vld [vmem:[#allocation122_spill] sm:$0xff] }
 0x2a3   : > { %v12606_v60 = vpop.f32.mrf.mxu1  ;;  %v15440_v29 = vadd.f32 %v5416_v14, %v5228_v41  ;;  %v5249_v62 = vadd.f32 %v12577_v26, %v15340_v24  ;;  %12948 = vmatmul.mubr.f32.vlgmr.msra.gmra.mxu1 %v19353_v7 }
 0x2a4   : > { %v5241_v27 = vpop.f32.mrf.mxu0  ;;  %12998 = vmatpush3.msra.mxu1 %v15338_v38  ;;  %12950 = vmatprep.mubr.f32.mxu1 %v19354_v53  ;;  %v15459_v38 = vpop.permute.xlu0 %9784 }
 0x2a5   : > { %v5448_v45 = vpop.f32.mrf.mxu1  ;;  %19837 = vst [vmem:[#allocation207_spill] sm:$0xff] %v15440_v29  ;;  %v15445_v44 = vadd.f32 %v12603_v10, %v5249_v62  ;;  %v5242_v32 = vadd.f32 %v5241_v27, %v15346_v30  ;;  %12891 = vmatmul.mubr.f32.gmra.mxu0 %v19531_v34  ;;  %13049 = vmatprep.subr.mxu1 %v15294_v20  ;;  %19840 = vst [vmem:[#allocation210_spill] sm:$0xff] %v15459_v38  ;;  %v15461_v30 = vpop.permute.xlu1 %9804  ;;  %v19899_v29 = vld [vmem:[#allocation42_spill] sm:$0xff] }
 0x2a6   : > { %v12580_v28 = vpop.f32.mrf.mxu0  ;;  %12921 = vmatprep.mubr.f32.mxu0 %v19350_v8  ;;  %19841 = vst [vmem:[#allocation211_spill] sm:$0xff] %v15461_v30 }
 0x2a7   : > { %v12637_v15 = vpop.f32.mrf.mxu1  ;;  %19838 = vst [vmem:[#allocation208_spill] sm:$0xff] %v15445_v44  ;;  %v15452_v24 = vadd.f32 %v5432_v16, %v5242_v32  ;;  %v5263_v41 = vadd.f32 %v12580_v28, %v15352_v33  ;;  %12951 = vmatmul.mubr.f32.gmra.mxu1 %v19356_v23  ;;  %v19844_v28 = vld [vmem:[#allocation117_spill] sm:$0xff]  ;;  %v9667_v32 = vlaneseq }
 0x2a8   : > { %v5255_v10 = vpop.f32.mrf.mxu0  ;;  %12953 = vmatprep.mubr.f32.mxu1 %v19357_v2  ;;  %v15505_v50 = vpop.permute.xlu0 %9792 }
 0x2a9   : > { %v5692_v14 = vpop.f32.mrf.mxu1  ;;  %19839 = vst [vmem:[#allocation209_spill] sm:$0xff] %v15452_v24  ;;  %v15463_v62 = vadd.f32 %v12606_v60, %v5263_v41  ;;  %v5256_v27 = vadd.f32 %v5255_v10, %v15356_v52  ;;  %12922 = vmatmul.mubr.f32.vlgmr.msra.gmra.mxu0 %v19353_v7  ;;  %v19846_v10 = vld [vmem:[#allocation118_spill] sm:$0xff]  ;;  %v19849_v41 = vld [vmem:[#allocation69_spill] sm:$0xff]  ;;  %v15503_v61 = vshrl.u32 %v9667_v32, 7  ;;  %19855 = vst [vmem:[#allocation117_spill] sm:$0xff] %v15505_v50  ;;  %v15507_v38 = vpop.permute.xlu1 %9904  ;;  %v19900_v50 = vsub.f32 1.0, %v19847_v6 }
 0x2aa   : > { %v12611_v33 = vpop.f32.mrf.mxu0  ;;  %12972 = vmatpush3.msra.mxu0 %v15294_v20  ;;  %12924 = vmatprep.mubr.f32.mxu0 %v19354_v53  ;;  %19856 = vst [vmem:[#allocation118_spill] sm:$0xff] %v15507_v38  ;;  %v19874_v38 = vld [vmem:[#allocation36_spill] sm:$0xff] }
 0x2ab   : > { %v15456_v26 = vpop.f32.mrf.mxu1  ;;  %19842 = vst [vmem:[#allocation212_spill] sm:$0xff] %v15463_v62  ;;  %v15474_v60 = vadd.f32 %v5448_v45, %v5256_v27  ;;  %v5537_v52 = vadd.f32 %v12611_v33, %v15369_v3  ;;  %12954 = vmatmul.mubr.f32.gmra.mxu1 %v19358_v22  ;;  %13023 = vmatprep.subr.mxu0 %v15305_v4 }
 0x2ac   : > { %v5530_v30 = vpop.f32.mrf.mxu0  ;;  %12956 = vmatprep.mubr.f32.mxu1 %v19360_v63 }
 0x2ad   : > { %v15472_v16 = vpop.f32.mrf.mxu1  ;;  %19845 = vst [vmem:[#allocation68_spill] sm:$0xff] %v15474_v60  ;;  %v15489_v3 = vadd.f32 %v12637_v15, %v5537_v52  ;;  %v5531_v33 = vadd.f32 %v5530_v30, %v15374_v57  ;;  %12925 = vmatmul.mubr.f32.gmra.mxu0 %v19356_v23  ;;  %v19853_v52 = vld [vmem:[#allocation134_spill] sm:$0xff]  ;;  %v19854_v57 = vld [vmem:[#allocation137_spill] sm:$0xff]  ;;  %v19872_v60 = vsub.f32 1.0, %v19844_v28 }
 0x2ae   : > { %v12614_v45 = vpop.f32.mrf.mxu0  ;;  %12927 = vmatprep.mubr.f32.mxu0 %v19357_v2  ;;  %v19863_v15 = vld [vmem:[#allocation70_spill] sm:$0xff] }
 0x2af   : > { %v15485_v27 = vpop.f32.mrf.mxu1  ;;  %v9060_v19 = vadd.f32 %v15489_v3, %v15082_v43  ;;  %vm9316_vm1 = vcmp.le.f32.partialorder %v15489_v3, 0.0  ;;  %v15512_v21 = vadd.f32 %v5692_v14, %v5531_v33  ;;  %v5549_v31 = vadd.f32 %v12614_v45, %v15383_v58  ;;  %12957 = vmatmul.mubr.f32.gmra.mxu1 %v13364_v39  ;;  %v19858_v14 = vld [vmem:[#allocation143_spill] sm:$0xff]  ;;  %v19878_v33 = vld [vmem:[#allocation84_spill] sm:$0xff] }
 0x2b0   : > { %vm9348_vm3 = vmand %vm9316_vm1, %vm9332_vm7  ;;  %v5542_v32 = vpop.f32.mrf.mxu0  ;;  %12959 = vmatprep.mubr.f32.mxu1 %v19716_v9  ;;  %vm19865_vm1 = vcmp.ge.f32.partialorder %v19844_v28, 0.0  ;;  %v9981_v58 = vsub.s32 5, %v15503_v61 }
 0x2b1   : > { %v15498_v34 = vpop.f32.mrf.mxu1  ;;  %vm9076_vm2 = vcmp.ge.f32.partialorder %v9060_v19, 1.0  ;;  %vm15529_vm0 = vmand %vm9348_vm3, %vm9364_vm13  ;;  %v9059_v56 = vadd.f32 %v15512_v21, %v15089_v25  ;;  %v15536_v36 = vadd.f32 %v15456_v26, %v5549_v31  ;;  %v5543_v19 = vadd.f32 %v5542_v32, %v15388_v12  ;;  %12928 = vmatmul.mubr.f32.gmra.mxu0 %v19358_v22  ;;  %v19871_v12 = vld [vmem:[#allocation166_spill] sm:$0xff]  ;;  %v15584_v26 = vpop.permute.xlu1 %9908 }
 0x2b2   : > { %vm9108_vm12 = vmand %vm9076_vm2, %vm19865_vm1  ;;  %v12617_v40 = vpop.f32.mrf.mxu0  ;;  %vm19868_vm13 = vcmp.le.f32.partialorder %v19844_v28, 1.0  ;;  %vm9315_vm1 = vcmp.le.f32.partialorder %v15512_v21, 0.0  ;;  %12930 = vmatprep.mubr.f32.mxu0 %v19360_v63  ;;  %19876 = vst [vmem:[#allocation122_spill] sm:$0xff] %v15584_v26  ;;  %v19883_v26 = vld [vmem:[#allocation37_spill] sm:$0xff] }
 0x2b3   : > { %v15520_v30 = vpop.f32.mrf.mxu1  ;;  %vm15553_vm7 = vmand %vm9108_vm12, %vm19868_vm13  ;;  %vm9075_vm2 = vcmp.ge.f32.partialorder %v9059_v56, 1.0  ;;  %v9062_v32 = vadd.f32 %v15536_v36, %v19871_v12  ;;  %v5561_v31 = vadd.f32 %v12617_v40, %v15393_v54  ;;  %vm19873_vm12 = vcmp.ge.f32.partialorder %v19846_v10, 0.0  ;;  %12960 = vmatmul.mubr.f32.gmra.mxu1 %v19874_v38 }
 0x2b4   : > { %v9172_v51 = vsel %vm15553_vm7, %v19872_v60, %v15082_v43  ;;  %v9188_v56 = vsel %vm15553_vm7, %v19844_v28, %v15489_v3  ;;  %vm9107_vm13 = vmand %vm9075_vm2, %vm19873_vm12  ;;  %v15575_v55 = vadd.f32 %v15472_v16, %v5543_v19  ;;  %v5554_v40 = vpop.f32.mrf.mxu0  ;;  %v15582_v60 = vpop.permute.xlu0 %9800  ;;  %vm19879_vm7 = vcmp.le.f32.partialorder %v19846_v10, 1.0  ;;  %v19882_v43 = vld [vmem:[#allocation71_spill] sm:$0xff]  ;;  %12962 = vmatprep.mubr.f32.mxu1 %v19883_v26 }
 0x2b5   : > { %v15546_v18 = vpop.f32.mrf.mxu1  ;;  %19875 = vst [vmem:[#allocation119_spill] sm:$0xff] %v15582_v60  ;;  %v9284_v3 = vsel %vm15095_vm15, 0.0, %v9172_v51  ;;  %v15591_v16 = vsel %vm15095_vm15, %v19878_v33, %v9188_v56  ;;  %vm15595_vm2 = vmand %vm9107_vm13, %vm19879_vm7  ;;  %vm9078_vm12 = vcmp.ge.f32.partialorder %v9062_v32, 1.0  ;;  %v15601_v60 = vadd.f32 %v15485_v27, %v5561_v31  ;;  %12931 = vmatmul.mubr.f32.gmra.mxu0 %v13364_v39  ;;  %v19898_v32 = vld [vmem:[#allocation72_spill] sm:$0xff] }
 0x2b6   : > { %v15607_v51 = vsel %vm15529_vm0, %v19843_v35, %v9284_v3  ;;  %v19884_v28 = vsub.f32 1.0, %v19846_v10  ;;  %v9187_v27 = vsel %vm15595_vm2, %v19846_v10, %v15512_v21  ;;  %vm19885_vm15 = vcmp.ge.f32.partialorder %v19849_v41, 0.0  ;;  %v12620_v35 = vpop.f32.mrf.mxu0  ;;  %v19891_v10 = vld [vmem:[#allocation168_spill] sm:$0xff]  ;;  %12933 = vmatprep.mubr.f32.mxu0 %v19716_v9  ;;  %v19893_v3 = vld [vmem:[#allocation170_spill] sm:$0xff] }
 0x2b7   : > { %v15578_v54 = vpop.f32.mrf.mxu1  ;;  %vm9347_vm13 = vmand %vm9315_vm1, %vm19885_vm15  ;;  %vm9318_vm1 = vcmp.le.f32.partialorder %v15536_v36, 0.0  ;;  %v9061_v56 = vadd.f32 %v15575_v55, %v19891_v10  ;;  %vm19895_vm15 = vcmp.le.f32.partialorder %v19847_v6, 1.0  ;;  %v5573_v45 = vadd.f32 %v12620_v35, %v15407_v48 }
 0x2b8   : > { %v9171_v33 = vsel %vm15595_vm2, %v19884_v28, %v15089_v25  ;;  %v19887_v28 = vld [vmem:[#allocation85_spill] sm:$0xff]  ;;  %vm19888_vm2 = vcmp.le.f32.partialorder %v19849_v41, 1.0  ;;  %v5566_v62 = vpop.f32.mrf.mxu0 }
 0x2b9   : > { %v15627_v31 = vpop.f32.mrf.mxu1  ;;  %v9283_v25 = vsel %vm15107_vm10, 0.0, %v9171_v33  ;;  %v15634_v19 = vsel %vm15107_vm10, %v19887_v28, %v9187_v27  ;;  %vm15638_vm3 = vmand %vm9347_vm13, %vm19888_vm2  ;;  %vm19892_vm10 = vcmp.ge.f32.partialorder %v19847_v6, 0.0  ;;  %v15660_v28 = vadd.f32 %v15601_v60, %v19893_v3  ;;  %12934 = vmatmul.mubr.f32.gmra.mxu0 %v19874_v38 }
 0x2ba   : > { %v15650_v33 = vsel %vm15638_vm3, %v19849_v41, %v9283_v25  ;;  %vm9110_vm13 = vmand %vm9078_vm12, %vm19892_vm10  ;;  %v19894_v41 = vld [vmem:[#allocation38_spill] sm:$0xff]  ;;  %vm9077_vm12 = vcmp.ge.f32.partialorder %v9061_v56, 1.0  ;;  %v5555_v27 = vadd.f32 %v5554_v40, %v15402_v49  ;;  %v5567_v44 = vadd.f32 %v5566_v62, %v15412_v11  ;;  %v12623_v49 = vpop.f32.mrf.mxu0  ;;  %v15699_v62 = vpop.permute.xlu0 %9900  ;;  %12936 = vmatprep.mubr.f32.mxu0 %v19883_v26  ;;  %v19929_v56 = vld [vmem:[#allocation88_spill] sm:$0xff] }
 0x2bb   : > { %v15664_v24 = vpop.f32.mrf.mxu1  ;;  %12963 = vmatmul.mubr.f32.gmra.mxu1 %v19894_v41  ;;  %vm15669_vm7 = vmand %vm9110_vm13, %vm19895_vm15  ;;  %vm19901_vm15 = vcmp.ge.f32.partialorder %v19863_v15, 0.0  ;;  %vm9317_vm10 = vcmp.le.f32.partialorder %v15575_v55, 0.0  ;;  %19904 = vst [vmem:[#allocation125_spill] sm:$0xff] %v15699_v62  ;;  %v19907_v40 = vld [vmem:[#allocation86_spill] sm:$0xff]  ;;  %v19910_v25 = vmov 0  ;;  %v19924_v62 = vsub.f32 1.0, %v19848_v17 }
 0x2bc   : > { %12965 = vmatprep.mubr.f32.mxu1 %v19899_v29  ;;  %v9174_v9 = vsel %vm15669_vm7, %v19900_v50, %v19871_v12  ;;  %v9190_v39 = vsel %vm15669_vm7, %v19847_v6, %v15536_v36  ;;  %vm9350_vm13 = vmand %vm9318_vm1, %vm19901_vm15  ;;  %v9475_v50 = vsel %vm14673_vm8, 0.0, %v15650_v33  ;;  %v15701_v6 = vpop.permute.xlu1 %9916  ;;  %vm19909_vm7 = vcmp.le.f32.partialorder %v19863_v15, 1.0  ;;  %v19916_v12 = vld [vmem:[#allocation44_spill] sm:$0xff] }
 0x2bd   : > { %v15697_v11 = vpop.f32.mrf.mxu1  ;;  %19905 = vst [vmem:[#allocation128_spill] sm:$0xff] %v15701_v6  ;;  %v9286_v36 = vsel %vm15119_vm11, 0.0, %v9174_v9  ;;  %v15708_v35 = vsel %vm15119_vm11, %v19907_v40, %v9190_v39  ;;  %vm15712_vm1 = vmand %vm9350_vm13, %vm19909_vm7  ;;  %v15717_v33 = vadd.f32 %v15498_v34, %v5555_v27  ;;  %v15721_v6 = vadd.f32 %v15520_v30, %v5573_v45  ;;  %v5578_v45 = vpop.f32.mrf.mxu0  ;;  %v19923_v9 = vld [vmem:[#allocation49_spill] sm:$0xff]  ;;  %v19926_v40 = vld [vmem:[#allocation176_spill] sm:$0xff]  ;;  %12937 = vmatmul.mubr.f32.gmra.mxu0 %v19894_v41 }
 0x2be   : > { %19903 = vst [vmem:[#allocation69_spill] sm:$0xff] %v15697_v11  ;;  %19908 = vst [vmem:[#allocation131_spill] sm:$0xff] %v15708_v35  ;;  %v19911_v25 = vsel %vm15712_vm1, 4294967295, %v19910_v25  ;;  %v15727_v39 = vsel %vm15712_vm1, %v19863_v15, %v9286_v36  ;;  %vm19914_vm11 = vcmp.ge.f32.partialorder %v19848_v17, 0.0  ;;  %v15737_v34 = vadd.f32 %v15546_v18, %v5567_v44  ;;  %v15743_v15 = vld [vmem:[%s18729_s2] sm:$0xff]  ;;  %v19921_v44 = vld [vmem:[#allocation73_spill] sm:$0xff]  ;;  %12939 = vmatprep.mubr.f32.mxu0 %v19899_v29 }
 0x2bf   : > { %19912 = vst [vmem:[#allocation134_spill] sm:$0xff] %v19911_v25  ;;  %19913 = vst [vmem:[#allocation137_spill] sm:$0xff] %v15727_v39  ;;  %v5585_v30 = vadd.f32 %v12623_v49, %v15421_v42  ;;  %v15745_v27 = vpop.f32.mrf.mxu1  ;;  %12966 = vmatmul.mubr.f32.gmra.mxu1 %v19916_v12  ;;  %vm19917_vm15 = vcmp.le.f32.partialorder %v19848_v17, 1.0  ;;  %v19920_v18 = vld [vmem:[#allocation172_spill] sm:$0xff]  ;;  %v19922_v49 = vld [vmem:[#allocation174_spill] sm:$0xff]  ;;  %v12626_v11 = vpop.f32.mrf.mxu0  ;;  %vm9130_vm7 = vcmp.le.f32.partialorder %v19852_v13, 1.0  ;;  %v5579_v29 = vadd.f32 %v5578_v45, %v15426_v37 }
 0x2c0   : > { %vm9109_vm13 = vmand %vm9077_vm12, %vm19914_vm11  ;;  %19915 = vst [vmem:[#allocation140_spill] sm:$0xff] %v15745_v27  ;;  %vm9080_vm11 = vcmp.ge.f32.partialorder %v15660_v28, 1.0  ;;  %v9063_v42 = vadd.f32 %v15717_v33, %v19920_v18  ;;  %v15760_v36 = vadd.f32 %v15721_v6, %v19922_v49  ;;  %12968 = vmatprep.mubr.f32.mxu1 %v19923_v9  ;;  %v15780_v39 = vadd.f32 %v15737_v34, %v19926_v40  ;;  %v19947_v37 = vld [vmem:[#allocation178_spill] sm:$0xff] }
 0x2c1   : > { %vm15750_vm12 = vmand %vm9109_vm13, %vm19917_vm15  ;;  %vm19925_vm15 = vcmp.ge.f32.partialorder %v19882_v43, 0.0  ;;  %v10001_v27 = vsub.s32 2, %v15503_v61  ;;  %vm19938_vm2 = vcmp.le.f32.partialorder %v19850_v59, 1.0  ;;  %v5597_v41 = vadd.f32 %v12626_v11, %v15431_v46  ;;  %12940 = vmatmul.mubr.f32.gmra.mxu0 %v19916_v12  ;;  %v19950_v11 = vld [vmem:[#allocation90_spill] sm:$0xff] }
 0x2c2   : > { %v9173_v35 = vsel %vm15750_vm12, %v19924_v62, %v19891_v10  ;;  %v9189_v25 = vsel %vm15750_vm12, %v19848_v17, %v15575_v55  ;;  %vm9349_vm13 = vmand %vm9317_vm10, %vm19925_vm15  ;;  %v15784_v10 = vpop.f32.mrf.mxu1  ;;  %vm19930_vm10 = vcmp.le.f32.partialorder %v19882_v43, 1.0  ;;  %v15821_v62 = vpop.f32.mrf.mxu0  ;;  %12942 = vmatprep.mubr.f32.mxu0 %v19923_v9 }
 0x2c3   : > { %19927 = vst [vmem:[#allocation143_spill] sm:$0xff] %v15784_v10  ;;  %v9285_v17 = vsel %vm15131_vm5, 0.0, %v9173_v35  ;;  %v15791_v55 = vsel %vm15131_vm5, %v19929_v56, %v9189_v25  ;;  %vm15795_vm12 = vmand %vm9349_vm13, %vm19930_vm10  ;;  %v15802_v10 = vrot.slane %v15743_v15, %v9981_v58  ;;  %vm19933_vm5 = vcmp.ge.f32.partialorder %v19850_v59, 0.0  ;;  %12969 = vmatmul.mubr.f32.gmra.mxu1 %v19608_v1  ;;  %v19941_v25 = vld [vmem:[#allocation74_spill] sm:$0xff] }
 0x2c4   : > { %v15808_v35 = vsel %vm15795_vm12, %v19882_v43, %v9285_v17  ;;  %vm9112_vm13 = vmand %vm9080_vm11, %vm19933_vm5  ;;  %vm9079_vm10 = vcmp.ge.f32.partialorder %v9063_v42, 1.0  ;;  %v15819_v58 = vadd.f32 %v15578_v54, %v5585_v30  ;;  %19934 = vst [vmem:[#allocation70_spill] sm:$0xff] %v15821_v62  ;;  %v15823_v56 = vpop.f32.mrf.mxu1  ;;  %v15826_v43 = vpop.permute.xlu0 %9912  ;;  %vm9338_vm11 = vcmp.ge.f32.partialorder %v19941_v25, 0.0  ;;  %v281_v54 = vld [vmem:[%s18729_s2 + $0x8] sm:$0xff]  ;;  %12999 = vmatprep.mubr.f32.mxu1 %v19350_v8 }
 0x2c5   : > { %19935 = vst [vmem:[#allocation166_spill] sm:$0xff] %v15823_v56  ;;  %19936 = vst [vmem:[#allocation165_spill] sm:$0xff] %v15826_v43  ;;  %v15828_v17 = vpop.permute.xlu1 %9924  ;;  %v19942_v30 = vsel %vm15638_vm3, 0.0, %v15634_v19  ;;  %v9555_v56 = vsel %vm14679_vm4, 1.0, %v9475_v50  ;;  %v19944_v62 = vsub.f32 1.0, %v19850_v59  ;;  %vm19946_vm3 = vcmp.le.f32.partialorder %v15601_v60, 0.0  ;;  %v15870_v48 = vpop.f32.mrf.mxu0  ;;  %12943 = vmatmul.mubr.f32.gmra.mxu0 %v19608_v1 }
 0x2c6   : > { %19937 = vst [vmem:[#allocation84_spill] sm:$0xff] %v15828_v17  ;;  %vm15832_vm15 = vmand %vm9112_vm13, %vm19938_vm2  ;;  %v9491_v43 = vsel %vm14673_vm8, 1.0, %v19942_v30  ;;  %vm19945_vm8 = vcmp.ge.f32.partialorder %v19898_v32, 0.0  ;;  %vm9319_vm5 = vcmp.le.f32.partialorder %v15717_v33, 0.0  ;;  %vm9370_vm13 = vcmp.le.f32.partialorder %v19941_v25, 1.0 }
 0x2c7   : > { %v9176_v21 = vsel %vm15832_vm15, %v19944_v62, %v19893_v3  ;;  %v9192_v19 = vsel %vm15832_vm15, %v19850_v59, %v15601_v60  ;;  %vm9352_vm2 = vmand %vm19946_vm3, %vm19945_vm8  ;;  %v15868_v46 = vadd.f32 %v15819_v58, %v19947_v37  ;;  %v15873_v3 = vpop.f32.mrf.mxu1  ;;  %vm19951_vm15 = vcmp.le.f32.partialorder %v19898_v32, 1.0  ;;  %13000 = vmatmul.mubr.f32.vlgmr.msra.gmra.mxu1 %v19353_v7  ;;  %v19969_v7 = vld [vmem:[#allocation92_spill] sm:$0xff] }
 0x2c8   : > { %19948 = vst [vmem:[#allocation71_spill] sm:$0xff] %v15873_v3  ;;  %v9288_v50 = vsel %vm15143_vm9, 0.0, %v9176_v21  ;;  %v15880_v60 = vsel %vm15143_vm9, %v19950_v11, %v9192_v19  ;;  %vm15884_vm8 = vmand %vm9352_vm2, %vm19951_vm15  ;;  %v9571_v62 = vsel %vm14679_vm4, 0.0, %v9491_v43  ;;  %v15893_v30 = vsel %vm14263_vm6, 0.0, %v9555_v56  ;;  %13050 = vmatpush3.msra.mxu1 %v15294_v20  ;;  %13002 = vmatprep.mubr.f32.mxu1 %v19354_v53  ;;  %v19988_v3 = vld [vmem:[#allocation177_spill] sm:$0xff] }
 0x2c9   : > { %v15899_v21 = vsel %vm15884_vm8, %v19898_v32, %v9288_v50  ;;  %vm19955_vm9 = vcmp.ge.f32.partialorder %v19851_v47, 0.0  ;;  %v19956_v56 = vsub.s32 0, %v15503_v61  ;;  %v15914_v17 = vsel %vm14263_vm6, 0.0, %v9571_v62  ;;  %v15916_v32 = vpop.f32.mrf.mxu0  ;;  %v15918_v59 = vpop.f32.mrf.mxu1  ;;  %13101 = vmatprep.subr.mxu1 %v15294_v20 }
 0x2ca   : > { %vm9111_vm2 = vmand %vm9079_vm10, %vm19955_vm9  ;;  %19957 = vst [vmem:[#allocation167_spill] sm:$0xff] %v15918_v59  ;;  %vm19958_vm15 = vcmp.le.f32.partialorder %v19851_v47, 1.0  ;;  %vm9082_vm10 = vcmp.ge.f32.partialorder %v15760_v36, 1.0  ;;  %vm9322_vm9 = vcmp.le.f32.partialorder %v15721_v6, 0.0  ;;  %v15932_v11 = vrot.slane %v15743_v15, %v10001_v27  ;;  %v15960_v42 = vpop.permute.xlu1 %9932  ;;  %v19986_v36 = vld [vmem:[#allocation28_spill] sm:$0xff] }
 0x2cb   : > { %v15910_v43 = vrot.slane %v281_v54, %v19956_v56  ;;  %vm15923_vm3 = vmand %vm9111_vm2, %vm19958_vm15  ;;  %v19961_v54 = vld [vmem:[#allocation75_spill] sm:$0xff]  ;;  %v19962_v62 = vsub.f32 1.0, %v19851_v47  ;;  %vm19963_vm6 = vcmp.ge.f32.partialorder %v19921_v44, 0.0  ;;  %v9983_v27 = vmul.f32 %v15802_v10, %v15893_v30  ;;  %v15953_v50 = vpop.f32.mrf.mxu0  ;;  %19966 = vst [vmem:[#allocation170_spill] sm:$0xff] %v15960_v42  ;;  %13003 = vmatmul.mubr.f32.gmra.mxu1 %v19356_v23 }
 0x2cc   : > { %v9191_v56 = vsel %vm15923_vm3, %v19851_v47, %v15717_v33  ;;  %vm9351_vm2 = vmand %vm9319_vm5, %vm19963_vm6  ;;  %v15958_v47 = vpop.permute.xlu0 %9920  ;;  %v19967_v33 = vld [vmem:[#allocation175_spill] sm:$0xff]  ;;  %v15980_v42 = vadd.f32 %v15664_v24, %v5597_v41  ;;  %v19976_v24 = vld [vmem:[#allocation129_spill] sm:$0xff]  ;;  %13005 = vmatprep.mubr.f32.mxu1 %v19357_v2  ;;  %v19984_v23 = vsub.f32 1.0, %v19852_v13  ;;  %v19985_v2 = vsel %vm15795_vm12, 0.0, %v15791_v55 }
 0x2cd   : > { %v9175_v28 = vsel %vm15923_vm3, %v19962_v62, %v19920_v18  ;;  %v10023_v19 = vmul.f32 %v15910_v43, %v15914_v17  ;;  %v15956_v18 = vpop.f32.mrf.mxu1  ;;  %19965 = vst [vmem:[#allocation168_spill] sm:$0xff] %v15958_v47  ;;  %vm19968_vm5 = vnez %v19967_v33  ;;  %vm19971_vm3 = vcmp.le.f32.partialorder %v19921_v44, 1.0  ;;  %v16001_v41 = vpop.f32.mrf.mxu0  ;;  %v19982_v33 = vld [vmem:[#allocation180_spill] sm:$0xff] }
 0x2ce   : > { %19964 = vst [vmem:[#allocation85_spill] sm:$0xff] %v15956_v18  ;;  %v9287_v62 = vsel %vm19968_vm5, 0.0, %v9175_v28  ;;  %v15967_v8 = vsel %vm19968_vm5, %v19969_v7, %v9191_v56  ;;  %vm15971_vm6 = vmand %vm9351_vm2, %vm19971_vm3  ;;  %v15977_v47 = vadd.f32 %v15627_v31, %v5579_v29  ;;  %v19974_v28 = vld [vmem:[#allocation27_spill] sm:$0xff]  ;;  %vm19975_vm2 = vcmp.ge.f32.partialorder %v19852_v13, 0.0 }
 0x2cf   : > { %19970 = vst [vmem:[#allocation72_spill] sm:$0xff] %v15967_v8  ;;  %12973 = vmatprep.mubr.f32.mxu0 %v19974_v28  ;;  %v15987_v7 = vsel %vm15971_vm6, %v19921_v44, %v9287_v62  ;;  %vm9114_vm5 = vmand %vm9082_vm10, %vm19975_vm2  ;;  %vm9132_vm3 = vcmp.le.f32.partialorder %v19854_v57, 1.0  ;;  %v10003_v29 = vadd.f32 %v15932_v11, %v9983_v27  ;;  %vm19977_vm15 = vnez %v19976_v24  ;;  %v16003_v44 = vpop.f32.mrf.mxu1  ;;  %v19981_v27 = vld [vmem:[#allocation76_spill] sm:$0xff]  ;;  %v19983_v28 = vld [vmem:[#allocation182_spill] sm:$0xff]  ;;  %13006 = vmatmul.mubr.f32.gmra.mxu1 %v19358_v22 }
 0x2d0   : > { %v9477_v31 = vsel %vm19977_vm15, 0.0, %v15808_v35  ;;  %19978 = vst [vmem:[#allocation123_spill] sm:$0xff] %v16003_v44  ;;  %vm16009_vm4 = vmand %vm9114_vm5, %vm9130_vm7  ;;  %vm9081_vm10 = vcmp.ge.f32.partialorder %v15780_v39, 1.0  ;;  %v9865_v35 = vsub.s32 7, %v15503_v61  ;;  %v16018_v62 = vadd.f32 %v15977_v47, %v19982_v33  ;;  %12974 = vmatmul.mubr.f32.vlgmr.msra.gmra.mxu0 %v19986_v36  ;;  %v19990_v8 = vld [vmem:[#allocation94_spill] sm:$0xff]  ;;  %v16096_v36 = vpop.permute.xlu0 %9928  ;;  %v20008_v22 = vld [vmem:[#allocation120_spill] sm:$0xff]  ;;  %13008 = vmatprep.mubr.f32.mxu1 %v19360_v63 }
 0x2d1   : > { %v16022_v56 = vadd.f32 %v15980_v42, %v19983_v28  ;;  %v9178_v53 = vsel %vm16009_vm4, %v19984_v23, %v19922_v49  ;;  %v9194_v44 = vsel %vm16009_vm4, %v19852_v13, %v15721_v6  ;;  %vm9354_vm7 = vmand %vm9322_vm9, %vm9338_vm11  ;;  %v16039_v18 = vadd.f32 %v10023_v19, %v10003_v29  ;;  %v16047_v49 = vpop.f32.mrf.mxu0  ;;  %v16050_v13 = vpop.f32.mrf.mxu1  ;;  %13024 = vmatpush3.msra.mxu0 %v15305_v4  ;;  %v19996_v4 = vld [vmem:[#allocation130_spill] sm:$0xff]  ;;  %v20019_v39 = vld [vmem:[#allocation96_spill] sm:$0xff] }
 0x2d2   : > { %v9493_v23 = vsel %vm19977_vm15, 1.0, %v19985_v2  ;;  %19987 = vst [vmem:[#allocation169_spill] sm:$0xff] %v16050_v13  ;;  %vm19989_vm4 = vnez %v19988_v3  ;;  %vm16061_vm12 = vmand %vm9354_vm7, %vm9370_vm13  ;;  %vm9321_vm11 = vcmp.le.f32.partialorder %v15737_v34, 0.0  ;;  %v19993_v2 = vsub.s32 3, %v15503_v61 }
 0x2d3   : > { %v9290_v6 = vsel %vm19989_vm4, 0.0, %v9178_v53  ;;  %v16057_v19 = vsel %vm19989_vm4, %v19990_v8, %v9194_v44  ;;  %v19994_v53 = vld [vmem:[#allocation29_spill] sm:$0xff]  ;;  %vm19995_vm13 = vcmp.ge.f32.partialorder %v19853_v52, 0.0  ;;  %vm9084_vm7 = vcmp.ge.f32.partialorder %v15868_v46, 1.0  ;;  %v16090_v24 = vpop.f32.mrf.mxu0  ;;  %v19999_v44 = vld [vmem:[#allocation194_spill] sm:$0xff]  ;;  %20000 = vst [vmem:[#allocation172_spill] sm:$0xff] %v16096_v36 }
 0x2d4   : > { %v16069_v55 = vrot.slane %v15743_v15, %v19993_v2  ;;  %12976 = vmatprep.mubr.f32.mxu0 %v19994_v53  ;;  %v16077_v8 = vsel %vm16061_vm12, %v19941_v25, %v9290_v6  ;;  %vm9113_vm15 = vmand %vm9081_vm10, %vm19995_vm13  ;;  %vm19997_vm9 = vnez %v19996_v4  ;;  %v16092_v25 = vpop.f32.mrf.mxu1  ;;  %13075 = vmatprep.subr.mxu0 %v19999_v44  ;;  %v16098_v6 = vpop.permute.xlu1 %9940  ;;  %vm20002_vm10 = vcmp.le.f32.partialorder %v19853_v52, 1.0  ;;  %v20005_v2 = vld [vmem:[#allocation77_spill] sm:$0xff]  ;;  %v20032_v46 = vld [vmem:[#allocation78_spill] sm:$0xff] }
 0x2d5   : > { %v9557_v29 = vsel %vm19997_vm9, 1.0, %v9477_v31  ;;  %19998 = vst [vmem:[#allocation86_spill] sm:$0xff] %v16092_v25  ;;  %20001 = vst [vmem:[#allocation73_spill] sm:$0xff] %v16098_v6  ;;  %vm9339_vm4 = vcmp.ge.f32.partialorder %v20005_v2, 0.0  ;;  %v9573_v31 = vsel %vm19997_vm9, 0.0, %v9493_v23  ;;  %v20006_v53 = vld [vmem:[#allocation93_spill] sm:$0xff]  ;;  %vm20009_vm2 = vnez %v20008_v22 }
 0x2d6   : > { %vm16102_vm13 = vmand %vm9113_vm15, %vm20002_vm10  ;;  %vm20007_vm5 = vnez %v20006_v53  ;;  %v9476_v36 = vsel %vm20009_vm2, 0.0, %v15607_v51  ;;  %v20010_v6 = vsel %vm15529_vm0, 0.0, %v15591_v16  ;;  %v20011_v23 = vsub.f32 1.0, %v19853_v52 }
 0x2d7   : > { %v16111_v3 = vsel %vm20007_vm5, 0.0, %v9557_v29  ;;  %v9492_v25 = vsel %vm20009_vm2, 1.0, %v20010_v6  ;;  %v9193_v51 = vsel %vm16102_vm13, %v19853_v52, %v15737_v34  ;;  %vm20012_vm9 = vcmp.ge.f32.partialorder %v19961_v54, 0.0  ;;  %v20015_v29 = vld [vmem:[#allocation31_spill] sm:$0xff]  ;;  %v16149_v52 = vpop.f32.mrf.mxu1 }
 0x2d8   : > { %v9177_v4 = vsel %vm16102_vm13, %v20011_v23, %v19926_v40  ;;  %vm9353_vm0 = vmand %vm9321_vm11, %vm20012_vm9  ;;  %v20013_v22 = vsub.s32 6, %v15503_v61  ;;  %v16144_v16 = vsel %vm20007_vm5, 0.0, %v9573_v31  ;;  %v16146_v40 = vpop.f32.mrf.mxu0  ;;  %12977 = vmatmul.mubr.f32.gmra.mxu0 %v20015_v29  ;;  %20016 = vst [vmem:[#allocation176_spill] sm:$0xff] %v16149_v52  ;;  %v20017_v6 = vld [vmem:[#allocation179_spill] sm:$0xff]  ;;  %vm20021_vm11 = vcmp.le.f32.partialorder %v19961_v54, 1.0 }
 0x2d9   : > { %20014 = vst [vmem:[#allocation174_spill] sm:$0xff] %v16146_v40  ;;  %vm20018_vm15 = vnez %v20017_v6  ;;  %vm16160_vm10 = vmand %vm9353_vm0, %vm20021_vm11  ;;  %vm9324_vm5 = vcmp.le.f32.partialorder %v15819_v58, 0.0  ;;  %v20024_v31 = vsub.s32 4, %v15503_v61  ;;  %vm20026_vm9 = vcmp.ge.f32.partialorder %v19854_v57, 0.0  ;;  %v20047_v40 = vld [vmem:[#allocation98_spill] sm:$0xff] }
 0x2da   : > { %v16139_v5 = vrot.slane %v15743_v15, %v20013_v22  ;;  %v9289_v34 = vsel %vm20018_vm15, 0.0, %v9177_v4  ;;  %v16156_v23 = vsel %vm20018_vm15, %v20019_v39, %v9193_v51  ;;  %v20025_v4 = vld [vmem:[#allocation32_spill] sm:$0xff]  ;;  %vm9116_vm0 = vmand %vm9084_vm7, %vm20026_vm9  ;;  %v16185_v6 = vrot.slane %v15743_v15, %v9865_v35  ;;  %v16189_v39 = vpop.f32.mrf.mxu0 }
 0x2db   : > { %20020 = vst [vmem:[#allocation171_spill] sm:$0xff] %v16156_v23  ;;  %v16168_v22 = vrot.slane %v15743_v15, %v20024_v31  ;;  %12979 = vmatprep.mubr.f32.mxu0 %v20025_v4  ;;  %v16175_v51 = vsel %vm16160_vm10, %v19961_v54, %v9289_v34  ;;  %vm9323_vm15 = vcmp.le.f32.partialorder %v15977_v47, 0.0  ;;  %20027 = vst [vmem:[#allocation88_spill] sm:$0xff] %v16189_v39  ;;  %v16191_v54 = vpop.f32.mrf.mxu1  ;;  %v20029_v34 = vld [vmem:[#allocation21_spill] sm:$0xff]  ;;  %vm9083_vm7 = vcmp.ge.f32.partialorder %v16018_v62, 1.0  ;;  %v16236_v31 = vpop.permute.xlu0 %9936 }
 0x2dc   : > { %20028 = vst [vmem:[#allocation74_spill] sm:$0xff] %v16191_v54  ;;  %13009 = vmatmul.mubr.f32.gmra.mxu1 %v20029_v34  ;;  %vm16196_vm13 = vmand %vm9116_vm0, %vm9132_vm3  ;;  %v9985_v35 = vmul.f32 %v15802_v10, %v16111_v3  ;;  %v20033_v4 = vld [vmem:[#allocation121_spill] sm:$0xff]  ;;  %v20035_v34 = vld [vmem:[#allocation35_spill] sm:$0xff]  ;;  %v20036_v52 = vsub.f32 1.0, %v19854_v57  ;;  %vm20037_vm3 = vcmp.ge.f32.partialorder %v19981_v27, 0.0  ;;  %vm9086_vm2 = vcmp.ge.f32.partialorder %v16022_v56, 1.0 }
 0x2dd   : > { %vm20034_vm11 = vnez %v20033_v4  ;;  %13011 = vmatprep.mubr.f32.mxu1 %v20035_v34  ;;  %v9196_v13 = vsel %vm16196_vm13, %v19854_v57, %v15819_v58  ;;  %vm9356_vm0 = vmand %vm9324_vm5, %vm20037_vm3  ;;  %v16234_v57 = vpop.f32.mrf.mxu1  ;;  %20043 = vst [vmem:[#allocation173_spill] sm:$0xff] %v16236_v31  ;;  %v16238_v58 = vpop.permute.xlu1 %9948  ;;  %v20045_v34 = vld [vmem:[#allocation181_spill] sm:$0xff]  ;;  %vm20061_vm3 = vcmp.le.f32.partialorder %v19857_v0, 1.0 }
 0x2de   : > { %v9556_v29 = vsel %vm20034_vm11, 1.0, %v9476_v36  ;;  %v9572_v54 = vsel %vm20034_vm11, 0.0, %v9492_v25  ;;  %v9180_v63 = vsel %vm16196_vm13, %v20036_v52, %v19947_v37  ;;  %v20038_v25 = vld [vmem:[#allocation87_spill] sm:$0xff]  ;;  %v16231_v37 = vpop.f32.mrf.mxu0  ;;  %v20041_v52 = vld [vmem:[#allocation33_spill] sm:$0xff]  ;;  %20042 = vst [vmem:[#allocation178_spill] sm:$0xff] %v16234_v57  ;;  %20044 = vst [vmem:[#allocation90_spill] sm:$0xff] %v16238_v58  ;;  %vm20046_vm5 = vnez %v20045_v34 }
 0x2df   : > { %vm20039_vm9 = vnez %v20038_v25  ;;  %20040 = vst [vmem:[#allocation124_spill] sm:$0xff] %v16231_v37  ;;  %12980 = vmatmul.mubr.f32.gmra.mxu0 %v20041_v52  ;;  %v9292_v39 = vsel %vm20046_vm5, 0.0, %v9180_v63  ;;  %vm20049_vm13 = vcmp.le.f32.partialorder %v19981_v27, 1.0  ;;  %v10005_v25 = vadd.f32 %v15932_v11, %v9985_v35  ;;  %v20053_v57 = vld [vmem:[#allocation79_spill] sm:$0xff]  ;;  %v20054_v58 = vld [vmem:[#allocation34_spill] sm:$0xff]  ;;  %v20108_v56 = vld [vmem:[#allocation185_spill] sm:$0xff] }
 0x2e0   : > { %v16225_v36 = vsel %vm20039_vm9, 0.0, %v9556_v29  ;;  %v16229_v4 = vsel %vm20039_vm9, 0.0, %v9572_v54  ;;  %v16245_v29 = vsel %vm20046_vm5, %v20047_v40, %v9196_v13  ;;  %vm16249_vm9 = vmand %vm9356_vm0, %vm20049_vm13  ;;  %v20050_v54 = vmov 0  ;;  %12982 = vmatprep.mubr.f32.mxu0 %v20054_v58  ;;  %v20058_v35 = vld [vmem:[#allocation146_spill] sm:$0xff]  ;;  %13012 = vmatmul.mubr.f32.gmra.mxu1 %v19874_v38  ;;  %v20064_v13 = vld [vmem:[#allocation37_spill] sm:$0xff] }
 0x2e1   : > { %20048 = vst [vmem:[#allocation89_spill] sm:$0xff] %v16245_v29  ;;  %v20051_v54 = vsel %vm16249_vm9, 4294967295, %v20050_v54  ;;  %v10025_v52 = vmul.f32 %v15910_v43, %v16144_v16  ;;  %v16261_v63 = vsel %vm16249_vm9, %v19981_v27, %v9292_v39  ;;  %v20056_v40 = vsub.s32 0, %v15503_v61  ;;  %v16277_v27 = vpop.f32.mrf.mxu0  ;;  %v16279_v39 = vpop.f32.mrf.mxu1  ;;  %13014 = vmatprep.mubr.f32.mxu1 %v20064_v13  ;;  %v20068_v13 = vld [vmem:[#allocation208_spill] sm:$0xff] }
 0x2e2   : > { %20052 = vst [vmem:[#allocation75_spill] sm:$0xff] %v20051_v54  ;;  %20055 = vst [vmem:[#allocation175_spill] sm:$0xff] %v16261_v63  ;;  %vm20057_vm0 = vcmp.ge.f32.partialorder %v19857_v0, 0.0  ;;  %vm9101_vm13 = vcmp.ge.f32.partialorder %v20058_v35, 0.0  ;;  %v9845_v58 = vsub.s32 1, %v15503_v61  ;;  %v9984_v61 = vmul.f32 %v15802_v10, %v16225_v36  ;;  %v20074_v54 = vld [vmem:[#allocation100_spill] sm:$0xff] }
 0x2e3   : > { %v16269_v34 = vrot.slane %v15743_v15, %v20056_v40  ;;  %vm9115_vm5 = vmand %vm9083_vm7, %vm20057_vm0  ;;  %20059 = vst [vmem:[#allocation92_spill] sm:$0xff] %v16277_v27  ;;  %vm9326_vm7 = vcmp.le.f32.partialorder %v15980_v42, 0.0  ;;  %v16290_v62 = vadd.f32 %v10025_v52, %v10005_v25  ;;  %v20066_v25 = vld [vmem:[#allocation207_spill] sm:$0xff]  ;;  %v20067_v52 = vld [vmem:[#allocation70_spill] sm:$0xff]  ;;  %v5609_v37 = vadd.f32 %v15870_v48, %v20068_v13  ;;  %v16314_v29 = vpop.f32.mrf.mxu0 }
 0x2e4   : > { %20060 = vst [vmem:[#allocation27_spill] sm:$0xff] %v16279_v39  ;;  %vm16284_vm11 = vmand %vm9115_vm5, %vm20061_vm3  ;;  %v20065_v39 = vsub.f32 1.0, %v19857_v0  ;;  %v5591_v27 = vadd.f32 %v20067_v52, %v20066_v25  ;;  %v20077_v25 = vmov 0  ;;  %v10004_v48 = vadd.f32 %v15932_v11, %v9984_v61  ;;  %v20080_v52 = vld [vmem:[#allocation149_spill] sm:$0xff] }
 0x2e5   : > { %v9195_v38 = vsel %vm16284_vm11, %v19857_v0, %v15977_v47  ;;  %vm9355_vm3 = vmand %vm9323_vm15, %vm9339_vm4  ;;  %20069 = vst [vmem:[#allocation129_spill] sm:$0xff] %v16314_v29  ;;  %v20072_v0 = vld [vmem:[#allocation183_spill] sm:$0xff]  ;;  %vm20076_vm4 = vcmp.le.f32.partialorder %v20005_v2, 1.0  ;;  %v10024_v13 = vmul.f32 %v15910_v43, %v16229_v4  ;;  %v16363_v29 = vpop.permute.xlu1 %9956 }
 0x2e6   : > { %v9179_v31 = vsel %vm16284_vm11, %v20065_v39, %v19982_v33  ;;  %v20070_v33 = vld [vmem:[#allocation50_spill] sm:$0xff]  ;;  %v16317_v39 = vpop.f32.mrf.mxu1  ;;  %vm20073_vm11 = vnez %v20072_v0  ;;  %vm16328_vm15 = vmand %vm9355_vm3, %vm20076_vm4  ;;  %vm20083_vm3 = vcmp.ge.f32.partialorder %v19858_v14, 0.0  ;;  %v20085_v0 = vld [vmem:[#allocation140_spill] sm:$0xff]  ;;  %20090 = vst [vmem:[#allocation130_spill] sm:$0xff] %v16363_v29 }
 0x2e7   : > { %12983 = vmatmul.mubr.f32.gmra.mxu0 %v20070_v33  ;;  %20071 = vst [vmem:[#allocation76_spill] sm:$0xff] %v16317_v39  ;;  %v9291_v40 = vsel %vm20073_vm11, 0.0, %v9179_v31  ;;  %v16324_v47 = vsel %vm20073_vm11, %v20074_v54, %v9195_v38  ;;  %v20078_v25 = vsel %vm16328_vm15, 4294967295, %v20077_v25  ;;  %v20081_v33 = vld [vmem:[#allocation54_spill] sm:$0xff]  ;;  %vm9118_vm11 = vmand %vm9086_vm2, %vm20083_vm3  ;;  %v20084_v54 = vld [vmem:[#allocation69_spill] sm:$0xff]  ;;  %v16353_v39 = vadd.f32 %v20085_v0, %v5609_v37  ;;  %v16361_v31 = vpop.permute.xlu0 %9944 }
 0x2e8   : > { %20075 = vst [vmem:[#allocation180_spill] sm:$0xff] %v16324_v47  ;;  %20079 = vst [vmem:[#allocation182_spill] sm:$0xff] %v20078_v25  ;;  %12985 = vmatprep.mubr.f32.mxu0 %v20081_v33  ;;  %v16340_v38 = vsel %vm16328_vm15, %v20005_v2, %v9291_v40  ;;  %v16350_v61 = vadd.f32 %v20084_v54, %v5591_v27  ;;  %v16356_v33 = vpop.f32.mrf.mxu0  ;;  %v16358_v2 = vpop.f32.mrf.mxu1  ;;  %v20088_v40 = vld [vmem:[#allocation38_spill] sm:$0xff]  ;;  %vm20091_vm2 = vcmp.le.f32.partialorder %v19858_v14, 1.0  ;;  %v20094_v27 = vld [vmem:[#allocation80_spill] sm:$0xff] }
 0x2e9   : > { %20082 = vst [vmem:[#allocation28_spill] sm:$0xff] %v16340_v38  ;;  %20086 = vst [vmem:[#allocation177_spill] sm:$0xff] %v16356_v33  ;;  %13015 = vmatmul.mubr.f32.gmra.mxu1 %v20088_v40  ;;  %v16371_v37 = vadd.f32 %v10024_v13, %v10004_v48  ;;  %v20095_v54 = vld [vmem:[#allocation137_spill] sm:$0xff]  ;;  %v20096_v0 = vld [vmem:[#allocation126_spill] sm:$0xff]  ;;  %v16384_v47 = vrot.slane %v15743_v15, %v9845_v58  ;;  %v20102_v48 = vsub.f32 1.0, %v19858_v14  ;;  %v10057_v23 = vpop.permute.xlu1 %10056 }
 0x2ea   : > { %20087 = vst [vmem:[#allocation94_spill] sm:$0xff] %v16358_v2  ;;  %20089 = vst [vmem:[#allocation29_spill] sm:$0xff] %v16361_v31  ;;  %vm20097_vm5 = vnez %v20096_v0  ;;  %v20099_v40 = vld [vmem:[#allocation131_spill] sm:$0xff]  ;;  %v20101_v25 = vld [vmem:[#allocation42_spill] sm:$0xff] }
 0x2eb   : > { %vm16367_vm3 = vmand %vm9118_vm11, %vm20091_vm2  ;;  %v9478_v33 = vsel %vm20097_vm5, 0.0, %v20095_v54  ;;  %v20100_v31 = vsel %vm15712_vm1, 0.0, %v20099_v40  ;;  %13017 = vmatprep.mubr.f32.mxu1 %v20101_v25  ;;  %vm20103_vm1 = vcmp.ge.f32.partialorder %v20032_v46, 0.0  ;;  %v20104_v15 = vld [vmem:[#allocation184_spill] sm:$0xff]  ;;  %vm9325_vm11 = vcmp.le.f32.partialorder %v16350_v61, 0.0  ;;  %v16407_v40 = vpop.f32.mrf.mxu1  ;;  %v20110_v54 = vld [vmem:[#allocation102_spill] sm:$0xff] }
 0x2ec   : > { %v9494_v29 = vsel %vm20097_vm5, 1.0, %v20100_v31  ;;  %v9182_v13 = vsel %vm16367_vm3, %v20102_v48, %v19983_v28  ;;  %v9198_v2 = vsel %vm16367_vm3, %v19858_v14, %v15980_v42  ;;  %vm9358_vm5 = vmand %vm9326_vm7, %vm20103_vm1  ;;  %v9069_v58 = vadd.f32 %v16350_v61, %v20104_v15  ;;  %v16404_v31 = vpop.f32.mrf.mxu0  ;;  %v20106_v28 = vld [vmem:[#allocation57_spill] sm:$0xff]  ;;  %20107 = vst [vmem:[#allocation77_spill] sm:$0xff] %v16407_v40  ;;  %v20117_v40 = vld [vmem:[#allocation60_spill] sm:$0xff] }
 0x2ed   : > { %20105 = vst [vmem:[#allocation194_spill] sm:$0xff] %v16404_v31  ;;  %12986 = vmatmul.mubr.f32.gmra.mxu0 %v20106_v28  ;;  %v16411_v14 = vmul.f32 %v16069_v55, %v15893_v30  ;;  %vm20109_vm3 = vnez %v20108_v56  ;;  %vm20112_vm7 = vcmp.le.f32.partialorder %v20032_v46, 1.0  ;;  %v20113_v48 = vmov 0  ;;  %v20116_v28 = vld [vmem:[#allocation186_spill] sm:$0xff]  ;;  %v20122_v56 = vld [vmem:[#allocation81_spill] sm:$0xff]  ;;  %v16452_v38 = vpop.f32.mrf.mxu1  ;;  %13018 = vmatmul.mubr.f32.gmra.mxu1 %v19916_v12  ;;  %v20133_v12 = vld [vmem:[#allocation152_spill] sm:$0xff] }
 0x2ee   : > { %v9294_v42 = vsel %vm20109_vm3, 0.0, %v9182_v13  ;;  %v16418_v0 = vsel %vm20109_vm3, %v20110_v54, %v9198_v2  ;;  %vm16422_vm1 = vmand %vm9358_vm5, %vm20112_vm7  ;;  %v9072_v31 = vadd.f32 %v16353_v39, %v20116_v28  ;;  %12988 = vmatprep.mubr.f32.mxu0 %v20117_v40  ;;  %v16431_v25 = vmul.f32 %v16139_v5, %v15914_v17  ;;  %v16450_v54 = vpop.f32.mrf.mxu0  ;;  %20124 = vst [vmem:[#allocation96_spill] sm:$0xff] %v16452_v38 }
 0x2ef   : > { %20111 = vst [vmem:[#allocation93_spill] sm:$0xff] %v16418_v0  ;;  %v20114_v48 = vsel %vm16422_vm1, 4294967295, %v20113_v48  ;;  %v16436_v13 = vsel %vm16422_vm1, %v20032_v46, %v9294_v42  ;;  %vm9085_vm5 = vcmp.ge.f32.partialorder %v9069_v58, 1.0  ;;  %vm20119_vm3 = vcmp.ge.f32.partialorder %v20053_v57, 0.0  ;;  %20123 = vst [vmem:[#allocation179_spill] sm:$0xff] %v16450_v54  ;;  %v20125_v58 = vld [vmem:[#allocation127_spill] sm:$0xff]  ;;  %13020 = vmatprep.mubr.f32.mxu1 %v19923_v9  ;;  %v16489_v63 = vpop.f32.mrf.mxu1 }
 0x2f0   : > { %20115 = vst [vmem:[#allocation120_spill] sm:$0xff] %v20114_v48  ;;  %20118 = vst [vmem:[#allocation31_spill] sm:$0xff] %v16436_v13  ;;  %v16457_v46 = vmul.f32 %v16168_v22, %v15893_v30  ;;  %vm9088_vm0 = vcmp.ge.f32.partialorder %v9072_v31, 1.0  ;;  %vm20127_vm2 = vcmp.le.f32.partialorder %v20058_v35, 1.0  ;;  %v20130_v30 = vld [vmem:[#allocation91_spill] sm:$0xff]  ;;  %v20134_v9 = vld [vmem:[#allocation212_spill] sm:$0xff]  ;;  %v16486_v48 = vpop.f32.mrf.mxu0 }
 0x2f1   : > { %vm16445_vm7 = vmand %vm9325_vm11, %vm20119_vm3  ;;  %vm20126_vm11 = vnez %v20125_v58  ;;  %vm9375_vm3 = vcmp.le.f32.partialorder %v20122_v56, 1.0  ;;  %vm20131_vm15 = vnez %v20130_v30  ;;  %v20132_v58 = vld [vmem:[#allocation209_spill] sm:$0xff]  ;;  %v5621_v0 = vadd.f32 %v15953_v50, %v20134_v9  ;;  %20135 = vst [vmem:[#allocation32_spill] sm:$0xff] %v16486_v48  ;;  %v20136_v13 = vld [vmem:[#allocation62_spill] sm:$0xff]  ;;  %13021 = vmatmul.mubr.f32.gmra.mxu1 %v19608_v1 }
 0x2f2   : > { %vm9117_vm4 = vmand %vm9085_vm5, %vm9101_vm13  ;;  %v9558_v42 = vsel %vm20126_vm11, 1.0, %v9478_v33  ;;  %v9574_v2 = vsel %vm20126_vm11, 0.0, %v9494_v29  ;;  %v5603_v29 = vadd.f32 %v15916_v32, %v20132_v58  ;;  %vm9103_vm13 = vcmp.ge.f32.partialorder %v20133_v12, 0.0  ;;  %12989 = vmatmul.mubr.f32.gmra.mxu0 %v20136_v13  ;;  %20137 = vst [vmem:[#allocation78_spill] sm:$0xff] %v16489_v63  ;;  %v20146_v54 = vld [vmem:[#allocation104_spill] sm:$0xff]  ;;  %v20148_v58 = vld [vmem:[#allocation155_spill] sm:$0xff] }
 0x2f3   : > { %vm16469_vm1 = vmand %vm9117_vm4, %vm20127_vm2  ;;  %v16475_v38 = vsel %vm20131_vm15, 0.0, %v9558_v42  ;;  %v16479_v33 = vsel %vm20131_vm15, 0.0, %v9574_v2  ;;  %v16491_v42 = vpop.permute.xlu0 %9952  ;;  %v16495_v2 = vmul.f32 %v16185_v6, %v15914_v17  ;;  %v20139_v32 = vsub.f32 1.0, %v20058_v35  ;;  %v20143_v17 = vld [vmem:[#allocation64_spill] sm:$0xff]  ;;  %v20158_v63 = vld [vmem:[#allocation166_spill] sm:$0xff] }
 0x2f4   : > { %20138 = vst [vmem:[#allocation121_spill] sm:$0xff] %v16491_v42  ;;  %v9197_v9 = vsel %vm16469_vm1, %v20058_v35, %v16350_v61  ;;  %vm20140_vm15 = vcmp.le.f32.partialorder %v20053_v57, 1.0  ;;  %vm9328_vm2 = vcmp.le.f32.partialorder %v16353_v39, 0.0  ;;  %12991 = vmatprep.mubr.f32.mxu0 %v20143_v17  ;;  %v9672_v13 = vmul.f32 %v16069_v55, %v16225_v36  ;;  %v20144_v35 = vld [vmem:[#allocation187_spill] sm:$0xff]  ;;  %v20163_v31 = vld [vmem:[#allocation189_spill] sm:$0xff]  ;;  %v20165_v42 = vld [vmem:[#allocation106_spill] sm:$0xff] }
 0x2f5   : > { %v9181_v30 = vsel %vm16469_vm1, %v20139_v32, %v20104_v15  ;;  %vm16510_vm4 = vmand %vm16445_vm7, %vm20140_vm15  ;;  %v10119_v15 = vsub.f32 %v10057_v23, %v16039_v18  ;;  %vm20145_vm1 = vnez %v20144_v35  ;;  %vm20147_vm7 = vcmp.ge.f32.partialorder %v20080_v52, 0.0  ;;  %v16531_v32 = vpop.f32.mrf.mxu0  ;;  %v16533_v18 = vpop.f32.mrf.mxu1 }
 0x2f6   : > { %v9293_v61 = vsel %vm20145_vm1, 0.0, %v9181_v30  ;;  %v16525_v40 = vsel %vm20145_vm1, %v20146_v54, %v9197_v9  ;;  %vm9120_vm11 = vmand %vm9088_vm0, %vm20147_vm7  ;;  %20149 = vst [vmem:[#allocation87_spill] sm:$0xff] %v16531_v32  ;;  %vm20151_vm1 = vcmp.le.f32.partialorder %v20080_v52, 1.0  ;;  %v9986_v9 = vmul.f32 %v15802_v10, %v16475_v38  ;;  %v20157_v30 = vld [vmem:[#allocation143_spill] sm:$0xff]  ;;  %v20159_v32 = vld [vmem:[#allocation82_spill] sm:$0xff] }
 0x2f7   : > { %20150 = vst [vmem:[#allocation33_spill] sm:$0xff] %v16533_v18  ;;  %v16539_v23 = vsel %vm16510_vm4, %v20053_v57, %v9293_v61  ;;  %vm16546_vm0 = vmand %vm9120_vm11, %vm20151_vm1  ;;  %v10026_v17 = vmul.f32 %v15910_v43, %v16479_v33  ;;  %v20154_v57 = vld [vmem:[#allocation14_spill] sm:$0xff]  ;;  %v20155_v35 = vsub.f32 1.0, %v20080_v52  ;;  %vm20156_vm11 = vcmp.ge.f32.partialorder %v20094_v27, 0.0  ;;  %v16574_v48 = vpop.f32.mrf.mxu0 }
 0x2f8   : > { %13051 = vmatprep.mubr.f32.mxu1 %v20154_v57  ;;  %v9200_v54 = vsel %vm16546_vm0, %v20080_v52, %v16353_v39  ;;  %vm9360_vm1 = vmand %vm9328_vm2, %vm20156_vm11  ;;  %v5765_v18 = vadd.f32 %v20157_v30, %v5603_v29  ;;  %v16571_v57 = vadd.f32 %v20158_v63, %v5621_v0  ;;  %20160 = vst [vmem:[#allocation181_spill] sm:$0xff] %v16574_v48  ;;  %vm20166_vm2 = vcmp.le.f32.partialorder %v20094_v27, 1.0  ;;  %v20169_v29 = vld [vmem:[#allocation132_spill] sm:$0xff]  ;;  %v20175_v48 = vld [vmem:[#allocation15_spill] sm:$0xff] }
 0x2f9   : > { %v9184_v61 = vsel %vm16546_vm0, %v20155_v35, %v20116_v28  ;;  %v20161_v28 = vld [vmem:[#allocation65_spill] sm:$0xff]  ;;  %v16577_v35 = vpop.f32.mrf.mxu1  ;;  %vm20164_vm0 = vnez %v20163_v31  ;;  %vm16588_vm11 = vmand %vm9360_vm1, %vm20166_vm2  ;;  %v10006_v0 = vadd.f32 %v15932_v11, %v9986_v9  ;;  %vm20170_vm15 = vnez %v20169_v29  ;;  %v16607_v9 = vpop.f32.mrf.mxu0  ;;  %13052 = vmatmul.mubr.f32.vlgmr.msra.gmra.mxu1 %v20175_v48  ;;  %v20180_v48 = vld [vmem:[#allocation16_spill] sm:$0xff] }
 0x2fa   : > { %12992 = vmatmul.mubr.f32.gmra.mxu0 %v20161_v28  ;;  %20162 = vst [vmem:[#allocation98_spill] sm:$0xff] %v16577_v35  ;;  %v9296_v52 = vsel %vm20164_vm0, 0.0, %v9184_v61  ;;  %v16584_v39 = vsel %vm20164_vm0, %v20165_v42, %v9200_v54  ;;  %v9480_v30 = vsel %vm20170_vm15, 0.0, %v15899_v21  ;;  %v20171_v61 = vld [vmem:[#allocation66_spill] sm:$0xff]  ;;  %v20172_v28 = vld [vmem:[#allocation188_spill] sm:$0xff]  ;;  %vm9327_vm1 = vcmp.le.f32.partialorder %v5765_v18, 0.0  ;;  %13102 = vmatpush3.msra.mxu1 %v15294_v20 }
 0x2fb   : > { %12994 = vmatprep.mubr.f32.mxu0 %v20171_v61  ;;  %v16601_v42 = vsel %vm16588_vm11, %v20094_v27, %v9296_v52  ;;  %v9071_v31 = vadd.f32 %v5765_v18, %v20172_v28  ;;  %20173 = vst [vmem:[#allocation79_spill] sm:$0xff] %v16607_v9  ;;  %v16609_v35 = vpop.f32.mrf.mxu1  ;;  %v16612_v21 = vmul.f32 %v10119_v15, %v10119_v15  ;;  %v16614_v61 = vpop.permute.xlu0 %9960  ;;  %vm20177_vm0 = vcmp.ge.f32.partialorder %v20122_v56, 0.0  ;;  %v20178_v27 = vld [vmem:[#allocation190_spill] sm:$0xff]  ;;  %v20186_v20 = vld [vmem:[#allocation67_spill] sm:$0xff] }
 0x2fc   : > { %20174 = vst [vmem:[#allocation34_spill] sm:$0xff] %v16609_v35  ;;  %20176 = vst [vmem:[#allocation146_spill] sm:$0xff] %v16614_v61  ;;  %v16616_v1 = vadd.f32 %v10026_v17, %v10006_v0  ;;  %v9074_v52 = vadd.f32 %v16571_v57, %v20178_v27  ;;  %v20179_v54 = vsel %vm15884_vm8, 0.0, %v15880_v60  ;;  %13054 = vmatprep.mubr.f32.mxu1 %v20180_v48  ;;  %v20183_v17 = vld [vmem:[#allocation133_spill] sm:$0xff]  ;;  %v16641_v29 = vpop.f32.mrf.mxu0  ;;  %v20197_v61 = vld [vmem:[#allocation83_spill] sm:$0xff] }
 0x2fd   : > { %vm9359_vm2 = vmand %vm9327_vm1, %vm20177_vm0  ;;  %v9496_v35 = vsel %vm20170_vm15, 1.0, %v20179_v54  ;;  %vm9087_vm7 = vcmp.ge.f32.partialorder %v9071_v31, 1.0  ;;  %vm20184_vm1 = vnez %v20183_v17  ;;  %v9692_v45 = vadd.f32 %v16269_v34, %v9672_v13  ;;  %20185 = vst [vmem:[#allocation207_spill] sm:$0xff] %v16641_v29  ;;  %v16644_v54 = vpop.f32.mrf.mxu1  ;;  %v10065_v31 = vpop.permute.xlu1 %10064  ;;  %v20190_v17 = vld [vmem:[#allocation7_spill] sm:$0xff] }
 0x2fe   : > { %vm16632_vm5 = vmand %vm9359_vm2, %vm9375_vm3  ;;  %v9560_v0 = vsel %vm20184_vm1, 1.0, %v9480_v30  ;;  %v9576_v60 = vsel %vm20184_vm1, 0.0, %v9496_v35  ;;  %12995 = vmatmul.mubr.f32.gmra.mxu0 %v20186_v20  ;;  %20187 = vst [vmem:[#allocation70_spill] sm:$0xff] %v16644_v54  ;;  %v16648_v48 = vmul.f32 %v16069_v55, %v16111_v3  ;;  %vm9090_vm3 = vcmp.ge.f32.partialorder %v9074_v52, 1.0  ;;  %v20188_v30 = vld [vmem:[#allocation95_spill] sm:$0xff] }
 0x2ff   : > { %vm9119_vm8 = vmand %vm9087_vm7, %vm9103_vm13  ;;  %vm20189_vm15 = vnez %v20188_v30  ;;  %13025 = vmatprep.mubr.f32.mxu0 %v20190_v17  ;;  %v9712_v20 = vmul.f32 %v16139_v5, %v16229_v4  ;;  %v9828_v54 = vmul.f32 %v16168_v22, %v16225_v36  ;;  %v9868_v29 = vmul.f32 %v16185_v6, %v16229_v4  ;;  %v20194_v30 = vld [vmem:[#allocation22_spill] sm:$0xff] }
 0x300   : > { %v16654_v35 = vsel %vm20189_vm15, 0.0, %v9560_v0  ;;  %v16658_v13 = vsel %vm20189_vm15, 0.0, %v9576_v60  ;;  %vm20191_vm13 = vcmp.le.f32.partialorder %v20133_v12, 1.0  ;;  %vm9330_vm0 = vcmp.le.f32.partialorder %v16571_v57, 0.0  ;;  %v16670_v0 = vpop.f32.mrf.mxu0  ;;  %v16672_v60 = vpop.f32.mrf.mxu1  ;;  %13055 = vmatmul.mubr.f32.gmra.mxu1 %v20194_v30  ;;  %v20199_v30 = vld [vmem:[#allocation191_spill] sm:$0xff] }
 0x301   : > { %vm9151_vm7 = vmand %vm9119_vm8, %vm20191_vm13  ;;  %20192 = vst [vmem:[#allocation208_spill] sm:$0xff] %v16670_v0  ;;  %v16676_v17 = vsub.f32 %v10065_v31, %v16290_v62  ;;  %v20195_v36 = vsub.f32 1.0, %v20133_v12  ;;  %vm20196_vm2 = vcmp.ge.f32.partialorder %v20148_v58, 0.0  ;;  %v9988_v0 = vmul.f32 %v15802_v10, %v16654_v35  ;;  %v20201_v31 = vld [vmem:[#allocation108_spill] sm:$0xff] }
 0x302   : > { %20193 = vst [vmem:[#allocation50_spill] sm:$0xff] %v16672_v60  ;;  %v9199_v4 = vsel %vm9151_vm7, %v20133_v12, %v5765_v18  ;;  %vm9122_vm1 = vmand %vm9090_vm3, %vm20196_vm2  ;;  %vm9345_vm8 = vcmp.ge.f32.partialorder %v20197_v61, 0.0  ;;  %v20198_v60 = vld [vmem:[#allocation23_spill] sm:$0xff]  ;;  %vm20200_vm15 = vnez %v20199_v30  ;;  %vm20202_vm13 = vcmp.le.f32.partialorder %v20148_v58, 1.0 }
 0x303   : > { %v9183_v9 = vsel %vm9151_vm7, %v20195_v36, %v20172_v28  ;;  %13057 = vmatprep.mubr.f32.mxu1 %v20198_v60  ;;  %v16694_v28 = vsel %vm20200_vm15, %v20201_v31, %v9199_v4  ;;  %vm16698_vm7 = vmand %vm9122_vm1, %vm20202_vm13  ;;  %v10028_v18 = vmul.f32 %v15910_v43, %v16658_v13  ;;  %v9728_v52 = vadd.f32 %v9712_v20, %v9692_v45  ;;  %v16705_v60 = vpop.f32.mrf.mxu0  ;;  %v16708_v36 = vpop.f32.mrf.mxu1  ;;  %v20219_v12 = vld [vmem:[#allocation199_spill] sm:$0xff] }
 0x304   : > { %v9295_v62 = vsel %vm20200_vm15, 0.0, %v9183_v9  ;;  %vm9377_vm3 = vcmp.le.f32.partialorder %v20197_v61, 1.0  ;;  %20205 = vst [vmem:[#allocation183_spill] sm:$0xff] %v16705_v60  ;;  %v20206_v9 = vld [vmem:[#allocation8_spill] sm:$0xff]  ;;  %20207 = vst [vmem:[#allocation100_spill] sm:$0xff] %v16708_v36  ;;  %v10061_v4 = vpop.permute.xlu0 %10060  ;;  %v20208_v45 = vsub.f32 1.0, %v20148_v58 }
 0x305   : > { %13026 = vmatmul.mubr.f32.vlgmr.msra.gmra.mxu0 %v20206_v9  ;;  %v16713_v30 = vsel %vm16632_vm5, %v20122_v56, %v9295_v62  ;;  %v9202_v9 = vsel %vm16698_vm7, %v20148_v58, %v16571_v57  ;;  %vm20209_vm2 = vcmp.ge.f32.partialorder %v20159_v32, 0.0  ;;  %v20210_v56 = vld [vmem:[#allocation158_spill] sm:$0xff]  ;;  %v20211_v62 = vld [vmem:[#allocation9_spill] sm:$0xff]  ;;  %vm20215_vm13 = vcmp.le.f32.partialorder %v20159_v32, 1.0  ;;  %v20222_v36 = vld [vmem:[#allocation24_spill] sm:$0xff] }
 0x306   : > { %v9186_v20 = vsel %vm16698_vm7, %v20208_v45, %v20178_v27  ;;  %vm9362_vm1 = vmand %vm9330_vm0, %vm20209_vm2  ;;  %vm9105_vm15 = vcmp.ge.f32.partialorder %v20210_v56, 0.0  ;;  %13076 = vmatpush3.msra.mxu0 %v19999_v44  ;;  %13028 = vmatprep.mubr.f32.mxu0 %v20211_v62  ;;  %v20213_v27 = vld [vmem:[#allocation110_spill] sm:$0xff]  ;;  %v20216_v58 = vmov 0  ;;  %v10008_v57 = vadd.f32 %v15932_v11, %v9988_v0  ;;  %v16750_v62 = vpop.f32.mrf.mxu0  ;;  %v20344_v61 = vld [vmem:[#allocation148_spill] sm:$0xff] }
 0x307   : > { %v9298_v60 = vsel %vm15268_vm14, 0.0, %v9186_v20  ;;  %v16739_v45 = vsel %vm15268_vm14, %v20213_v27, %v9202_v9  ;;  %vm16743_vm7 = vmand %vm9362_vm1, %vm20215_vm13  ;;  %v9808_v44 = vsub.f32 %v20219_v12, %v9728_v52  ;;  %vm9137_vm0 = vcmp.le.f32.partialorder %v20210_v56, 1.0  ;;  %20220 = vst [vmem:[#allocation69_spill] sm:$0xff] %v16750_v62  ;;  %v16752_v20 = vpop.f32.mrf.mxu1  ;;  %13058 = vmatmul.mubr.f32.gmra.mxu1 %v20222_v36  ;;  %v20223_v52 = vld [vmem:[#allocation68_spill] sm:$0xff]  ;;  %v20224_v12 = vld [vmem:[#allocation25_spill] sm:$0xff] }
 0x308   : > { %20214 = vst [vmem:[#allocation149_spill] sm:$0xff] %v16739_v45  ;;  %v20217_v58 = vsel %vm16743_vm7, 4294967295, %v20216_v58  ;;  %20221 = vst [vmem:[#allocation140_spill] sm:$0xff] %v16752_v20  ;;  %v16758_v31 = vsel %vm16743_vm7, %v20159_v32, %v9298_v60  ;;  %v9848_v0 = vadd.f32 %v16384_v47, %v9828_v54  ;;  %v5615_v27 = vadd.f32 %v16001_v41, %v20223_v52  ;;  %v20225_v36 = vld [vmem:[#allocation135_spill] sm:$0xff]  ;;  %v20227_v60 = vld [vmem:[#allocation72_spill] sm:$0xff]  ;;  %v16779_v9 = vpop.f32.mrf.mxu0 }
 0x309   : > { %20218 = vst [vmem:[#allocation54_spill] sm:$0xff] %v20217_v58  ;;  %13060 = vmatprep.mubr.f32.mxu1 %v20224_v12  ;;  %v10120_v62 = vsub.f32 %v10061_v4, %v16371_v37  ;;  %v16768_v20 = vadd.f32 %v10028_v18, %v10008_v57  ;;  %vm20226_vm14 = vnez %v20225_v36  ;;  %v20228_v58 = vsel %vm15971_vm6, 0.0, %v20227_v60  ;;  %20229 = vst [vmem:[#allocation80_spill] sm:$0xff] %v16779_v9  ;;  %v20230_v41 = vld [vmem:[#allocation17_spill] sm:$0xff]  ;;  %v16782_v52 = vpop.f32.mrf.mxu1  ;;  %v20232_v18 = vld [vmem:[#allocation71_spill] sm:$0xff] }
 0x30a   : > { %v9479_v32 = vsel %vm20226_vm14, 0.0, %v15987_v7  ;;  %v9495_v54 = vsel %vm20226_vm14, 1.0, %v20228_v58  ;;  %13029 = vmatmul.mubr.f32.gmra.mxu0 %v20230_v41  ;;  %20231 = vst [vmem:[#allocation137_spill] sm:$0xff] %v16782_v52  ;;  %v9884_v37 = vadd.f32 %v9868_v29, %v9848_v0  ;;  %v5777_v4 = vadd.f32 %v20232_v18, %v5615_v27  ;;  %v20233_v57 = vld [vmem:[#allocation136_spill] sm:$0xff]  ;;  %v20235_v7 = vld [vmem:[#allocation18_spill] sm:$0xff]  ;;  %v20236_v36 = vld [vmem:[#allocation97_spill] sm:$0xff] }
 0x30b   : > { %vm20234_vm2 = vnez %v20233_v57  ;;  %13031 = vmatprep.mubr.f32.mxu0 %v20235_v7  ;;  %v16792_v58 = vmul.f32 %v16139_v5, %v16144_v16  ;;  %vm20237_vm6 = vnez %v20236_v36  ;;  %v20238_v0 = vld [vmem:[#allocation167_spill] sm:$0xff]  ;;  %v20242_v41 = vld [vmem:[#allocation30_spill] sm:$0xff]  ;;  %v10136_v7 = vmul.f32 %v9808_v44, %v9808_v44  ;;  %v20244_v52 = vld [vmem:[#allocation192_spill] sm:$0xff] }
 0x30c   : > { %v9559_v12 = vsel %vm20234_vm2, 1.0, %v9479_v32  ;;  %v9575_v59 = vsel %vm20234_vm2, 0.0, %v9495_v54  ;;  %v16804_v27 = vadd.f32 %v20238_v0, %v16047_v49  ;;  %v16806_v32 = vpop.f32.mrf.mxu0  ;;  %v16808_v54 = vpop.f32.mrf.mxu1  ;;  %13061 = vmatmul.mubr.f32.gmra.mxu1 %v20242_v41  ;;  %v20243_v18 = vld [vmem:[#allocation118_spill] sm:$0xff]  ;;  %vm9329_vm1 = vcmp.le.f32.partialorder %v5777_v4, 0.0  ;;  %v20245_v9 = vld [vmem:[#allocation45_spill] sm:$0xff]  ;;  %v20252_v41 = vld [vmem:[#allocation20_spill] sm:$0xff] }
 0x30d   : > { %v16796_v60 = vsel %vm20237_vm6, 0.0, %v9559_v12  ;;  %v16800_v29 = vsel %vm20237_vm6, 0.0, %v9575_v59  ;;  %20240 = vst [vmem:[#allocation134_spill] sm:$0xff] %v16806_v32  ;;  %20241 = vst [vmem:[#allocation131_spill] sm:$0xff] %v16808_v54  ;;  %v9964_v57 = vsub.f32 %v20243_v18, %v9884_v37  ;;  %v9073_v12 = vadd.f32 %v5777_v4, %v20244_v52  ;;  %13063 = vmatprep.mubr.f32.mxu1 %v20245_v9  ;;  %v20247_v37 = vld [vmem:[#allocation19_spill] sm:$0xff]  ;;  %v20269_v32 = vld [vmem:[#allocation193_spill] sm:$0xff] }
 0x30e   : > { %20239 = vst [vmem:[#allocation126_spill] sm:$0xff] %v16804_v27  ;;  %v16816_v59 = vmul.f32 %v16168_v22, %v16111_v3  ;;  %v16820_v49 = vmul.f32 %v16185_v6, %v16144_v16  ;;  %v16824_v36 = vmul.f32 %v16676_v17, %v16676_v17  ;;  %v10184_v0 = vmul.f32 %v10120_v62, %v10120_v62  ;;  %vm9361_vm13 = vmand %vm9329_vm1, %vm9345_vm8  ;;  %v16828_v44 = vpop.f32.mrf.mxu0  ;;  %v16831_v9 = vpop.f32.mrf.mxu1 }
 0x30f   : > { %20246 = vst [vmem:[#allocation184_spill] sm:$0xff] %v16828_v44  ;;  %13032 = vmatmul.mubr.f32.gmra.mxu0 %v20247_v37  ;;  %20248 = vst [vmem:[#allocation57_spill] sm:$0xff] %v16831_v9  ;;  %v10152_v3 = vmul.f32 %v9964_v57, %v9964_v57  ;;  %vm9089_vm14 = vcmp.ge.f32.partialorder %v9073_v12, 1.0  ;;  %v20249_v16 = vmov 0  ;;  %v9987_v17 = vmul.f32 %v15802_v10, %v16796_v60  ;;  %v20253_v12 = vld [vmem:[#allocation138_spill] sm:$0xff] }
 0x310   : > { %vm16835_vm2 = vmand %vm9361_vm13, %vm9377_vm3  ;;  %v10027_v62 = vmul.f32 %v15910_v43, %v16800_v29  ;;  %13034 = vmatprep.mubr.f32.mxu0 %v20252_v41  ;;  %v9691_v18 = vadd.f32 %v16269_v34, %v16411_v14  ;;  %v9847_v57 = vadd.f32 %v16384_v47, %v16457_v46  ;;  %vm20254_vm3 = vnez %v20253_v12  ;;  %v16859_v27 = vpop.f32.mrf.mxu0  ;;  %v16861_v54 = vpop.f32.mrf.mxu1  ;;  %v20258_v44 = vld [vmem:[#allocation46_spill] sm:$0xff]  ;;  %v20263_v12 = vld [vmem:[#allocation47_spill] sm:$0xff] }
 0x311   : > { %v20250_v16 = vsel %vm16835_vm2, 4294967295, %v20249_v16  ;;  %vm9121_vm8 = vmand %vm9089_vm14, %vm9105_vm15  ;;  %v9482_v37 = vsel %vm20254_vm3, 0.0, %v16077_v8  ;;  %v20255_v9 = vsel %vm16061_vm12, 0.0, %v16057_v19  ;;  %20256 = vst [vmem:[#allocation102_spill] sm:$0xff] %v16859_v27  ;;  %13064 = vmatmul.mubr.f32.gmra.mxu1 %v20258_v44  ;;  %v10168_v14 = vadd.f32 %v10152_v3, %v10136_v7  ;;  %v20261_v8 = vld [vmem:[#allocation139_spill] sm:$0xff] }
 0x312   : > { %20251 = vst [vmem:[#allocation185_spill] sm:$0xff] %v20250_v16  ;;  %v9498_v41 = vsel %vm20254_vm3, 1.0, %v20255_v9  ;;  %20257 = vst [vmem:[#allocation186_spill] sm:$0xff] %v16861_v54  ;;  %v10007_v26 = vadd.f32 %v15932_v11, %v9987_v17  ;;  %vm20262_vm12 = vnez %v20261_v8  ;;  %13066 = vmatprep.mubr.f32.mxu1 %v20263_v12  ;;  %v20264_v44 = vsub.f32 1.0, %v20210_v56  ;;  %v16888_v54 = vpop.f32.mrf.mxu0  ;;  %v16891_v8 = vpop.f32.mrf.mxu1 }
 0x313   : > { %vm16866_vm15 = vmand %vm9121_vm8, %vm9137_vm0  ;;  %v9562_v19 = vsel %vm20262_vm12, 1.0, %v9482_v37  ;;  %v9578_v9 = vsel %vm20262_vm12, 0.0, %v9498_v41  ;;  %v9727_v17 = vadd.f32 %v16431_v25, %v9691_v18  ;;  %v9883_v37 = vadd.f32 %v16495_v2, %v9847_v57  ;;  %20266 = vst [vmem:[#allocation81_spill] sm:$0xff] %v16888_v54  ;;  %v20267_v41 = vld [vmem:[#allocation26_spill] sm:$0xff]  ;;  %v10069_v12 = vpop.permute.xlu1 %10068  ;;  %v20273_v2 = vld [vmem:[#allocation39_spill] sm:$0xff] }
 0x314   : > { %v16881_v7 = vsel %vm16866_vm15, %v20264_v44, %v20244_v52  ;;  %v9201_v3 = vsel %vm16866_vm15, %v20210_v56, %v5777_v4  ;;  %13035 = vmatmul.mubr.f32.gmra.mxu0 %v20267_v41  ;;  %20268 = vst [vmem:[#allocation127_spill] sm:$0xff] %v16891_v8  ;;  %v10200_v27 = vadd.f32 %v10184_v0, %v10168_v14  ;;  %v20271_v44 = vld [vmem:[#allocation112_spill] sm:$0xff]  ;;  %v20274_v4 = vld [vmem:[#allocation197_spill] sm:$0xff]  ;;  %v20276_v41 = vld [vmem:[#allocation99_spill] sm:$0xff]  ;;  %v16914_v52 = vpop.f32.mrf.mxu0 }
 0x315   : > { %20265 = vst [vmem:[#allocation60_spill] sm:$0xff] %v16881_v7  ;;  %vm20270_vm0 = vnez %v20269_v32  ;;  %v16901_v25 = vadd.f32 %v10027_v62, %v10007_v26  ;;  %13037 = vmatprep.mubr.f32.mxu0 %v20273_v2  ;;  %v9807_v18 = vsub.f32 %v20274_v4, %v9727_v17  ;;  %v20275_v57 = vld [vmem:[#allocation125_spill] sm:$0xff]  ;;  %vm20277_vm6 = vnez %v20276_v41  ;;  %20278 = vst [vmem:[#allocation209_spill] sm:$0xff] %v16914_v52  ;;  %v20280_v62 = vld [vmem:[#allocation51_spill] sm:$0xff] }
 0x316   : > { %v16899_v56 = vsel %vm20270_vm0, %v20271_v44, %v9201_v3  ;;  %v9963_v46 = vsub.f32 %v20275_v57, %v9883_v37  ;;  %v16908_v0 = vsel %vm20277_vm6, 0.0, %v9562_v19  ;;  %v16912_v14 = vsel %vm20277_vm6, 0.0, %v9578_v9  ;;  %v16916_v3 = vpop.f32.mrf.mxu1  ;;  %13067 = vmatmul.mubr.f32.gmra.mxu1 %v20280_v62  ;;  %10508 = vmin.xlane.f32.xlu1 %v10200_v27  ;;  %v16930_v57 = vpop.f32.mrf.mxu0  ;;  %v20282_v41 = vld [vmem:[#allocation40_spill] sm:$0xff]  ;;  %v20290_v52 = vld [vmem:[#allocation171_spill] sm:$0xff] }
 0x317   : > { %20272 = vst [vmem:[#allocation91_spill] sm:$0xff] %v16899_v56  ;;  %20279 = vst [vmem:[#allocation152_spill] sm:$0xff] %v16916_v3  ;;  %v9674_v26 = vmul.f32 %v16069_v55, %v16475_v38  ;;  %v9714_v17 = vmul.f32 %v16139_v5, %v16479_v33  ;;  %v9830_v19 = vmul.f32 %v16168_v22, %v16475_v38  ;;  %vm20345_vm12 = vnez %v20344_v61 }
 0x318   : > { %v9870_v37 = vmul.f32 %v16185_v6, %v16479_v33  ;;  %v10122_v9 = vsub.f32 %v10069_v12, %v16616_v1  ;;  %v10135_v44 = vmul.f32 %v9807_v18, %v9807_v18  ;;  %v10151_v2 = vmul.f32 %v9963_v46, %v9963_v46  ;;  %20281 = vst [vmem:[#allocation212_spill] sm:$0xff] %v16930_v57  ;;  %v16933_v62 = vpop.f32.mrf.mxu1  ;;  %v20284_v1 = vld [vmem:[#allocation85_spill] sm:$0xff] }
 0x319   : > { %v9990_v4 = vmul.f32 %v15802_v10, %v16908_v0  ;;  %13038 = vmatmul.mubr.f32.gmra.mxu0 %v20282_v41  ;;  %20283 = vst [vmem:[#allocation62_spill] sm:$0xff] %v16933_v62  ;;  %v16937_v38 = vmul.f32 %v16069_v55, %v16654_v35  ;;  %v10030_v33 = vmul.f32 %v15910_v43, %v16912_v14  ;;  %v20286_v12 = vld [vmem:[#allocation141_spill] sm:$0xff]  ;;  %v20289_v41 = vld [vmem:[#allocation55_spill] sm:$0xff]  ;;  %v20291_v62 = vsel %vm16160_vm10, 0.0, %v20290_v52  ;;  %v20299_v52 = vld [vmem:[#allocation174_spill] sm:$0xff] }
 0x31a   : > { %v16943_v27 = vadd.f32 %v20284_v1, %v16090_v24  ;;  %vm20287_vm1 = vnez %v20286_v12  ;;  %v20288_v46 = vld [vmem:[#allocation41_spill] sm:$0xff]  ;;  %13069 = vmatprep.mubr.f32.mxu1 %v20289_v41  ;;  %v10167_v8 = vadd.f32 %v10151_v2, %v10135_v44  ;;  %v20292_v24 = vld [vmem:[#allocation142_spill] sm:$0xff]  ;;  %v10077_v41 = vpop.permute.xlu1 %10076  ;;  %v9694_v12 = vadd.f32 %v16269_v34, %v9674_v26 }
 0x31b   : > { %v9481_v18 = vsel %vm20287_vm1, 0.0, %v16175_v51  ;;  %13040 = vmatprep.mubr.f32.mxu0 %v20288_v46  ;;  %v10010_v57 = vadd.f32 %v15932_v11, %v9990_v4  ;;  %v9497_v3 = vsel %vm20287_vm1, 1.0, %v20291_v62  ;;  %vm20293_vm13 = vnez %v20292_v24  ;;  %v16961_v51 = vpop.f32.mrf.mxu1  ;;  %v20296_v46 = vld [vmem:[#allocation58_spill] sm:$0xff]  ;;  %v20297_v2 = vld [vmem:[#allocation101_spill] sm:$0xff]  ;;  %v20300_v4 = vld [vmem:[#allocation123_spill] sm:$0xff] }
 0x31c   : > { %20285 = vst [vmem:[#allocation64_spill] sm:$0xff] %v16943_v27  ;;  %v9561_v1 = vsel %vm20293_vm13, 1.0, %v9481_v18  ;;  %v16959_v27 = vpop.f32.mrf.mxu0  ;;  %20295 = vst [vmem:[#allocation104_spill] sm:$0xff] %v16961_v51  ;;  %13070 = vmatmul.mubr.f32.gmra.mxu1 %v20296_v46  ;;  %v9577_v44 = vsel %vm20293_vm13, 0.0, %v9497_v3  ;;  %vm20298_vm14 = vnez %v20297_v2  ;;  %v16972_v62 = vadd.f32 %v20300_v4, %v20299_v52  ;;  %v20302_v18 = vld [vmem:[#allocation61_spill] sm:$0xff]  ;;  %v20304_v52 = vld [vmem:[#allocation43_spill] sm:$0xff] }
 0x31d   : > { %20294 = vst [vmem:[#allocation187_spill] sm:$0xff] %v16959_v27  ;;  %v16968_v53 = vsel %vm20298_vm14, 0.0, %v9561_v1  ;;  %13072 = vmatprep.mubr.f32.mxu1 %v20302_v18  ;;  %v16978_v27 = vmul.f32 %v16139_v5, %v16658_v13  ;;  %v10199_v46 = vadd.f32 %v16612_v21, %v10167_v8  ;;  %v16981_v24 = vadd.f32 %v10030_v33, %v10010_v57  ;;  %v16990_v4 = vpop.f32.mrf.mxu1  ;;  %v20306_v57 = vld [vmem:[#allocation48_spill] sm:$0xff]  ;;  %v20309_v51 = vld [vmem:[#allocation175_spill] sm:$0xff] }
 0x31e   : > { %20301 = vst [vmem:[#allocation155_spill] sm:$0xff] %v16972_v62  ;;  %v16985_v3 = vsel %vm20298_vm14, 0.0, %v9577_v44  ;;  %v16987_v1 = vpop.f32.mrf.mxu0  ;;  %13041 = vmatmul.mubr.f32.gmra.mxu0 %v20304_v52  ;;  %20305 = vst [vmem:[#allocation143_spill] sm:$0xff] %v16990_v4  ;;  %v16992_v26 = vmul.f32 %v10122_v9, %v10122_v9  ;;  %v16996_v18 = vmul.f32 %v16168_v22, %v16654_v35 }
 0x31f   : > { %20303 = vst [vmem:[#allocation14_spill] sm:$0xff] %v16987_v1  ;;  %v17000_v21 = vmul.f32 %v16185_v6, %v16658_v13  ;;  %v9989_v8 = vmul.f32 %v15802_v10, %v16968_v53  ;;  %13043 = vmatprep.mubr.f32.mxu0 %v20306_v57  ;;  %v10124_v33 = vsub.f32 %v10077_v41, %v16768_v20  ;;  %v17011_v52 = vpop.f32.mrf.mxu1  ;;  %v10073_v13 = vpop.permute.xlu0 %10072  ;;  %v20310_v1 = vld [vmem:[#allocation144_spill] sm:$0xff]  ;;  %v20313_v20 = vld [vmem:[#allocation89_spill] sm:$0xff] }
 0x320   : > { %10506 = vmin.xlane.f32.xlu0 %v10199_v46  ;;  %v10029_v9 = vmul.f32 %v15910_v43, %v16985_v3  ;;  %v9730_v44 = vadd.f32 %v9714_v17, %v9694_v12  ;;  %v9850_v2 = vadd.f32 %v16384_v47, %v9830_v19  ;;  %v17009_v35 = vpop.f32.mrf.mxu0  ;;  %20308 = vst [vmem:[#allocation82_spill] sm:$0xff] %v17011_v52  ;;  %v20314_v41 = vsel %vm16249_vm9, 0.0, %v20313_v20  ;;  %v20315_v12 = vld [vmem:[#allocation88_spill] sm:$0xff]  ;;  %v20316_v19 = vld [vmem:[#allocation169_spill] sm:$0xff] }
 0x321   : > { %20307 = vst [vmem:[#allocation166_spill] sm:$0xff] %v17009_v35  ;;  %v10009_v4 = vadd.f32 %v15932_v11, %v9989_v8  ;;  %vm20311_vm10 = vnez %v20310_v1  ;;  %v17025_v46 = vadd.f32 %v20316_v19, %v20315_v12  ;;  %v20318_v35 = vld [vmem:[#allocation63_spill] sm:$0xff]  ;;  %v9675_v8 = vmul.f32 %v16069_v55, %v16796_v60  ;;  %v20319_v52 = vld [vmem:[#allocation196_spill] sm:$0xff]  ;;  %v17036_v1 = vpop.f32.mrf.mxu1 }
 0x322   : > { %v9484_v57 = vsel %vm20311_vm10, 0.0, %v20309_v51  ;;  %v9500_v17 = vsel %vm20311_vm10, 1.0, %v20314_v41  ;;  %13073 = vmatmul.mubr.f32.gmra.mxu1 %v20318_v35  ;;  %v9810_v62 = vsub.f32 %v20319_v52, %v9730_v44  ;;  %v9886_v56 = vadd.f32 %v9870_v37, %v9850_v2  ;;  %v20320_v51 = vld [vmem:[#allocation145_spill] sm:$0xff]  ;;  %v17033_v16 = vpop.f32.mrf.mxu0  ;;  %v20323_v20 = vld [vmem:[#allocation52_spill] sm:$0xff]  ;;  %20324 = vst [vmem:[#allocation106_spill] sm:$0xff] %v17036_v1  ;;  %v20326_v19 = vld [vmem:[#allocation103_spill] sm:$0xff] }
 0x323   : > { %20317 = vst [vmem:[#allocation65_spill] sm:$0xff] %v17025_v46  ;;  %vm20321_vm8 = vnez %v20320_v51  ;;  %20322 = vst [vmem:[#allocation189_spill] sm:$0xff] %v17033_v16  ;;  %13044 = vmatmul.mubr.f32.gmra.mxu0 %v20323_v20  ;;  %v20325_v41 = vld [vmem:[#allocation4_spill] sm:$0xff]  ;;  %v17039_v12 = vadd.f32 %v10029_v9, %v10009_v4  ;;  %vm20327_vm9 = vnez %v20326_v19  ;;  %v20329_v2 = vld [vmem:[#allocation147_spill] sm:$0xff]  ;;  %v17051_v20 = vmul.f32 %v10124_v33, %v10124_v33 }
 0x324   : > { %v9564_v54 = vsel %vm20321_vm8, 1.0, %v9484_v57  ;;  %13103 = vmatprep.mubr.f32.mxu1 %v20325_v41  ;;  %v9580_v35 = vsel %vm20321_vm8, 0.0, %v9500_v17  ;;  %v20328_v37 = vld [vmem:[#allocation28_spill] sm:$0xff]  ;;  %vm20330_vm3 = vnez %v20329_v2  ;;  %v20332_v1 = vld [vmem:[#allocation165_spill] sm:$0xff]  ;;  %v10138_v46 = vmul.f32 %v9810_v62, %v9810_v62  ;;  %v17058_v9 = vpop.f32.mrf.mxu0  ;;  %v17060_v17 = vpop.f32.mrf.mxu1  ;;  %v20347_v2 = vld [vmem:[#allocation86_spill] sm:$0xff] }
 0x325   : > { %v17045_v44 = vsel %vm20327_vm9, 0.0, %v9564_v54  ;;  %v9483_v52 = vsel %vm20330_vm3, 0.0, %v20328_v37  ;;  %v20331_v57 = vld [vmem:[#allocation56_spill] sm:$0xff]  ;;  %v9966_v16 = vsub.f32 %v20332_v1, %v9886_v56  ;;  %v17056_v4 = vsel %vm20327_vm9, 0.0, %v9580_v35  ;;  %20333 = vst [vmem:[#allocation132_spill] sm:$0xff] %v17058_v9  ;;  %20334 = vst [vmem:[#allocation66_spill] sm:$0xff] %v17060_v17 }
 0x326   : > { %13046 = vmatprep.mubr.f32.mxu0 %v20331_v57  ;;  %v9715_v51 = vmul.f32 %v16139_v5, %v16800_v29  ;;  %v9831_v54 = vmul.f32 %v16168_v22, %v16796_v60  ;;  %v9871_v33 = vmul.f32 %v16185_v6, %v16800_v29  ;;  %v10123_v56 = vsub.f32 %v10073_v13, %v16901_v25  ;;  %v20335_v62 = vld [vmem:[#allocation5_spill] sm:$0xff]  ;;  %v20336_v37 = vld [vmem:[#allocation182_spill] sm:$0xff]  ;;  %v20338_v57 = vld [vmem:[#allocation180_spill] sm:$0xff]  ;;  %v17082_v29 = vpop.f32.mrf.mxu0  ;;  %v17085_v13 = vpop.f32.mrf.mxu1 }
 0x327   : > { %13104 = vmatmul.mubr.f32.vlgmr.msra.gmra.mxu1 %v20335_v62  ;;  %v17072_v1 = vmul.f32 %v16069_v55, %v16908_v0  ;;  %v10154_v35 = vmul.f32 %v9966_v16, %v9966_v16  ;;  %v9992_v19 = vmul.f32 %v15802_v10, %v17045_v44  ;;  %vm20337_vm15 = vnez %v20336_v37  ;;  %v20341_v25 = vld [vmem:[#allocation59_spill] sm:$0xff]  ;;  %v20343_v9 = vld [vmem:[#allocation6_spill] sm:$0xff] }
 0x328   : > { %v20339_v17 = vsel %vm20337_vm15, 0.0, %v20338_v57  ;;  %20340 = vst [vmem:[#allocation188_spill] sm:$0xff] %v17082_v29  ;;  %13047 = vmatmul.mubr.f32.gmra.mxu0 %v20341_v25  ;;  %20342 = vst [vmem:[#allocation15_spill] sm:$0xff] %v17085_v13  ;;  %13106 = vmatprep.mubr.f32.mxu1 %v20343_v9  ;;  %v10032_v16 = vmul.f32 %v15910_v43, %v17056_v4  ;;  %v9563_v7 = vsel %vm20345_vm12, 1.0, %v9483_v52  ;;  %v20346_v57 = vld [vmem:[#allocation124_spill] sm:$0xff]  ;;  %v20349_v29 = vld [vmem:[#allocation105_spill] sm:$0xff]  ;;  %v17108_v52 = vpop.f32.mrf.mxu0  ;;  %v17110_v61 = vpop.f32.mrf.mxu1 }
 0x329   : > { %v9499_v60 = vsel %vm20330_vm3, 1.0, %v20339_v17  ;;  %v17096_v17 = vadd.f32 %v20347_v2, %v20346_v57  ;;  %13077 = vmatprep.mubr.f32.mxu0 %v20325_v41  ;;  %v10170_v25 = vadd.f32 %v10154_v35, %v10138_v46  ;;  %v10012_v13 = vadd.f32 %v15932_v11, %v9992_v19  ;;  %20351 = vst [vmem:[#allocation16_spill] sm:$0xff] %v17108_v52  ;;  %v20355_v35 = vld [vmem:[#allocation10_spill] sm:$0xff] }
 0x32a   : > { %v9579_v37 = vsel %vm20345_vm12, 0.0, %v9499_v60  ;;  %vm20350_vm6 = vnez %v20349_v29  ;;  %20352 = vst [vmem:[#allocation133_spill] sm:$0xff] %v17110_v61  ;;  %v17112_v60 = vmul.f32 %v10123_v56, %v10123_v56  ;;  %v17116_v41 = vmul.f32 %v16139_v5, %v16912_v14  ;;  %v17136_v57 = vpop.f32.mrf.mxu0 }
 0x32b   : > { %20348 = vst [vmem:[#allocation190_spill] sm:$0xff] %v17096_v17  ;;  %v17102_v32 = vsel %vm20350_vm6, 0.0, %v9563_v7  ;;  %v17106_v45 = vsel %vm20350_vm6, 0.0, %v9579_v37  ;;  %v17120_v46 = vmul.f32 %v16168_v22, %v16908_v0  ;;  %v17124_v7 = vmul.f32 %v16185_v6, %v16912_v14  ;;  %13107 = vmatmul.mubr.f32.gmra.mxu1 %v20355_v35  ;;  %20356 = vst [vmem:[#allocation7_spill] sm:$0xff] %v17136_v57  ;;  %v17139_v0 = vpop.f32.mrf.mxu1  ;;  %v10085_v14 = vpop.permute.xlu1 %10084 }
 0x32c   : > { %20353 = vst [vmem:[#allocation67_spill] sm:$0xff] %v17116_v41  ;;  %v17129_v19 = vmul.f32 %v16069_v55, %v16968_v53  ;;  %v10202_v56 = vadd.f32 %v16992_v26, %v10170_v25  ;;  %v17132_v29 = vadd.f32 %v10032_v16, %v10012_v13  ;;  %v9991_v37 = vmul.f32 %v15802_v10, %v17102_v32  ;;  %v20358_v16 = vld [vmem:[#allocation31_spill] sm:$0xff]  ;;  %v20359_v25 = vld [vmem:[#allocation150_spill] sm:$0xff] }
 0x32d   : > { %20354 = vst [vmem:[#allocation95_spill] sm:$0xff] %v17124_v7  ;;  %13078 = vmatmul.mubr.f32.vlgmr.msra.gmra.mxu0 %v20335_v62  ;;  %20357 = vst [vmem:[#allocation22_spill] sm:$0xff] %v17139_v0  ;;  %v9695_v2 = vadd.f32 %v16269_v34, %v9675_v8  ;;  %v9851_v61 = vadd.f32 %v16384_v47, %v9831_v54  ;;  %v9693_v52 = vadd.f32 %v16269_v34, %v16648_v48  ;;  %v20361_v0 = vld [vmem:[#allocation120_spill] sm:$0xff]  ;;  %v20363_v54 = vld [vmem:[#allocation93_spill] sm:$0xff] }
 0x32e   : > { %v9849_v26 = vadd.f32 %v16384_v47, %v16816_v59  ;;  %13080 = vmatprep.mubr.f32.mxu0 %v20343_v9  ;;  %10512 = vmin.xlane.f32.xlu0 %v10202_v56  ;;  %v10011_v13 = vadd.f32 %v15932_v11, %v9991_v37  ;;  %v10031_v62 = vmul.f32 %v15910_v43, %v17106_v45  ;;  %v17160_v59 = vpop.f32.mrf.mxu0  ;;  %v17162_v9 = vpop.f32.mrf.mxu1  ;;  %v20367_v56 = vld [vmem:[#allocation11_spill] sm:$0xff] }
 0x32f   : > { %vm20360_vm1 = vnez %v20359_v25  ;;  %vm20362_vm13 = vnez %v20361_v0  ;;  %20365 = vst [vmem:[#allocation23_spill] sm:$0xff] %v17160_v59  ;;  %20366 = vst [vmem:[#allocation191_spill] sm:$0xff] %v17162_v9  ;;  %13109 = vmatprep.mubr.f32.mxu1 %v20367_v56  ;;  %v9731_v37 = vadd.f32 %v9715_v51, %v9695_v2  ;;  %v9887_v17 = vadd.f32 %v9871_v33, %v9851_v61  ;;  %v20369_v25 = vld [vmem:[#allocation151_spill] sm:$0xff]  ;;  %v20373_v33 = vld [vmem:[#allocation201_spill] sm:$0xff] }
 0x330   : > { %v9486_v8 = vsel %vm20360_vm1, 0.0, %v20358_v16  ;;  %v20364_v57 = vsel %vm20362_vm13, 0.0, %v20363_v54  ;;  %v9729_v7 = vadd.f32 %v16792_v58, %v9693_v52  ;;  %v9885_v41 = vadd.f32 %v16820_v49, %v9849_v26  ;;  %v20368_v16 = vld [vmem:[#allocation12_spill] sm:$0xff]  ;;  %v17175_v59 = vpop.f32.mrf.mxu0  ;;  %v17178_v51 = vpop.f32.mrf.mxu1  ;;  %v20372_v58 = vld [vmem:[#allocation13_spill] sm:$0xff]  ;;  %v20376_v26 = vld [vmem:[#allocation122_spill] sm:$0xff] }
 0x331   : > { %v9502_v48 = vsel %vm20360_vm1, 1.0, %v20364_v57  ;;  %13110 = vmatmul.mubr.f32.gmra.mxu1 %v20368_v16  ;;  %v10126_v0 = vsub.f32 %v10085_v14, %v16981_v24  ;;  %v17169_v54 = vadd.f32 %v10031_v62, %v10011_v13  ;;  %vm20370_vm14 = vnez %v20369_v25  ;;  %13081 = vmatmul.mubr.f32.gmra.mxu0 %v20355_v35  ;;  %20371 = vst [vmem:[#allocation108_spill] sm:$0xff] %v17178_v51  ;;  %v10081_v49 = vpop.permute.xlu0 %10080  ;;  %v20374_v24 = vld [vmem:[#allocation128_spill] sm:$0xff]  ;;  %v20375_v14 = vld [vmem:[#allocation195_spill] sm:$0xff]  ;;  %v20390_v51 = vld [vmem:[#allocation154_spill] sm:$0xff] }
 0x332   : > { %v9566_v57 = vsel %vm20370_vm14, 1.0, %v9486_v8  ;;  %v9582_v9 = vsel %vm20370_vm14, 0.0, %v9502_v48  ;;  %13112 = vmatprep.mubr.f32.mxu1 %v20372_v58  ;;  %v9811_v52 = vsub.f32 %v20373_v33, %v9731_v37  ;;  %v9967_v61 = vsub.f32 %v20374_v24, %v9887_v17  ;;  %13083 = vmatprep.mubr.f32.mxu0 %v20367_v56  ;;  %v20377_v8 = vld [vmem:[#allocation107_spill] sm:$0xff]  ;;  %v20379_v37 = vld [vmem:[#allocation92_spill] sm:$0xff] }
 0x333   : > { %v9809_v2 = vsub.f32 %v20375_v14, %v9729_v7  ;;  %v9965_v13 = vsub.f32 %v20376_v26, %v9885_v41  ;;  %v9717_v62 = vmul.f32 %v16139_v5, %v16985_v3  ;;  %vm20378_vm10 = vnez %v20377_v8  ;;  %v20380_v25 = vld [vmem:[#allocation176_spill] sm:$0xff]  ;;  %v17200_v7 = vpop.f32.mrf.mxu0  ;;  %v17202_v41 = vpop.f32.mrf.mxu1  ;;  %v20382_v26 = vld [vmem:[#allocation21_spill] sm:$0xff] }
 0x334   : > { %v17190_v35 = vsel %vm20378_vm10, 0.0, %v9566_v57  ;;  %v17194_v48 = vsel %vm20378_vm10, 0.0, %v9582_v9  ;;  %v17198_v17 = vadd.f32 %v20380_v25, %v20379_v37  ;;  %20381 = vst [vmem:[#allocation8_spill] sm:$0xff] %v17202_v41  ;;  %v10139_v56 = vmul.f32 %v9811_v52, %v9811_v52 }
 0x335   : > { %v10155_v33 = vmul.f32 %v9967_v61, %v9967_v61  ;;  %v10137_v24 = vmul.f32 %v9809_v2, %v9809_v2  ;;  %v10153_v14 = vmul.f32 %v9965_v13, %v9965_v13  ;;  %13113 = vmatmul.mubr.f32.gmra.mxu1 %v20382_v26  ;;  %v17205_v57 = vmul.f32 %v10126_v0, %v10126_v0  ;;  %v17215_v25 = vpop.f32.mrf.mxu0  ;;  %v17218_v52 = vpop.f32.mrf.mxu1 }
 0x336   : > { %v9833_v9 = vmul.f32 %v16168_v22, %v16968_v53  ;;  %v9873_v8 = vmul.f32 %v16185_v6, %v16985_v3  ;;  %v17213_v37 = vmul.f32 %v16069_v55, %v17045_v44  ;;  %13084 = vmatmul.mubr.f32.gmra.mxu0 %v20368_v16  ;;  %20383 = vst [vmem:[#allocation158_spill] sm:$0xff] %v17218_v52  ;;  %v20384_v16 = vld [vmem:[#allocation153_spill] sm:$0xff] }
 0x337   : > { %v10125_v61 = vsub.f32 %v10081_v49, %v17039_v12  ;;  %v10171_v0 = vadd.f32 %v10155_v33, %v10139_v56  ;;  %v10169_v2 = vadd.f32 %v10153_v14, %v10137_v24  ;;  %v9994_v53 = vmul.f32 %v15802_v10, %v17190_v35  ;;  %13086 = vmatprep.mubr.f32.mxu0 %v20372_v58  ;;  %v17239_v56 = vpop.f32.mrf.mxu0  ;;  %v17241_v58 = vpop.f32.mrf.mxu1  ;;  %v20389_v33 = vld [vmem:[#allocation35_spill] sm:$0xff] }
 0x338   : > { %v17226_v3 = vmul.f32 %v16139_v5, %v17056_v4  ;;  %v10034_v13 = vmul.f32 %v15910_v43, %v17194_v48  ;;  %vm20385_vm8 = vnez %v20384_v16  ;;  %v20386_v12 = vsel %vm16510_vm4, 0.0, %v16525_v40  ;;  %20387 = vst [vmem:[#allocation9_spill] sm:$0xff] %v17239_v56  ;;  %20388 = vst [vmem:[#allocation164_spill] sm:$0xff] %v17241_v58  ;;  %13115 = vmatprep.mubr.f32.mxu1 %v20389_v33  ;;  %v10093_v24 = vpop.permute.xlu1 %10092  ;;  %v20392_v40 = vld [vmem:[#allocation36_spill] sm:$0xff] }
 0x339   : > { %v9485_v52 = vsel %vm20385_vm8, 0.0, %v16539_v23  ;;  %v9501_v49 = vsel %vm20385_vm8, 1.0, %v20386_v12  ;;  %v10203_v14 = vadd.f32 %v17112_v60, %v10171_v0  ;;  %v10201_v41 = vadd.f32 %v16824_v36, %v10169_v2  ;;  %13116 = vmatmul.mubr.f32.gmra.mxu1 %v20392_v40  ;;  %v20393_v12 = vld [vmem:[#allocation109_spill] sm:$0xff]  ;;  %v17259_v36 = vpop.f32.mrf.mxu0  ;;  %v17262_v0 = vpop.f32.mrf.mxu1 }
 0x33a   : > { %v10014_v23 = vadd.f32 %v15932_v11, %v9994_v53  ;;  %vm20391_vm9 = vnez %v20390_v51  ;;  %vm20394_vm4 = vnez %v20393_v12  ;;  %v9697_v56 = vadd.f32 %v16269_v34, %v17129_v19  ;;  %13087 = vmatmul.mubr.f32.gmra.mxu0 %v20382_v26  ;;  %20395 = vst [vmem:[#allocation110_spill] sm:$0xff] %v17262_v0  ;;  %v10089_v53 = vpop.permute.xlu0 %10088  ;;  %v20399_v12 = vld [vmem:[#allocation156_spill] sm:$0xff] }
 0x33b   : > { %v9565_v50 = vsel %vm20391_vm9, 1.0, %v9485_v52  ;;  %v9581_v16 = vsel %vm20391_vm9, 0.0, %v9501_v49  ;;  %v9853_v60 = vadd.f32 %v16384_v47, %v9833_v9  ;;  %v20396_v52 = vld [vmem:[#allocation37_spill] sm:$0xff]  ;;  %v17267_v51 = vmul.f32 %v16168_v22, %v17045_v44  ;;  %10514 = vmin.xlane.f32.xlu1 %v10203_v14  ;;  %10510 = vmin.xlane.f32.xlu0 %v10201_v41  ;;  %v17289_v41 = vpop.f32.mrf.mxu1 }
 0x33c   : > { %v17254_v58 = vsel %vm20394_vm4, 0.0, %v9565_v50  ;;  %13118 = vmatprep.mubr.f32.mxu1 %v20396_v52  ;;  %v17271_v2 = vmul.f32 %v16185_v6, %v17056_v4  ;;  %v17273_v19 = vadd.f32 %v10034_v13, %v10014_v23  ;;  %v17277_v26 = vsel %vm20394_vm4, 0.0, %v9581_v16  ;;  %v17286_v50 = vpop.f32.mrf.mxu0  ;;  %13089 = vmatprep.mubr.f32.mxu0 %v20389_v33 }
 0x33d   : > { %v10189_v9 = vmul.f32 %v10125_v61, %v10125_v61  ;;  %v10128_v49 = vsub.f32 %v10093_v24, %v17132_v29  ;;  %v17282_v44 = vmul.f32 %v16069_v55, %v17102_v32  ;;  %v9993_v4 = vmul.f32 %v15802_v10, %v17254_v58  ;;  %20397 = vst [vmem:[#allocation199_spill] sm:$0xff] %v17286_v50  ;;  %v20398_v24 = vld [vmem:[#allocation38_spill] sm:$0xff] }
 0x33e   : > { %v10033_v13 = vmul.f32 %v15910_v43, %v17277_v26  ;;  %v9733_v14 = vadd.f32 %v9717_v62, %v9697_v56  ;;  %v9889_v61 = vadd.f32 %v9873_v8, %v9853_v60  ;;  %v9696_v29 = vadd.f32 %v16269_v34, %v16937_v38  ;;  %13119 = vmatmul.mubr.f32.gmra.mxu1 %v20398_v24  ;;  %v17308_v8 = vpop.f32.mrf.mxu0  ;;  %v17311_v38 = vpop.f32.mrf.mxu1  ;;  %v20404_v56 = vld [vmem:[#allocation42_spill] sm:$0xff]  ;;  %v20405_v60 = vld [vmem:[#allocation203_spill] sm:$0xff] }
 0x33f   : > { %v10013_v23 = vadd.f32 %v15932_v11, %v9993_v4  ;;  %v9852_v16 = vadd.f32 %v16384_v47, %v16996_v18  ;;  %vm20400_vm3 = vnez %v20399_v12  ;;  %v20401_v0 = vsel %vm16588_vm11, 0.0, %v16584_v39  ;;  %20402 = vst [vmem:[#allocation24_spill] sm:$0xff] %v17308_v8  ;;  %13090 = vmatmul.mubr.f32.gmra.mxu0 %v20392_v40  ;;  %20403 = vst [vmem:[#allocation68_spill] sm:$0xff] %v17311_v38  ;;  %v20407_v12 = vld [vmem:[#allocation157_spill] sm:$0xff] }
 0x340   : > { %v9488_v33 = vsel %vm20400_vm3, 0.0, %v16601_v42  ;;  %v9504_v62 = vsel %vm20400_vm3, 1.0, %v20401_v0  ;;  %13121 = vmatprep.mubr.f32.mxu1 %v20404_v56  ;;  %v10127_v18 = vsub.f32 %v10089_v53, %v17169_v54  ;;  %v9813_v4 = vsub.f32 %v20405_v60, %v9733_v14  ;;  %v20406_v42 = vld [vmem:[#allocation84_spill] sm:$0xff]  ;;  %13092 = vmatprep.mubr.f32.mxu0 %v20396_v52  ;;  %v17326_v38 = vpop.f32.mrf.mxu0  ;;  %v17328_v54 = vpop.f32.mrf.mxu1 }
 0x341   : > { %v9969_v50 = vsub.f32 %v20406_v42, %v9889_v61  ;;  %v9732_v63 = vadd.f32 %v16978_v27, %v9696_v29  ;;  %v17319_v39 = vadd.f32 %v10033_v13, %v10013_v23  ;;  %v9888_v0 = vadd.f32 %v17000_v21, %v9852_v16  ;;  %20409 = vst [vmem:[#allocation25_spill] sm:$0xff] %v17326_v38  ;;  %v20411_v61 = vld [vmem:[#allocation198_spill] sm:$0xff]  ;;  %v20412_v29 = vld [vmem:[#allocation111_spill] sm:$0xff]  ;;  %v20414_v13 = vld [vmem:[#allocation44_spill] sm:$0xff] }
 0x342   : > { %vm20408_vm11 = vnez %v20407_v12  ;;  %20410 = vst [vmem:[#allocation135_spill] sm:$0xff] %v17328_v54  ;;  %v10141_v53 = vmul.f32 %v9813_v4, %v9813_v4  ;;  %vm20413_vm15 = vnez %v20412_v29  ;;  %13122 = vmatmul.mubr.f32.gmra.mxu1 %v20414_v13  ;;  %v9719_v21 = vmul.f32 %v16139_v5, %v17106_v45  ;;  %v20415_v16 = vld [vmem:[#allocation168_spill] sm:$0xff]  ;;  %v17348_v60 = vpop.f32.mrf.mxu1  ;;  %v20417_v4 = vld [vmem:[#allocation49_spill] sm:$0xff] }
 0x343   : > { %v9568_v40 = vsel %vm20408_vm11, 1.0, %v9488_v33  ;;  %v9584_v8 = vsel %vm20408_vm11, 0.0, %v9504_v62  ;;  %v10157_v14 = vmul.f32 %v9969_v50, %v9969_v50  ;;  %v9812_v27 = vsub.f32 %v20411_v61, %v9732_v63  ;;  %v17345_v50 = vpop.f32.mrf.mxu0  ;;  %13093 = vmatmul.mubr.f32.gmra.mxu0 %v20398_v24  ;;  %20416 = vst [vmem:[#allocation72_spill] sm:$0xff] %v17348_v60  ;;  %13124 = vmatprep.mubr.f32.mxu1 %v20417_v4  ;;  %v10101_v60 = vpop.permute.xlu1 %10100 }
 0x344   : > { %v17333_v52 = vsel %vm20413_vm15, 0.0, %v9568_v40  ;;  %v9835_v23 = vmul.f32 %v16168_v22, %v17102_v32  ;;  %v9968_v33 = vsub.f32 %v20415_v16, %v9888_v0  ;;  %v17343_v62 = vsel %vm20413_vm15, 0.0, %v9584_v8  ;;  %13095 = vmatprep.mubr.f32.mxu0 %v20404_v56 }
 0x345   : > { %v17351_v42 = vmul.f32 %v10128_v49, %v10128_v49  ;;  %v9875_v63 = vmul.f32 %v16185_v6, %v17106_v45  ;;  %v10173_v32 = vadd.f32 %v10157_v14, %v10141_v53  ;;  %v10140_v12 = vmul.f32 %v9812_v27, %v9812_v27  ;;  %v17364_v61 = vpop.f32.mrf.mxu0  ;;  %v17366_v49 = vpop.f32.mrf.mxu1  ;;  %v20421_v27 = vld [vmem:[#allocation53_spill] sm:$0xff] }
 0x346   : > { %v17356_v0 = vmul.f32 %v10127_v18, %v10127_v18  ;;  %v17360_v8 = vmul.f32 %v16069_v55, %v17190_v35  ;;  %v10156_v24 = vmul.f32 %v9968_v33, %v9968_v33  ;;  %v9996_v40 = vmul.f32 %v15802_v10, %v17333_v52  ;;  %20418 = vst [vmem:[#allocation17_spill] sm:$0xff] %v17366_v49  ;;  %v20419_v18 = vld [vmem:[#allocation159_spill] sm:$0xff] }
 0x347   : > { %v17370_v45 = vmul.f32 %v16139_v5, %v17194_v48  ;;  %v10205_v53 = vadd.f32 %v10189_v9, %v10173_v32  ;;  %v10036_v56 = vmul.f32 %v15910_v43, %v17343_v62  ;;  %vm20420_vm12 = vnez %v20419_v18  ;;  %13125 = vmatmul.mubr.f32.gmra.mxu1 %v20421_v27  ;;  %v20423_v9 = vld [vmem:[#allocation116_spill] sm:$0xff]  ;;  %v17387_v49 = vpop.f32.mrf.mxu0 }
 0x348   : > { %v9487_v14 = vsel %vm20420_vm12, 0.0, %v16713_v30  ;;  %v10172_v29 = vadd.f32 %v10156_v24, %v10140_v12  ;;  %v10016_v16 = vadd.f32 %v15932_v11, %v9996_v40  ;;  %v20422_v33 = vsel %vm16632_vm5, 0.0, %v16694_v28  ;;  %20425 = vst [vmem:[#allocation71_spill] sm:$0xff] %v17387_v49  ;;  %13096 = vmatmul.mubr.f32.gmra.mxu0 %v20414_v13  ;;  %v17390_v30 = vpop.f32.mrf.mxu1  ;;  %v20427_v28 = vld [vmem:[#allocation113_spill] sm:$0xff] }
 0x349   : > { %v9503_v38 = vsel %vm20420_vm12, 1.0, %v20422_v33  ;;  %vm20424_vm6 = vnez %v20423_v9  ;;  %20426 = vst [vmem:[#allocation136_spill] sm:$0xff] %v17390_v30  ;;  %v17394_v12 = vmul.f32 %v16168_v22, %v17190_v35  ;;  %10518 = vmin.xlane.f32.xlu1 %v10205_v53  ;;  %vm20428_vm5 = vnez %v20427_v28  ;;  %13098 = vmatprep.mubr.f32.mxu0 %v20417_v4  ;;  %v17416_v53 = vpop.f32.mrf.mxu0  ;;  %v10097_v33 = vpop.permute.xlu0 %10096 }
 0x34a   : > { %v9567_v32 = vsel %vm20424_vm6, 1.0, %v9487_v14  ;;  %v9583_v15 = vsel %vm20424_vm6, 0.0, %v9503_v38  ;;  %v9699_v40 = vadd.f32 %v16269_v34, %v17282_v44  ;;  %v17407_v13 = vmul.f32 %v16185_v6, %v17194_v48  ;;  %20429 = vst [vmem:[#allocation18_spill] sm:$0xff] %v17416_v53  ;;  %v17418_v14 = vpop.f32.mrf.mxu1 }
 0x34b   : > { %v17400_v24 = vsel %vm20428_vm5, 0.0, %v9567_v32  ;;  %v10204_v35 = vadd.f32 %v17051_v20, %v10172_v29  ;;  %v17410_v18 = vadd.f32 %v10036_v56, %v10016_v16  ;;  %v17414_v38 = vsel %vm20428_vm5, 0.0, %v9583_v15  ;;  %20430 = vst [vmem:[#allocation97_spill] sm:$0xff] %v17418_v14  ;;  %v17438_v32 = vpop.f32.mrf.mxu0 }
 0x34c   : > { %v17422_v44 = vmul.f32 %v16069_v55, %v17254_v58  ;;  %v17426_v48 = vmul.f32 %v16139_v5, %v17277_v26  ;;  %v17430_v20 = vmul.f32 %v16168_v22, %v17254_v58  ;;  %v9995_v4 = vmul.f32 %v15802_v10, %v17400_v24  ;;  %20431 = vst [vmem:[#allocation167_spill] sm:$0xff] %v17438_v32  ;;  %v17440_v15 = vpop.f32.mrf.mxu1 }
 0x34d   : > { %v10130_v56 = vsub.f32 %v10101_v60, %v17273_v19  ;;  %10516 = vmin.xlane.f32.xlu0 %v10204_v35  ;;  %v10035_v29 = vmul.f32 %v15910_v43, %v17414_v38  ;;  %v9735_v16 = vadd.f32 %v9719_v21, %v9699_v40  ;;  %v9855_v9 = vadd.f32 %v16384_v47, %v9835_v23  ;;  %v20433_v19 = vld [vmem:[#allocation160_spill] sm:$0xff]  ;;  %v20435_v23 = vld [vmem:[#allocation205_spill] sm:$0xff]  ;;  %v17459_v32 = vpop.f32.mrf.mxu0 }
 0x34e   : > { %20432 = vst [vmem:[#allocation30_spill] sm:$0xff] %v17440_v15  ;;  %v10015_v28 = vadd.f32 %v15932_v11, %v9995_v4  ;;  %v9698_v58 = vadd.f32 %v16269_v34, %v17072_v1  ;;  %v9854_v30 = vadd.f32 %v16384_v47, %v17120_v46  ;;  %vm20434_vm1 = vnez %v20433_v19  ;;  %v20437_v4 = vld [vmem:[#allocation149_spill] sm:$0xff]  ;;  %20439 = vst [vmem:[#allocation118_spill] sm:$0xff] %v17459_v32  ;;  %v17461_v46 = vpop.f32.mrf.mxu1  ;;  %v20446_v19 = vld [vmem:[#allocation114_spill] sm:$0xff]  ;;  %v10105_v32 = vpop.permute.xlu0 %10104 }
 0x34f   : > { %v9490_v60 = vsel %vm20434_vm1, 0.0, %v16758_v31  ;;  %13099 = vmatmul.mubr.f32.gmra.mxu0 %v20421_v27  ;;  %v10129_v21 = vsub.f32 %v10097_v33, %v17319_v39  ;;  %v9815_v40 = vsub.f32 %v20435_v23, %v9735_v16  ;;  %v9891_v35 = vadd.f32 %v9875_v63, %v9855_v9  ;;  %20440 = vst [vmem:[#allocation192_spill] sm:$0xff] %v17461_v46  ;;  %v20441_v31 = vld [vmem:[#allocation67_spill] sm:$0xff]  ;;  %v20443_v39 = vld [vmem:[#allocation161_spill] sm:$0xff]  ;;  %v20445_v63 = vld [vmem:[#allocation170_spill] sm:$0xff]  ;;  %v17472_v23 = vpop.f32.mrf.mxu0 }
 0x350   : > { %v20438_v14 = vsel %vm16743_vm7, 0.0, %v20437_v4  ;;  %v10051_v53 = vadd.f32 %v10035_v29, %v10015_v28  ;;  %v9734_v54 = vadd.f32 %v20441_v31, %v9698_v58  ;;  %v20442_v27 = vld [vmem:[#allocation95_spill] sm:$0xff]  ;;  %vm20444_vm13 = vnez %v20443_v39  ;;  %20448 = vst [vmem:[#allocation45_spill] sm:$0xff] %v17472_v23  ;;  %v17474_v4 = vpop.f32.mrf.mxu1  ;;  %v20451_v58 = vld [vmem:[#allocation172_spill] sm:$0xff] }
 0x351   : > { %v9506_v1 = vsel %vm20434_vm1, 1.0, %v20438_v14  ;;  %v9890_v49 = vadd.f32 %v20442_v27, %v9854_v30  ;;  %v9570_v33 = vsel %vm20444_vm13, 1.0, %v9490_v60  ;;  %v9971_v16 = vsub.f32 %v20445_v63, %v9891_v35  ;;  %20449 = vst [vmem:[#allocation19_spill] sm:$0xff] %v17474_v4  ;;  %v20450_v30 = vld [vmem:[#allocation200_spill] sm:$0xff]  ;;  %v20459_v4 = vld [vmem:[#allocation83_spill] sm:$0xff] }
 0x352   : > { %v10143_v9 = vmul.f32 %v9815_v40, %v9815_v40  ;;  %v9586_v15 = vsel %vm20444_vm13, 0.0, %v9506_v1  ;;  %vm20447_vm7 = vnez %v20446_v19  ;;  %v9877_v29 = vmul.f32 %v16185_v6, %v17277_v26  ;;  %v17494_v26 = vpop.f32.mrf.mxu0 }
 0x353   : > { %v9650_v14 = vsel %vm20447_vm7, 0.0, %v9570_v33  ;;  %v9814_v28 = vsub.f32 %v20450_v30, %v9734_v54  ;;  %v9970_v60 = vsub.f32 %v20451_v58, %v9890_v49  ;;  %v17482_v40 = vsel %vm20447_vm7, 0.0, %v9586_v15  ;;  %20452 = vst [vmem:[#allocation20_spill] sm:$0xff] %v17494_v26  ;;  %v17496_v54 = vpop.f32.mrf.mxu1  ;;  %v10109_v58 = vpop.permute.xlu1 %10108 }
 0x354   : > { %v17484_v35 = vmul.f32 %v10130_v56, %v10130_v56  ;;  %v17488_v1 = vmul.f32 %v16069_v55, %v17333_v52  ;;  %v17492_v31 = vmul.f32 %v16139_v5, %v17343_v62  ;;  %v10159_v27 = vmul.f32 %v9971_v16, %v9971_v16  ;;  %20453 = vst [vmem:[#allocation138_spill] sm:$0xff] %v17496_v54  ;;  %v17511_v30 = vpop.f32.mrf.mxu0 }
 0x355   : > { %v17498_v49 = vmul.f32 %v10129_v21, %v10129_v21  ;;  %v17502_v39 = vmul.f32 %v16168_v22, %v17333_v52  ;;  %v10142_v56 = vmul.f32 %v9814_v28, %v9814_v28  ;;  %v10158_v33 = vmul.f32 %v9970_v60, %v9970_v60  ;;  %20454 = vst [vmem:[#allocation46_spill] sm:$0xff] %v17511_v30  ;;  %v17513_v21 = vpop.f32.mrf.mxu1  ;;  %v20457_v60 = vld [vmem:[#allocation60_spill] sm:$0xff] }
 0x356   : > { %v17506_v63 = vmul.f32 %v16185_v6, %v17343_v62  ;;  %v9683_v15 = vmul.f32 %v16069_v55, %v17400_v24  ;;  %v10175_v16 = vadd.f32 %v10159_v27, %v10143_v9  ;;  %v9998_v19 = vmul.f32 %v15802_v10, %v9650_v14  ;;  %20455 = vst [vmem:[#allocation139_spill] sm:$0xff] %v17513_v21  ;;  %v20461_v9 = vld [vmem:[#allocation91_spill] sm:$0xff]  ;;  %v17533_v23 = vpop.f32.mrf.mxu0 }
 0x357   : > { %v10174_v54 = vadd.f32 %v10158_v33, %v10142_v56  ;;  %v10038_v52 = vmul.f32 %v15910_v43, %v17482_v40  ;;  %v20458_v62 = vsel %vm20270_vm0, 0.0, %v20457_v60  ;;  %v9425_v27 = vsel %vm16835_vm2, 0.0, %v20461_v9  ;;  %v20462_v56 = vld [vmem:[#allocation162_spill] sm:$0xff]  ;;  %v17535_v60 = vpop.f32.mrf.mxu1 }
 0x358   : > { %v9409_v26 = vsel %vm16835_vm2, %v20459_v4, %v20458_v62  ;;  %v10207_v30 = vadd.f32 %v17356_v0, %v10175_v16  ;;  %v10018_v21 = vadd.f32 %v15932_v11, %v9998_v19  ;;  %vm20463_vm14 = vnez %v20462_v56  ;;  %v20464_v62 = vld [vmem:[#allocation163_spill] sm:$0xff] }
 0x359   : > { %v9489_v33 = vsel %vm20463_vm14, 0.0, %v9409_v26  ;;  %v9505_v28 = vsel %vm20463_vm14, 1.0, %v9425_v27  ;;  %v10206_v4 = vadd.f32 %v17205_v57, %v10174_v54  ;;  %vm20465_vm0 = vnez %v20464_v62  ;;  %v20466_v19 = vld [vmem:[#allocation115_spill] sm:$0xff]  ;;  %v17554_v54 = vpop.f32.mrf.mxu0  ;;  %v17556_v56 = vpop.f32.mrf.mxu1 }
 0x35a   : > { %v9569_v46 = vsel %vm20465_vm0, 1.0, %v9489_v33  ;;  %v9585_v0 = vsel %vm20465_vm0, 0.0, %v9505_v28  ;;  %v9701_v16 = vadd.f32 %v16269_v34, %v17422_v44  ;;  %10522 = vmin.xlane.f32.xlu1 %v10207_v30  ;;  %v17544_v26 = vadd.f32 %v10038_v52, %v10018_v21  ;;  %20468 = vst [vmem:[#allocation47_spill] sm:$0xff] %v17556_v56 }
 0x35b   : > { %vm20467_vm2 = vnez %v20466_v19  ;;  %v9857_v57 = vadd.f32 %v16384_v47, %v17430_v20  ;;  %v17559_v33 = vsub.f32 %v10109_v58, %v17410_v18  ;;  %v9723_v44 = vmul.f32 %v16139_v5, %v17414_v38  ;;  %10520 = vmin.xlane.f32.xlu0 %v10206_v4  ;;  %v17572_v18 = vpop.f32.mrf.mxu0  ;;  %v17574_v58 = vpop.f32.mrf.mxu1  ;;  %v20470_v4 = vld [vmem:[#allocation210_spill] sm:$0xff] }
 0x35c   : > { %v9649_v9 = vsel %vm20467_vm2, 0.0, %v9569_v46  ;;  %v17550_v27 = vsel %vm20467_vm2, 0.0, %v9585_v0  ;;  %v9839_v30 = vmul.f32 %v16168_v22, %v17400_v24  ;;  %v9879_v21 = vmul.f32 %v16185_v6, %v17414_v38  ;;  %20469 = vst [vmem:[#allocation26_spill] sm:$0xff] %v17574_v58 }
 0x35d   : > { %v10131_v52 = vsub.f32 %v10105_v32, %v10051_v53  ;;  %v17568_v20 = vmul.f32 %v16069_v55, %v9650_v14  ;;  %v9997_v28 = vmul.f32 %v15802_v10, %v9649_v9  ;;  %v9737_v62 = vadd.f32 %v17426_v48, %v9701_v16  ;;  %v17591_v16 = vpop.f32.mrf.mxu0  ;;  %v17593_v19 = vpop.f32.mrf.mxu1 }
 0x35e   : > { %v17578_v46 = vmul.f32 %v16139_v5, %v17482_v40  ;;  %v9893_v24 = vadd.f32 %v9877_v29, %v9857_v57  ;;  %v9700_v38 = vadd.f32 %v16269_v34, %v17213_v37  ;;  %v9856_v53 = vadd.f32 %v16384_v47, %v17267_v51  ;;  %20471 = vst [vmem:[#allocation112_spill] sm:$0xff] %v17593_v19  ;;  %v20472_v29 = vld [vmem:[#allocation73_spill] sm:$0xff]  ;;  %v20474_v19 = vld [vmem:[#allocation202_spill] sm:$0xff] }
 0x35f   : > { %v17585_v32 = vmul.f32 %v16168_v22, %v9650_v14  ;;  %v10017_v10 = vadd.f32 %v15932_v11, %v9997_v28  ;;  %v10037_v48 = vmul.f32 %v15910_v43, %v17550_v27  ;;  %v9817_v0 = vsub.f32 %v20470_v4, %v9737_v62  ;;  %v17602_v28 = vpop.f32.mrf.mxu0  ;;  %v17604_v62 = vpop.f32.mrf.mxu1 }
 0x360   : > { %v9973_v57 = vsub.f32 %v20472_v29, %v9893_v24  ;;  %v9736_v37 = vadd.f32 %v17226_v3, %v9700_v38  ;;  %v9892_v51 = vadd.f32 %v17271_v2, %v9856_v53  ;;  %v9703_v14 = vadd.f32 %v16269_v34, %v9683_v15  ;;  %20473 = vst [vmem:[#allocation39_spill] sm:$0xff] %v17604_v62  ;;  %v20475_v29 = vld [vmem:[#allocation173_spill] sm:$0xff] }
 0x361   : > { %v10053_v58 = vadd.f32 %v10037_v48, %v10017_v10  ;;  %v10145_v56 = vmul.f32 %v9817_v0, %v9817_v0  ;;  %v9859_v11 = vadd.f32 %v16384_v47, %v9839_v30  ;;  %v9702_v43 = vadd.f32 %v16269_v34, %v17360_v8  ;;  %v17612_v10 = vpop.f32.mrf.mxu0  ;;  %v17614_v8 = vpop.f32.mrf.mxu1  ;;  %v20476_v62 = vld [vmem:[#allocation117_spill] sm:$0xff] }
 0x362   : > { %v10161_v4 = vmul.f32 %v9973_v57, %v9973_v57  ;;  %v9816_v24 = vsub.f32 %v20474_v19, %v9736_v37  ;;  %v9972_v3 = vsub.f32 %v20475_v29, %v9892_v51  ;;  %v9739_v38 = vadd.f32 %v9723_v44, %v9703_v14  ;;  %v20477_v44 = vld [vmem:[#allocation90_spill] sm:$0xff] }
 0x363   : > { %v9685_v2 = vmul.f32 %v16069_v55, %v9649_v9  ;;  %v9895_v15 = vadd.f32 %v9879_v21, %v9859_v11  ;;  %v9738_v53 = vadd.f32 %v17370_v45, %v9702_v43  ;;  %v9858_v30 = vadd.f32 %v16384_v47, %v17394_v12  ;;  %v20478_v55 = vld [vmem:[#allocation204_spill] sm:$0xff]  ;;  %v17621_v14 = vpop.f32.mrf.mxu0  ;;  %v17623_v12 = vpop.f32.mrf.mxu1 }
 0x364   : > { %v10177_v48 = vadd.f32 %v10161_v4, %v10145_v56  ;;  %v10144_v0 = vmul.f32 %v9816_v24, %v9816_v24  ;;  %v10160_v57 = vmul.f32 %v9972_v3, %v9972_v3  ;;  %v9819_v19 = vsub.f32 %v20476_v62, %v9739_v38 }
 0x365   : > { %v9841_v37 = vmul.f32 %v16168_v22, %v9649_v9  ;;  %v9975_v51 = vsub.f32 %v20477_v44, %v9895_v15  ;;  %v9818_v21 = vsub.f32 %v20478_v55, %v9738_v53  ;;  %v9894_v45 = vadd.f32 %v17407_v13, %v9858_v30  ;;  %v20479_v22 = vld [vmem:[#allocation29_spill] sm:$0xff]  ;;  %v17629_v3 = vpop.f32.mrf.mxu0  ;;  %v17631_v38 = vpop.f32.mrf.mxu1 }
 0x366   : > { %v10195_v11 = vmul.f32 %v10131_v52, %v10131_v52  ;;  %v10209_v43 = vadd.f32 %v17498_v49, %v10177_v48  ;;  %v10176_v56 = vadd.f32 %v10160_v57, %v10144_v0  ;;  %v10147_v4 = vmul.f32 %v9819_v19, %v9819_v19  ;;  %v10113_v13 = vpop.permute.xlu0 %10112 }
 0x367   : > { %v9725_v62 = vmul.f32 %v16139_v5, %v17550_v27  ;;  %v10163_v24 = vmul.f32 %v9975_v51, %v9975_v51  ;;  %v9974_v9 = vsub.f32 %v20479_v22, %v9894_v45  ;;  %v10146_v29 = vmul.f32 %v9818_v21, %v9818_v21  ;;  %v17642_v57 = vpop.f32.mrf.mxu0  ;;  %v17644_v19 = vpop.f32.mrf.mxu1 }
 0x368   : > { %10526 = vmin.xlane.f32.xlu1 %v10209_v43  ;;  %v10208_v15 = vadd.f32 %v17351_v42, %v10176_v56  ;;  %v9704_v49 = vadd.f32 %v16269_v34, %v17488_v1  ;;  %v9860_v52 = vadd.f32 %v16384_v47, %v17502_v39  ;;  %v9705_v5 = vadd.f32 %v16269_v34, %v9685_v2  ;;  %v10117_v45 = vpop.permute.xlu1 %10116  ;;  %v20480_v56 = vld [vmem:[#allocation206_spill] sm:$0xff] }
 0x369   : > { %v9881_v53 = vmul.f32 %v16185_v6, %v17550_v27  ;;  %v10179_v30 = vadd.f32 %v10163_v24, %v10147_v4  ;;  %v10162_v48 = vmul.f32 %v9974_v9, %v9974_v9  ;;  %v9861_v0 = vadd.f32 %v16384_v47, %v9841_v37  ;;  %v17652_v37 = vpop.f32.mrf.mxu0  ;;  %v17654_v21 = vpop.f32.mrf.mxu1 }
 0x36a   : > { %v9882_v42 = vmul.f32 %v16185_v6, %v17482_v40  ;;  %10524 = vmin.xlane.f32.xlu0 %v10208_v15  ;;  %v9740_v1 = vadd.f32 %v17492_v31, %v9704_v49  ;;  %v9896_v39 = vadd.f32 %v17506_v63, %v9860_v52  ;;  %v9741_v2 = vadd.f32 %v9725_v62, %v9705_v5  ;;  %v20481_v40 = vld [vmem:[#allocation121_spill] sm:$0xff]  ;;  %v20482_v31 = vld [vmem:[#allocation119_spill] sm:$0xff] }
 0x36b   : > { %v10211_v44 = vadd.f32 %v10195_v11, %v10179_v30  ;;  %v10178_v51 = vadd.f32 %v10162_v48, %v10146_v29  ;;  %v9897_v27 = vadd.f32 %v9881_v53, %v9861_v0  ;;  %v9706_v55 = vadd.f32 %v16269_v34, %v17568_v20  ;;  %v20483_v11 = vld [vmem:[#allocation130_spill] sm:$0xff]  ;;  %v17664_v20 = vpop.f32.mrf.mxu0  ;;  %v17666_v9 = vpop.f32.mrf.mxu1  ;;  %v20484_v49 = vld [vmem:[#allocation211_spill] sm:$0xff] }
 0x36c   : > { %v10133_v43 = vsub.f32 %v10113_v13, %v10053_v58  ;;  %v9820_v6 = vsub.f32 %v20480_v56, %v9740_v1  ;;  %v9976_v4 = vsub.f32 %v20481_v40, %v9896_v39  ;;  %v9821_v24 = vsub.f32 %v20482_v31, %v9741_v2  ;;  %v20485_v0 = vld [vmem:[#allocation146_spill] sm:$0xff]  ;;  %v20488_v40 = vld [vmem:[#allocation155_spill] sm:$0xff] }
 0x36d   : > { %10530 = vmin.xlane.f32.xlu1 %v10211_v44  ;;  %v10210_v63 = vadd.f32 %v17484_v35, %v10178_v51  ;;  %v9977_v62 = vsub.f32 %v20483_v11, %v9897_v27  ;;  %v9742_v22 = vadd.f32 %v17578_v46, %v9706_v55  ;;  %v9862_v34 = vadd.f32 %v16384_v47, %v17585_v32  ;;  %v17669_v35 = vpop.f32.mrf.mxu0  ;;  %v17671_v53 = vpop.f32.mrf.mxu1  ;;  %v20487_v51 = vld [vmem:[#allocation74_spill] sm:$0xff]  ;;  %v20494_v11 = vld [vmem:[#allocation184_spill] sm:$0xff] }
 0x36e   : > { %v10148_v58 = vmul.f32 %v9820_v6, %v9820_v6  ;;  %v10164_v29 = vmul.f32 %v9976_v4, %v9976_v4  ;;  %v10149_v13 = vmul.f32 %v9821_v24, %v9821_v24  ;;  %v10196_v46 = vmul.f32 %v17559_v33, %v17559_v33  ;;  %v20489_v33 = vld [vmem:[#allocation80_spill] sm:$0xff] }
 0x36f   : > { %10528 = vmin.xlane.f32.xlu0 %v10210_v63  ;;  %v10165_v15 = vmul.f32 %v9977_v62, %v9977_v62  ;;  %v9822_v52 = vsub.f32 %v20484_v49, %v9742_v22  ;;  %v9898_v5 = vadd.f32 %v9882_v42, %v9862_v34  ;;  %v10134_v47 = vsub.f32 %v10117_v45, %v17544_v26  ;;  %v17677_v2 = vpop.f32.mrf.mxu0  ;;  %v17679_v44 = vpop.f32.mrf.mxu1  ;;  %v20486_v42 = vld [vmem:[#allocation129_spill] sm:$0xff]  ;;  %v20491_v45 = vld [vmem:[#allocation134_spill] sm:$0xff] }
 0x370   : > { %v10180_v32 = vadd.f32 %v10164_v29, %v10148_v58  ;;  %v10197_v30 = vmul.f32 %v10133_v43, %v10133_v43  ;;  %v6127_v27 = vadd.f32 %v20487_v51, %v20486_v42  ;;  %v6270_v4 = vadd.f32 %v20489_v33, %v20488_v40  ;;  %v20490_v26 = vld [vmem:[#allocation65_spill] sm:$0xff]  ;;  %v20493_v63 = vld [vmem:[#allocation190_spill] sm:$0xff] }
 0x371   : > { %v10181_v48 = vadd.f32 %v10165_v15, %v10149_v13  ;;  %v9978_v1 = vsub.f32 %v20485_v0, %v9898_v5  ;;  %v10150_v39 = vmul.f32 %v9822_v52, %v9822_v52  ;;  %v6263_v43 = vadd.f32 %v20491_v45, %v20490_v26  ;;  %v17687_v31 = vpop.f32.mrf.mxu0  ;;  %v17689_v24 = vpop.f32.mrf.mxu1  ;;  %v20495_v22 = vld [vmem:[#allocation102_spill] sm:$0xff]  ;;  %v20496_v13 = vld [vmem:[#allocation81_spill] sm:$0xff]  ;;  %v20498_v5 = vld [vmem:[#allocation32_spill] sm:$0xff] }
 0x372   : > { %v10212_v55 = vadd.f32 %v10196_v46, %v10180_v32  ;;  %20492 = vst [vmem:[#allocation197_spill] sm:$0xff] %v17689_v24  ;;  %v6284_v62 = vadd.f32 %v20494_v11, %v20493_v63  ;;  %v6277_v34 = vadd.f32 %v20495_v22, %v17198_v17  ;;  %v10198_v58 = vmul.f32 %v10134_v47, %v10134_v47  ;;  %v20499_v46 = vld [vmem:[#allocation94_spill] sm:$0xff]  ;;  %v20508_v45 = vld [vmem:[#allocation131_spill] sm:$0xff] }
 0x373   : > { %v10213_v56 = vadd.f32 %v10197_v30, %v10181_v48  ;;  %v10166_v6 = vmul.f32 %v9978_v1, %v9978_v1  ;;  %v6298_v15 = vadd.f32 %v20496_v13, %v6127_v27  ;;  %v17696_v49 = vpop.f32.mrf.mxu0  ;;  %v17698_v52 = vpop.f32.mrf.mxu1  ;;  %v6151_v32 = vadd.f32 %v20499_v46, %v20498_v5  ;;  %v20500_v30 = vld [vmem:[#allocation87_spill] sm:$0xff]  ;;  %v20501_v48 = vld [vmem:[#allocation77_spill] sm:$0xff]  ;;  %v20502_v42 = vld [vmem:[#allocation50_spill] sm:$0xff] }
 0x374   : > { %10532 = vmin.xlane.f32.xlu0 %v10212_v55  ;;  %20497 = vst [vmem:[#allocation125_spill] sm:$0xff] %v17698_v52  ;;  %v6145_v0 = vadd.f32 %v20501_v48, %v20500_v30  ;;  %v6452_v51 = vadd.f32 %v20502_v42, %v6270_v4  ;;  %v20503_v55 = vld [vmem:[#allocation100_spill] sm:$0xff]  ;;  %v20507_v33 = vld [vmem:[#allocation14_spill] sm:$0xff]  ;;  %v20511_v13 = vld [vmem:[#allocation181_spill] sm:$0xff] }
 0x375   : > { %10534 = vmin.xlane.f32.xlu1 %v10213_v56  ;;  %v10182_v29 = vadd.f32 %v10166_v6, %v10150_v39  ;;  %v6444_v17 = vadd.f32 %v20503_v55, %v6263_v43  ;;  %v17706_v47 = vpop.f32.mrf.mxu0  ;;  %v17708_v39 = vpop.f32.mrf.mxu1  ;;  %v20505_v27 = vld [vmem:[#allocation140_spill] sm:$0xff]  ;;  %v20506_v6 = vld [vmem:[#allocation137_spill] sm:$0xff]  ;;  %v6326_v26 = vadd.f32 %v20507_v33, %v6151_v32  ;;  %v6484_v63 = vadd.f32 %v20508_v45, %v6298_v15  ;;  %v20509_v11 = vld [vmem:[#allocation166_spill] sm:$0xff] }
 0x376   : > { %20504 = vst [vmem:[#allocation99_spill] sm:$0xff] %v17708_v39  ;;  %v6468_v56 = vadd.f32 %v20505_v27, %v6284_v62  ;;  %v6460_v40 = vadd.f32 %v20506_v6, %v6277_v34  ;;  %v6319_v22 = vadd.f32 %v20509_v11, %v6145_v0  ;;  %v20512_v62 = vld [vmem:[#allocation96_spill] sm:$0xff]  ;;  %v20513_v46 = vld [vmem:[#allocation126_spill] sm:$0xff]  ;;  %v20514_v32 = vld [vmem:[#allocation183_spill] sm:$0xff] }
 0x377   : > { %v10214_v1 = vadd.f32 %v10198_v58, %v10182_v29  ;;  %v6640_v58 = vadd.f32 %v17175_v59, %v6452_v51  ;;  %v17717_v4 = vadd.f32 %v17200_v7, %v6444_v17  ;;  %v17719_v43 = vpop.f32.mrf.mxu0  ;;  %v17721_v29 = vpop.f32.mrf.mxu1  ;;  %v6163_v5 = vadd.f32 %v20512_v62, %v20511_v13  ;;  %v20515_v30 = vld [vmem:[#allocation9_spill] sm:$0xff]  ;;  %v20518_v51 = vld [vmem:[#allocation79_spill] sm:$0xff]  ;;  %v20519_v55 = vld [vmem:[#allocation78_spill] sm:$0xff] }
 0x378   : > { %20510 = vst [vmem:[#allocation51_spill] sm:$0xff] %v17721_v29  ;;  %v17726_v34 = vadd.f32 %v17215_v25, %v6468_v56  ;;  %v6256_v15 = vadd.f32 %v20514_v32, %v20513_v46  ;;  %v17731_v48 = vadd.f32 %v20515_v30, %v6460_v40  ;;  %v17734_v59 = vadd.f32 %v17259_v36, %v6484_v63  ;;  %v20520_v25 = vld [vmem:[#allocation64_spill] sm:$0xff]  ;;  %v20521_v27 = vld [vmem:[#allocation69_spill] sm:$0xff]  ;;  %v20523_v45 = vld [vmem:[#allocation62_spill] sm:$0xff] }
 0x379   : > { %10536 = vmin.xlane.f32.xlu0 %v10214_v1  ;;  %v17736_v7 = vpop.f32.mrf.mxu0  ;;  %v17738_v0 = vpop.f32.mrf.mxu1  ;;  %v20517_v1 = vld [vmem:[#allocation189_spill] sm:$0xff]  ;;  %v6157_v17 = vadd.f32 %v20519_v55, %v20518_v51  ;;  %v6249_v56 = vadd.f32 %v20521_v27, %v20520_v25  ;;  %v20522_v6 = vld [vmem:[#allocation152_spill] sm:$0xff]  ;;  %v6508_v40 = vadd.f32 %v20523_v45, %v6319_v22  ;;  %v20526_v13 = vld [vmem:[#allocation178_spill] sm:$0xff] }
 0x37a   : > { %20516 = vst [vmem:[#allocation40_spill] sm:$0xff] %v17738_v0  ;;  %v6340_v42 = vadd.f32 %v20517_v1, %v6163_v5  ;;  %v6516_v33 = vadd.f32 %v20522_v6, %v6326_v26  ;;  %v20525_v63 = vld [vmem:[#allocation177_spill] sm:$0xff]  ;;  %v20527_v46 = vld [vmem:[#allocation194_spill] sm:$0xff]  ;;  %v20528_v32 = vld [vmem:[#allocation27_spill] sm:$0xff] }
 0x37b   : > { %v17747_v11 = vpop.f32.mrf.mxu0  ;;  %v17749_v36 = vpop.f32.mrf.mxu1  ;;  %v6121_v62 = vadd.f32 %v20526_v13, %v20525_v63  ;;  %v6139_v5 = vadd.f32 %v20528_v32, %v20527_v46  ;;  %v20529_v30 = vld [vmem:[#allocation207_spill] sm:$0xff]  ;;  %v20530_v1 = vld [vmem:[#allocation33_spill] sm:$0xff]  ;;  %v20531_v55 = vld [vmem:[#allocation208_spill] sm:$0xff] }
 0x37c   : > { %20524 = vst [vmem:[#allocation85_spill] sm:$0xff] %v17749_v36  ;;  %v6175_v51 = vadd.f32 %v20530_v1, %v20529_v30  ;;  %v20532_v0 = vld [vmem:[#allocation98_spill] sm:$0xff]  ;;  %v20534_v6 = vld [vmem:[#allocation132_spill] sm:$0xff]  ;;  %v6688_v45 = vadd.f32 %v17345_v50, %v6516_v33  ;;  %v6682_v36 = vadd.f32 %v17364_v61, %v6508_v40  ;;  %v20536_v13 = vld [vmem:[#allocation209_spill] sm:$0xff] }
 0x37d   : > { %v6169_v25 = vadd.f32 %v20532_v0, %v20531_v55  ;;  %v20533_v27 = vld [vmem:[#allocation34_spill] sm:$0xff]  ;;  %v6333_v22 = vadd.f32 %v20534_v6, %v6157_v17  ;;  %v17763_v29 = vpop.f32.mrf.mxu0  ;;  %v17765_v63 = vpop.f32.mrf.mxu1  ;;  %v6291_v46 = vadd.f32 %v20536_v13, %v6121_v62  ;;  %v20537_v32 = vld [vmem:[#allocation104_spill] sm:$0xff]  ;;  %v20542_v6 = vld [vmem:[#allocation7_spill] sm:$0xff] }
 0x37e   : > { %v6436_v26 = vadd.f32 %v20533_v27, %v6256_v15  ;;  %20535 = vst [vmem:[#allocation141_spill] sm:$0xff] %v17765_v63  ;;  %v6532_v39 = vadd.f32 %v20537_v32, %v6340_v42  ;;  %v20538_v30 = vld [vmem:[#allocation188_spill] sm:$0xff]  ;;  %v20540_v55 = vld [vmem:[#allocation70_spill] sm:$0xff]  ;;  %v20543_v40 = vld [vmem:[#allocation179_spill] sm:$0xff]  ;;  %v17781_v62 = vadd.f32 %v17289_v41, %v6688_v45 }
 0x37f   : > { %v6354_v1 = vadd.f32 %v20538_v30, %v6175_v51  ;;  %v20539_v52 = vld [vmem:[#allocation16_spill] sm:$0xff]  ;;  %v6428_v15 = vadd.f32 %v20540_v55, %v6249_v56  ;;  %v17774_v33 = vpop.f32.mrf.mxu0  ;;  %v17776_v61 = vpop.f32.mrf.mxu1  ;;  %v20549_v56 = vld [vmem:[#allocation143_spill] sm:$0xff]  ;;  %v20551_v55 = vld [vmem:[#allocation57_spill] sm:$0xff] }
 0x380   : > { %v6347_v0 = vadd.f32 %v20539_v52, %v6169_v25  ;;  %v20541_v27 = vld [vmem:[#allocation212_spill] sm:$0xff]  ;;  %v6628_v50 = vadd.f32 %v20542_v6, %v6436_v26  ;;  %20545 = vst [vmem:[#allocation41_spill] sm:$0xff] %v17781_v62  ;;  %v20548_v52 = vld [vmem:[#allocation71_spill] sm:$0xff]  ;;  %v6524_v13 = vadd.f32 %v20549_v56, %v6333_v22  ;;  %v20554_v45 = vld [vmem:[#allocation106_spill] sm:$0xff] }
 0x381   : > { %v6312_v17 = vadd.f32 %v20541_v27, %v6139_v5  ;;  %v20544_v63 = vld [vmem:[#allocation76_spill] sm:$0xff]  ;;  %v6700_v25 = vadd.f32 %v20548_v52, %v6532_v39  ;;  %v20550_v5 = vld [vmem:[#allocation23_spill] sm:$0xff]  ;;  %v17789_v26 = vpop.f32.mrf.mxu0  ;;  %v17791_v30 = vpop.f32.mrf.mxu1  ;;  %v6476_v27 = vadd.f32 %v20551_v55, %v6291_v46  ;;  %v20557_v39 = vld [vmem:[#allocation66_spill] sm:$0xff] }
 0x382   : > { %v6133_v24 = vadd.f32 %v20544_v63, %v20543_v40  ;;  %v20546_v42 = vld [vmem:[#allocation68_spill] sm:$0xff]  ;;  %v6622_v32 = vadd.f32 %v20550_v5, %v6428_v15  ;;  %v20552_v6 = vld [vmem:[#allocation187_spill] sm:$0xff]  ;;  %v20553_v40 = vld [vmem:[#allocation82_spill] sm:$0xff]  ;;  %v6540_v62 = vadd.f32 %v20554_v45, %v6347_v0  ;;  %v17801_v52 = vadd.f32 %v20557_v39, %v6628_v50 }
 0x383   : > { %v17784_v51 = vadd.f32 %v20546_v42, %v6682_v36  ;;  %v6548_v41 = vadd.f32 %v20553_v40, %v6354_v1  ;;  %v20555_v36 = vld [vmem:[#allocation186_spill] sm:$0xff]  ;;  %v20558_v22 = vld [vmem:[#allocation135_spill] sm:$0xff]  ;;  %v17809_v46 = vpop.f32.mrf.mxu1  ;;  %v20564_v0 = vld [vmem:[#allocation45_spill] sm:$0xff] }
 0x384   : > { %v6305_v63 = vadd.f32 %v20552_v6, %v6133_v24  ;;  %v17798_v42 = vadd.f32 %v20555_v36, %v6312_v17  ;;  %v17804_v15 = vadd.f32 %v20558_v22, %v6700_v25  ;;  %v20560_v56 = vld [vmem:[#allocation18_spill] sm:$0xff]  ;;  %20561 = vst [vmem:[#allocation58_spill] sm:$0xff] %v17809_v46  ;;  %v20562_v24 = vld [vmem:[#allocation167_spill] sm:$0xff]  ;;  %v20565_v40 = vld [vmem:[#allocation97_spill] sm:$0xff]  ;;  %vm10264_vm10 = vcmp.ge.f32.partialorder %v17801_v52, 0.0 }
 0x385   : > { %20547 = vst [vmem:[#allocation55_spill] sm:$0xff] %v17784_v51  ;;  %v6694_v5 = vadd.f32 %v20560_v56, %v6524_v13  ;;  %v17807_v51 = vpop.f32.mrf.mxu0  ;;  %v6712_v55 = vadd.f32 %v20562_v24, %v6548_v41  ;;  %v20563_v1 = vld [vmem:[#allocation118_spill] sm:$0xff]  ;;  %v7182_v17 = vadd.f32 %v20565_v40, %v20564_v0  ;;  %v20566_v45 = vld [vmem:[#allocation20_spill] sm:$0xff]  ;;  %v20568_v39 = vld [vmem:[#allocation15_spill] sm:$0xff]  ;;  %vm10280_vm8 = vcmp.le.f32.partialorder %v17801_v52, 1.0 }
 0x386   : > { %20556 = vst [vmem:[#allocation171_spill] sm:$0xff] %v17798_v42  ;;  %20559 = vst [vmem:[#allocation142_spill] sm:$0xff] %v17804_v15  ;;  %v6706_v6 = vadd.f32 %v20563_v1, %v6540_v62  ;;  %v20567_v36 = vld [vmem:[#allocation30_spill] sm:$0xff]  ;;  %v17818_v42 = vadd.f32 %v20568_v39, %v6622_v32  ;;  %v20569_v25 = vld [vmem:[#allocation133_spill] sm:$0xff]  ;;  %v17828_v62 = vpop.f32.mrf.mxu1 }
 0x387   : > { %v7176_v50 = vadd.f32 %v20567_v36, %v20566_v45  ;;  %v17821_v22 = vadd.f32 %v20569_v25, %v6640_v58  ;;  %v20570_v13 = vld [vmem:[#allocation72_spill] sm:$0xff]  ;;  %v20571_v15 = vld [vmem:[#allocation46_spill] sm:$0xff]  ;;  %v12886_v24 = vpop.f32.mrf.mxu0  ;;  %v20573_v1 = vld [vmem:[#allocation17_spill] sm:$0xff] }
 0x388   : > { %v17824_v56 = vadd.f32 %v20570_v13, %v6694_v5  ;;  %v20572_v46 = vld [vmem:[#allocation192_spill] sm:$0xff]  ;;  %v17831_v0 = vadd.f32 %v20573_v1, %v6712_v55  ;;  %v20575_v32 = vld [vmem:[#allocation19_spill] sm:$0xff]  ;;  %v20576_v58 = vld [vmem:[#allocation138_spill] sm:$0xff]  ;;  %vm10263_vm9 = vcmp.ge.f32.partialorder %v17818_v42, 0.0  ;;  %vm10279_vm4 = vcmp.le.f32.partialorder %v17818_v42, 1.0 }
 0x389   : > { %v7194_v41 = vadd.f32 %v20572_v46, %v20571_v15  ;;  %v20574_v40 = vld [vmem:[#allocation136_spill] sm:$0xff]  ;;  %v7188_v36 = vadd.f32 %v20575_v32, %v17533_v23  ;;  %v7206_v39 = vadd.f32 %v20576_v58, %v17554_v54  ;;  %v20577_v5 = vld [vmem:[#allocation127_spill] sm:$0xff]  ;;  %v20578_v15 = vld [vmem:[#allocation22_spill] sm:$0xff]  ;;  %v7409_v1 = vpop.f32.mrf.mxu0  ;;  %vm10266_vm3 = vcmp.ge.f32.partialorder %v17821_v22, 0.0 }
 0x38a   : > { %v17834_v45 = vadd.f32 %v20574_v40, %v6706_v6  ;;  %v17841_v25 = vadd.f32 %v20577_v5, %v6305_v63  ;;  %v17845_v46 = vadd.f32 %v20578_v15, %v17717_v4  ;;  %v20579_v13 = vld [vmem:[#allocation139_spill] sm:$0xff]  ;;  %v7218_v6 = vadd.f32 %v17535_v60, %v17591_v16  ;;  %v12918_v40 = vpop.f32.mrf.mxu1  ;;  %v20581_v63 = vld [vmem:[#allocation108_spill] sm:$0xff]  ;;  %vm17946_vm6 = vmand %vm10264_vm10, %vm10280_vm8 }
 0x38b   : > { %v7200_v55 = vadd.f32 %v20579_v13, %v17572_v18  ;;  %v20580_v23 = vld [vmem:[#allocation191_spill] sm:$0xff]  ;;  %v17859_v4 = vadd.f32 %v20581_v63, %v17731_v48  ;;  %v20582_v32 = vld [vmem:[#allocation8_spill] sm:$0xff]  ;;  %v12889_v63 = vpop.f32.mrf.mxu0  ;;  %vm10282_vm11 = vcmp.le.f32.partialorder %v17821_v22, 1.0  ;;  %vm17958_vm13 = vmand %vm10263_vm9, %vm10279_vm4 }
 0x38c   : > { %v17855_v54 = vadd.f32 %v20580_v23, %v17726_v34  ;;  %v17863_v18 = vadd.f32 %v20582_v32, %v17734_v59  ;;  %v20583_v58 = vld [vmem:[#allocation199_spill] sm:$0xff]  ;;  %v20585_v34 = vld [vmem:[#allocation26_spill] sm:$0xff]  ;;  %v20586_v48 = vld [vmem:[#allocation112_spill] sm:$0xff]  ;;  %v7630_v32 = vpop.f32.mrf.mxu1  ;;  %vm10265_vm15 = vcmp.ge.f32.partialorder %v17845_v46, 0.0  ;;  %vm10281_vm12 = vcmp.le.f32.partialorder %v17845_v46, 1.0 }
 0x38d   : > { %v17866_v60 = vadd.f32 %v20583_v58, %v6476_v27  ;;  %v20584_v16 = vld [vmem:[#allocation47_spill] sm:$0xff]  ;;  %v7230_v15 = vadd.f32 %v20585_v34, %v17612_v10  ;;  %v7224_v13 = vadd.f32 %v20586_v48, %v17621_v14  ;;  %v7236_v27 = vadd.f32 %v17614_v8, %v17642_v57  ;;  %v7423_v57 = vpop.f32.mrf.mxu0  ;;  %vm17972_vm0 = vmand %vm10266_vm3, %vm10282_vm11 }
 0x38e   : > { %v7212_v5 = vadd.f32 %v20584_v16, %v17602_v28  ;;  %v20587_v23 = vld [vmem:[#allocation39_spill] sm:$0xff]  ;;  %v7254_v28 = vadd.f32 %v17623_v12, %v17652_v37  ;;  %v7248_v10 = vadd.f32 %v17631_v38, %v17664_v20  ;;  %v7266_v14 = vadd.f32 %v17644_v19, %v17669_v35  ;;  %v12949_v34 = vpop.f32.mrf.mxu1  ;;  %vm17981_vm10 = vmand %vm10265_vm15, %vm10281_vm12 }
 0x38f   : > { %v7242_v59 = vadd.f32 %v20587_v23, %v17629_v3  ;;  %v7260_v3 = vadd.f32 %v17654_v21, %v17677_v2  ;;  %v7347_v58 = vadd.f32 %v17687_v31, %v7182_v17  ;;  %v7340_v16 = vadd.f32 %v17696_v49, %v7176_v50  ;;  %v12892_v31 = vpop.f32.mrf.mxu0  ;;  %v20589_v50 = vld [vmem:[#allocation125_spill] sm:$0xff] }
 0x390   : > { %v7361_v8 = vadd.f32 %v17706_v47, %v7194_v41  ;;  %v7354_v12 = vadd.f32 %v17719_v43, %v7188_v36  ;;  %v7375_v38 = vadd.f32 %v17736_v7, %v7206_v39  ;;  %v7368_v37 = vadd.f32 %v17747_v11, %v7200_v55  ;;  %v7874_v49 = vpop.f32.mrf.mxu1  ;;  %v20588_v47 = vld [vmem:[#allocation197_spill] sm:$0xff]  ;;  %v20590_v7 = vld [vmem:[#allocation99_spill] sm:$0xff] }
 0x391   : > { %v7389_v19 = vadd.f32 %v17763_v29, %v7218_v6  ;;  %v7527_v20 = vadd.f32 %v17666_v9, %v7347_v58  ;;  %v7519_v21 = vadd.f32 %v17671_v53, %v7340_v16  ;;  %v7382_v2 = vadd.f32 %v17774_v33, %v7212_v5  ;;  %v20591_v11 = vld [vmem:[#allocation51_spill] sm:$0xff]  ;;  %v20592_v9 = vld [vmem:[#allocation40_spill] sm:$0xff]  ;;  %v7437_v39 = vpop.f32.mrf.mxu0  ;;  %v20593_v58 = vld [vmem:[#allocation85_spill] sm:$0xff] }
 0x392   : > { %v7543_v35 = vadd.f32 %v17679_v44, %v7361_v8  ;;  %v7535_v17 = vadd.f32 %v20588_v47, %v7354_v12  ;;  %v17904_v43 = vadd.f32 %v20589_v50, %v7375_v38  ;;  %v17907_v41 = vadd.f32 %v20590_v7, %v7368_v37  ;;  %v12952_v55 = vpop.f32.mrf.mxu1  ;;  %v20594_v8 = vld [vmem:[#allocation141_spill] sm:$0xff] }
 0x393   : > { %v17910_v29 = vadd.f32 %v20591_v11, %v7389_v19  ;;  %v17913_v36 = vadd.f32 %v20592_v9, %v7382_v2  ;;  %v7403_v53 = vadd.f32 %v17789_v26, %v7230_v15  ;;  %v7396_v44 = vadd.f32 %v17807_v51, %v7224_v13  ;;  %v12923_v26 = vpop.f32.mrf.mxu0  ;;  %v20603_v19 = vld [vmem:[#allocation158_spill] sm:$0xff] }
 0x394   : > { %v7417_v33 = vadd.f32 %v12886_v24, %v7242_v59  ;;  %v7410_v6 = vadd.f32 %v7409_v1, %v7236_v27  ;;  %v7431_v5 = vadd.f32 %v12889_v63, %v7254_v28  ;;  %v7424_v48 = vadd.f32 %v7423_v57, %v7248_v10  ;;  %v7886_v15 = vpop.f32.mrf.mxu1  ;;  %v20595_v24 = vld [vmem:[#allocation58_spill] sm:$0xff]  ;;  %v20596_v63 = vld [vmem:[#allocation171_spill] sm:$0xff]  ;;  %v20597_v27 = vld [vmem:[#allocation24_spill] sm:$0xff] }
 0x395   : > { %v7445_v23 = vadd.f32 %v12892_v31, %v7266_v14  ;;  %v17918_v16 = vadd.f32 %v20593_v58, %v7403_v53  ;;  %v17921_v12 = vadd.f32 %v20594_v8, %v7396_v44  ;;  %v7438_v37 = vadd.f32 %v7437_v39, %v7260_v3 }
 0x396   : > { %v17924_v38 = vadd.f32 %v17776_v61, %v7417_v33  ;;  %v17927_v51 = vadd.f32 %v17791_v30, %v7410_v6  ;;  %v17930_v1 = vadd.f32 %v20595_v24, %v7431_v5  ;;  %v17933_v13 = vadd.f32 %v17828_v62, %v7424_v48  ;;  %v7712_v62 = vpop.f32.mrf.mxu0  ;;  %v12955_v14 = vpop.f32.mrf.mxu1  ;;  %v20615_v6 = vld [vmem:[#allocation110_spill] sm:$0xff] }
 0x397   : > { %v17935_v59 = vadd.f32 %v12918_v40, %v7445_v23  ;;  %v6676_v61 = vadd.f32 %v20597_v27, %v20596_v63  ;;  %v17940_v28 = vadd.f32 %v7630_v32, %v7438_v37  ;;  %v7719_v10 = vadd.f32 %v12923_v26, %v7527_v20  ;;  %v20600_v40 = vld [vmem:[#allocation25_spill] sm:$0xff] }
 0x398   : > { %vm10268_vm5 = vcmp.ge.f32.partialorder %v17855_v54, 0.0  ;;  %vm10284_vm1 = vcmp.le.f32.partialorder %v17855_v54, 1.0  ;;  %v6670_v3 = vadd.f32 %v20600_v40, %v17841_v25  ;;  %v7713_v32 = vadd.f32 %v7712_v62, %v7519_v21  ;;  %v12926_v31 = vpop.f32.mrf.mxu0  ;;  %v7898_v21 = vpop.f32.mrf.mxu1 }
 0x399   : > { %vm10267_vm7 = vcmp.ge.f32.partialorder %v17859_v4, 0.0  ;;  %vm10283_vm14 = vcmp.le.f32.partialorder %v17859_v4, 1.0  ;;  %v17966_v20 = vadd.f32 %v20603_v19, %v17866_v60  ;;  %v7881_v2 = vadd.f32 %v12949_v34, %v7719_v10  ;;  %v20608_v34 = vld [vmem:[#allocation164_spill] sm:$0xff]  ;;  %vm17994_vm4 = vmand %vm10268_vm5, %vm10284_vm1 }
 0x39a   : > { %vm10270_vm2 = vcmp.ge.f32.partialorder %v17863_v18, 0.0  ;;  %v7875_v47 = vadd.f32 %v7874_v49, %v7713_v32  ;;  %v7731_v50 = vadd.f32 %v12926_v31, %v7543_v35  ;;  %vm10286_vm8 = vcmp.le.f32.partialorder %v17863_v18, 1.0  ;;  %v7724_v9 = vpop.f32.mrf.mxu0  ;;  %v12958_v49 = vpop.f32.mrf.mxu1  ;;  %vm18009_vm15 = vmand %vm10267_vm7, %vm10283_vm14 }
 0x39b   : > { %v17987_v7 = vadd.f32 %v20608_v34, %v6676_v61  ;;  %vm10312_vm9 = vcmp.ge.f32.partialorder %v7881_v2, 0.0  ;;  %v10344_v11 = vadd.f32 %v7881_v2, %v17801_v52  ;;  %v7725_v33 = vadd.f32 %v7724_v9, %v7535_v17  ;;  %v20653_v9 = vld [vmem:[#allocation142_spill] sm:$0xff] }
 0x39c   : > { %vm18000_vm3 = vmand %vm17946_vm6, %vm10312_vm9  ;;  %vm10311_vm11 = vcmp.ge.f32.partialorder %v7875_v47, 0.0  ;;  %v10343_v44 = vadd.f32 %v7875_v47, %v17818_v42  ;;  %v7893_v52 = vadd.f32 %v12952_v55, %v7731_v50  ;;  %vm10285_vm6 = vcmp.le.f32.partialorder %v17966_v20, 1.0  ;;  %v12929_v17 = vpop.f32.mrf.mxu0  ;;  %v7910_v55 = vpop.f32.mrf.mxu1  ;;  %v20648_v47 = vld [vmem:[#allocation55_spill] sm:$0xff] }
 0x39d   : > { %v18016_v5 = vadd.f32 %v20615_v6, %v6670_v3  ;;  %vm10360_vm5 = vcmp.le.f32.partialorder %v10344_v11, 1.0  ;;  %vm18020_vm1 = vmand %vm17958_vm13, %vm10311_vm11  ;;  %v7887_v23 = vadd.f32 %v7886_v15, %v7725_v33  ;;  %v20620_v8 = vmov 0  ;;  %v20635_v3 = vld [vmem:[#allocation41_spill] sm:$0xff] }
 0x39e   : > { %vm10314_vm14 = vcmp.ge.f32.partialorder %v7893_v52, 0.0  ;;  %v10346_v48 = vadd.f32 %v7893_v52, %v17821_v22  ;;  %vm18029_vm9 = vmand %vm10270_vm2, %vm10286_vm8  ;;  %v7743_v37 = vadd.f32 %v12929_v17, %v17904_v43  ;;  %v7736_v26 = vpop.f32.mrf.mxu0  ;;  %v12961_v15 = vpop.f32.mrf.mxu1  ;;  %v20628_v43 = vmov 0 }
 0x39f   : > { %vm18035_vm13 = vmand %vm18000_vm3, %vm10360_vm5  ;;  %vm10313_vm8 = vcmp.ge.f32.partialorder %v7887_v23, 0.0  ;;  %v10345_v24 = vadd.f32 %v7887_v23, %v17845_v46  ;;  %v7737_v63 = vadd.f32 %v7736_v26, %v17907_v41  ;;  %vm20624_vm3 = vcmp.ge.f32.partialorder %v17966_v20, 0.0 }
 0x3a0   : > { %v20621_v8 = vsel %vm18035_vm13, 4294967295, %v20620_v8  ;;  %vm18043_vm12 = vmand %vm17972_vm0, %vm10314_vm14  ;;  %vm20627_vm0 = vcmp.le.f32.partialorder %v10343_v44, 1.0  ;;  %v7905_v41 = vadd.f32 %v12955_v14, %v7743_v37  ;;  %v12932_v61 = vpop.f32.mrf.mxu0  ;;  %v7922_v10 = vpop.f32.mrf.mxu1  ;;  %v20633_v40 = vmov 0 }
 0x3a1   : > { %vm18054_vm5 = vmand %vm20624_vm3, %vm10285_vm6  ;;  %vm10361_vm6 = vcmp.le.f32.partialorder %v10345_v24, 1.0  ;;  %v7899_v30 = vadd.f32 %v7898_v21, %v7737_v63  ;;  %v7755_v62 = vadd.f32 %v12932_v61, %v17910_v29  ;;  %vm20636_vm11 = vcmp.le.f32.partialorder %v17987_v7, 1.0 }
 0x3a2   : > { %vm18061_vm14 = vmand %vm18020_vm1, %vm20627_vm0  ;;  %vm20632_vm1 = vcmp.le.f32.partialorder %v10346_v48, 1.0  ;;  %v10348_v14 = vadd.f32 %v7905_v41, %v17855_v54  ;;  %v7748_v32 = vpop.f32.mrf.mxu0  ;;  %vm20637_vm7 = vcmp.ge.f32.partialorder %v17987_v7, 0.0  ;;  %v12964_v57 = vpop.f32.mrf.mxu1  ;;  %v20640_v19 = vmov 0 }
 0x3a3   : > { %v20629_v43 = vsel %vm18061_vm14, 4294967295, %v20628_v43  ;;  %vm18069_vm2 = vmand %vm17981_vm10, %vm10313_vm8  ;;  %vm10316_vm8 = vcmp.ge.f32.partialorder %v7905_v41, 0.0  ;;  %vm10315_vm0 = vcmp.ge.f32.partialorder %v7899_v30, 0.0  ;;  %v10347_v2 = vadd.f32 %v7899_v30, %v17859_v4 }
 0x3a4   : > { %vm18077_vm3 = vmand %vm18043_vm12, %vm20632_vm1  ;;  %v7917_v31 = vadd.f32 %v12958_v49, %v7755_v62  ;;  %v7749_v25 = vadd.f32 %v7748_v32, %v17913_v36  ;;  %v12935_v36 = vpop.f32.mrf.mxu0  ;;  %v7934_v50 = vpop.f32.mrf.mxu1  ;;  %v20651_v11 = vmov 0  ;;  %v20668_v48 = vmov 0 }
 0x3a5   : > { %v20634_v40 = vsel %vm18077_vm3, 4294967295, %v20633_v40  ;;  %vm18088_vm14 = vmand %vm20637_vm7, %vm20636_vm11  ;;  %vm20644_vm7 = vcmp.le.f32.partialorder %v18016_v5, 1.0  ;;  %vm20645_vm11 = vcmp.ge.f32.partialorder %v18016_v5, 0.0  ;;  %v7767_v49 = vadd.f32 %v12935_v36, %v17918_v16 }
 0x3a6   : > { %vm18094_vm12 = vmand %vm18069_vm2, %vm10361_vm6  ;;  %vm10318_vm3 = vcmp.ge.f32.partialorder %v7917_v31, 0.0  ;;  %v10350_v60 = vadd.f32 %v7917_v31, %v17863_v18  ;;  %v7911_v34 = vadd.f32 %v7910_v55, %v7749_v25  ;;  %v7760_v18 = vpop.f32.mrf.mxu0  ;;  %vm20656_vm6 = vcmp.le.f32.partialorder %v20635_v3, 1.0  ;;  %v12967_v44 = vpop.f32.mrf.mxu1 }
 0x3a7   : > { %v20641_v19 = vsel %vm18094_vm12, 4294967295, %v20640_v19  ;;  %vm18100_vm1 = vmand %vm17994_vm4, %vm10316_vm8  ;;  %vm10289_vm4 = vcmp.le.f32.partialorder %v20648_v47, 1.0  ;;  %vm10364_vm8 = vcmp.le.f32.partialorder %v10348_v14, 1.0  ;;  %vm10363_vm12 = vcmp.le.f32.partialorder %v10347_v2, 1.0 }
 0x3a8   : > { %vm18110_vm2 = vmand %vm20645_vm11, %vm20644_vm7  ;;  %v10349_v52 = vadd.f32 %v7911_v34, %v17966_v20  ;;  %v7761_v33 = vadd.f32 %v7760_v18, %v17921_v12  ;;  %v20660_v16 = vmov 0  ;;  %v7929_v20 = vadd.f32 %v12961_v15, %v7767_v49  ;;  %v12938_v6 = vpop.f32.mrf.mxu0  ;;  %v7946_v42 = vpop.f32.mrf.mxu1 }
 0x3a9   : > { %vm18118_vm10 = vmand %vm18009_vm15, %vm10315_vm0  ;;  %vm10317_vm15 = vcmp.ge.f32.partialorder %v7911_v34, 0.0  ;;  %vm20664_vm11 = vcmp.ge.f32.partialorder %v20648_v47, 0.0  ;;  %v7779_v55 = vadd.f32 %v12938_v6, %v17924_v38  ;;  %v20673_v38 = vmov 0 }
 0x3aa   : > { %vm18125_vm7 = vmand %vm18100_vm1, %vm10364_vm8  ;;  %vm20657_vm1 = vcmp.ge.f32.partialorder %v20635_v3, 0.0  ;;  %v7923_v17 = vadd.f32 %v7922_v10, %v7761_v33  ;;  %v10352_v23 = vadd.f32 %v7929_v20, %v17987_v7  ;;  %v7772_v58 = vpop.f32.mrf.mxu0  ;;  %v12970_v22 = vpop.f32.mrf.mxu1  ;;  %v20675_v37 = vmov 0 }
 0x3ab   : > { %v20652_v11 = vsel %vm18125_vm7, 4294967295, %v20651_v11  ;;  %vm18133_vm0 = vmand %vm18029_vm9, %vm10318_vm3  ;;  %vm20667_vm3 = vcmp.le.f32.partialorder %v10350_v60, 1.0  ;;  %v7941_v26 = vadd.f32 %v12964_v57, %v7779_v55  ;;  %v7773_v15 = vadd.f32 %v7772_v58, %v17927_v51 }
 0x3ac   : > { %vm18142_vm8 = vmand %vm20657_vm1, %vm20656_vm6  ;;  %v10351_v7 = vadd.f32 %v7923_v17, %v18016_v5  ;;  %v12941_v63 = vpop.f32.mrf.mxu0  ;;  %vm20683_vm13 = vcmp.ge.f32.partialorder %v17831_v0, 0.0  ;;  %v7958_v5 = vpop.f32.mrf.mxu1  ;;  %v20686_v27 = vmov 0  ;;  %v20689_v30 = vmov 0 }
 0x3ad   : > { %vm18151_vm9 = vmand %vm18118_vm10, %vm10363_vm12  ;;  %vm10365_vm12 = vcmp.le.f32.partialorder %v10349_v52, 1.0  ;;  %v10354_v46 = vadd.f32 %v7941_v26, %v20635_v3  ;;  %v7935_v41 = vadd.f32 %v7934_v50, %v7773_v15  ;;  %v7791_v61 = vadd.f32 %v12941_v63, %v17930_v1 }
 0x3ae   : > { %v20661_v16 = vsel %vm18151_vm9, 4294967295, %v20660_v16  ;;  %vm18159_vm1 = vmand %vm18054_vm5, %vm10317_vm15  ;;  %vm20672_vm9 = vcmp.ge.f32.partialorder %v20653_v9, 0.0  ;;  %vm10319_vm15 = vcmp.ge.f32.partialorder %v7923_v17, 0.0  ;;  %v7784_v10 = vpop.f32.mrf.mxu0  ;;  %v18237_v32 = vpop.f32.mrf.mxu1  ;;  %v20712_v39 = vmov 0 }
 0x3af   : > { %vm18167_vm10 = vmand %vm20664_vm11, %vm10289_vm4  ;;  %vm10320_vm4 = vcmp.ge.f32.partialorder %v7929_v20, 0.0  ;;  %vm20671_vm11 = vcmp.le.f32.partialorder %v20653_v9, 1.0  ;;  %v7785_v14 = vadd.f32 %v7784_v10, %v17933_v13  ;;  %v10353_v3 = vadd.f32 %v7935_v41, %v20648_v47 }
 0x3b0   : > { %vm18175_vm5 = vmand %vm18133_vm0, %vm20667_vm3  ;;  %v7953_v1 = vadd.f32 %v12967_v44, %v7791_v61  ;;  %v12944_v29 = vpop.f32.mrf.mxu0  ;;  %v18255_v31 = vpop.f32.mrf.mxu1  ;;  %v20698_v47 = vmov 0  ;;  %v20709_v44 = vmov 0  ;;  %v20715_v20 = vmov 0 }
 0x3b1   : > { %v20669_v48 = vsel %vm18175_vm5, 4294967295, %v20668_v48  ;;  %vm18186_vm7 = vmand %vm20672_vm9, %vm20671_vm11  ;;  %vm20678_vm9 = vcmp.le.f32.partialorder %v17824_v56, 1.0  ;;  %vm20679_vm11 = vcmp.ge.f32.partialorder %v17824_v56, 0.0  ;;  %vm20682_vm5 = vcmp.le.f32.partialorder %v17831_v0, 1.0 }
 0x3b2   : > { %20670 = vst [vmem:[#allocation101_spill] sm:$0xff] %v20669_v48  ;;  %v20674_v38 = vsel %vm18186_vm7, 4294967295, %v20673_v38  ;;  %vm18192_vm0 = vmand %vm18159_vm1, %vm10365_vm12  ;;  %vm10368_vm1 = vcmp.le.f32.partialorder %v10352_v23, 1.0  ;;  %v7947_v54 = vadd.f32 %v7946_v42, %v7785_v14  ;;  %v7803_v2 = vadd.f32 %v12944_v29, %v17935_v59  ;;  %v7796_v21 = vpop.f32.mrf.mxu0  ;;  %v18272_v60 = vpop.f32.mrf.mxu1 }
 0x3b3   : > { %v20676_v37 = vsel %vm18192_vm0, 4294967295, %v20675_v37  ;;  %vm10336_vm3 = vmand %vm18088_vm14, %vm10320_vm4  ;;  %vm10277_vm14 = vcmp.ge.f32.partialorder %v17834_v45, 0.0  ;;  %vm10293_vm4 = vcmp.le.f32.partialorder %v17834_v45, 1.0  ;;  %vm10367_vm0 = vcmp.le.f32.partialorder %v10351_v7, 1.0 }
 0x3b4   : > { %20677 = vst [vmem:[#allocation174_spill] sm:$0xff] %v20676_v37  ;;  %vm18204_vm6 = vmand %vm20679_vm11, %vm20678_vm9  ;;  %vm10369_vm11 = vcmp.le.f32.partialorder %v10353_v3, 1.0  ;;  %v10356_v25 = vadd.f32 %v7953_v1, %v20653_v9  ;;  %v10355_v59 = vadd.f32 %v7947_v54, %v17824_v56  ;;  %v7965_v36 = vadd.f32 %v12970_v22, %v7803_v2  ;;  %v18280_v9 = vpop.f32.mrf.mxu0  ;;  %v18283_v18 = vpop.f32.mrf.mxu1 }
 0x3b5   : > { %vm10335_vm12 = vmand %vm18110_vm2, %vm10319_vm15  ;;  %vm10322_vm2 = vcmp.ge.f32.partialorder %v7941_v26, 0.0  ;;  %v7797_v50 = vadd.f32 %v7796_v21, %v17940_v28  ;;  %v20706_v56 = vmov 0  ;;  %v20718_v12 = vmov 0 }
 0x3b6   : > { %vm18216_vm7 = vmand %vm20683_vm13, %vm20682_vm5  ;;  %vm10370_vm5 = vcmp.le.f32.partialorder %v10354_v46, 1.0  ;;  %v10358_v35 = vadd.f32 %v7965_v36, %v17831_v0  ;;  %v18294_v28 = vpop.f32.mrf.mxu0  ;;  %v13007_v53 = vpop.f32.mrf.mxu1 }
 0x3b7   : > { %vm18220_vm9 = vmand %vm10336_vm3, %vm10368_vm1  ;;  %vm10321_vm3 = vcmp.ge.f32.partialorder %v7935_v41, 0.0  ;;  %vm10324_vm1 = vcmp.ge.f32.partialorder %v7953_v1, 0.0  ;;  %v7959_v49 = vadd.f32 %v7958_v5, %v7797_v50 }
 0x3b8   : > { %v20687_v27 = vsel %vm18220_vm9, 4294967295, %v20686_v27  ;;  %vm18226_vm15 = vmand %vm10335_vm12, %vm10367_vm0  ;;  %v18306_v52 = vpop.f32.mrf.mxu0  ;;  %v8290_v33 = vpop.f32.mrf.mxu1 }
 0x3b9   : > { %20688 = vst [vmem:[#allocation123_spill] sm:$0xff] %v20687_v27  ;;  %v20690_v30 = vsel %vm18226_vm15, 4294967295, %v20689_v30  ;;  %vm18232_vm13 = vmand %vm18142_vm8, %vm10322_vm2  ;;  %vm10372_vm2 = vcmp.le.f32.partialorder %v10356_v25, 1.0  ;;  %v10357_v0 = vadd.f32 %v7959_v49, %v17834_v45 }
 0x3ba   : > { %20691 = vst [vmem:[#allocation61_spill] sm:$0xff] %v20690_v30  ;;  %vm18244_vm0 = vmand %vm10277_vm14, %vm10293_vm4  ;;  %vm10323_vm4 = vcmp.ge.f32.partialorder %v7947_v54, 0.0  ;;  %v18314_v45 = vpop.f32.mrf.mxu0  ;;  %v13010_v6 = vpop.f32.mrf.mxu1 }
 0x3bb   : > { %vm18250_vm8 = vmand %vm18167_vm10, %vm10321_vm3  ;;  %vm20701_vm10 = vnez %v20674_v38 }
 0x3bc   : > { %vm18260_vm12 = vmand %vm18232_vm13, %vm10370_vm5  ;;  %vm10326_vm5 = vcmp.ge.f32.partialorder %v7965_v36, 0.0  ;;  %v12981_v42 = vpop.f32.mrf.mxu0  ;;  %v8302_v55 = vpop.f32.mrf.mxu1 }
 0x3bd   : > { %v20699_v47 = vsel %vm18260_vm12, 4294967295, %v20698_v47  ;;  %vm18266_vm14 = vmand %vm20701_vm10, %vm10324_vm1  ;;  %vm10371_vm1 = vcmp.le.f32.partialorder %v10355_v59, 1.0  ;;  %vm10374_vm10 = vcmp.le.f32.partialorder %v10358_v35, 1.0  ;;  %v18324_v17 = vadd.f32 %v13007_v53, %v12981_v42 }
 0x3be   : > { %20700 = vst [vmem:[#allocation43_spill] sm:$0xff] %v20699_v47  ;;  %vm18276_vm13 = vmand %vm18204_vm6, %vm10323_vm4  ;;  %vm10325_vm4 = vcmp.ge.f32.partialorder %v7959_v49, 0.0  ;;  %v8080_v23 = vpop.f32.mrf.mxu0  ;;  %v13013_v38 = vpop.f32.mrf.mxu1  ;;  %v8267_v47 = vadd.f32 %v18255_v31, %v18294_v28 }
 0x3bf   : > { %vm18288_vm3 = vmand %vm18250_vm8, %vm10369_vm11  ;;  %v18326_v58 = vadd.f32 %v8290_v33, %v8080_v23 }
 0x3c0   : > { %v20707_v56 = vsel %vm18288_vm3, 4294967295, %v20706_v56  ;;  %vm10342_vm6 = vmand %vm18216_vm7, %vm10326_vm5  ;;  %vm10373_vm7 = vcmp.le.f32.partialorder %v10357_v0, 1.0  ;;  %v12984_v22 = vpop.f32.mrf.mxu0  ;;  %v8314_v26 = vpop.f32.mrf.mxu1 }
 0x3c1   : > { %20708 = vst [vmem:[#allocation48_spill] sm:$0xff] %v20707_v56  ;;  %vm18300_vm12 = vmand %vm18266_vm14, %vm10372_vm2  ;;  %v18328_v7 = vadd.f32 %v13010_v6, %v12984_v22  ;;  %vm20730_vm2 = vnez %v20621_v8 }
 0x3c2   : > { %v20710_v44 = vsel %vm18300_vm12, 4294967295, %v20709_v44  ;;  %vm10341_vm8 = vmand %vm18244_vm0, %vm10325_vm4  ;;  %v8100_v15 = vpop.f32.mrf.mxu0  ;;  %v13016_v63 = vpop.f32.mrf.mxu1 }
 0x3c3   : > { %20711 = vst [vmem:[#allocation175_spill] sm:$0xff] %v20710_v44  ;;  %vm18310_vm11 = vmand %vm18276_vm13, %vm10371_vm1  ;;  %v18330_v24 = vadd.f32 %v8302_v55, %v8100_v15 }
 0x3c4   : > { %v20713_v39 = vsel %vm18310_vm11, 4294967295, %v20712_v39  ;;  %vm18316_vm5 = vmand %vm10342_vm6, %vm10374_vm10  ;;  %v12987_v51 = vpop.f32.mrf.mxu0  ;;  %v8326_v46 = vpop.f32.mrf.mxu1  ;;  %vm20732_vm6 = vnez %v20629_v43 }
 0x3c5   : > { %20714 = vst [vmem:[#allocation144_spill] sm:$0xff] %v20713_v39  ;;  %v20716_v20 = vsel %vm18316_vm5, 4294967295, %v20715_v20  ;;  %vm18320_vm14 = vmand %vm10341_vm8, %vm10373_vm7  ;;  %v18332_v5 = vadd.f32 %v13013_v38, %v12987_v51  ;;  %vm20735_vm8 = vnez %v20634_v40 }
 0x3c6   : > { %20717 = vst [vmem:[#allocation75_spill] sm:$0xff] %v20716_v20  ;;  %v20719_v12 = vsel %vm18320_vm14, 4294967295, %v20718_v12  ;;  %v8120_v41 = vpop.f32.mrf.mxu0  ;;  %v13019_v10 = vpop.f32.mrf.mxu1 }
 0x3c7   : > { %20720 = vst [vmem:[#allocation89_spill] sm:$0xff] %v20719_v12  ;;  %v18334_v61 = vadd.f32 %v8314_v26, %v8120_v41  ;;  %v8273_v12 = vadd.f32 %v18237_v32, %v18280_v9  ;;  %v8279_v32 = vadd.f32 %v18283_v18, %v18314_v45 }
 0x3c8   : > { %v12990_v62 = vpop.f32.mrf.mxu0  ;;  %v8338_v3 = vpop.f32.mrf.mxu1 }
 0x3c9   : > { %v18336_v14 = vadd.f32 %v13016_v63, %v12990_v62 }
 0x3ca   : > { %v8140_v1 = vpop.f32.mrf.mxu0  ;;  %v13022_v29 = vpop.f32.mrf.mxu1 }
 0x3cb   : > { %v18338_v57 = vadd.f32 %v8326_v46, %v8140_v1 }
 0x3cc   : > { %v12993_v13 = vpop.f32.mrf.mxu0  ;;  %v8350_v54 = vpop.f32.mrf.mxu1 }
 0x3cd   : > { %v18340_v2 = vadd.f32 %v13019_v10, %v12993_v13 }
 0x3ce   : > { %v8160_v25 = vpop.f32.mrf.mxu0  ;;  %v13053_v21 = vpop.f32.mrf.mxu1 }
 0x3cf   : > { %v18342_v4 = vadd.f32 %v8338_v3, %v8160_v25 }
 0x3d0   : > { %v12996_v59 = vpop.f32.mrf.mxu0  ;;  %v8609_v36 = vpop.f32.mrf.mxu1 }
 0x3d1   : > { %v18344_v50 = vadd.f32 %v13022_v29, %v12996_v59 }
 0x3d2   : > { %v8180_v34 = vpop.f32.mrf.mxu0  ;;  %v13056_v35 = vpop.f32.mrf.mxu1 }
 0x3d3   : > { %20721 = vst [vmem:[#allocation88_spill] sm:$0xff] %v18344_v50  ;;  %v18346_v49 = vadd.f32 %v8350_v54, %v8180_v34 }
 0x3d4   : > { %v13027_v0 = vpop.f32.mrf.mxu0  ;;  %v8625_v53 = vpop.f32.mrf.mxu1 }
 0x3d5   : > { %20722 = vst [vmem:[#allocation169_spill] sm:$0xff] %v18346_v49  ;;  %v8438_v44 = vadd.f32 %v13027_v0, %v8273_v12 }
 0x3d6   : > { %v8430_v33 = vpop.f32.mrf.mxu0  ;;  %v13059_v6 = vpop.f32.mrf.mxu1 }
 0x3d7   : > { %v8431_v27 = vadd.f32 %v8430_v33, %v8267_v47  ;;  %v8618_v9 = vadd.f32 %v13053_v21, %v8438_v44 }
 0x3d8   : > { %v13030_v42 = vpop.f32.mrf.mxu0  ;;  %v18348_v55 = vpop.f32.mrf.mxu1 }
 0x3d9   : > { %v8610_v31 = vadd.f32 %v8609_v36, %v8431_v27 }
 0x3da   : > { %v8444_v23 = vpop.f32.mrf.mxu0  ;;  %v18350_v38 = vpop.f32.mrf.mxu1 }
 0x3db   : > { %v8445_v0 = vadd.f32 %v8444_v23, %v8279_v32 }
 0x3dc   : > { %v13033_v22 = vpop.f32.mrf.mxu0  ;;  %v18352_v26 = vpop.f32.mrf.mxu1 }
 0x3dd   : > { %v8626_v33 = vadd.f32 %v8625_v53, %v8445_v0 }
 0x3de   : > { %v8458_v15 = vpop.f32.mrf.mxu0  ;;  %v18354_v63 = vpop.f32.mrf.mxu1 }
 0x3e0   : > { %v13036_v51 = vpop.f32.mrf.mxu0  ;;  %v18356_v46 = vpop.f32.mrf.mxu1 }
 0x3e1   : > { %v8480_v36 = vadd.f32 %v13036_v51, %v18328_v7 }
 0x3e2   : > { %v8472_v41 = vpop.f32.mrf.mxu0  ;;  %v18358_v10 = vpop.f32.mrf.mxu1 }
 0x3e3   : > { %v8473_v23 = vadd.f32 %v8472_v41, %v18330_v24 }
 0x3e4   : > { %v13039_v62 = vpop.f32.mrf.mxu0  ;;  %v18360_v3 = vpop.f32.mrf.mxu1 }
 0x3e5   : > { %20723 = vst [vmem:[#allocation63_spill] sm:$0xff] %v18360_v3 }
 0x3e6   : > { %v8486_v1 = vpop.f32.mrf.mxu0  ;;  %v18362_v29 = vpop.f32.mrf.mxu1 }
 0x3e7   : > { %20724 = vst [vmem:[#allocation196_spill] sm:$0xff] %v18362_v29  ;;  %v8487_v51 = vadd.f32 %v8486_v1, %v18334_v61 }
 0x3e8   : > { %v18364_v13 = vpop.f32.mrf.mxu0  ;;  %v18366_v54 = vpop.f32.mrf.mxu1 }
 0x3e9   : > { %20725 = vst [vmem:[#allocation145_spill] sm:$0xff] %v18366_v54 }
 0x3ea   : > { %v18368_v25 = vpop.f32.mrf.mxu0  ;;  %v18370_v59 = vpop.f32.mrf.mxu1 }
 0x3eb   : > { %20726 = vst [vmem:[#allocation52_spill] sm:$0xff] %v18370_v59  ;;  %v8285_v59 = vadd.f32 %v18272_v60, %v18306_v52 }
 0x3ec   : > { %v18372_v34 = vpop.f32.mrf.mxu0  ;;  %v18376_v20 = vpop.f32.mrf.mxu1 }
 0x3ed   : > { %20727 = vst [vmem:[#allocation4_spill] sm:$0xff] %v18376_v20  ;;  %v8452_v54 = vadd.f32 %v13030_v42, %v8285_v59 }
 0x3ee   : > { %v18378_v39 = vpop.f32.mrf.mxu0  ;;  %v13105_v56 = vpop.f32.mrf.mxu1  ;;  %v20756_v8 = vld [vmem:[#allocation196_spill] sm:$0xff] }
 0x3ef   : > { %v8634_v60 = vadd.f32 %v13056_v35, %v8452_v54  ;;  %v8508_v54 = vadd.f32 %v18364_v13, %v18336_v14 }
 0x3f0   : > { %v18382_v30 = vpop.f32.mrf.mxu0  ;;  %v8965_v49 = vpop.f32.mrf.mxu1 }
 0x3f1   : > { %20728 = vst [vmem:[#allocation103_spill] sm:$0xff] %v18382_v30  ;;  %v8466_v30 = vadd.f32 %v13033_v22, %v18324_v17 }
 0x3f2   : > { %v18386_v50 = vpop.f32.mrf.mxu0  ;;  %v13108_v20 = vpop.f32.mrf.mxu1 }
 0x3f3   : > { %20729 = vst [vmem:[#allocation28_spill] sm:$0xff] %v18386_v50  ;;  %v8459_v50 = vadd.f32 %v8458_v15, %v18326_v58  ;;  %v8650_v27 = vadd.f32 %v13059_v6, %v8466_v30  ;;  %v8494_v6 = vadd.f32 %v13039_v62, %v18332_v5 }
 0x3f4   : > { %v13079_v12 = vpop.f32.mrf.mxu0  ;;  %v8977_v37 = vpop.f32.mrf.mxu1 }
 0x3f5   : > { %v8810_v29 = vadd.f32 %v13079_v12, %v8618_v9  ;;  %v8642_v15 = vadd.f32 %v18348_v55, %v8459_v50 }
 0x3f6   : > { %v8803_v28 = vpop.f32.mrf.mxu0  ;;  %v13111_v48 = vpop.f32.mrf.mxu1 }
 0x3f7   : > { %v8972_v3 = vadd.f32 %v13105_v56, %v8810_v29  ;;  %v8804_v47 = vadd.f32 %v8803_v28, %v8610_v31  ;;  %v20731_v56 = vmov 0  }
 0x3f8   : > { %v13082_v52 = vpop.f32.mrf.mxu0  ;;  %v8989_v18 = vpop.f32.mrf.mxu1 }
 0x3f9   : > { %vm10392_vm0 = vcmp.gt.f32.partialorder %v8972_v3, 0.0  ;;  %v8966_v44 = vadd.f32 %v8965_v49, %v8804_v47  ;;  %v8822_v45 = vadd.f32 %v13082_v52, %v8634_v60 }
 0x3fa   : > { %vm10408_vm13 = vmand %vm20730_vm2, %vm10392_vm0  ;;  %v8815_v21 = vpop.f32.mrf.mxu0  ;;  %v13114_v35 = vpop.f32.mrf.mxu1  ;;  %vm20738_vm2 = vnez %v20641_v19  ;;  %v8674_v19 = vadd.f32 %v18356_v46, %v8487_v51  ;;  %v20759_v51 = vld [vmem:[#allocation103_spill] sm:$0xff] }
 0x3fb   : > { %v8816_v17 = vadd.f32 %v8815_v21, %v8626_v33  ;;  %v10440_v42 = vsel %vm10408_vm13, 1, %v20731_v56  ;;  %vm10391_vm1 = vcmp.gt.f32.partialorder %v8966_v44, 0.0  ;;  %v8984_v53 = vadd.f32 %v13108_v20, %v8822_v45  ;;  %v20747_v44 = vld [vmem:[#allocation101_spill] sm:$0xff] }
 0x3fc   : > { %v13085_v58 = vpop.f32.mrf.mxu0  ;;  %v10679_v22 = vshrl.u32 %v10440_v42, 16  ;;  %vm18400_vm10 = vmand %vm20732_vm6, %vm10391_vm1  ;;  %v9001_v49 = vpop.f32.mrf.mxu1  ;;  %v8666_v20 = vadd.f32 %v18350_v38, %v8480_v36  ;;  %v10678_v62 = vand.u32 65535, %v10440_v42  ;;  %vm20741_vm6 = vnez %v20652_v11 }
 0x3fd   : > { %v8834_v30 = vadd.f32 %v13085_v58, %v8650_v27  ;;  %v8978_v7 = vadd.f32 %v8977_v37, %v8816_v17  ;;  %vm10394_vm4 = vcmp.gt.f32.partialorder %v8984_v53, 0.0  ;;  %v8658_v37 = vadd.f32 %v18352_v26, %v8473_v23  ;;  %v20751_v27 = vld [vmem:[#allocation63_spill] sm:$0xff] }
 0x3fe   : > { %v8827_v24 = vpop.f32.mrf.mxu0  ;;  %vm18409_vm7 = vmand %vm20735_vm8, %vm10394_vm4  ;;  %v13117_v41 = vpop.f32.mrf.mxu1  ;;  %v10681_v38 = vcvt.s32.f32 %v10679_v22  ;;  %v10439_v40 = vsel %vm18400_vm10, 1, %v20731_v56  ;;  %v8682_v26 = vadd.f32 %v18354_v63, %v8494_v6  ;;  %v8501_v63 = vadd.f32 %v18368_v25, %v18338_v57  ;;  %v20758_v6 = vld [vmem:[#allocation88_spill] sm:$0xff] }
 0x3ff   : > { %vm10393_vm0 = vcmp.gt.f32.partialorder %v8978_v7, 0.0  ;;  %v8828_v43 = vadd.f32 %v8827_v24, %v8642_v15  ;;  %v8996_v55 = vadd.f32 %v13111_v48, %v8834_v30  ;;  %v10667_v48 = vshrl.u32 %v10439_v40, 16  ;;  %v20757_v7 = vld [vmem:[#allocation145_spill] sm:$0xff] }
 0x400   : > { %vm18416_vm13 = vmand %vm20738_vm2, %vm10393_vm0  ;;  %v13088_v61 = vpop.f32.mrf.mxu0  ;;  %v9013_v29 = vpop.f32.mrf.mxu1  ;;  %10684 = vadd.xlane.f32.xlu0 %v10681_v38  ;;  %v10442_v9 = vsel %vm18409_vm7, 1, %v20731_v56  ;;  %vm20744_vm8 = vnez %v20661_v16  ;;  %v10680_v31 = vcvt.s32.f32 %v10678_v62  ;;  %v10666_v28 = vand.u32 65535, %v10439_v40 }
 0x401   : > { %vm10396_vm1 = vcmp.gt.f32.partialorder %v8996_v55, 0.0  ;;  %v8846_v3 = vadd.f32 %v13088_v61, %v8666_v20  ;;  %v8990_v1 = vadd.f32 %v8989_v18, %v8828_v43  ;;  %v10669_v14 = vcvt.s32.f32 %v10667_v48 }
 0x402   : > { %vm18429_vm4 = vmand %vm20741_vm6, %vm10396_vm1  ;;  %v8839_v32 = vpop.f32.mrf.mxu0  ;;  %v13120_v0 = vpop.f32.mrf.mxu1  ;;  %v10703_v60 = vshrl.u32 %v10442_v9, 16  ;;  %v10441_v57 = vsel %vm18416_vm13, 1, %v20731_v56  ;;  %v8698_v33 = vadd.f32 %v18358_v10, %v8508_v54  ;;  %v8522_v16 = vadd.f32 %v18372_v34, %v18340_v2 }
 0x403   : > { %vm10395_vm10 = vcmp.gt.f32.partialorder %v8990_v1, 0.0  ;;  %v8840_v46 = vadd.f32 %v8839_v32, %v8658_v37  ;;  %v9008_v12 = vadd.f32 %v13114_v35, %v8846_v3  ;;  %v8515_v18 = vadd.f32 %v18378_v39, %v18342_v4  ;;  %10672 = vadd.xlane.f32.xlu1 %v10669_v14  ;;  %v20752_v35 = vld [vmem:[#allocation174_spill] sm:$0xff]  ;;  %v20764_v37 = vld [vmem:[#allocation28_spill] sm:$0xff] }
 0x404   : > { %vm18440_vm0 = vmand %vm20744_vm8, %vm10395_vm10  ;;  %v13091_v13 = vpop.f32.mrf.mxu0  ;;  %v9025_v25 = vpop.f32.mrf.mxu1  ;;  %vm20748_vm7 = vnez %v20747_v44  ;;  %10682 = vadd.xlane.f32.xlu0 %v10680_v31  ;;  %v8690_v36 = vadd.f32 %v20751_v27, %v8501_v63  ;;  %vm20753_vm6 = vnez %v20752_v35  ;;  %v10668_v39 = vcvt.s32.f32 %v10666_v28  ;;  %v20768_v32 = vld [vmem:[#allocation52_spill] sm:$0xff]  ;;  %v20769_v63 = vld [vmem:[#allocation43_spill] sm:$0xff] }
 0x405   : > { %vm10398_vm2 = vcmp.gt.f32.partialorder %v9008_v12, 0.0  ;;  %v8858_v47 = vadd.f32 %v13091_v13, %v8682_v26  ;;  %v9002_v52 = vadd.f32 %v9001_v49, %v8840_v46  ;;  %v10705_v34 = vcvt.s32.f32 %v10703_v60  ;;  %v20773_v14 = vld [vmem:[#allocation4_spill] sm:$0xff] }
 0x406   : > { %vm18454_vm1 = vmand %vm20748_vm7, %vm10398_vm2  ;;  %v8851_v21 = vpop.f32.mrf.mxu0  ;;  %v13123_v42 = vpop.f32.mrf.mxu1  ;;  %v10691_v23 = vshrl.u32 %v10441_v57, 16  ;;  %v10702_v53 = vand.u32 65535, %v10442_v9  ;;  %v10444_v15 = vsel %vm18429_vm4, 1, %v20731_v56  ;;  %v8714_v30 = vadd.f32 %v20756_v8, %v8522_v16 }
 0x407   : > { %vm10397_vm13 = vcmp.gt.f32.partialorder %v9002_v52, 0.0  ;;  %v8852_v17 = vadd.f32 %v8851_v21, %v8674_v19  ;;  %v9020_v10 = vadd.f32 %v13117_v41, %v8858_v47  ;;  %v8706_v49 = vadd.f32 %v20757_v7, %v8515_v18  ;;  %10670 = vadd.xlane.f32.xlu1 %v10668_v39  ;;  %v20763_v41 = vld [vmem:[#allocation169_spill] sm:$0xff] }
 0x408   : > { %vm18461_vm10 = vmand %vm20753_vm6, %vm10397_vm13  ;;  %v13094_v4 = vpop.f32.mrf.mxu0  ;;  %v8536_v24 = vadd.f32 %v20759_v51, %v20758_v6  ;;  %10708 = vadd.xlane.f32.xlu0 %v10705_v34  ;;  %v9037_v55 = vpop.f32.mrf.mxu1  ;;  %v8529_v5 = vadd.f32 %v20764_v37, %v20763_v41  ;;  %v10693_v3 = vcvt.s32.f32 %v10691_v23  ;;  %v10704_v48 = vcvt.s32.f32 %v10702_v53 }
 0x409   : > { %vm10400_vm8 = vcmp.gt.f32.partialorder %v9020_v10, 0.0  ;;  %v8870_v58 = vadd.f32 %v13094_v4, %v8698_v33  ;;  %v9014_v22 = vadd.f32 %v9013_v29, %v8852_v17  ;;  %v10690_v29 = vand.u32 65535, %v10441_v57 }
 0x40a   : > { %vm18474_vm2 = vmand %vm18220_vm9, %vm10400_vm8  ;;  %v8863_v43 = vpop.f32.mrf.mxu0  ;;  %v10727_v26 = vshrl.u32 %v10444_v15, 16  ;;  %v10443_v59 = vsel %vm18440_vm0, 1, %v20731_v56  ;;  %v8730_v9 = vadd.f32 %v20768_v32, %v8536_v24  ;;  %vm20770_vm13 = vnez %v20769_v63 }
 0x40b   : > { %vm10399_vm4 = vcmp.gt.f32.partialorder %v9014_v22, 0.0  ;;  %v8864_v61 = vadd.f32 %v8863_v43, %v8690_v36  ;;  %v9032_v38 = vadd.f32 %v13120_v0, %v8870_v58  ;;  %10696 = vadd.xlane.f32.xlu1 %v10693_v3  ;;  %v13126_v0 = vpop.f32.mrf.mxu1  ;;  %v8722_v13 = vadd.f32 %v20773_v14, %v8529_v5 }
 0x40c   : > { %vm18482_vm7 = vmand %vm18226_vm15, %vm10399_vm4  ;;  %v13097_v1 = vpop.f32.mrf.mxu0  ;;  %10706 = vadd.xlane.f32.xlu0 %v10704_v48  ;;  %v10692_v47 = vcvt.s32.f32 %v10690_v29  ;;  %v10729_v57 = vcvt.s32.f32 %v10727_v26  ;;  %v10726_v33 = vand.u32 65535, %v10444_v15  ;;  %v10446_v44 = vsel %vm18454_vm1, 1, %v20731_v56 }
 0x40d   : > { %vm10402_vm9 = vcmp.gt.f32.partialorder %v9032_v38, 0.0  ;;  %v8882_v19 = vadd.f32 %v13097_v1, %v8714_v30  ;;  %v9026_v54 = vadd.f32 %v9025_v25, %v8864_v61  ;;  %v10715_v25 = vshrl.u32 %v10443_v59, 16  ;;  %v9049_v17 = vpop.f32.mrf.mxu1 }
 0x40e   : > { %vm18492_vm15 = vmand %vm20770_vm13, %vm10402_vm9  ;;  %v8875_v12 = vpop.f32.mrf.mxu0  ;;  %v10728_v4 = vcvt.s32.f32 %v10726_v33  ;;  %v10714_v34 = vand.u32 65535, %v10443_v59  ;;  %v10751_v23 = vshrl.u32 %v10446_v44, 16  ;;  %v10445_v58 = vsel %vm18461_vm10, 1, %v20731_v56 }
 0x40f   : > { %vm10401_vm6 = vcmp.gt.f32.partialorder %v9026_v54, 0.0  ;;  %v8876_v31 = vadd.f32 %v8875_v12, %v8706_v49  ;;  %v9044_v28 = vadd.f32 %v13123_v42, %v8882_v19  ;;  %10694 = vadd.xlane.f32.xlu1 %v10692_v47  ;;  %v10717_v45 = vcvt.s32.f32 %v10715_v25 }
 0x410   : > { %vm18499_vm0 = vmand %vm18288_vm3, %vm10401_vm6  ;;  %v13100_v52 = vpop.f32.mrf.mxu0  ;;  %10732 = vadd.xlane.f32.xlu0 %v10729_v57  ;;  %v10716_v7 = vcvt.s32.f32 %v10714_v34  ;;  %v10753_v49 = vcvt.s32.f32 %v10751_v23  ;;  %v10739_v6 = vshrl.u32 %v10445_v58, 16  ;;  %v10750_v2 = vand.u32 65535, %v10446_v44 }
 0x411   : > { %vm10404_vm8 = vcmp.gt.f32.partialorder %v9044_v28, 0.0  ;;  %v8894_v16 = vadd.f32 %v13100_v52, %v8730_v9  ;;  %v9038_v18 = vadd.f32 %v9037_v55, %v8876_v31  ;;  %v10448_v51 = vsel %vm18474_vm2, 1, %v20731_v56 }
 0x412   : > { %vm18508_vm4 = vmand %vm18300_vm12, %vm10404_vm8  ;;  %v8887_v36 = vpop.f32.mrf.mxu0  ;;  %v10741_v24 = vcvt.s32.f32 %v10739_v6  ;;  %v10752_v20 = vcvt.s32.f32 %v10750_v2  ;;  %v10738_v43 = vand.u32 65535, %v10445_v58  ;;  %v10775_v55 = vshrl.u32 %v10448_v51, 16 }
 0x413   : > { %vm10403_vm3 = vcmp.gt.f32.partialorder %v9038_v18, 0.0  ;;  %v8888_v10 = vadd.f32 %v8887_v36, %v8722_v13  ;;  %v9056_v42 = vadd.f32 %v13126_v0, %v8894_v16  ;;  %10720 = vadd.xlane.f32.xlu1 %v10717_v45  ;;  %v10447_v41 = vsel %vm18482_vm7, 1, %v20731_v56 }
 0x414   : > { %vm18514_vm9 = vmand %vm18310_vm11, %vm10403_vm3  ;;  %10730 = vadd.xlane.f32.xlu0 %v10728_v4  ;;  %v10740_v37 = vcvt.s32.f32 %v10738_v43  ;;  %v10777_v5 = vcvt.s32.f32 %v10775_v55  ;;  %v10763_v61 = vshrl.u32 %v10447_v41, 16  ;;  %v10774_v38 = vand.u32 65535, %v10448_v51 }
 0x415   : > { %vm10406_vm12 = vcmp.gt.f32.partialorder %v9056_v42, 0.0  ;;  %v9050_v53 = vadd.f32 %v9049_v17, %v8888_v10  ;;  %v10450_v50 = vsel %vm18492_vm15, 1, %v20731_v56  ;;  %v10762_v1 = vand.u32 65535, %v10447_v41  ;;  %v18557_v17 = vpop.xlane.xlu0 %10506  ;;  %v10509_v42 = vpop.xlane.xlu1 %10508 }
 0x416   : > { %vm18523_vm1 = vmand %vm18316_vm5, %vm10406_vm12  ;;  %v10765_v40 = vcvt.s32.f32 %v10763_v61  ;;  %v10776_v3 = vcvt.s32.f32 %v10774_v38  ;;  %v10799_v48 = vshrl.u32 %v10450_v50, 16  ;;  %v10449_v62 = vsel %vm18499_vm0, 1, %v20731_v56 }
 0x417   : > { %vm10405_vm11 = vcmp.gt.f32.partialorder %v9050_v53, 0.0  ;;  %10718 = vadd.xlane.f32.xlu1 %v10716_v7  ;;  %v10764_v29 = vcvt.s32.f32 %v10762_v1  ;;  %v10787_v19 = vshrl.u32 %v10449_v62, 16  ;;  %v10798_v54 = vand.u32 65535, %v10450_v50 }
 0x418   : > { %vm18529_vm13 = vmand %vm18320_vm14, %vm10405_vm11  ;;  %10756 = vadd.xlane.f32.xlu0 %v10753_v49  ;;  %v10801_v26 = vcvt.s32.f32 %v10799_v48  ;;  %v10452_v59 = vsel %vm18508_vm4, 1, %v20731_v56  ;;  %v10786_v63 = vand.u32 65535, %v10449_v62  ;;  %v10451_v12 = vsel %vm18514_vm9, 1, %v20731_v56 }
 0x419   : > { %v10789_v32 = vcvt.s32.f32 %v10787_v19  ;;  %v10800_v9 = vcvt.s32.f32 %v10798_v54  ;;  %v10823_v46 = vshrl.u32 %v10452_v59, 16  ;;  %v10811_v13 = vshrl.u32 %v10451_v12, 16  ;;  %v18559_v10 = vpop.xlane.xlu0 %10512  ;;  %v18565_v39 = vpop.xlane.xlu1 %10514 }
 0x41a   : > { %v10788_v0 = vcvt.s32.f32 %v10786_v63  ;;  %v10822_v31 = vand.u32 65535, %v10452_v59  ;;  %v10454_v28 = vsel %vm18523_vm1, 1, %v20731_v56  ;;  %v10810_v47 = vand.u32 65535, %v10451_v12 }
 0x41b   : > { %10744 = vadd.xlane.f32.xlu1 %v10741_v24  ;;  %v10825_v14 = vcvt.s32.f32 %v10823_v46  ;;  %v10813_v60 = vcvt.s32.f32 %v10811_v13  ;;  %v10847_v52 = vshrl.u32 %v10454_v28, 16  ;;  %v10453_v57 = vsel %vm18529_vm13, 1, %v20731_v56 }
 0x41c   : > { %10754 = vadd.xlane.f32.xlu0 %v10752_v20  ;;  %v10824_v11 = vcvt.s32.f32 %v10822_v31  ;;  %v10812_v25 = vcvt.s32.f32 %v10810_v47  ;;  %v10835_v16 = vshrl.u32 %v10453_v57, 16  ;;  %v10846_v18 = vand.u32 65535, %v10454_v28 }
 0x41d   : > { %v10849_v33 = vcvt.s32.f32 %v10847_v52  ;;  %v10834_v27 = vand.u32 65535, %v10453_v57  ;;  %v18561_v56 = vpop.xlane.xlu0 %10510  ;;  %v18569_v4 = vpop.xlane.xlu1 %10518  ;;  %13160 = vrsqrt.f32 %v10509_v42  ;;  %vm10547_vm5 = vcmp.eq.f32.partialorder %v10509_v42, inf }
 0x41e   : > { %v10837_v44 = vcvt.s32.f32 %v10835_v16  ;;  %v10848_v21 = vcvt.s32.f32 %v10846_v18  ;;  %13162 = vrsqrt.f32 %v18557_v17  ;;  %vm10549_vm14 = vcmp.eq.f32.partialorder %v10509_v42, 0.0 }
 0x41f   : > { %10742 = vadd.xlane.f32.xlu1 %v10740_v37  ;;  %v10836_v36 = vcvt.s32.f32 %v10834_v27  ;;  %13164 = vrsqrt.f32 %v18559_v10  ;;  %vm10540_vm10 = vcmp.eq.f32.partialorder %v18557_v17, inf  ;;  %vm10938_vm2 = vcmask 7168  }
 0x420   : > { %10780 = vadd.xlane.f32.xlu0 %v10777_v5  ;;  %13166 = vrsqrt.f32 %v18561_v56  ;;  %vm10561_vm7 = vcmp.eq.f32.partialorder %v18559_v10, inf  ;;  %vm10542_vm15 = vcmp.eq.f32.partialorder %v18557_v17, 0.0  ;;  %vm10554_vm6 = vcmp.eq.f32.partialorder %v18561_v56, inf }
 0x421   : > { %v18563_v35 = vpop.xlane.xlu0 %10516  ;;  %v18573_v23 = vpop.xlane.xlu1 %10522  ;;  %vm10563_vm0 = vcmp.eq.f32.partialorder %v18559_v10, 0.0  ;;  %vm10556_vm8 = vcmp.eq.f32.partialorder %v18561_v56, 0.0  ;;  %vm10568_vm3 = vcmp.eq.f32.partialorder %v18565_v39, inf  ;;  %vm10570_vm12 = vcmp.eq.f32.partialorder %v18565_v39, 0.0 }
 0x422   : > { %13168 = vrsqrt.f32 %v18563_v35  ;;  %vm10575_vm4 = vcmp.eq.f32.partialorder %v18563_v35, inf  ;;  %vm10577_vm9 = vcmp.eq.f32.partialorder %v18563_v35, 0.0  ;;  %vm10582_vm11 = vcmp.eq.f32.partialorder %v18569_v4, inf }
 0x423   : > { %10768 = vadd.xlane.f32.xlu1 %v10765_v40  ;;  %13170 = vrsqrt.f32 %v18565_v39 }
 0x424   : > { %10778 = vadd.xlane.f32.xlu0 %v10776_v3 }
 0x425   : > { %v18567_v45 = vpop.xlane.xlu0 %10520  ;;  %v18577_v58 = vpop.xlane.xlu1 %10526 }
 0x426   : > { %13172 = vrsqrt.f32 %v18567_v45  ;;  %vm10589_vm1 = vcmp.eq.f32.partialorder %v18567_v45, inf  ;;  %vm10591_vm13 = vcmp.eq.f32.partialorder %v18567_v45, 0.0 }
 0x427   : > { %10766 = vadd.xlane.f32.xlu1 %v10764_v29  ;;  %13174 = vrsqrt.f32 %v18569_v4 }
 0x428   : > { %10804 = vadd.xlane.f32.xlu0 %v10801_v26  ;;  %v10550_v26 = vand.u32 2147483648, %v10509_v42 }
 0x429   : > { %v18571_v34 = vpop.xlane.xlu0 %10524  ;;  %v18581_v15 = vpop.xlane.xlu1 %10530 }
 0x42a   : > { %v13161_v6 = vpop.eup %13160  ;;  %13176 = vrsqrt.f32 %v18571_v34 }
 0x42b   : > { %10792 = vadd.xlane.f32.xlu1 %v10789_v32  ;;  %v10546_v55 = vmul.f32 %v13161_v6, %v10509_v42  ;;  %v13163_v37 = vpop.eup %13162  ;;  %13178 = vrsqrt.f32 %v18573_v23 }
 0x42c   : > { %10802 = vadd.xlane.f32.xlu0 %v10800_v9  ;;  %v10539_v48 = vmul.f32 %v13163_v37, %v18557_v17  ;;  %v13165_v32 = vpop.eup %13164 }
 0x42d   : > { %v18575_v53 = vpop.xlane.xlu0 %10528  ;;  %v18587_v30 = vpop.xlane.xlu1 %10534  ;;  %v10548_v1 = vsel %vm10547_vm5, %v10509_v42, %v10546_v55  ;;  %v10560_v47 = vmul.f32 %v13165_v32, %v18559_v10  ;;  %v10557_v32 = vand.u32 2147483648, %v18561_v56  ;;  %vm10584_vm5 = vcmp.eq.f32.partialorder %v18569_v4, 0.0 }
 0x42e   : > { %v10541_v31 = vsel %vm10540_vm10, %v18557_v17, %v10539_v48  ;;  %13180 = vrsqrt.f32 %v18575_v53  ;;  %vm10596_vm10 = vcmp.eq.f32.partialorder %v18573_v23, inf }
 0x42f   : > { %10790 = vadd.xlane.f32.xlu1 %v10788_v0  ;;  %v10543_v0 = vand.u32 2147483648, %v18557_v17  ;;  %13182 = vrsqrt.f32 %v18577_v58 }
 0x430   : > { %10828 = vadd.xlane.f32.xlu0 %v10825_v14  ;;  %v10551_v14 = vsel %vm10549_vm14, %v10550_v26, %v10548_v1  ;;  %vm10603_vm14 = vcmp.eq.f32.partialorder %v18571_v34, inf }
 0x431   : > { %v18579_v22 = vpop.xlane.xlu0 %10532  ;;  %v10544_v6 = vsel %vm10542_vm15, %v10543_v0, %v10541_v31  ;;  %vm10598_vm15 = vcmp.eq.f32.partialorder %v18573_v23, 0.0 }
 0x432   : > { %13184 = vrsqrt.f32 %v18579_v22 }
 0x433   : > { %10816 = vadd.xlane.f32.xlu1 %v10813_v60  ;;  %13186 = vrsqrt.f32 %v18581_v15 }
 0x434   : > { %10826 = vadd.xlane.f32.xlu0 %v10824_v11  ;;  %v13167_v11 = vpop.eup %13166 }
 0x435   : > { %v18584_v8 = vpop.xlane.xlu0 %10536  ;;  %v10553_v27 = vmul.f32 %v13167_v11, %v18561_v56 }
 0x436   : > { %13188 = vrsqrt.f32 %v18584_v8 }
 0x437   : > { %10814 = vadd.xlane.f32.xlu1 %v10812_v25  ;;  %13190 = vrsqrt.f32 %v18587_v30 }
 0x438   : > { %10852 = vadd.xlane.f32.xlu0 %v10849_v33 }
 0x43b   : > { %10840 = vadd.xlane.f32.xlu1 %v10837_v44 }
 0x43c   : > { %10850 = vadd.xlane.f32.xlu0 %v10848_v21 }
 0x43f   : > { %10838 = vadd.xlane.f32.xlu1 %v10836_v36 }
 0x489   : > { %v10685_v7 = vpop.xlane.xlu0 %10684 }
 0x48a   : > { %v10687_v49 = vcvt.f32.s32 %v10685_v7 }
 0x48c   : > { %v10673_v2 = vpop.xlane.xlu1 %10672  ;;  %v10688_v24 = vshll.u32 %v10687_v49, 16  ;;  %v10564_v49 = vand.u32 2147483648, %v18559_v10 }
 0x48d   : > { %v10683_v51 = vpop.xlane.xlu0 %10682  ;;  %v10675_v20 = vcvt.f32.s32 %v10673_v2  ;;  %v10562_v2 = vsel %vm10561_vm7, %v18559_v10, %v10560_v47  ;;  %vm10605_vm7 = vcmp.eq.f32.partialorder %v18571_v34, 0.0 }
 0x48e   : > { %v10686_v43 = vcvt.f32.s32 %v10683_v51 }
 0x48f   : > { %v10676_v38 = vshll.u32 %v10675_v20, 16  ;;  %v13169_v20 = vpop.eup %13168 }
 0x490   : > { %v10689_v41 = vadd.s32 %v10688_v24, %v10686_v43  ;;  %v10671_v5 = vpop.xlane.xlu1 %10670  ;;  %v10574_v1 = vmul.f32 %v13169_v20, %v18563_v35 }
 0x491   : > { %v10709_v61 = vpop.xlane.xlu0 %10708  ;;  %v10674_v40 = vcvt.f32.s32 %v10671_v5 }
 0x492   : > { %v10859_v50 = vand.u32 1, %v10689_v41  ;;  %v10711_v3 = vcvt.f32.s32 %v10709_v61  ;;  %v10565_v61 = vsel %vm10563_vm0, %v10564_v49, %v10562_v2  ;;  %vm10610_vm0 = vcmp.eq.f32.partialorder %v18577_v58, inf }
 0x493   : > { %v10677_v29 = vadd.s32 %v10676_v38, %v10674_v40 }
 0x494   : > { %v10875_v62 = vcvt.s32.f32 %v10859_v50  ;;  %v10712_v19 = vshll.u32 %v10711_v3, 16  ;;  %v10697_v54 = vpop.xlane.xlu1 %10696  ;;  %v10555_v50 = vsel %vm10554_vm6, %v18561_v56, %v10553_v27  ;;  %v13171_v3 = vpop.eup %13170  ;;  %vm10617_vm6 = vcmp.eq.f32.partialorder %v18575_v53, inf }
 0x495   : > { %v10707_v59 = vpop.xlane.xlu0 %10706  ;;  %v10858_v63 = vand.u32 1, %v10677_v29  ;;  %v10699_v46 = vcvt.f32.s32 %v10697_v54  ;;  %v10558_v0 = vsel %vm10556_vm8, %v10557_v32, %v10555_v50  ;;  %v13173_v11 = vpop.eup %13172  ;;  %vm10619_vm8 = vcmp.eq.f32.partialorder %v18575_v53, 0.0 }
 0x496   : > { %v10891_v9 = vmul.f32 2.0, %v10875_v62  ;;  %v10710_v12 = vcvt.f32.s32 %v10707_v59 }
 0x497   : > { %v10874_v28 = vcvt.s32.f32 %v10858_v63  ;;  %v10700_v52 = vshll.u32 %v10699_v46, 16  ;;  %v10567_v63 = vmul.f32 %v13171_v3, %v18565_v39 }
 0x498   : > { %v10907_v13 = vsub.f32 1.0, %v10891_v9  ;;  %v10713_v60 = vadd.s32 %v10712_v19, %v10710_v12  ;;  %v10695_v57 = vpop.xlane.xlu1 %10694 }
 0x499   : > { %v10733_v25 = vpop.xlane.xlu0 %10732  ;;  %v10890_v16 = vmul.f32 2.0, %v10874_v28  ;;  %v10698_v44 = vcvt.f32.s32 %v10695_v57 }
 0x49a   : > { %v10923_v33 = vmul.f32 %v10907_v13, %v10551_v14  ;;  %v10861_v18 = vand.u32 1, %v10713_v60  ;;  %v10735_v21 = vcvt.f32.s32 %v10733_v25  ;;  %v10576_v14 = vsel %vm10575_vm4, %v18563_v35, %v10574_v1 }
 0x49b   : > { %v10906_v36 = vsub.f32 1.0, %v10890_v16  ;;  %v10701_v7 = vadd.s32 %v10700_v52, %v10698_v44  ;;  %v10571_v25 = vand.u32 2147483648, %v18565_v39  ;;  %v10569_v44 = vsel %vm10568_vm3, %v18565_v39, %v10567_v63 }
 0x49c   : > { %10940 = vst.msk [vmem:[%s18603_s21 + $0x8] sm:$0xff] %vm10938_vm2, %v10923_v33  ;;  %v10877_v42 = vcvt.s32.f32 %v10861_v18  ;;  %v10721_v51 = vpop.xlane.xlu1 %10720  ;;  %v10736_v37 = vshll.u32 %v10735_v21, 16  ;;  %v10578_v33 = vand.u32 2147483648, %v18563_v35  ;;  %v13175_v18 = vpop.eup %13174  ;;  %vm10612_vm4 = vcmp.eq.f32.partialorder %v18577_v58, 0.0 }
 0x49d   : > { %v10731_v24 = vpop.xlane.xlu0 %10730  ;;  %v10922_v43 = vmul.f32 %v10906_v36, %v10544_v6  ;;  %v10860_v17 = vand.u32 1, %v10701_v7  ;;  %v10723_v41 = vcvt.f32.s32 %v10721_v51  ;;  %v10588_v36 = vmul.f32 %v13173_v11, %v18567_v45 }
 0x49e   : > { %v10893_v55 = vmul.f32 2.0, %v10877_v42  ;;  %v10734_v5 = vcvt.f32.s32 %v10731_v24  ;;  %v10579_v42 = vsel %vm10577_vm9, %v10578_v33, %v10576_v14  ;;  %vm10631_vm3 = vcmp.eq.f32.partialorder %v18579_v22, inf }
 0x49f   : > { %10939 = vst.msk [vmem:[%s18603_s21] sm:$0xff] %vm10938_vm2, %v10922_v43  ;;  %v10876_v40 = vcvt.s32.f32 %v10860_v17  ;;  %v10724_v48 = vshll.u32 %v10723_v41, 16  ;;  %v10581_v43 = vmul.f32 %v13175_v18, %v18569_v4  ;;  %vm10624_vm9 = vcmp.eq.f32.partialorder %v18581_v15, inf }
 0x4a0   : > { %v10909_v38 = vsub.f32 1.0, %v10893_v55  ;;  %v10737_v62 = vadd.s32 %v10736_v37, %v10734_v5  ;;  %v10719_v29 = vpop.xlane.xlu1 %10718  ;;  %v10572_v5 = vsel %vm10570_vm12, %v10571_v25, %v10569_v44  ;;  %vm10633_vm12 = vcmp.eq.f32.partialorder %v18579_v22, 0.0 }
 0x4a1   : > { %v10757_v26 = vpop.xlane.xlu0 %10756  ;;  %v10892_v19 = vmul.f32 2.0, %v10876_v40  ;;  %v10722_v54 = vcvt.f32.s32 %v10719_v29  ;;  %v13177_v40 = vpop.eup %13176 }
 0x4a2   : > { %v10925_v10 = vmul.f32 %v10909_v38, %v10565_v61  ;;  %v10759_v59 = vcvt.f32.s32 %v10757_v26  ;;  %v10863_v9 = vand.u32 1, %v10737_v62  ;;  %v10590_v61 = vsel %vm10589_vm1, %v18567_v45, %v10588_v36 }
 0x4a3   : > { %v10908_v46 = vsub.f32 1.0, %v10892_v19  ;;  %v10725_v12 = vadd.s32 %v10724_v48, %v10722_v54  ;;  %v10592_v62 = vand.u32 2147483648, %v18567_v45  ;;  %v10583_v54 = vsel %vm10582_vm11, %v18569_v4, %v10581_v43 }
 0x4a4   : > { %10942 = vst.msk [vmem:[%s18603_s21 + $0x18] sm:$0xff] %vm10938_vm2, %v10925_v10  ;;  %v10879_v13 = vcvt.s32.f32 %v10863_v9  ;;  %v10760_v31 = vshll.u32 %v10759_v59, 16  ;;  %v10745_v28 = vpop.xlane.xlu1 %10744  ;;  %v13179_v10 = vpop.eup %13178  ;;  %v10602_v32 = vmul.f32 %v13177_v40, %v18571_v34  ;;  %vm10626_vm1 = vcmp.eq.f32.partialorder %v18581_v15, 0.0 }
 0x4a5   : > { %v10755_v60 = vpop.xlane.xlu0 %10754  ;;  %v10924_v47 = vmul.f32 %v10908_v46, %v10558_v0  ;;  %v10862_v56 = vand.u32 1, %v10725_v12  ;;  %v10747_v52 = vcvt.f32.s32 %v10745_v28  ;;  %v10593_v9 = vsel %vm10591_vm13, %v10592_v62, %v10590_v61  ;;  %v13181_v44 = vpop.eup %13180 }
 0x4a6   : > { %v10758_v57 = vcvt.f32.s32 %v10755_v60  ;;  %v10895_v16 = vmul.f32 2.0, %v10879_v13  ;;  %v10585_v28 = vand.u32 2147483648, %v18569_v4  ;;  %v10595_v60 = vmul.f32 %v13179_v10, %v18573_v23 }
 0x4a7   : > { %10941 = vst.msk [vmem:[%s18603_s21 + $0x10] sm:$0xff] %vm10938_vm2, %v10924_v47  ;;  %v10878_v21 = vcvt.s32.f32 %v10862_v56  ;;  %v10748_v51 = vshll.u32 %v10747_v52, 16  ;;  %vm10645_vm11 = vcmp.eq.f32.partialorder %v18584_v8, inf  ;;  %vm10647_vm13 = vcmp.eq.f32.partialorder %v18584_v8, 0.0 }
 0x4a8   : > { %v10761_v27 = vadd.s32 %v10760_v31, %v10758_v57  ;;  %v10911_v7 = vsub.f32 1.0, %v10895_v16  ;;  %v10743_v49 = vpop.xlane.xlu1 %10742  ;;  %v10586_v52 = vsel %vm10584_vm5, %v10585_v28, %v10583_v54  ;;  %v10604_v57 = vsel %vm10603_vm14, %v18571_v34, %v10602_v32 }
 0x4a9   : > { %v10781_v6 = vpop.xlane.xlu0 %10780  ;;  %v10894_v2 = vmul.f32 2.0, %v10878_v21  ;;  %v10746_v20 = vcvt.f32.s32 %v10743_v49  ;;  %v10597_v49 = vsel %vm10596_vm10, %v18573_v23, %v10595_v60  ;;  %vm10638_vm5 = vcmp.eq.f32.partialorder %v18587_v30, inf }
 0x4aa   : > { %v10865_v24 = vand.u32 1, %v10761_v27  ;;  %v10927_v35 = vmul.f32 %v10911_v7, %v10579_v42  ;;  %v10783_v55 = vcvt.f32.s32 %v10781_v6  ;;  %v10606_v42 = vand.u32 2147483648, %v18571_v34 }
 0x4ab   : > { %v10910_v17 = vsub.f32 1.0, %v10894_v2  ;;  %v10749_v37 = vadd.s32 %v10748_v51, %v10746_v20  ;;  %v10616_v51 = vmul.f32 %v13181_v44, %v18575_v53  ;;  %v10599_v34 = vand.u32 2147483648, %v18573_v23 }
 0x4ac   : > { %v10881_v41 = vcvt.s32.f32 %v10865_v24  ;;  %10944 = vst.msk [vmem:[%s18603_s21 + $0x28] sm:$0xff] %vm10938_vm2, %v10927_v35  ;;  %v10769_v38 = vpop.xlane.xlu1 %10768  ;;  %v10784_v29 = vshll.u32 %v10783_v55, 16  ;;  %v10607_v24 = vsel %vm10605_vm7, %v10606_v42, %v10604_v57  ;;  %v13183_v55 = vpop.eup %13182  ;;  %v10613_v57 = vand.u32 2147483648, %v18577_v58 }
 0x4ad   : > { %v10779_v50 = vpop.xlane.xlu0 %10778  ;;  %v10926_v39 = vmul.f32 %v10910_v17, %v10572_v5  ;;  %v10864_v1 = vand.u32 1, %v10749_v37  ;;  %v10771_v48 = vcvt.f32.s32 %v10769_v38  ;;  %v10618_v62 = vsel %vm10617_vm6, %v18575_v53, %v10616_v51 }
 0x4ae   : > { %v10897_v3 = vmul.f32 2.0, %v10881_v41  ;;  %v10782_v26 = vcvt.f32.s32 %v10779_v50  ;;  %vm10640_vm14 = vcmp.eq.f32.partialorder %v18587_v30, 0.0 }
 0x4af   : > { %10943 = vst.msk [vmem:[%s18603_s21 + $0x20] sm:$0xff] %vm10938_vm2, %v10926_v39  ;;  %v10880_v59 = vcvt.s32.f32 %v10864_v1  ;;  %v10772_v63 = vshll.u32 %v10771_v48, 16  ;;  %v10609_v1 = vmul.f32 %v13183_v55, %v18577_v58  ;;  %v10600_v48 = vsel %vm10598_vm15, %v10599_v34, %v10597_v49 }
 0x4b0   : > { %v10913_v19 = vsub.f32 1.0, %v10897_v3  ;;  %v10785_v46 = vadd.s32 %v10784_v29, %v10782_v26  ;;  %v10767_v45 = vpop.xlane.xlu1 %10766  ;;  %v13185_v3 = vpop.eup %13184 }
 0x4b1   : > { %v10805_v12 = vpop.xlane.xlu0 %10804  ;;  %v10896_v14 = vmul.f32 2.0, %v10880_v59  ;;  %v10770_v13 = vcvt.f32.s32 %v10767_v45  ;;  %v10620_v59 = vand.u32 2147483648, %v18575_v53 }
 0x4b2   : > { %v10929_v0 = vmul.f32 %v10913_v19, %v10593_v9  ;;  %v10807_v31 = vcvt.f32.s32 %v10805_v12  ;;  %v10867_v11 = vand.u32 1, %v10785_v46  ;;  %v13187_v12 = vpop.eup %13186 }
 0x4b3   : > { %v10912_v47 = vsub.f32 1.0, %v10896_v14  ;;  %v10773_v56 = vadd.s32 %v10772_v63, %v10770_v13  ;;  %v10630_v63 = vmul.f32 %v13185_v3, %v18579_v22  ;;  %v10611_v14 = vsel %vm10610_vm0, %v18577_v58, %v10609_v1  ;;  %v13189_v42 = vpop.eup %13188 }
 0x4b4   : > { %10946 = vst.msk [vmem:[%s18603_s21 + $0x38] sm:$0xff] %vm10938_vm2, %v10929_v0  ;;  %v10883_v25 = vcvt.s32.f32 %v10867_v11  ;;  %v10808_v33 = vshll.u32 %v10807_v31, 16  ;;  %v10793_v16 = vpop.xlane.xlu1 %10792  ;;  %v10621_v0 = vsel %vm10619_vm8, %v10620_v59, %v10618_v62 }
 0x4b5   : > { %v10803_v18 = vpop.xlane.xlu0 %10802  ;;  %v10928_v21 = vmul.f32 %v10912_v47, %v10586_v52  ;;  %v10866_v4 = vand.u32 1, %v10773_v56  ;;  %v10795_v27 = vcvt.f32.s32 %v10793_v16  ;;  %v10632_v44 = vsel %vm10631_vm3, %v18579_v22, %v10630_v63 }
 0x4b6   : > { %v10806_v36 = vcvt.f32.s32 %v10803_v18  ;;  %v10899_v7 = vmul.f32 2.0, %v10883_v25  ;;  %v10623_v25 = vmul.f32 %v13187_v12, %v18581_v15  ;;  %v10614_v18 = vsel %vm10612_vm4, %v10613_v57, %v10611_v14 }
 0x4b7   : > { %10945 = vst.msk [vmem:[%s18603_s21 + $0x30] sm:$0xff] %vm10938_vm2, %v10928_v21  ;;  %v10882_v6 = vcvt.s32.f32 %v10866_v4  ;;  %v10796_v41 = vshll.u32 %v10795_v27, 16  ;;  %v10641_v63 = vand.u32 2147483648, %v18587_v30 }
 0x4b8   : > { %v10809_v2 = vadd.s32 %v10808_v33, %v10806_v36  ;;  %v10915_v20 = vsub.f32 1.0, %v10899_v7  ;;  %v10791_v43 = vpop.xlane.xlu1 %10790 }
 0x4b9   : > { %v10829_v35 = vpop.xlane.xlu0 %10828  ;;  %v10898_v17 = vmul.f32 2.0, %v10882_v6  ;;  %v10794_v5 = vcvt.f32.s32 %v10791_v43  ;;  %v10644_v43 = vmul.f32 %v13189_v42, %v18584_v8 }
 0x4ba   : > { %v10869_v37 = vand.u32 1, %v10809_v2  ;;  %v10931_v61 = vmul.f32 %v10915_v20, %v10607_v24  ;;  %v10831_v38 = vcvt.f32.s32 %v10829_v35  ;;  %v10634_v2 = vand.u32 2147483648, %v18579_v22 }
 0x4bb   : > { %v10914_v50 = vsub.f32 1.0, %v10898_v17  ;;  %v10797_v39 = vadd.s32 %v10796_v41, %v10794_v5  ;;  %v10625_v17 = vsel %vm10624_vm9, %v18581_v15, %v10623_v25 }
 0x4bc   : > { %v10885_v40 = vcvt.s32.f32 %v10869_v37  ;;  %10948 = vst.msk [vmem:[%s18603_s21 + $0x48] sm:$0xff] %vm10938_vm2, %v10931_v61  ;;  %v10817_v29 = vpop.xlane.xlu1 %10816  ;;  %v10832_v32 = vshll.u32 %v10831_v38, 16  ;;  %v10635_v35 = vsel %vm10633_vm12, %v10634_v2, %v10632_v44  ;;  %v13191_v37 = vpop.eup %13190 }
 0x4bd   : > { %v10827_v26 = vpop.xlane.xlu0 %10826  ;;  %v10930_v23 = vmul.f32 %v10914_v50, %v10600_v48  ;;  %v10868_v19 = vand.u32 1, %v10797_v39  ;;  %v10819_v54 = vcvt.f32.s32 %v10817_v29  ;;  %v10627_v50 = vand.u32 2147483648, %v18581_v15 }
 0x4be   : > { %v10901_v10 = vmul.f32 2.0, %v10885_v40  ;;  %v10830_v9 = vcvt.f32.s32 %v10827_v26  ;;  %v10637_v1 = vmul.f32 %v13191_v37, %v18587_v30  ;;  %v10646_v29 = vsel %vm10645_vm11, %v18584_v8, %v10644_v43 }
 0x4bf   : > { %10947 = vst.msk [vmem:[%s18603_s21 + $0x40] sm:$0xff] %vm10938_vm2, %v10930_v23  ;;  %v10884_v45 = vcvt.s32.f32 %v10868_v19  ;;  %v10820_v13 = vshll.u32 %v10819_v54, 16  ;;  %v10628_v48 = vsel %vm10626_vm1, %v10627_v50, %v10625_v17 }
 0x4c0   : > { %v10917_v46 = vsub.f32 1.0, %v10901_v10  ;;  %v10833_v31 = vadd.s32 %v10832_v32, %v10830_v9  ;;  %v10815_v28 = vpop.xlane.xlu1 %10814  ;;  %v10648_v10 = vand.u32 2147483648, %v18584_v8  ;;  %v10639_v32 = vsel %vm10638_vm5, %v18587_v30, %v10637_v1 }
 0x4c1   : > { %v10853_v60 = vpop.xlane.xlu0 %10852  ;;  %v10900_v47 = vmul.f32 2.0, %v10884_v45  ;;  %v10818_v56 = vcvt.f32.s32 %v10815_v28  ;;  %v10642_v45 = vsel %vm10640_vm14, %v10641_v63, %v10639_v32 }
 0x4c2   : > { %v10933_v11 = vmul.f32 %v10917_v46, %v10621_v0  ;;  %v10855_v52 = vcvt.f32.s32 %v10853_v60  ;;  %v10871_v53 = vand.u32 1, %v10833_v31  ;;  %v10649_v54 = vsel %vm10647_vm13, %v10648_v10, %v10646_v29 }
 0x4c3   : > { %v10916_v33 = vsub.f32 1.0, %v10900_v47  ;;  %v10821_v16 = vadd.s32 %v10820_v13, %v10818_v56 }
 0x4c4   : > { %10950 = vst.msk [vmem:[%s18603_s21 + $0x58] sm:$0xff] %vm10938_vm2, %v10933_v11  ;;  %v10887_v21 = vcvt.s32.f32 %v10871_v53  ;;  %v10856_v4 = vshll.u32 %v10855_v52, 16  ;;  %v10841_v27 = vpop.xlane.xlu1 %10840 }
 0x4c5   : > { %v10851_v36 = vpop.xlane.xlu0 %10850  ;;  %v10932_v7 = vmul.f32 %v10916_v33, %v10614_v18  ;;  %v10870_v58 = vand.u32 1, %v10821_v16  ;;  %v10843_v49 = vcvt.f32.s32 %v10841_v27 }
 0x4c6   : > { %v10854_v6 = vcvt.f32.s32 %v10851_v36  ;;  %v10903_v51 = vmul.f32 2.0, %v10887_v21 }
 0x4c7   : > { %10949 = vst.msk [vmem:[%s18603_s21 + $0x50] sm:$0xff] %vm10938_vm2, %v10932_v7  ;;  %v10886_v24 = vcvt.s32.f32 %v10870_v58  ;;  %v10844_v34 = vshll.u32 %v10843_v49, 16 }
 0x4c8   : > { %v10857_v20 = vadd.s32 %v10856_v4, %v10854_v6  ;;  %v10919_v55 = vsub.f32 1.0, %v10903_v51  ;;  %v10839_v41 = vpop.xlane.xlu1 %10838 }
 0x4c9   : > { %v10902_v5 = vmul.f32 2.0, %v10886_v24  ;;  %v10842_v38 = vcvt.f32.s32 %v10839_v41 }
 0x4ca   : > { %v10873_v61 = vand.u32 1, %v10857_v20  ;;  %v10935_v40 = vmul.f32 %v10919_v55, %v10635_v35 }
 0x4cb   : > { %v10918_v22 = vsub.f32 1.0, %v10902_v5  ;;  %v10845_v3 = vadd.s32 %v10844_v34, %v10842_v38 }
 0x4cc   : > { %v10889_v39 = vcvt.s32.f32 %v10873_v61  ;;  %10952 = vst.msk [vmem:[%s18603_s21 + $0x68] sm:$0xff] %vm10938_vm2, %v10935_v40 }
 0x4cd   : > { %v10934_v62 = vmul.f32 %v10918_v22, %v10628_v48  ;;  %v10872_v23 = vand.u32 1, %v10845_v3 }
 0x4ce   : > { %v10905_v26 = vmul.f32 2.0, %v10889_v39 }
 0x4cf   : > { %10951 = vst.msk [vmem:[%s18603_s21 + $0x60] sm:$0xff] %vm10938_vm2, %v10934_v62  ;;  %v10888_v19 = vcvt.s32.f32 %v10872_v23 }
 0x4d0   : > { %v10921_v15 = vsub.f32 1.0, %v10905_v26 }
 0x4d1   : > { %v10904_v9 = vmul.f32 2.0, %v10888_v19 }
 0x4d2   : > { %v10937_v59 = vmul.f32 %v10921_v15, %v10649_v54 }
 0x4d3   : > { %v10920_v46 = vsub.f32 1.0, %v10904_v9 }
 0x4d4   : > { %10954 = vst.msk [vmem:[%s18603_s21 + $0x78] sm:$0xff] %vm10938_vm2, %v10937_v59 }
 0x4d5   : > { %v10936_v12 = vmul.f32 %v10920_v46, %v10642_v45 }
 0x4d7   : > { %10953 = vst.msk [vmem:[%s18603_s21 + $0x70] sm:$0xff] %vm10938_vm2, %v10936_v12 }
 0x4d8 PF: > { %s13_s14 = sadd.s32 1, %s13230_s14   ;;  %s20789_s12 = smov %s13226_s13 }
 0x4d9   : > { %p10_p5 = scmp.ge.s32.totalorder %s13_s14, 4   ;;  %s20790_s13 = smov %s20792_s15 }
 0x4db   :  { %12 = sbr.rel (!%p10_p5) target bundleno = 2 (0x2), region = 76 }

</bundles_post_ra>
